<compile_context>
chip_gen: v6e
topology: v6e:2x2x1
jax: 0.10.0
libtpu: 0.0.40
codegen_flags: <defaults>
</compile_context>

<pallas_src>
import jax
import jax.numpy as jnp
import numpy as np
from jax.experimental import pallas as pl
from jax.experimental.pallas import tpu as pltpu

# ---------------------------------------------------------------------------
# Model hyper-parameters (small, consistent with the module's forward).
# ---------------------------------------------------------------------------
NUM_NEWS = 50          # user history length (hard-coded `.repeat(50,1,1)`)
NUM_WORDS = 16         # words per news title
WORD_DIM = 32          # word embedding dim
NUM_FILTERS = 64       # conv output channels / attention candidate dim
WINDOW = 3             # conv window size (odd -> "same" length output)
QUERY_DIM = 32         # query_vector_dim
PAD = (WINDOW - 1) // 2

# Padded-words scratch layout: the 16 words of each news item sit at a
# sublane-aligned offset (X_OFF = 8) inside a 32-row block; the surrounding
# zero rows provide the conv "same" padding, and every scratch store stays
# (8,128)-aligned.
LP_SCRATCH = 32
X_OFF = 8
M_ROWS = NUM_NEWS * NUM_WORDS      # 800 rows for the batched MXU matmuls


# ---------------------------------------------------------------------------
# Fused kernel: conv -> relu -> per-news query attention -> user attention.
# Single invocation, everything VMEM-resident.
# ---------------------------------------------------------------------------
def fused_user_encoder_kernel(x_ref, cw_ref, cb_ref, q1_ref, q2_ref,
                              o_ref, xp_ref):
    # x_ref : (NUM_NEWS, NUM_WORDS, WORD_DIM)   word embeddings of all news
    # cw_ref: (WINDOW, WORD_DIM, NUM_FILTERS)   conv weight, channels-last
    # cb_ref: (1, NUM_FILTERS)                  conv bias
    # q1_ref: (NUM_FILTERS, 1)   news-level query column = tanh(u1 W1 + b1)^T
    # q2_ref: (NUM_FILTERS, 1)   user-level query column = tanh(u2 W2 + b2)^T
    # o_ref : (1, NUM_FILTERS)                  user representation (output)
    # xp_ref: (NUM_NEWS, LP_SCRATCH, WORD_DIM)  zero-padded words, VMEM scratch

    # Zero-padded copy of the words (aligned block store; neighbours stay 0).
    xp_ref[...] = jnp.zeros_like(xp_ref)
    xp_ref[:, X_OFF:X_OFF + NUM_WORDS, :] = x_ref[...]
    xp = xp_ref[...]                                       # (N, 32, D)

    # "Same" 1-D conv over words, batched over ALL news items:
    # WINDOW shifted (800, 32) @ (32, 64) MXU matmuls accumulated in f32.
    acc = jnp.zeros((M_ROWS, NUM_FILTERS), jnp.float32)
    for k in range(WINDOW):                                # static unroll
        s = X_OFF - PAD + k                                # 7, 8, 9
        xs = xp[:, s:s + NUM_WORDS, :].reshape(M_ROWS, WORD_DIM)
        acc = acc + jnp.dot(xs, cw_ref[k],
                            preferred_element_type=jnp.float32)
    h = jnp.maximum(acc + cb_ref[...], 0.0)                # relu, (800, 64)

    # Word-level (news) attention: scores via a single MXU dot, softmax per
    # news over its 16 words, weighted sum -> (50, 64) news representations.
    s1 = jnp.dot(h, q1_ref[...], preferred_element_type=jnp.float32)  # (800,1)
    s1 = s1.reshape(NUM_NEWS, NUM_WORDS, 1)
    m1 = jnp.max(s1, axis=1, keepdims=True)                # (50, 1, 1)
    e1 = jnp.exp(s1 - m1)
    w1 = e1 * pl.reciprocal(jnp.sum(e1, axis=1, keepdims=True), approx=True)
    h3 = h.reshape(NUM_NEWS, NUM_WORDS, NUM_FILTERS)
    news_rep = jnp.sum(w1 * h3, axis=1)                    # (50, 64), in VMEM

    # User-level attention over the 50 news representations.
    s2 = jnp.dot(news_rep, q2_ref[...],
                 preferred_element_type=jnp.float32)       # (50, 1)
    m2 = jnp.max(s2, axis=0, keepdims=True)                # (1, 1)
    e2 = jnp.exp(s2 - m2)
    w2 = e2 * pl.reciprocal(jnp.sum(e2, axis=0, keepdims=True), approx=True)
    o_ref[...] = jnp.sum(w2 * news_rep, axis=0,
                         keepdims=True).astype(o_ref.dtype)


# ---------------------------------------------------------------------------
# Wrapper
# ---------------------------------------------------------------------------
@jax.jit
def user_encoder_forward(word_embedding, user_embedding, user_embedding_two,
                         params):
    """word_embedding: (NUM_NEWS, NUM_WORDS, WORD_DIM)
       user_embedding: (1, QUERY_DIM)        (repeated over 50 news in torch)
       user_embedding_two: (QUERY_DIM,)
    """
    cw, cb = params["conv_w"], params["conv_b"]

    # Grid-invariant query projections (tiny) hoisted out of the kernel,
    # passed as (NUM_FILTERS, 1) columns so in-kernel scoring is one MXU dot.
    q1 = jnp.tanh(user_embedding @ params["att1_w"]
                  + params["att1_b"]).reshape(NUM_FILTERS, 1)
    q2 = jnp.tanh(user_embedding_two.reshape(1, QUERY_DIM) @ params["att2_w"]
                  + params["att2_b"]).reshape(NUM_FILTERS, 1)

    user_rep = pl.pallas_call(
        fused_user_encoder_kernel,
        out_shape=jax.ShapeDtypeStruct((1, NUM_FILTERS), jnp.float32),
        scratch_shapes=[
            pltpu.VMEM((NUM_NEWS, LP_SCRATCH, WORD_DIM), jnp.float32)],
    )(word_embedding, cw, cb, q1, q2)

    return user_rep            # (1, NUM_FILTERS) == torch output shape


def reference_forward(word_embedding, user_embedding, user_embedding_two,
                      params):
    """Pure-JAX reference of the same math (for a correctness check)."""
    cw, cb = params["conv_w"], params["conv_b"]
    x_pad = jnp.pad(word_embedding, ((0, 0), (PAD, PAD), (0, 0)))
    conv = jnp.zeros((NUM_NEWS, NUM_WORDS, NUM_FILTERS), jnp.float32)
    for k in range(WINDOW):
        conv = conv + jnp.einsum("bld,df->blf",
                                 x_pad[:, k:k + NUM_WORDS, :], cw[k])
    h = jnp.maximum(conv + cb, 0.0)                     # (B, L, F)
    q1 = jnp.tanh(user_embedding @ params["att1_w"] + params["att1_b"])  # (1,F)
    s1 = jnp.sum(h * q1[None, :, :], axis=-1)           # (B, L)
    w1 = jax.nn.softmax(s1, axis=-1)
    news_rep = jnp.einsum("bl,blf->bf", w1, h)          # (B, F)
    q2 = jnp.tanh(user_embedding_two[None, :] @ params["att2_w"]
                  + params["att2_b"])                   # (1, F)
    s2 = jnp.sum(news_rep * q2, axis=-1)                # (B,)
    w2 = jax.nn.softmax(s2)
    return (w2[None, :] @ news_rep)                     # (1, F)


def init_params(key):
    ks = jax.random.split(key, 6)
    scale = 0.1
    return {
        # Conv2d(1, F, kernel=(WINDOW, WORD_DIM)) -> channels-last (W, D, F).
        "conv_w": scale * jax.random.normal(
            ks[0], (WINDOW, WORD_DIM, NUM_FILTERS), jnp.float32),
        "conv_b": scale * jax.random.normal(ks[1], (1, NUM_FILTERS),
                                            jnp.float32),
        # news-level QueryAttention Linear(QUERY_DIM -> NUM_FILTERS)
        "att1_w": scale * jax.random.normal(ks[2], (QUERY_DIM, NUM_FILTERS),
                                            jnp.float32),
        "att1_b": scale * jax.random.normal(ks[3], (1, NUM_FILTERS),
                                            jnp.float32),
        # user-level QueryAttention Linear(QUERY_DIM -> NUM_FILTERS)
        "att2_w": scale * jax.random.normal(ks[4], (QUERY_DIM, NUM_FILTERS),
                                            jnp.float32),
        "att2_b": scale * jax.random.normal(ks[5], (1, NUM_FILTERS),
                                            jnp.float32),
    }


if __name__ == "__main__":
    key = jax.random.PRNGKey(0)
    k_p, k_x, k_u1, k_u2 = jax.random.split(key, 4)
    params = init_params(k_p)

    word_embedding = jax.random.normal(
        k_x, (NUM_NEWS, NUM_WORDS, WORD_DIM), jnp.float32)
    user_embedding = jax.random.normal(k_u1, (1, QUERY_DIM), jnp.float32)
    user_embedding_two = jax.random.normal(k_u2, (QUERY_DIM,), jnp.float32)

    out = user_encoder_forward(word_embedding, user_embedding,
                               user_embedding_two, params)
    out = jax.block_until_ready(out)

    ref = reference_forward(word_embedding, user_embedding,
                            user_embedding_two, params)
    np.testing.assert_allclose(np.asarray(out), np.asarray(ref),
                               rtol=1e-3, atol=1e-3)

    print("KERNEL_OK")
</pallas_src>

<mosaic_0001>
module attributes {stable_mosaic.version = 11 : i64} {
  func.func @fused_user_encoder_kernel(%arg0: memref<50x16x32xf32, #tpu.memory_space<vmem>>, %arg1: memref<3x32x64xf32, #tpu.memory_space<vmem>>, %arg2: memref<1x64xf32, #tpu.memory_space<vmem>>, %arg3: memref<64x1xf32, #tpu.memory_space<vmem>>, %arg4: memref<64x1xf32, #tpu.memory_space<vmem>>, %arg5: memref<1x64xf32, #tpu.memory_space<vmem>>, %arg6: memref<50x32x32xf32, #tpu.memory_space<vmem>>) attributes {dimension_semantics = [], scalar_prefetch = 0 : i64, scratch_operands = 1 : i64, tpu.core_type = #tpu.core_type<tc>} {
    %cst = arith.constant 0.000000e+00 : f32
    %0 = vector.broadcast %cst : f32 to vector<50x32x32xf32>
    %c0 = arith.constant 0 : index
    %c0_0 = arith.constant 0 : index
    %c0_1 = arith.constant 0 : index
    %1 = vector.load %arg6[%c0, %c0_0, %c0_1] : memref<50x32x32xf32, #tpu.memory_space<vmem>>, vector<50x32x32xf32>
    tpu.vector_store %arg6[%c0, %c0_0, %c0_1], %0 {strides = array<i32>} : memref<50x32x32xf32, #tpu.memory_space<vmem>>, vector<50x32x32xf32>,
    %c0_2 = arith.constant 0 : index
    %c0_3 = arith.constant 0 : index
    %c0_4 = arith.constant 0 : index
    %2 = vector.load %arg0[%c0_2, %c0_3, %c0_4] : memref<50x16x32xf32, #tpu.memory_space<vmem>>, vector<50x16x32xf32>
    %c0_5 = arith.constant 0 : index
    %c8 = arith.constant 8 : index
    %c0_6 = arith.constant 0 : index
    %3 = vector.load %arg6[%c0_5, %c8, %c0_6] : memref<50x32x32xf32, #tpu.memory_space<vmem>>, vector<50x16x32xf32>
    tpu.vector_store %arg6[%c0_5, %c8, %c0_6], %2 {strides = array<i32>} : memref<50x32x32xf32, #tpu.memory_space<vmem>>, vector<50x16x32xf32>,
    %c0_7 = arith.constant 0 : index
    %c0_8 = arith.constant 0 : index
    %c0_9 = arith.constant 0 : index
    %4 = vector.load %arg6[%c0_7, %c0_8, %c0_9] : memref<50x32x32xf32, #tpu.memory_space<vmem>>, vector<50x32x32xf32>
    %cst_10 = arith.constant 0.000000e+00 : f32
    %5 = vector.broadcast %cst_10 : f32 to vector<800x64xf32>
    %6 = vector.extract_strided_slice %4 {offsets = [0, 7, 0], sizes = [50, 16, 32], strides = [1, 1, 1]} : vector<50x32x32xf32> to vector<50x16x32xf32>
    %7 = vector.shape_cast %6 : vector<50x16x32xf32> to vector<800x32xf32>
    %c0_11 = arith.constant 0 : index
    %c0_12 = arith.constant 0 : index
    %c0_13 = arith.constant 0 : index
    %8 = vector.load %arg1[%c0_11, %c0_12, %c0_13] : memref<3x32x64xf32, #tpu.memory_space<vmem>>, vector<1x32x64xf32>
    %9 = vector.shape_cast %8 : vector<1x32x64xf32> to vector<32x64xf32>
    %cst_14 = arith.constant dense<0.000000e+00> : vector<800x64xf32>
    %10 = tpu.matmul %7, %9, %cst_14 {dimension_numbers = #tpu.dot_dimension_numbers<[1], [0], [0], [1], [0, 0, 1, 1], [], []>} : vector<800x32xf32>, vector<32x64xf32>, vector<800x64xf32> -> vector<800x64xf32>
    %11 = arith.addf %5, %10 : vector<800x64xf32>
    %12 = vector.extract_strided_slice %4 {offsets = [0, 8, 0], sizes = [50, 16, 32], strides = [1, 1, 1]} : vector<50x32x32xf32> to vector<50x16x32xf32>
    %13 = vector.shape_cast %12 : vector<50x16x32xf32> to vector<800x32xf32>
    %c1 = arith.constant 1 : index
    %c0_15 = arith.constant 0 : index
    %c0_16 = arith.constant 0 : index
    %14 = vector.load %arg1[%c1, %c0_15, %c0_16] : memref<3x32x64xf32, #tpu.memory_space<vmem>>, vector<1x32x64xf32>
    %15 = vector.shape_cast %14 : vector<1x32x64xf32> to vector<32x64xf32>
    %cst_17 = arith.constant dense<0.000000e+00> : vector<800x64xf32>
    %16 = tpu.matmul %13, %15, %cst_17 {dimension_numbers = #tpu.dot_dimension_numbers<[1], [0], [0], [1], [0, 0, 1, 1], [], []>} : vector<800x32xf32>, vector<32x64xf32>, vector<800x64xf32> -> vector<800x64xf32>
    %17 = arith.addf %11, %16 : vector<800x64xf32>
    %18 = vector.extract_strided_slice %4 {offsets = [0, 9, 0], sizes = [50, 16, 32], strides = [1, 1, 1]} : vector<50x32x32xf32> to vector<50x16x32xf32>
    %19 = vector.shape_cast %18 : vector<50x16x32xf32> to vector<800x32xf32>
    %c2 = arith.constant 2 : index
    %c0_18 = arith.constant 0 : index
    %c0_19 = arith.constant 0 : index
    %20 = vector.load %arg1[%c2, %c0_18, %c0_19] : memref<3x32x64xf32, #tpu.memory_space<vmem>>, vector<1x32x64xf32>
    %21 = vector.shape_cast %20 : vector<1x32x64xf32> to vector<32x64xf32>
    %cst_20 = arith.constant dense<0.000000e+00> : vector<800x64xf32>
    %22 = tpu.matmul %19, %21, %cst_20 {dimension_numbers = #tpu.dot_dimension_numbers<[1], [0], [0], [1], [0, 0, 1, 1], [], []>} : vector<800x32xf32>, vector<32x64xf32>, vector<800x64xf32> -> vector<800x64xf32>
    %23 = arith.addf %17, %22 : vector<800x64xf32>
    %c0_21 = arith.constant 0 : index
    %c0_22 = arith.constant 0 : index
    %24 = vector.load %arg2[%c0_21, %c0_22] : memref<1x64xf32, #tpu.memory_space<vmem>>, vector<1x64xf32>
    %25 = vector.broadcast %24 : vector<1x64xf32> to vector<800x64xf32>
    %26 = arith.addf %23, %25 : vector<800x64xf32>
    %cst_23 = arith.constant 0.000000e+00 : f32
    %27 = vector.broadcast %cst_23 : f32 to vector<800x64xf32>
    %28 = arith.maximumf %26, %27 : vector<800x64xf32>
    %c0_24 = arith.constant 0 : index
    %c0_25 = arith.constant 0 : index
    %29 = vector.load %arg3[%c0_24, %c0_25] : memref<64x1xf32, #tpu.memory_space<vmem>>, vector<64x1xf32>
    %cst_26 = arith.constant dense<0.000000e+00> : vector<800x1xf32>
    %30 = tpu.matmul %28, %29, %cst_26 {dimension_numbers = #tpu.dot_dimension_numbers<[1], [0], [0], [1], [0, 0, 1, 1], [], []>} : vector<800x64xf32>, vector<64x1xf32>, vector<800x1xf32> -> vector<800x1xf32>
    %31 = vector.shape_cast %30 : vector<800x1xf32> to vector<50x16x1xf32>
    %cst_27 = arith.constant dense<0xFF800000> : vector<50x1xf32>
    %32 = vector.multi_reduction <maximumf>, %31, %cst_27 [1] : vector<50x16x1xf32> to vector<50x1xf32>
    %33 = vector.shape_cast %32 : vector<50x1xf32> to vector<50x1x1xf32>
    %34 = vector.broadcast %33 : vector<50x1x1xf32> to vector<50x16x1xf32>
    %35 = arith.subf %31, %34 : vector<50x16x1xf32>
    %36 = math.exp %35 : vector<50x16x1xf32>
    %cst_28 = arith.constant dense<0.000000e+00> : vector<50x1xf32>
    %37 = vector.multi_reduction <add>, %36, %cst_28 [1] : vector<50x16x1xf32> to vector<50x1xf32>
    %38 = vector.shape_cast %37 : vector<50x1xf32> to vector<50x1x1xf32>
    %39 = tpu.reciprocal %38 {approx = true} : vector<50x1x1xf32> -> vector<50x1x1xf32>
    %40 = vector.broadcast %39 : vector<50x1x1xf32> to vector<50x16x1xf32>
    %41 = arith.mulf %36, %40 : vector<50x16x1xf32>
    %42 = vector.shape_cast %28 : vector<800x64xf32> to vector<50x16x64xf32>
    %43 = vector.broadcast %41 : vector<50x16x1xf32> to vector<50x16x64xf32>
    %44 = arith.mulf %43, %42 : vector<50x16x64xf32>
    %cst_29 = arith.constant dense<0.000000e+00> : vector<50x64xf32>
    %45 = vector.multi_reduction <add>, %44, %cst_29 [1] : vector<50x16x64xf32> to vector<50x64xf32>
    %c0_30 = arith.constant 0 : index
    %c0_31 = arith.constant 0 : index
    %46 = vector.load %arg4[%c0_30, %c0_31] : memref<64x1xf32, #tpu.memory_space<vmem>>, vector<64x1xf32>
    %cst_32 = arith.constant dense<0.000000e+00> : vector<50x1xf32>
    %47 = tpu.matmul %45, %46, %cst_32 {dimension_numbers = #tpu.dot_dimension_numbers<[1], [0], [0], [1], [0, 0, 1, 1], [], []>} : vector<50x64xf32>, vector<64x1xf32>, vector<50x1xf32> -> vector<50x1xf32>
    %cst_33 = arith.constant dense<0xFF800000> : vector<1xf32>
    %48 = vector.multi_reduction <maximumf>, %47, %cst_33 [0] : vector<50x1xf32> to vector<1xf32>
    %49 = vector.shape_cast %48 : vector<1xf32> to vector<1x1xf32>
    %50 = vector.broadcast %49 : vector<1x1xf32> to vector<50x1xf32>
    %51 = arith.subf %47, %50 : vector<50x1xf32>
    %52 = math.exp %51 : vector<50x1xf32>
    %cst_34 = arith.constant dense<0.000000e+00> : vector<1xf32>
    %53 = vector.multi_reduction <add>, %52, %cst_34 [0] : vector<50x1xf32> to vector<1xf32>
    %54 = vector.shape_cast %53 : vector<1xf32> to vector<1x1xf32>
    %55 = tpu.reciprocal %54 {approx = true} : vector<1x1xf32> -> vector<1x1xf32>
    %56 = vector.broadcast %55 : vector<1x1xf32> to vector<50x1xf32>
    %57 = arith.mulf %52, %56 : vector<50x1xf32>
    %58 = vector.broadcast %57 : vector<50x1xf32> to vector<50x64xf32>
    %59 = arith.mulf %58, %45 : vector<50x64xf32>
    %cst_35 = arith.constant dense<0.000000e+00> : vector<64xf32>
    %60 = vector.multi_reduction <add>, %59, %cst_35 [0] : vector<50x64xf32> to vector<64xf32>
    %61 = vector.shape_cast %60 : vector<64xf32> to vector<1x64xf32>
    %c0_36 = arith.constant 0 : index
    %c0_37 = arith.constant 0 : index
    %62 = vector.load %arg5[%c0_36, %c0_37] : memref<1x64xf32, #tpu.memory_space<vmem>>, vector<1x64xf32>
    tpu.vector_store %arg5[%c0_36, %c0_37], %61 {strides = array<i32>} : memref<1x64xf32, #tpu.memory_space<vmem>>, vector<1x64xf32>,
    return
  }
}

</mosaic_0001>

<bundles_post_ra>
// kernel: user_encoder_forward.1
= control target key start
LH: loop header
LB: loop body
LE: loop exit
PB: predicated region body
PF: predicated region fallthrough
CT: control target
= control target key end

     0   :  { %vm21_vm0 = vcmask 261120   ;;  %v14876_v2 = vmov 0.0   ;;  %vm772_vm1 = vcmask 1040384   ;;  %vm2612_vm2 = vcmask 1046528   ;;  %s14870_s0 = inlined_call_operand.vmem [shape: f32[50,16,32], index: 0, kind: input, shape index: {}]   ;;  %s14871_s1 = inlined_call_operand.vmem [shape: f32[3,32,64], index: 1, kind: input, shape index: {}]   ;;  %s14872_s2 = inlined_call_operand.vmem [shape: f32[1,64], index: 2, kind: input, shape index: {}]   ;;  %s14873_s3 = inlined_call_operand.vmem [shape: f32[64,1], index: 3, kind: input, shape index: {}]   ;;  %s14874_s4 = inlined_call_operand.vmem [shape: f32[64,1], index: 4, kind: input, shape index: {}]   ;;  %s14875_s5 = inlined_call_operand.hbm [shape: f32[1,64], index: 5, kind: output, shape index: {}]  }
   0x1   :  { %v9522_v0 = vld [vmem:[%s14871_s1 + $0x38] sm:$0xff]  ;;  %v9527_v1 = vld [vmem:[%s14871_s1 + $0x30] sm:$0xff]  ;;  %23 = vst.msk [vmem:[#allocation2 + $0x8] sm:$0xff] %vm21_vm0, %v14876_v2  ;;  %v9536_v3 = vld [vmem:[%s14870_s0] sm:$0xff] }
   0x2   :  { %8441 = vmatprep.subr.mxu0 %v9522_v0  ;;  %9118 = vmatprep.subr.mxu1 %v9522_v0  ;;  %22 = vst.msk [vmem:[#allocation2] sm:$0xff] %vm21_vm0, %v14876_v2  ;;  %24 = vst.msk [vmem:[#allocation2 + $0x10] sm:$0xff] %vm21_vm0, %v14876_v2  ;;  %v316_v4 = vld [vmem:[%s14870_s0 + $0x2f0] sm:$0xff]  ;;  %v7591_v5 = vld [vmem:[%s14871_s1 + $0x28] sm:$0xff] }
   0x3   :  { %25 = vst.msk [vmem:[#allocation2 + $0x18] sm:$0xff] %vm21_vm0, %v14876_v2  ;;  %26 = vst.msk [vmem:[#allocation2 + $0x20] sm:$0xff] %vm21_vm0, %v14876_v2  ;;  %8442 = vmatpush3.msra.mxu0 %v9522_v0  ;;  %9122 = vmatpush3.msra.mxu1 %v9522_v0  ;;  %v223_v6 = vld [vmem:[%s14870_s0 + $0x8] sm:$0xff]  ;;  %v317_v7 = vld [vmem:[%s14870_s0 + $0x2f8] sm:$0xff] }
   0x4   :  { %27 = vst.msk [vmem:[#allocation2 + $0x28] sm:$0xff] %vm21_vm0, %v14876_v2  ;;  %28 = vst.msk [vmem:[#allocation2 + $0x30] sm:$0xff] %vm21_vm0, %v14876_v2  ;;  %8443 = vmatprep.subr.mxu0 %v9527_v1  ;;  %9119 = vmatprep.subr.mxu1 %v9527_v1  ;;  %v224_v8 = vld [vmem:[%s14870_s0 + $0x10] sm:$0xff]  ;;  %v318_v9 = vld [vmem:[%s14870_s0 + $0x300] sm:$0xff] }
   0x5   :  { %29 = vst.msk [vmem:[#allocation2 + $0x38] sm:$0xff] %vm21_vm0, %v14876_v2  ;;  %30 = vst.msk [vmem:[#allocation2 + $0x40] sm:$0xff] %vm21_vm0, %v14876_v2  ;;  %v225_v10 = vld [vmem:[%s14870_s0 + $0x18] sm:$0xff]  ;;  %8444 = vmatpush3.msra.mxu0 %v9527_v1  ;;  %9123 = vmatpush3.msra.mxu1 %v9527_v1  ;;  %v7590_v11 = vld [vmem:[%s14871_s1 + $0x20] sm:$0xff] }
   0x6   :  { %31 = vst.msk [vmem:[#allocation2 + $0x48] sm:$0xff] %vm21_vm0, %v14876_v2  ;;  %32 = vst.msk [vmem:[#allocation2 + $0x50] sm:$0xff] %vm21_vm0, %v14876_v2  ;;  %v319_v12 = vld [vmem:[%s14870_s0 + $0x308] sm:$0xff]  ;;  %8445 = vmatprep.subr.mxu0 %v7591_v5  ;;  %9120 = vmatprep.subr.mxu1 %v7591_v5  ;;  %v226_v13 = vld [vmem:[%s14870_s0 + $0x20] sm:$0xff] }
   0x7   :  { %33 = vst.msk [vmem:[#allocation2 + $0x58] sm:$0xff] %vm21_vm0, %v14876_v2  ;;  %34 = vst.msk [vmem:[#allocation2 + $0x60] sm:$0xff] %vm21_vm0, %v14876_v2  ;;  %v320_v14 = vld [vmem:[%s14870_s0 + $0x310] sm:$0xff]  ;;  %v227_v15 = vld [vmem:[%s14870_s0 + $0x28] sm:$0xff]  ;;  %8446 = vmatpush3.msra.mxu0 %v7591_v5  ;;  %9124 = vmatpush3.msra.mxu1 %v7591_v5 }
   0x8   :  { %35 = vst.msk [vmem:[#allocation2 + $0x68] sm:$0xff] %vm21_vm0, %v14876_v2  ;;  %36 = vst.msk [vmem:[#allocation2 + $0x70] sm:$0xff] %vm21_vm0, %v14876_v2  ;;  %v7797_v16 = vld [vmem:[%s14871_s1 + $0x58] sm:$0xff]  ;;  %8447 = vmatprep.subr.mxu0 %v7590_v11  ;;  %9121 = vmatprep.subr.mxu1 %v7590_v11  ;;  %v228_v19 = vld [vmem:[%s14870_s0 + $0x30] sm:$0xff] }
   0x9   :  { %37 = vst.msk [vmem:[#allocation2 + $0x78] sm:$0xff] %vm21_vm0, %v14876_v2  ;;  %38 = vst.msk [vmem:[#allocation2 + $0x80] sm:$0xff] %vm21_vm0, %v14876_v2  ;;  %v1026_v17 = vld [vmem:[%s14871_s1 + $0x18] sm:$0xff]  ;;  %v230_v21 = vld [vmem:[%s14870_s0 + $0x40] sm:$0xff]  ;;  %8448 = vmatpush3.msra.mxu0 %v7590_v11  ;;  %9125 = vmatpush3.msra.mxu1 %v7590_v11 }
   0xa   :  { %39 = vst.msk [vmem:[#allocation2 + $0x88] sm:$0xff] %vm21_vm0, %v14876_v2  ;;  %40 = vst.msk [vmem:[#allocation2 + $0x90] sm:$0xff] %vm21_vm0, %v14876_v2  ;;  %v321_v18 = vld [vmem:[%s14870_s0 + $0x318] sm:$0xff]  ;;  %v231_v22 = vld [vmem:[%s14870_s0 + $0x48] sm:$0xff]  ;;  %8757 = vmatprep.subr.mxu0 %v7797_v16  ;;  %8599 = vmatprep.subr.mxu1 %v1026_v17 }
   0xb   :  { %41 = vst.msk [vmem:[#allocation2 + $0x98] sm:$0xff] %vm21_vm0, %v14876_v2  ;;  %42 = vst.msk [vmem:[#allocation2 + $0xa0] sm:$0xff] %vm21_vm0, %v14876_v2  ;;  %v229_v20 = vld [vmem:[%s14870_s0 + $0x38] sm:$0xff]  ;;  %v232_v25 = vld [vmem:[%s14870_s0 + $0x50] sm:$0xff] }
   0xc   :  { %43 = vst.msk [vmem:[#allocation2 + $0xa8] sm:$0xff] %vm21_vm0, %v14876_v2  ;;  %44 = vst.msk [vmem:[#allocation2 + $0xb0] sm:$0xff] %vm21_vm0, %v14876_v2  ;;  %v1025_v28 = vld [vmem:[%s14871_s1 + $0x10] sm:$0xff]  ;;  %v422_v31 = vld [vmem:[#allocation2] sm:$0xff] }
   0xd   :  { %45 = vst.msk [vmem:[#allocation2 + $0xb8] sm:$0xff] %vm21_vm0, %v14876_v2  ;;  %46 = vst.msk [vmem:[#allocation2 + $0xc0] sm:$0xff] %vm21_vm0, %v14876_v2  ;;  %v773_v37 = vrot.slane %v422_v31, 7  ;;  %v426_v38 = vld [vmem:[#allocation2 + $0x20] sm:$0xff]  ;;  %v1024_v39 = vld [vmem:[%s14871_s1 + $0x8] sm:$0xff] }
   0xe   :  { %47 = vst.msk [vmem:[#allocation2 + $0xc8] sm:$0xff] %vm21_vm0, %v14876_v2  ;;  %48 = vst.msk [vmem:[#allocation2 + $0xd0] sm:$0xff] %vm21_vm0, %v14876_v2  ;;  %v1023_v43 = vld [vmem:[%s14871_s1] sm:$0xff]  ;;  %v778_v46 = vrot.slane %v426_v38, 7  ;;  %v233_v47 = vld [vmem:[%s14870_s0 + $0x58] sm:$0xff] }
   0xf   :  { %49 = vst.msk [vmem:[#allocation2 + $0xd8] sm:$0xff] %vm21_vm0, %v14876_v2  ;;  %50 = vst.msk [vmem:[#allocation2 + $0xe0] sm:$0xff] %vm21_vm0, %v14876_v2  ;;  %v234_v48 = vld [vmem:[%s14870_s0 + $0x60] sm:$0xff]  ;;  %v235_v51 = vld [vmem:[%s14870_s0 + $0x68] sm:$0xff] }
  0x10   :  { %51 = vst.msk [vmem:[#allocation2 + $0xe8] sm:$0xff] %vm21_vm0, %v14876_v2  ;;  %52 = vst.msk [vmem:[#allocation2 + $0xf0] sm:$0xff] %vm21_vm0, %v14876_v2  ;;  %v430_v50 = vld [vmem:[#allocation2 + $0x40] sm:$0xff]  ;;  %v236_v52 = vld [vmem:[%s14870_s0 + $0x70] sm:$0xff] }
  0x11   :  { %53 = vst.msk [vmem:[#allocation2 + $0xf8] sm:$0xff] %vm21_vm0, %v14876_v2  ;;  %54 = vst.msk [vmem:[#allocation2 + $0x100] sm:$0xff] %vm21_vm0, %v14876_v2  ;;  %v237_v53 = vld [vmem:[%s14870_s0 + $0x78] sm:$0xff]  ;;  %v238_v54 = vld [vmem:[%s14870_s0 + $0x80] sm:$0xff]  ;;  %v783_v63 = vrot.slane %v430_v50, 7 }
  0x12   :  { %55 = vst.msk [vmem:[#allocation2 + $0x108] sm:$0xff] %vm21_vm0, %v14876_v2  ;;  %56 = vst.msk [vmem:[#allocation2 + $0x110] sm:$0xff] %vm21_vm0, %v14876_v2  ;;  %v239_v58 = vld [vmem:[%s14870_s0 + $0x88] sm:$0xff]  ;;  %v240_v59 = vld [vmem:[%s14870_s0 + $0x90] sm:$0xff] }
  0x13   :  { %57 = vst.msk [vmem:[#allocation2 + $0x118] sm:$0xff] %vm21_vm0, %v14876_v2  ;;  %58 = vst.msk [vmem:[#allocation2 + $0x120] sm:$0xff] %vm21_vm0, %v14876_v2  ;;  %v241_v0 = vld [vmem:[%s14870_s0 + $0x98] sm:$0xff]  ;;  %v242_v1 = vld [vmem:[%s14870_s0 + $0xa0] sm:$0xff] }
  0x14   :  { %59 = vst.msk [vmem:[#allocation2 + $0x128] sm:$0xff] %vm21_vm0, %v14876_v2  ;;  %60 = vst.msk [vmem:[#allocation2 + $0x130] sm:$0xff] %vm21_vm0, %v14876_v2  ;;  %v244_v5 = vld [vmem:[%s14870_s0 + $0xb0] sm:$0xff]  ;;  %v246_v11 = vld [vmem:[%s14870_s0 + $0xc0] sm:$0xff] }
  0x15   :  { %61 = vst.msk [vmem:[#allocation2 + $0x138] sm:$0xff] %vm21_vm0, %v14876_v2  ;;  %62 = vst.msk [vmem:[#allocation2 + $0x140] sm:$0xff] %vm21_vm0, %v14876_v2  ;;  %v250_v38 = vld [vmem:[%s14870_s0 + $0xe0] sm:$0xff]  ;;  %v252_v50 = vld [vmem:[%s14870_s0 + $0xf0] sm:$0xff] }
  0x16   :  { %63 = vst.msk [vmem:[#allocation2 + $0x148] sm:$0xff] %vm21_vm0, %v14876_v2  ;;  %64 = vst.msk [vmem:[#allocation2 + $0x150] sm:$0xff] %vm21_vm0, %v14876_v2 }
  0x17   :  { %65 = vst.msk [vmem:[#allocation2 + $0x158] sm:$0xff] %vm21_vm0, %v14876_v2  ;;  %66 = vst.msk [vmem:[#allocation2 + $0x160] sm:$0xff] %vm21_vm0, %v14876_v2 }
  0x18   :  { %67 = vst.msk [vmem:[#allocation2 + $0x168] sm:$0xff] %vm21_vm0, %v14876_v2  ;;  %68 = vst.msk [vmem:[#allocation2 + $0x170] sm:$0xff] %vm21_vm0, %v14876_v2 }
  0x19   :  { %69 = vst.msk [vmem:[#allocation2 + $0x178] sm:$0xff] %vm21_vm0, %v14876_v2  ;;  %70 = vst.msk [vmem:[#allocation2 + $0x180] sm:$0xff] %vm21_vm0, %v14876_v2 }
  0x1a   :  { %71 = vst.msk [vmem:[#allocation2 + $0x188] sm:$0xff] %vm21_vm0, %v14876_v2  ;;  %72 = vst.msk [vmem:[#allocation2 + $0x190] sm:$0xff] %vm21_vm0, %v14876_v2 }
  0x1b   :  { %73 = vst.msk [vmem:[#allocation2 + $0x198] sm:$0xff] %vm21_vm0, %v14876_v2  ;;  %74 = vst.msk [vmem:[#allocation2 + $0x1a0] sm:$0xff] %vm21_vm0, %v14876_v2 }
  0x1c   :  { %75 = vst.msk [vmem:[#allocation2 + $0x1a8] sm:$0xff] %vm21_vm0, %v14876_v2  ;;  %76 = vst.msk [vmem:[#allocation2 + $0x1b0] sm:$0xff] %vm21_vm0, %v14876_v2 }
  0x1d   :  { %77 = vst.msk [vmem:[#allocation2 + $0x1b8] sm:$0xff] %vm21_vm0, %v14876_v2  ;;  %78 = vst.msk [vmem:[#allocation2 + $0x1c0] sm:$0xff] %vm21_vm0, %v14876_v2 }
  0x1e   :  { %79 = vst.msk [vmem:[#allocation2 + $0x1c8] sm:$0xff] %vm21_vm0, %v14876_v2  ;;  %80 = vst.msk [vmem:[#allocation2 + $0x1d0] sm:$0xff] %vm21_vm0, %v14876_v2 }
  0x1f   :  { %81 = vst.msk [vmem:[#allocation2 + $0x1d8] sm:$0xff] %vm21_vm0, %v14876_v2  ;;  %82 = vst.msk [vmem:[#allocation2 + $0x1e0] sm:$0xff] %vm21_vm0, %v14876_v2 }
  0x20   :  { %83 = vst.msk [vmem:[#allocation2 + $0x1e8] sm:$0xff] %vm21_vm0, %v14876_v2  ;;  %84 = vst.msk [vmem:[#allocation2 + $0x1f0] sm:$0xff] %vm21_vm0, %v14876_v2 }
  0x21   :  { %85 = vst.msk [vmem:[#allocation2 + $0x1f8] sm:$0xff] %vm21_vm0, %v14876_v2  ;;  %86 = vst.msk [vmem:[#allocation2 + $0x200] sm:$0xff] %vm21_vm0, %v14876_v2 }
  0x22   :  { %87 = vst.msk [vmem:[#allocation2 + $0x208] sm:$0xff] %vm21_vm0, %v14876_v2  ;;  %88 = vst.msk [vmem:[#allocation2 + $0x210] sm:$0xff] %vm21_vm0, %v14876_v2 }
  0x23   :  { %89 = vst.msk [vmem:[#allocation2 + $0x218] sm:$0xff] %vm21_vm0, %v14876_v2  ;;  %90 = vst.msk [vmem:[#allocation2 + $0x220] sm:$0xff] %vm21_vm0, %v14876_v2 }
  0x24   :  { %91 = vst.msk [vmem:[#allocation2 + $0x228] sm:$0xff] %vm21_vm0, %v14876_v2  ;;  %92 = vst.msk [vmem:[#allocation2 + $0x230] sm:$0xff] %vm21_vm0, %v14876_v2 }
  0x25   :  { %93 = vst.msk [vmem:[#allocation2 + $0x238] sm:$0xff] %vm21_vm0, %v14876_v2  ;;  %94 = vst.msk [vmem:[#allocation2 + $0x240] sm:$0xff] %vm21_vm0, %v14876_v2 }
  0x26   :  { %95 = vst.msk [vmem:[#allocation2 + $0x248] sm:$0xff] %vm21_vm0, %v14876_v2  ;;  %96 = vst.msk [vmem:[#allocation2 + $0x250] sm:$0xff] %vm21_vm0, %v14876_v2 }
  0x27   :  { %97 = vst.msk [vmem:[#allocation2 + $0x258] sm:$0xff] %vm21_vm0, %v14876_v2  ;;  %98 = vst.msk [vmem:[#allocation2 + $0x260] sm:$0xff] %vm21_vm0, %v14876_v2 }
  0x28   :  { %99 = vst.msk [vmem:[#allocation2 + $0x268] sm:$0xff] %vm21_vm0, %v14876_v2  ;;  %100 = vst.msk [vmem:[#allocation2 + $0x270] sm:$0xff] %vm21_vm0, %v14876_v2 }
  0x29   :  { %101 = vst.msk [vmem:[#allocation2 + $0x278] sm:$0xff] %vm21_vm0, %v14876_v2  ;;  %102 = vst.msk [vmem:[#allocation2 + $0x280] sm:$0xff] %vm21_vm0, %v14876_v2 }
  0x2a   :  { %103 = vst.msk [vmem:[#allocation2 + $0x288] sm:$0xff] %vm21_vm0, %v14876_v2  ;;  %104 = vst.msk [vmem:[#allocation2 + $0x290] sm:$0xff] %vm21_vm0, %v14876_v2 }
  0x2b   :  { %105 = vst.msk [vmem:[#allocation2 + $0x298] sm:$0xff] %vm21_vm0, %v14876_v2  ;;  %106 = vst.msk [vmem:[#allocation2 + $0x2a0] sm:$0xff] %vm21_vm0, %v14876_v2 }
  0x2c   :  { %107 = vst.msk [vmem:[#allocation2 + $0x2a8] sm:$0xff] %vm21_vm0, %v14876_v2  ;;  %108 = vst.msk [vmem:[#allocation2 + $0x2b0] sm:$0xff] %vm21_vm0, %v14876_v2 }
  0x2d   :  { %109 = vst.msk [vmem:[#allocation2 + $0x2b8] sm:$0xff] %vm21_vm0, %v14876_v2  ;;  %110 = vst.msk [vmem:[#allocation2 + $0x2c0] sm:$0xff] %vm21_vm0, %v14876_v2 }
  0x2e   :  { %111 = vst.msk [vmem:[#allocation2 + $0x2c8] sm:$0xff] %vm21_vm0, %v14876_v2  ;;  %112 = vst.msk [vmem:[#allocation2 + $0x2d0] sm:$0xff] %vm21_vm0, %v14876_v2 }
  0x2f   :  { %113 = vst.msk [vmem:[#allocation2 + $0x2d8] sm:$0xff] %vm21_vm0, %v14876_v2  ;;  %114 = vst.msk [vmem:[#allocation2 + $0x2e0] sm:$0xff] %vm21_vm0, %v14876_v2 }
  0x30   :  { %115 = vst.msk [vmem:[#allocation2 + $0x2e8] sm:$0xff] %vm21_vm0, %v14876_v2  ;;  %116 = vst.msk [vmem:[#allocation2 + $0x2f0] sm:$0xff] %vm21_vm0, %v14876_v2 }
  0x31   :  { %117 = vst.msk [vmem:[#allocation2 + $0x2f8] sm:$0xff] %vm21_vm0, %v14876_v2  ;;  %118 = vst.msk [vmem:[#allocation2 + $0x300] sm:$0xff] %vm21_vm0, %v14876_v2 }
  0x32   :  { %119 = vst.msk [vmem:[#allocation2 + $0x308] sm:$0xff] %vm21_vm0, %v14876_v2  ;;  %120 = vst.msk [vmem:[#allocation2 + $0x310] sm:$0xff] %vm21_vm0, %v14876_v2 }
  0x33   :  { %121 = vst.msk [vmem:[#allocation2 + $0x318] sm:$0xff] %vm21_vm0, %v14876_v2  ;;  %122 = vst.msk [vmem:[#allocation2 + $0x320] sm:$0xff] %vm21_vm0, %v14876_v2 }
  0x34   :  { %123 = vst.msk [vmem:[#allocation2 + $0x328] sm:$0xff] %vm21_vm0, %v14876_v2  ;;  %124 = vst.msk [vmem:[#allocation2 + $0x330] sm:$0xff] %vm21_vm0, %v14876_v2 }
  0x35   :  { %125 = vst.msk [vmem:[#allocation2 + $0x338] sm:$0xff] %vm21_vm0, %v14876_v2  ;;  %126 = vst.msk [vmem:[#allocation2 + $0x340] sm:$0xff] %vm21_vm0, %v14876_v2 }
  0x36   :  { %127 = vst.msk [vmem:[#allocation2 + $0x348] sm:$0xff] %vm21_vm0, %v14876_v2  ;;  %128 = vst.msk [vmem:[#allocation2 + $0x350] sm:$0xff] %vm21_vm0, %v14876_v2 }
  0x37   :  { %129 = vst.msk [vmem:[#allocation2 + $0x358] sm:$0xff] %vm21_vm0, %v14876_v2  ;;  %130 = vst.msk [vmem:[#allocation2 + $0x360] sm:$0xff] %vm21_vm0, %v14876_v2 }
  0x38   :  { %131 = vst.msk [vmem:[#allocation2 + $0x368] sm:$0xff] %vm21_vm0, %v14876_v2  ;;  %132 = vst.msk [vmem:[#allocation2 + $0x370] sm:$0xff] %vm21_vm0, %v14876_v2 }
  0x39   :  { %133 = vst.msk [vmem:[#allocation2 + $0x378] sm:$0xff] %vm21_vm0, %v14876_v2  ;;  %134 = vst.msk [vmem:[#allocation2 + $0x380] sm:$0xff] %vm21_vm0, %v14876_v2 }
  0x3a   :  { %135 = vst.msk [vmem:[#allocation2 + $0x388] sm:$0xff] %vm21_vm0, %v14876_v2  ;;  %136 = vst.msk [vmem:[#allocation2 + $0x390] sm:$0xff] %vm21_vm0, %v14876_v2 }
  0x3b   :  { %137 = vst.msk [vmem:[#allocation2 + $0x398] sm:$0xff] %vm21_vm0, %v14876_v2  ;;  %138 = vst.msk [vmem:[#allocation2 + $0x3a0] sm:$0xff] %vm21_vm0, %v14876_v2 }
  0x3c   :  { %139 = vst.msk [vmem:[#allocation2 + $0x3a8] sm:$0xff] %vm21_vm0, %v14876_v2  ;;  %140 = vst.msk [vmem:[#allocation2 + $0x3b0] sm:$0xff] %vm21_vm0, %v14876_v2 }
  0x3d   :  { %141 = vst.msk [vmem:[#allocation2 + $0x3b8] sm:$0xff] %vm21_vm0, %v14876_v2  ;;  %142 = vst.msk [vmem:[#allocation2 + $0x3c0] sm:$0xff] %vm21_vm0, %v14876_v2 }
  0x3e   :  { %143 = vst.msk [vmem:[#allocation2 + $0x3c8] sm:$0xff] %vm21_vm0, %v14876_v2  ;;  %144 = vst.msk [vmem:[#allocation2 + $0x3d0] sm:$0xff] %vm21_vm0, %v14876_v2 }
  0x3f   :  { %145 = vst.msk [vmem:[#allocation2 + $0x3d8] sm:$0xff] %vm21_vm0, %v14876_v2  ;;  %146 = vst.msk [vmem:[#allocation2 + $0x3e0] sm:$0xff] %vm21_vm0, %v14876_v2 }
  0x40   :  { %147 = vst.msk [vmem:[#allocation2 + $0x3e8] sm:$0xff] %vm21_vm0, %v14876_v2  ;;  %148 = vst.msk [vmem:[#allocation2 + $0x3f0] sm:$0xff] %vm21_vm0, %v14876_v2 }
  0x41   :  { %149 = vst.msk [vmem:[#allocation2 + $0x3f8] sm:$0xff] %vm21_vm0, %v14876_v2  ;;  %150 = vst.msk [vmem:[#allocation2 + $0x400] sm:$0xff] %vm21_vm0, %v14876_v2 }
  0x42   :  { %151 = vst.msk [vmem:[#allocation2 + $0x408] sm:$0xff] %vm21_vm0, %v14876_v2  ;;  %152 = vst.msk [vmem:[#allocation2 + $0x410] sm:$0xff] %vm21_vm0, %v14876_v2 }
  0x43   :  { %153 = vst.msk [vmem:[#allocation2 + $0x418] sm:$0xff] %vm21_vm0, %v14876_v2  ;;  %154 = vst.msk [vmem:[#allocation2 + $0x420] sm:$0xff] %vm21_vm0, %v14876_v2 }
  0x44   :  { %155 = vst.msk [vmem:[#allocation2 + $0x428] sm:$0xff] %vm21_vm0, %v14876_v2  ;;  %156 = vst.msk [vmem:[#allocation2 + $0x430] sm:$0xff] %vm21_vm0, %v14876_v2 }
  0x45   :  { %157 = vst.msk [vmem:[#allocation2 + $0x438] sm:$0xff] %vm21_vm0, %v14876_v2  ;;  %158 = vst.msk [vmem:[#allocation2 + $0x440] sm:$0xff] %vm21_vm0, %v14876_v2 }
  0x46   :  { %159 = vst.msk [vmem:[#allocation2 + $0x448] sm:$0xff] %vm21_vm0, %v14876_v2  ;;  %160 = vst.msk [vmem:[#allocation2 + $0x450] sm:$0xff] %vm21_vm0, %v14876_v2 }
  0x47   :  { %161 = vst.msk [vmem:[#allocation2 + $0x458] sm:$0xff] %vm21_vm0, %v14876_v2  ;;  %162 = vst.msk [vmem:[#allocation2 + $0x460] sm:$0xff] %vm21_vm0, %v14876_v2 }
  0x48   :  { %163 = vst.msk [vmem:[#allocation2 + $0x468] sm:$0xff] %vm21_vm0, %v14876_v2  ;;  %164 = vst.msk [vmem:[#allocation2 + $0x470] sm:$0xff] %vm21_vm0, %v14876_v2 }
  0x49   :  { %165 = vst.msk [vmem:[#allocation2 + $0x478] sm:$0xff] %vm21_vm0, %v14876_v2  ;;  %166 = vst.msk [vmem:[#allocation2 + $0x480] sm:$0xff] %vm21_vm0, %v14876_v2 }
  0x4a   :  { %167 = vst.msk [vmem:[#allocation2 + $0x488] sm:$0xff] %vm21_vm0, %v14876_v2  ;;  %168 = vst.msk [vmem:[#allocation2 + $0x490] sm:$0xff] %vm21_vm0, %v14876_v2 }
  0x4b   :  { %169 = vst.msk [vmem:[#allocation2 + $0x498] sm:$0xff] %vm21_vm0, %v14876_v2  ;;  %170 = vst.msk [vmem:[#allocation2 + $0x4a0] sm:$0xff] %vm21_vm0, %v14876_v2 }
  0x4c   :  { %171 = vst.msk [vmem:[#allocation2 + $0x4a8] sm:$0xff] %vm21_vm0, %v14876_v2  ;;  %172 = vst.msk [vmem:[#allocation2 + $0x4b0] sm:$0xff] %vm21_vm0, %v14876_v2 }
  0x4d   :  { %173 = vst.msk [vmem:[#allocation2 + $0x4b8] sm:$0xff] %vm21_vm0, %v14876_v2  ;;  %174 = vst.msk [vmem:[#allocation2 + $0x4c0] sm:$0xff] %vm21_vm0, %v14876_v2 }
  0x4e   :  { %175 = vst.msk [vmem:[#allocation2 + $0x4c8] sm:$0xff] %vm21_vm0, %v14876_v2  ;;  %176 = vst.msk [vmem:[#allocation2 + $0x4d0] sm:$0xff] %vm21_vm0, %v14876_v2 }
  0x4f   :  { %177 = vst.msk [vmem:[#allocation2 + $0x4d8] sm:$0xff] %vm21_vm0, %v14876_v2  ;;  %178 = vst.msk [vmem:[#allocation2 + $0x4e0] sm:$0xff] %vm21_vm0, %v14876_v2 }
  0x50   :  { %179 = vst.msk [vmem:[#allocation2 + $0x4e8] sm:$0xff] %vm21_vm0, %v14876_v2  ;;  %180 = vst.msk [vmem:[#allocation2 + $0x4f0] sm:$0xff] %vm21_vm0, %v14876_v2 }
  0x51   :  { %181 = vst.msk [vmem:[#allocation2 + $0x4f8] sm:$0xff] %vm21_vm0, %v14876_v2  ;;  %182 = vst.msk [vmem:[#allocation2 + $0x500] sm:$0xff] %vm21_vm0, %v14876_v2 }
  0x52   :  { %183 = vst.msk [vmem:[#allocation2 + $0x508] sm:$0xff] %vm21_vm0, %v14876_v2  ;;  %184 = vst.msk [vmem:[#allocation2 + $0x510] sm:$0xff] %vm21_vm0, %v14876_v2 }
  0x53   :  { %185 = vst.msk [vmem:[#allocation2 + $0x518] sm:$0xff] %vm21_vm0, %v14876_v2  ;;  %186 = vst.msk [vmem:[#allocation2 + $0x520] sm:$0xff] %vm21_vm0, %v14876_v2 }
  0x54   :  { %187 = vst.msk [vmem:[#allocation2 + $0x528] sm:$0xff] %vm21_vm0, %v14876_v2  ;;  %188 = vst.msk [vmem:[#allocation2 + $0x530] sm:$0xff] %vm21_vm0, %v14876_v2 }
  0x55   :  { %189 = vst.msk [vmem:[#allocation2 + $0x538] sm:$0xff] %vm21_vm0, %v14876_v2  ;;  %190 = vst.msk [vmem:[#allocation2 + $0x540] sm:$0xff] %vm21_vm0, %v14876_v2 }
  0x56   :  { %191 = vst.msk [vmem:[#allocation2 + $0x548] sm:$0xff] %vm21_vm0, %v14876_v2  ;;  %192 = vst.msk [vmem:[#allocation2 + $0x550] sm:$0xff] %vm21_vm0, %v14876_v2 }
  0x57   :  { %193 = vst.msk [vmem:[#allocation2 + $0x558] sm:$0xff] %vm21_vm0, %v14876_v2  ;;  %194 = vst.msk [vmem:[#allocation2 + $0x560] sm:$0xff] %vm21_vm0, %v14876_v2 }
  0x58   :  { %195 = vst.msk [vmem:[#allocation2 + $0x568] sm:$0xff] %vm21_vm0, %v14876_v2  ;;  %196 = vst.msk [vmem:[#allocation2 + $0x570] sm:$0xff] %vm21_vm0, %v14876_v2 }
  0x59   :  { %197 = vst.msk [vmem:[#allocation2 + $0x578] sm:$0xff] %vm21_vm0, %v14876_v2  ;;  %198 = vst.msk [vmem:[#allocation2 + $0x580] sm:$0xff] %vm21_vm0, %v14876_v2 }
  0x5a   :  { %199 = vst.msk [vmem:[#allocation2 + $0x588] sm:$0xff] %vm21_vm0, %v14876_v2  ;;  %200 = vst.msk [vmem:[#allocation2 + $0x590] sm:$0xff] %vm21_vm0, %v14876_v2 }
  0x5b   :  { %201 = vst.msk [vmem:[#allocation2 + $0x598] sm:$0xff] %vm21_vm0, %v14876_v2  ;;  %202 = vst.msk [vmem:[#allocation2 + $0x5a0] sm:$0xff] %vm21_vm0, %v14876_v2 }
  0x5c   :  { %203 = vst.msk [vmem:[#allocation2 + $0x5a8] sm:$0xff] %vm21_vm0, %v14876_v2  ;;  %204 = vst.msk [vmem:[#allocation2 + $0x5b0] sm:$0xff] %vm21_vm0, %v14876_v2 }
  0x5d   :  { %205 = vst.msk [vmem:[#allocation2 + $0x5b8] sm:$0xff] %vm21_vm0, %v14876_v2  ;;  %206 = vst.msk [vmem:[#allocation2 + $0x5c0] sm:$0xff] %vm21_vm0, %v14876_v2 }
  0x5e   :  { %207 = vst.msk [vmem:[#allocation2 + $0x5c8] sm:$0xff] %vm21_vm0, %v14876_v2  ;;  %208 = vst.msk [vmem:[#allocation2 + $0x5d0] sm:$0xff] %vm21_vm0, %v14876_v2 }
  0x5f   :  { %209 = vst.msk [vmem:[#allocation2 + $0x5d8] sm:$0xff] %vm21_vm0, %v14876_v2  ;;  %210 = vst.msk [vmem:[#allocation2 + $0x5e0] sm:$0xff] %vm21_vm0, %v14876_v2 }
  0x60   :  { %211 = vst.msk [vmem:[#allocation2 + $0x5e8] sm:$0xff] %vm21_vm0, %v14876_v2  ;;  %212 = vst.msk [vmem:[#allocation2 + $0x5f0] sm:$0xff] %vm21_vm0, %v14876_v2 }
  0x61   :  { %213 = vst.msk [vmem:[#allocation2 + $0x5f8] sm:$0xff] %vm21_vm0, %v14876_v2  ;;  %214 = vst.msk [vmem:[#allocation2 + $0x600] sm:$0xff] %vm21_vm0, %v14876_v2 }
  0x62   :  { %215 = vst.msk [vmem:[#allocation2 + $0x608] sm:$0xff] %vm21_vm0, %v14876_v2  ;;  %216 = vst.msk [vmem:[#allocation2 + $0x610] sm:$0xff] %vm21_vm0, %v14876_v2 }
  0x63   :  { %217 = vst.msk [vmem:[#allocation2 + $0x618] sm:$0xff] %vm21_vm0, %v14876_v2  ;;  %218 = vst.msk [vmem:[#allocation2 + $0x620] sm:$0xff] %vm21_vm0, %v14876_v2 }
  0x64   :  { %219 = vst.msk [vmem:[#allocation2 + $0x628] sm:$0xff] %vm21_vm0, %v14876_v2  ;;  %220 = vst.msk [vmem:[#allocation2 + $0x630] sm:$0xff] %vm21_vm0, %v14876_v2 }
  0x65   :  { %221 = vst.msk [vmem:[#allocation2 + $0x638] sm:$0xff] %vm21_vm0, %v14876_v2  ;;  %322 = vst.msk [vmem:[#allocation2 + $0x8] sm:$0xff] %vm21_vm0, %v9536_v3  ;;  %v434_v3 = vld [vmem:[#allocation2 + $0x60] sm:$0xff] }
  0x66   :  { %416 = vst.msk [vmem:[#allocation2 + $0x5e8] sm:$0xff] %vm21_vm0, %v316_v4  ;;  %323 = vst.msk [vmem:[#allocation2 + $0x10] sm:$0xff] %vm21_vm0, %v223_v6  ;;  %v243_v4 = vld [vmem:[%s14870_s0 + $0xa8] sm:$0xff]  ;;  %v245_v6 = vld [vmem:[%s14870_s0 + $0xb8] sm:$0xff] }
  0x67   :  { %417 = vst.msk [vmem:[#allocation2 + $0x5f0] sm:$0xff] %vm21_vm0, %v317_v7  ;;  %324 = vst.msk [vmem:[#allocation2 + $0x28] sm:$0xff] %vm21_vm0, %v224_v8  ;;  %v7796_v7 = vld [vmem:[%s14871_s1 + $0x50] sm:$0xff] }
  0x68   :  { %418 = vst.msk [vmem:[#allocation2 + $0x608] sm:$0xff] %vm21_vm0, %v318_v9  ;;  %325 = vst.msk [vmem:[#allocation2 + $0x30] sm:$0xff] %vm21_vm0, %v225_v10 }
  0x69   :  { %419 = vst.msk [vmem:[#allocation2 + $0x610] sm:$0xff] %vm21_vm0, %v319_v12  ;;  %326 = vst.msk [vmem:[#allocation2 + $0x48] sm:$0xff] %vm21_vm0, %v226_v13  ;;  %v247_v12 = vld [vmem:[%s14870_s0 + $0xc8] sm:$0xff] }
  0x6a   :  { %420 = vst.msk [vmem:[#allocation2 + $0x628] sm:$0xff] %vm21_vm0, %v320_v14  ;;  %327 = vst.msk [vmem:[#allocation2 + $0x50] sm:$0xff] %vm21_vm0, %v227_v15 }
  0x6b   :  { %421 = vst.msk [vmem:[#allocation2 + $0x630] sm:$0xff] %vm21_vm0, %v321_v18  ;;  %328 = vst.msk [vmem:[#allocation2 + $0x68] sm:$0xff] %vm21_vm0, %v228_v19  ;;  %v438_v18 = vld [vmem:[#allocation2 + $0x80] sm:$0xff] }
  0x6c   :  { %329 = vst.msk [vmem:[#allocation2 + $0x70] sm:$0xff] %vm21_vm0, %v229_v20  ;;  %330 = vst.msk [vmem:[#allocation2 + $0x88] sm:$0xff] %vm21_vm0, %v230_v21  ;;  %v10015_v23 = vld [vmem:[#allocation2 + $0x8] sm:$0xff]  ;;  %v793_v31 = vrot.slane %v438_v18, 7 }
  0x6d   :  { %v10017_v24 = vld [vmem:[#allocation2 + $0x5e8] sm:$0xff]  ;;  %331 = vst.msk [vmem:[#allocation2 + $0x90] sm:$0xff] %vm21_vm0, %v231_v22  ;;  %8449 = vmatprep.mubr.msk.f32.mxu0 %vm21_vm0, %v10015_v23  ;;  %v10027_v26 = vld [vmem:[#allocation2 + $0x10] sm:$0xff]  ;;  %332 = vst.msk [vmem:[#allocation2 + $0xa8] sm:$0xff] %vm21_vm0, %v232_v25  ;;  %v774_v36 = vrot.slane %v10015_v23, 7 }
  0x6e   :  { %8590 = vmatprep.mubr.msk.f32.mxu1 %vm21_vm0, %v10017_v24  ;;  %15173 = vst [vmem:[#allocation6_spill] sm:$0xff] %v10027_v26  ;;  %v10029_v27 = vld [vmem:[#allocation2 + $0x5f0] sm:$0xff]  ;;  %8450 = vmatmul.mubr.msk.f32.vlgmr.msra.gmra.mxu0 %vm21_vm0, %v10027_v26  ;;  %v10039_v29 = vld [vmem:[#allocation2 + $0x28] sm:$0xff]  ;;  %v776_v40 = vrot.slane %v10027_v26, 7  ;;  %333 = vst.msk [vmem:[#allocation2 + $0xb0] sm:$0xff] %vm21_vm0, %v233_v47 }
  0x6f   :  { %8591 = vmatmul.mubr.msk.f32.vlgmr.msra.gmra.mxu1 %vm21_vm0, %v10029_v27  ;;  %v10041_v30 = vld [vmem:[#allocation2 + $0x608] sm:$0xff]  ;;  %8758 = vmatpush3.msra.mxu0 %v7797_v16  ;;  %v10045_v32 = vld [vmem:[#allocation2 + $0x30] sm:$0xff]  ;;  %v779_v44 = vrot.slane %v10039_v29, 7  ;;  %v775_v49 = vsel %vm772_vm1, %v773_v37, %v774_v36  ;;  %334 = vst.msk [vmem:[#allocation2 + $0xc8] sm:$0xff] %vm21_vm0, %v234_v48  ;;  %335 = vst.msk [vmem:[#allocation2 + $0xd0] sm:$0xff] %vm21_vm0, %v235_v51  ;;  %v788_v16 = vrot.slane %v434_v3, 7 }
  0x70   :  { %8452 = vmatprep.mubr.msk.f32.mxu0 %vm21_vm0, %v10039_v29  ;;  %15174 = vst [vmem:[#allocation7_spill] sm:$0xff] %v10045_v32  ;;  %v10047_v33 = vld [vmem:[#allocation2 + $0x610] sm:$0xff]  ;;  %8593 = vmatprep.mubr.msk.f32.mxu1 %vm21_vm0, %v10041_v30  ;;  %v10051_v34 = vld [vmem:[#allocation2 + $0x48] sm:$0xff]  ;;  %336 = vst.msk [vmem:[#allocation2 + $0xe8] sm:$0xff] %vm21_vm0, %v236_v52  ;;  %v781_v55 = vrot.slane %v10045_v32, 7  ;;  %v777_v57 = vsel %vm772_vm1, %v774_v36, %v776_v40 }
  0x71   :  { %8600 = vmatpush3.msra.mxu1 %v1026_v17  ;;  %v10053_v35 = vld [vmem:[#allocation2 + $0x628] sm:$0xff]  ;;  %v10068_v41 = vld [vmem:[#allocation2 + $0x50] sm:$0xff]  ;;  %337 = vst.msk [vmem:[#allocation2 + $0xf0] sm:$0xff] %vm21_vm0, %v237_v53  ;;  %338 = vst.msk [vmem:[#allocation2 + $0x108] sm:$0xff] %vm21_vm0, %v238_v54  ;;  %v784_v60 = vrot.slane %v10051_v34, 7  ;;  %v780_v62 = vsel %vm772_vm1, %v778_v46, %v779_v44  ;;  %8759 = vmatprep.subr.mxu0 %v7796_v7 }
  0x72   :  { %8601 = vmatprep.subr.mxu1 %v1025_v28  ;;  %8453 = vmatmul.mubr.msk.f32.gmra.mxu0 %vm21_vm0, %v10045_v32  ;;  %15175 = vst [vmem:[#allocation8_spill] sm:$0xff] %v10068_v41  ;;  %v10070_v42 = vld [vmem:[#allocation2 + $0x630] sm:$0xff]  ;;  %v10076_v45 = vld [vmem:[#allocation2 + $0x68] sm:$0xff]  ;;  %339 = vst.msk [vmem:[#allocation2 + $0x110] sm:$0xff] %vm21_vm0, %v239_v58  ;;  %v786_v8 = vrot.slane %v10068_v41, 7  ;;  %v782_v10 = vsel %vm772_vm1, %v779_v44, %v781_v55 }
  0x73   :  { %8594 = vmatmul.mubr.msk.f32.gmra.mxu1 %vm21_vm0, %v10047_v33  ;;  %8455 = vmatprep.mubr.msk.f32.mxu0 %vm21_vm0, %v10051_v34  ;;  %v10108_v56 = vld [vmem:[#allocation2 + $0x70] sm:$0xff]  ;;  %v10121_v61 = vld [vmem:[#allocation2 + $0x88] sm:$0xff]  ;;  %340 = vst.msk [vmem:[#allocation2 + $0x128] sm:$0xff] %vm21_vm0, %v240_v59  ;;  %341 = vst.msk [vmem:[#allocation2 + $0x130] sm:$0xff] %vm21_vm0, %v241_v0  ;;  %v789_v13 = vrot.slane %v10076_v45, 7  ;;  %v785_v15 = vsel %vm772_vm1, %v783_v63, %v784_v60 }
  0x74   :  { %8596 = vmatprep.mubr.msk.f32.mxu1 %vm21_vm0, %v10053_v35  ;;  %8602 = vmatpush3.msra.mxu1 %v1025_v28  ;;  %15176 = vst [vmem:[#allocation9_spill] sm:$0xff] %v10108_v56  ;;  %342 = vst.msk [vmem:[#allocation2 + $0x148] sm:$0xff] %vm21_vm0, %v242_v1  ;;  %v10155_v9 = vld [vmem:[#allocation2 + $0x90] sm:$0xff]  ;;  %v10166_v14 = vld [vmem:[#allocation2 + $0xa8] sm:$0xff]  ;;  %v791_v19 = vrot.slane %v10108_v56, 7  ;;  %v787_v21 = vsel %vm772_vm1, %v784_v60, %v786_v8  ;;  %v794_v22 = vrot.slane %v10121_v61, 7 }
  0x75   :  { %8603 = vmatprep.subr.mxu1 %v1024_v39  ;;  %343 = vst.msk [vmem:[#allocation2 + $0x150] sm:$0xff] %vm21_vm0, %v243_v4  ;;  %344 = vst.msk [vmem:[#allocation2 + $0x168] sm:$0xff] %vm21_vm0, %v244_v5  ;;  %v248_v17 = vld [vmem:[%s14870_s0 + $0xd0] sm:$0xff]  ;;  %8760 = vmatpush3.msra.mxu0 %v7796_v7  ;;  %v790_v28 = vsel %vm772_vm1, %v788_v16, %v789_v13  ;;  %v442_v36 = vld [vmem:[#allocation2 + $0xa0] sm:$0xff]  ;;  %v799_v46 = vrot.slane %v10166_v14, 7 }
  0x76   :  { %8456 = vmatmul.mubr.msk.f32.gmra.mxu0 %vm21_vm0, %v10068_v41  ;;  %8604 = vmatpush3.msra.mxu1 %v1024_v39  ;;  %345 = vst.msk [vmem:[#allocation2 + $0x170] sm:$0xff] %vm21_vm0, %v245_v6  ;;  %346 = vst.msk [vmem:[#allocation2 + $0x188] sm:$0xff] %vm21_vm0, %v246_v11  ;;  %v10182_v20 = vld [vmem:[#allocation2 + $0xb0] sm:$0xff]  ;;  %v10186_v25 = vld [vmem:[#allocation2 + $0xc8] sm:$0xff]  ;;  %v796_v39 = vrot.slane %v10155_v9, 7  ;;  %v795_v48 = vsel %vm772_vm1, %v793_v31, %v794_v22 }
  0x77   :  { %8597 = vmatmul.mubr.msk.f32.gmra.mxu1 %vm21_vm0, %v10070_v42  ;;  %8458 = vmatprep.mubr.msk.f32.mxu0 %vm21_vm0, %v10076_v45  ;;  %347 = vst.msk [vmem:[#allocation2 + $0x190] sm:$0xff] %vm21_vm0, %v247_v12  ;;  %348 = vst.msk [vmem:[#allocation2 + $0x1a8] sm:$0xff] %vm21_vm0, %v248_v17  ;;  %v249_v37 = vld [vmem:[%s14870_s0 + $0xd8] sm:$0xff]  ;;  %v10203_v40 = vld [vmem:[#allocation2 + $0xd0] sm:$0xff]  ;;  %v804_v63 = vrot.slane %v10186_v25, 7 }
  0x78   :  { %8605 = vmatprep.subr.mxu1 %v1023_v43  ;;  %8607 = vmatprep.mubr.msk.f32.mxu1 %vm21_vm0, %v775_v49  ;;  %349 = vst.msk [vmem:[#allocation2 + $0x1b0] sm:$0xff] %vm21_vm0, %v249_v37  ;;  %350 = vst.msk [vmem:[#allocation2 + $0x1c8] sm:$0xff] %vm21_vm0, %v250_v38  ;;  %v251_v44 = vld [vmem:[%s14870_s0 + $0xe8] sm:$0xff]  ;;  %v798_v49 = vrot.slane %v442_v36, 7  ;;  %v446_v51 = vld [vmem:[#allocation2 + $0xc0] sm:$0xff]  ;;  %v797_v59 = vsel %vm772_vm1, %v794_v22, %v796_v39  ;;  %v806_v11 = vrot.slane %v10203_v40, 7 }
  0x79   :  { %8606 = vmatpush3.msra.mxu1 %v1023_v43  ;;  %v792_v43 = vsel %vm772_vm1, %v789_v13, %v791_v19  ;;  %v10211_v47 = vld [vmem:[#allocation2 + $0xe8] sm:$0xff]  ;;  %351 = vst.msk [vmem:[#allocation2 + $0x1d0] sm:$0xff] %vm21_vm0, %v251_v44  ;;  %352 = vst.msk [vmem:[#allocation2 + $0x1e8] sm:$0xff] %vm21_vm0, %v252_v50  ;;  %v253_v52 = vld [vmem:[%s14870_s0 + $0xf8] sm:$0xff]  ;;  %v803_v3 = vrot.slane %v446_v51, 7 }
  0x7a   :  { %8459 = vmatmul.mubr.msk.f32.gmra.mxu0 %vm21_vm0, %v10108_v56  ;;  %v254_v53 = vld [vmem:[%s14870_s0 + $0x100] sm:$0xff]  ;;  %353 = vst.msk [vmem:[#allocation2 + $0x1f0] sm:$0xff] %vm21_vm0, %v253_v52  ;;  %v255_v54 = vld [vmem:[%s14870_s0 + $0x108] sm:$0xff]  ;;  %v256_v55 = vld [vmem:[%s14870_s0 + $0x110] sm:$0xff]  ;;  %v800_v1 = vsel %vm772_vm1, %v798_v49, %v799_v46  ;;  %v809_v16 = vrot.slane %v10211_v47, 7  ;;  %v807_v37 = vsel %vm772_vm1, %v804_v63, %v806_v11 }
  0x7b   :  { %8608 = vmatmul.mubr.msk.f32.vlgmr.msra.gmra.mxu1 %vm21_vm0, %v777_v57  ;;  %8461 = vmatprep.mubr.msk.f32.mxu0 %vm21_vm0, %v10121_v61  ;;  %354 = vst.msk [vmem:[#allocation2 + $0x208] sm:$0xff] %vm21_vm0, %v254_v53  ;;  %v801_v57 = vrot.slane %v10182_v20, 7  ;;  %v10240_v58 = vld [vmem:[#allocation2 + $0xf0] sm:$0xff]  ;;  %355 = vst.msk [vmem:[#allocation2 + $0x210] sm:$0xff] %vm21_vm0, %v255_v54  ;;  %v257_v60 = vld [vmem:[%s14870_s0 + $0x118] sm:$0xff]  ;;  %v805_v18 = vsel %vm772_vm1, %v803_v3, %v804_v63 }
  0x7c   :  { %8610 = vmatprep.mubr.msk.f32.mxu1 %vm21_vm0, %v780_v62  ;;  %356 = vst.msk [vmem:[#allocation2 + $0x228] sm:$0xff] %vm21_vm0, %v256_v55  ;;  %v258_v62 = vld [vmem:[%s14870_s0 + $0x120] sm:$0xff]  ;;  %v10252_v0 = vld [vmem:[#allocation2 + $0x108] sm:$0xff]  ;;  %357 = vst.msk [vmem:[#allocation2 + $0x230] sm:$0xff] %vm21_vm0, %v257_v60  ;;  %v811_v31 = vrot.slane %v10240_v58, 7 }
  0x7d   :  { %358 = vst.msk [vmem:[#allocation2 + $0x248] sm:$0xff] %vm21_vm0, %v258_v62  ;;  %v259_v4 = vld [vmem:[%s14870_s0 + $0x128] sm:$0xff]  ;;  %v260_v5 = vld [vmem:[%s14870_s0 + $0x130] sm:$0xff]  ;;  %v450_v6 = vld [vmem:[#allocation2 + $0xe0] sm:$0xff]  ;;  %v802_v13 = vsel %vm772_vm1, %v799_v46, %v801_v57  ;;  %v814_v38 = vrot.slane %v10252_v0, 7 }
  0x7e   :  { %8462 = vmatmul.mubr.msk.f32.gmra.mxu0 %vm21_vm0, %v10155_v9  ;;  %359 = vst.msk [vmem:[#allocation2 + $0x250] sm:$0xff] %vm21_vm0, %v259_v4  ;;  %360 = vst.msk [vmem:[#allocation2 + $0x268] sm:$0xff] %vm21_vm0, %v260_v5  ;;  %v261_v7 = vld [vmem:[%s14870_s0 + $0x138] sm:$0xff]  ;;  %v262_v8 = vld [vmem:[%s14870_s0 + $0x140] sm:$0xff]  ;;  %v808_v19 = vrot.slane %v450_v6, 7  ;;  %v812_v52 = vsel %vm772_vm1, %v809_v16, %v811_v31 }
  0x7f   :  { %8611 = vmatmul.mubr.msk.f32.gmra.mxu1 %vm21_vm0, %v782_v10  ;;  %8464 = vmatprep.mubr.msk.f32.mxu0 %vm21_vm0, %v10166_v14  ;;  %361 = vst.msk [vmem:[#allocation2 + $0x270] sm:$0xff] %vm21_vm0, %v261_v7  ;;  %362 = vst.msk [vmem:[#allocation2 + $0x288] sm:$0xff] %vm21_vm0, %v262_v8  ;;  %v263_v10 = vld [vmem:[%s14870_s0 + $0x148] sm:$0xff]  ;;  %v10283_v12 = vld [vmem:[#allocation2 + $0x110] sm:$0xff] }
  0x80   :  { %8613 = vmatprep.mubr.msk.f32.mxu1 %vm21_vm0, %v785_v15  ;;  %363 = vst.msk [vmem:[#allocation2 + $0x290] sm:$0xff] %vm21_vm0, %v263_v10  ;;  %v264_v15 = vld [vmem:[%s14870_s0 + $0x150] sm:$0xff]  ;;  %v10291_v17 = vld [vmem:[#allocation2 + $0x128] sm:$0xff]  ;;  %v454_v22 = vld [vmem:[#allocation2 + $0x100] sm:$0xff]  ;;  %v816_v50 = vrot.slane %v10283_v12, 7 }
  0x81   :  { %364 = vst.msk [vmem:[#allocation2 + $0x2a8] sm:$0xff] %vm21_vm0, %v264_v15  ;;  %v10310_v36 = vld [vmem:[#allocation2 + $0x130] sm:$0xff]  ;;  %v10314_v39 = vld [vmem:[#allocation2 + $0x148] sm:$0xff]  ;;  %v813_v44 = vrot.slane %v454_v22, 7  ;;  %v458_v46 = vld [vmem:[#allocation2 + $0x120] sm:$0xff]  ;;  %v819_v55 = vrot.slane %v10291_v17, 7 }
  0x82   :  { %8465 = vmatmul.mubr.msk.f32.gmra.mxu0 %vm21_vm0, %v10182_v20  ;;  %15177 = vst [vmem:[#allocation10_spill] sm:$0xff] %v10310_v36  ;;  %v268_v49 = vld [vmem:[%s14870_s0 + $0x170] sm:$0xff]  ;;  %v269_v53 = vld [vmem:[%s14870_s0 + $0x178] sm:$0xff]  ;;  %v7795_v54 = vld [vmem:[%s14871_s1 + $0x48] sm:$0xff]  ;;  %v818_v60 = vrot.slane %v458_v46, 7  ;;  %v821_v6 = vrot.slane %v10310_v36, 7  ;;  %v817_v8 = vsel %vm772_vm1, %v814_v38, %v816_v50 }
  0x83   :  { %8614 = vmatmul.mubr.msk.f32.gmra.mxu1 %vm21_vm0, %v787_v21  ;;  %8467 = vmatprep.mubr.msk.f32.mxu0 %vm21_vm0, %v10186_v25  ;;  %v265_v21 = vld [vmem:[%s14870_s0 + $0x158] sm:$0xff]  ;;  %v10331_v51 = vld [vmem:[#allocation2 + $0x150] sm:$0xff]  ;;  %368 = vst.msk [vmem:[#allocation2 + $0x2e8] sm:$0xff] %vm21_vm0, %v268_v49  ;;  %v10342_v57 = vld [vmem:[#allocation2 + $0x168] sm:$0xff] }
  0x84   :  { %8616 = vmatprep.mubr.msk.f32.mxu1 %vm21_vm0, %v790_v28  ;;  %365 = vst.msk [vmem:[#allocation2 + $0x2b0] sm:$0xff] %vm21_vm0, %v265_v21  ;;  %v266_v28 = vld [vmem:[%s14870_s0 + $0x160] sm:$0xff]  ;;  %15178 = vst [vmem:[#allocation11_spill] sm:$0xff] %v10331_v51  ;;  %8761 = vmatprep.subr.mxu0 %v7795_v54  ;;  %v272_v3 = vld [vmem:[%s14870_s0 + $0x190] sm:$0xff]  ;;  %v829_v46 = vrot.slane %v10342_v57, 7 }
  0x85   :  { %366 = vst.msk [vmem:[#allocation2 + $0x2c8] sm:$0xff] %vm21_vm0, %v266_v28  ;;  %369 = vst.msk [vmem:[#allocation2 + $0x2f0] sm:$0xff] %vm21_vm0, %v269_v53  ;;  %v270_v62 = vld [vmem:[%s14870_s0 + $0x180] sm:$0xff]  ;;  %8762 = vmatpush3.msra.mxu0 %v7795_v54  ;;  %v273_v4 = vld [vmem:[%s14870_s0 + $0x198] sm:$0xff] }
  0x86   :  { %8468 = vmatmul.mubr.msk.f32.gmra.mxu0 %vm21_vm0, %v10203_v40  ;;  %v462_v63 = vld [vmem:[#allocation2 + $0x140] sm:$0xff]  ;;  %370 = vst.msk [vmem:[#allocation2 + $0x308] sm:$0xff] %vm21_vm0, %v270_v62  ;;  %372 = vst.msk [vmem:[#allocation2 + $0x328] sm:$0xff] %vm21_vm0, %v272_v3  ;;  %v10371_v7 = vld [vmem:[#allocation2 + $0x170] sm:$0xff] }
  0x87   :  { %8617 = vmatmul.mubr.msk.f32.gmra.mxu1 %vm21_vm0, %v792_v43  ;;  %8470 = vmatprep.mubr.msk.f32.mxu0 %vm21_vm0, %v10211_v47  ;;  %v810_v43 = vsel %vm772_vm1, %v808_v19, %v809_v16  ;;  %v274_v5 = vld [vmem:[%s14870_s0 + $0x1a0] sm:$0xff]  ;;  %15179 = vst [vmem:[#allocation12_spill] sm:$0xff] %v10371_v7  ;;  %373 = vst.msk [vmem:[#allocation2 + $0x330] sm:$0xff] %vm21_vm0, %v273_v4  ;;  %v275_v10 = vld [vmem:[%s14870_s0 + $0x1a8] sm:$0xff]  ;;  %v820_v16 = vsel %vm772_vm1, %v818_v60, %v819_v55 }
  0x88   :  { %8619 = vmatprep.mubr.msk.f32.mxu1 %vm21_vm0, %v795_v48  ;;  %v267_v48 = vld [vmem:[%s14870_s0 + $0x168] sm:$0xff]  ;;  %374 = vst.msk [vmem:[#allocation2 + $0x348] sm:$0xff] %vm21_vm0, %v274_v5  ;;  %v276_v11 = vld [vmem:[%s14870_s0 + $0x1b0] sm:$0xff]  ;;  %375 = vst.msk [vmem:[#allocation2 + $0x350] sm:$0xff] %vm21_vm0, %v275_v10 }
  0x89   :  { %367 = vst.msk [vmem:[#allocation2 + $0x2d0] sm:$0xff] %vm21_vm0, %v267_v48  ;;  %v10383_v15 = vld [vmem:[#allocation2 + $0x188] sm:$0xff]  ;;  %376 = vst.msk [vmem:[#allocation2 + $0x368] sm:$0xff] %vm21_vm0, %v276_v11  ;;  %v277_v19 = vld [vmem:[%s14870_s0 + $0x1b8] sm:$0xff] }
  0x8a   :  { %8471 = vmatmul.mubr.msk.f32.gmra.mxu0 %vm21_vm0, %v10240_v58  ;;  %v278_v21 = vld [vmem:[%s14870_s0 + $0x1c0] sm:$0xff]  ;;  %377 = vst.msk [vmem:[#allocation2 + $0x370] sm:$0xff] %vm21_vm0, %v277_v19  ;;  %v279_v28 = vld [vmem:[%s14870_s0 + $0x1c8] sm:$0xff]  ;;  %v280_v31 = vld [vmem:[%s14870_s0 + $0x1d0] sm:$0xff]  ;;  %v834_v62 = vrot.slane %v10383_v15, 7 }
  0x8b   :  { %8620 = vmatmul.mubr.msk.f32.gmra.mxu1 %vm21_vm0, %v797_v59  ;;  %8473 = vmatprep.mubr.msk.f32.mxu0 %vm21_vm0, %v10252_v0  ;;  %v815_v59 = vsel %vm772_vm1, %v813_v44, %v814_v38  ;;  %v466_v22 = vld [vmem:[#allocation2 + $0x160] sm:$0xff]  ;;  %378 = vst.msk [vmem:[#allocation2 + $0x388] sm:$0xff] %vm21_vm0, %v278_v21  ;;  %379 = vst.msk [vmem:[#allocation2 + $0x390] sm:$0xff] %vm21_vm0, %v279_v28  ;;  %v10410_v38 = vld [vmem:[#allocation2 + $0x190] sm:$0xff] }
  0x8c   :  { %8622 = vmatprep.mubr.msk.f32.mxu1 %vm21_vm0, %v800_v1  ;;  %v271_v1 = vld [vmem:[%s14870_s0 + $0x188] sm:$0xff]  ;;  %15180 = vst [vmem:[#allocation13_spill] sm:$0xff] %v10410_v38  ;;  %380 = vst.msk [vmem:[#allocation2 + $0x3a8] sm:$0xff] %vm21_vm0, %v280_v31  ;;  %v281_v44 = vld [vmem:[%s14870_s0 + $0x1d8] sm:$0xff]  ;;  %v828_v50 = vrot.slane %v466_v22, 7  ;;  %v836_v10 = vrot.slane %v10410_v38, 7 }
  0x8d   :  { %371 = vst.msk [vmem:[#allocation2 + $0x310] sm:$0xff] %vm21_vm0, %v271_v1  ;;  %v10418_v48 = vld [vmem:[#allocation2 + $0x1a8] sm:$0xff]  ;;  %381 = vst.msk [vmem:[#allocation2 + $0x3b0] sm:$0xff] %vm21_vm0, %v281_v44  ;;  %v470_v53 = vld [vmem:[#allocation2 + $0x180] sm:$0xff] }
  0x8e   :  { %8474 = vmatmul.mubr.msk.f32.gmra.mxu0 %vm21_vm0, %v10283_v12  ;;  %v283_v54 = vld [vmem:[%s14870_s0 + $0x1e8] sm:$0xff]  ;;  %v830_v1 = vsel %vm772_vm1, %v828_v50, %v829_v46  ;;  %v833_v3 = vrot.slane %v470_v53, 7  ;;  %v284_v4 = vld [vmem:[%s14870_s0 + $0x1f0] sm:$0xff]  ;;  %v474_v5 = vld [vmem:[#allocation2 + $0x1a0] sm:$0xff]  ;;  %v839_v19 = vrot.slane %v10418_v48, 7 }
  0x8f   :  { %8623 = vmatmul.mubr.msk.f32.gmra.mxu1 %vm21_vm0, %v802_v13  ;;  %8476 = vmatprep.mubr.msk.f32.mxu0 %vm21_vm0, %v10291_v17  ;;  %v824_v13 = vrot.slane %v10314_v39, 7  ;;  %383 = vst.msk [vmem:[#allocation2 + $0x3d0] sm:$0xff] %vm21_vm0, %v283_v54  ;;  %384 = vst.msk [vmem:[#allocation2 + $0x3e8] sm:$0xff] %vm21_vm0, %v284_v4  ;;  %v10462_v11 = vld [vmem:[#allocation2 + $0x1d0] sm:$0xff]  ;;  %v10473_v21 = vld [vmem:[#allocation2 + $0x1e8] sm:$0xff]  ;;  %v838_v28 = vrot.slane %v474_v5, 7 }
  0x90   :  { %8625 = vmatprep.mubr.msk.f32.mxu1 %vm21_vm0, %v805_v18  ;;  %v823_v18 = vrot.slane %v462_v63, 7  ;;  %v10441_v63 = vld [vmem:[#allocation2 + $0x1c8] sm:$0xff]  ;;  %15182 = vst [vmem:[#allocation15_spill] sm:$0xff] %v10462_v11  ;;  %v835_v22 = vsel %vm772_vm1, %v833_v3, %v834_v62  ;;  %v289_v31 = vld [vmem:[%s14870_s0 + $0x218] sm:$0xff]  ;;  %v10488_v44 = vld [vmem:[#allocation2 + $0x1f0] sm:$0xff] }
  0x91   :  { %389 = vst.msk [vmem:[#allocation2 + $0x430] sm:$0xff] %vm21_vm0, %v289_v31  ;;  %15183 = vst [vmem:[#allocation16_spill] sm:$0xff] %v10488_v44  ;;  %v293_v53 = vld [vmem:[%s14870_s0 + $0x238] sm:$0xff]  ;;  %v7794_v54 = vld [vmem:[%s14871_s1 + $0x40] sm:$0xff] }
  0x92   :  { %8477 = vmatmul.mubr.msk.f32.gmra.mxu0 %vm21_vm0, %v10310_v36  ;;  %v825_v49 = vsel %vm772_vm1, %v823_v18, %v824_v13  ;;  %v288_v18 = vld [vmem:[%s14870_s0 + $0x210] sm:$0xff]  ;;  %393 = vst.msk [vmem:[#allocation2 + $0x470] sm:$0xff] %vm21_vm0, %v293_v53  ;;  %8763 = vmatprep.subr.mxu0 %v7794_v54  ;;  %v295_v4 = vld [vmem:[%s14870_s0 + $0x248] sm:$0xff]  ;;  %v482_v5 = vld [vmem:[#allocation2 + $0x1e0] sm:$0xff] }
  0x93   :  { %8626 = vmatmul.mubr.msk.f32.gmra.mxu1 %vm21_vm0, %v807_v37  ;;  %8479 = vmatprep.mubr.msk.f32.mxu0 %vm21_vm0, %v10314_v39  ;;  %v826_v37 = vrot.slane %v10331_v51, 7  ;;  %388 = vst.msk [vmem:[#allocation2 + $0x428] sm:$0xff] %vm21_vm0, %v288_v18  ;;  %395 = vst.msk [vmem:[#allocation2 + $0x490] sm:$0xff] %vm21_vm0, %v295_v4  ;;  %v298_v18 = vld [vmem:[%s14870_s0 + $0x260] sm:$0xff] }
  0x94   :  { %8628 = vmatprep.mubr.msk.f32.mxu1 %vm21_vm0, %v810_v43  ;;  %v822_v43 = vsel %vm772_vm1, %v819_v55, %v821_v6  ;;  %v831_v55 = vrot.slane %v10371_v7, 7  ;;  %v285_v6 = vld [vmem:[%s14870_s0 + $0x1f8] sm:$0xff]  ;;  %8764 = vmatpush3.msra.mxu0 %v7794_v54  ;;  %398 = vst.msk [vmem:[#allocation2 + $0x4c8] sm:$0xff] %vm21_vm0, %v298_v18  ;;  %v10569_v54 = vld [vmem:[#allocation2 + $0x248] sm:$0xff]  ;;  %v490_v4 = vld [vmem:[#allocation2 + $0x220] sm:$0xff] }
  0x95   :  { %v827_v60 = vsel %vm772_vm1, %v824_v13, %v826_v37  ;;  %385 = vst.msk [vmem:[#allocation2 + $0x3f0] sm:$0xff] %vm21_vm0, %v285_v6  ;;  %v478_v37 = vld [vmem:[#allocation2 + $0x1c0] sm:$0xff]  ;;  %v296_v6 = vld [vmem:[%s14870_s0 + $0x250] sm:$0xff]  ;;  %9081 = vmatprep.subr.mxu0 %v14876_v2  ;;  %v10647_v2 = vld [vmem:[#allocation2 + $0x288] sm:$0xff] }
  0x96   :  { %8480 = vmatmul.mubr.msk.f32.gmra.mxu0 %vm21_vm0, %v10331_v51  ;;  %v832_v13 = vsel %vm772_vm1, %v829_v46, %v831_v55  ;;  %v291_v46 = vld [vmem:[%s14870_s0 + $0x228] sm:$0xff]  ;;  %v294_v55 = vld [vmem:[%s14870_s0 + $0x240] sm:$0xff]  ;;  %v843_v3 = vrot.slane %v478_v37, 7  ;;  %396 = vst.msk [vmem:[#allocation2 + $0x4a8] sm:$0xff] %vm21_vm0, %v296_v6  ;;  %v848_v37 = vrot.slane %v482_v5, 7  ;;  %v10596_v18 = vld [vmem:[#allocation2 + $0x250] sm:$0xff] }
  0x97   :  { %8629 = vmatmul.mubr.msk.f32.gmra.mxu1 %vm21_vm0, %v812_v52  ;;  %8482 = vmatprep.mubr.msk.f32.mxu0 %vm21_vm0, %v10342_v57  ;;  %v282_v52 = vld [vmem:[%s14870_s0 + $0x1e0] sm:$0xff]  ;;  %391 = vst.msk [vmem:[#allocation2 + $0x450] sm:$0xff] %vm21_vm0, %v291_v46  ;;  %394 = vst.msk [vmem:[#allocation2 + $0x488] sm:$0xff] %vm21_vm0, %v294_v55  ;;  %v300_v46 = vld [vmem:[%s14870_s0 + $0x270] sm:$0xff] }
  0x98   :  { %8631 = vmatprep.mubr.msk.f32.mxu1 %vm21_vm0, %v815_v59  ;;  %382 = vst.msk [vmem:[#allocation2 + $0x3c8] sm:$0xff] %vm21_vm0, %v282_v52  ;;  %v10437_v59 = vld [vmem:[#allocation2 + $0x1b0] sm:$0xff]  ;;  %v837_v52 = vsel %vm772_vm1, %v834_v62, %v836_v10  ;;  %v840_v62 = vsel %vm772_vm1, %v838_v28, %v839_v19  ;;  %v846_v10 = vrot.slane %v10462_v11, 7  ;;  %v10545_v28 = vld [vmem:[#allocation2 + $0x228] sm:$0xff]  ;;  %400 = vst.msk [vmem:[#allocation2 + $0x4e8] sm:$0xff] %vm21_vm0, %v300_v46 }
  0x99   :  { %15181 = vst [vmem:[#allocation14_spill] sm:$0xff] %v10437_v59  ;;  %v841_v50 = vrot.slane %v10437_v59, 7  ;;  %v302_v5 = vld [vmem:[%s14870_s0 + $0x280] sm:$0xff]  ;;  %v303_v6 = vld [vmem:[%s14870_s0 + $0x288] sm:$0xff] }
  0x9a   :  { %8483 = vmatmul.mubr.msk.f32.gmra.mxu0 %vm21_vm0, %v10371_v7  ;;  %402 = vst.msk [vmem:[#allocation2 + $0x508] sm:$0xff] %vm21_vm0, %v302_v5  ;;  %403 = vst.msk [vmem:[#allocation2 + $0x510] sm:$0xff] %vm21_vm0, %v303_v6  ;;  %v10606_v46 = vld [vmem:[#allocation2 + $0x268] sm:$0xff]  ;;  %v2628_v5 = vrot.slane %v10076_v45, 1  ;;  %v14878_v6 = vrot.slane %v10108_v56, 1 }
  0x9b   :  { %8632 = vmatmul.mubr.msk.f32.gmra.mxu1 %vm21_vm0, %v817_v8  ;;  %8485 = vmatprep.mubr.msk.f32.mxu0 %vm21_vm0, %v10383_v15  ;;  %v286_v8 = vld [vmem:[%s14870_s0 + $0x200] sm:$0xff] }
  0x9c   :  { %8634 = vmatprep.mubr.msk.f32.mxu1 %vm21_vm0, %v820_v16  ;;  %386 = vst.msk [vmem:[#allocation2 + $0x408] sm:$0xff] %vm21_vm0, %v286_v8  ;;  %v287_v16 = vld [vmem:[%s14870_s0 + $0x208] sm:$0xff]  ;;  %v297_v8 = vld [vmem:[%s14870_s0 + $0x258] sm:$0xff] }
  0x9d   :  { %387 = vst.msk [vmem:[#allocation2 + $0x410] sm:$0xff] %vm21_vm0, %v287_v16  ;;  %v842_v16 = vsel %vm772_vm1, %v839_v19, %v841_v50  ;;  %397 = vst.msk [vmem:[#allocation2 + $0x4b0] sm:$0xff] %vm21_vm0, %v297_v8  ;;  %v299_v19 = vld [vmem:[%s14870_s0 + $0x268] sm:$0xff]  ;;  %v10565_v50 = vld [vmem:[#allocation2 + $0x230] sm:$0xff] }
  0x9e   :  { %8486 = vmatmul.mubr.msk.f32.gmra.mxu0 %vm21_vm0, %v10410_v38  ;;  %399 = vst.msk [vmem:[#allocation2 + $0x4d0] sm:$0xff] %vm21_vm0, %v299_v19  ;;  %15185 = vst [vmem:[#allocation18_spill] sm:$0xff] %v10565_v50  ;;  %v304_v8 = vld [vmem:[%s14870_s0 + $0x290] sm:$0xff]  ;;  %v859_v19 = vrot.slane %v10545_v28, 7 }
  0x9f   :  { %8635 = vmatmul.mubr.msk.f32.gmra.mxu1 %vm21_vm0, %v822_v43  ;;  %8488 = vmatprep.mubr.msk.f32.mxu0 %vm21_vm0, %v10418_v48  ;;  %v290_v43 = vld [vmem:[%s14870_s0 + $0x220] sm:$0xff]  ;;  %404 = vst.msk [vmem:[#allocation2 + $0x528] sm:$0xff] %vm21_vm0, %v304_v8  ;;  %v309_v8 = vld [vmem:[%s14870_s0 + $0x2b8] sm:$0xff] }
  0xa0   :  { %8637 = vmatprep.mubr.msk.f32.mxu1 %vm21_vm0, %v825_v49  ;;  %390 = vst.msk [vmem:[#allocation2 + $0x448] sm:$0xff] %vm21_vm0, %v290_v43  ;;  %v292_v49 = vld [vmem:[%s14870_s0 + $0x230] sm:$0xff]  ;;  %v486_v43 = vld [vmem:[#allocation2 + $0x200] sm:$0xff]  ;;  %409 = vst.msk [vmem:[#allocation2 + $0x570] sm:$0xff] %vm21_vm0, %v309_v8 }
  0xa1   :  { %392 = vst.msk [vmem:[#allocation2 + $0x468] sm:$0xff] %vm21_vm0, %v292_v49  ;;  %v851_v49 = vrot.slane %v10488_v44, 7  ;;  %v498_v8 = vld [vmem:[#allocation2 + $0x260] sm:$0xff] }
  0xa2   :  { %8489 = vmatmul.mubr.msk.f32.gmra.mxu0 %vm21_vm0, %v10437_v59 }
  0xa3   :  { %8638 = vmatmul.mubr.msk.f32.gmra.mxu1 %vm21_vm0, %v827_v60  ;;  %8491 = vmatprep.mubr.msk.f32.mxu0 %vm21_vm0, %v10441_v63  ;;  %v844_v60 = vrot.slane %v10441_v63, 7 }
  0xa4   :  { %8640 = vmatprep.mubr.msk.f32.mxu1 %vm21_vm0, %v830_v1  ;;  %v10514_v1 = vld [vmem:[#allocation2 + $0x208] sm:$0xff] }
  0xa5   :  { %v845_v31 = vsel %vm772_vm1, %v843_v3, %v844_v60  ;;  %v854_v53 = vrot.slane %v10514_v1, 7  ;;  %v301_v3 = vld [vmem:[%s14870_s0 + $0x278] sm:$0xff] }
  0xa6   :  { %8492 = vmatmul.mubr.msk.f32.gmra.mxu0 %vm21_vm0, %v10462_v11  ;;  %401 = vst.msk [vmem:[#allocation2 + $0x4f0] sm:$0xff] %vm21_vm0, %v301_v3  ;;  %v308_v3 = vld [vmem:[%s14870_s0 + $0x2b0] sm:$0xff] }
  0xa7   :  { %8641 = vmatmul.mubr.msk.f32.gmra.mxu1 %vm21_vm0, %v832_v13  ;;  %8494 = vmatprep.mubr.msk.f32.mxu0 %vm21_vm0, %v10473_v21  ;;  %v10537_v13 = vld [vmem:[#allocation2 + $0x210] sm:$0xff]  ;;  %408 = vst.msk [vmem:[#allocation2 + $0x568] sm:$0xff] %vm21_vm0, %v308_v3  ;;  %v864_v3 = vrot.slane %v10569_v54, 7 }
  0xa8   :  { %8643 = vmatprep.mubr.msk.f32.mxu1 %vm21_vm0, %v835_v22  ;;  %15184 = vst [vmem:[#allocation17_spill] sm:$0xff] %v10537_v13  ;;  %v849_v22 = vrot.slane %v10473_v21, 7 }
  0xaa   :  { %8495 = vmatmul.mubr.msk.f32.gmra.mxu0 %vm21_vm0, %v10488_v44  ;;  %v850_v55 = vsel %vm772_vm1, %v848_v37, %v849_v22  ;;  %v494_v37 = vld [vmem:[#allocation2 + $0x240] sm:$0xff] }
  0xab   :  { %8644 = vmatmul.mubr.msk.f32.gmra.mxu1 %vm21_vm0, %v837_v52  ;;  %8497 = vmatprep.mubr.msk.f32.mxu0 %vm21_vm0, %v10514_v1  ;;  %v847_v52 = vsel %vm772_vm1, %v844_v60, %v846_v10  ;;  %v2613_v60 = vrot.slane %v10015_v23, 1  ;;  %v14881_v10 = vrot.slane %v10027_v26, 1  ;;  %v856_v23 = vrot.slane %v10537_v13, 7 }
  0xac   :  { %8646 = vmatprep.mubr.msk.f32.mxu1 %vm21_vm0, %v840_v62  ;;  %v853_v62 = vrot.slane %v486_v43, 7  ;;  %v14880_v43 = vrot.slane %v10045_v32, 1  ;;  %v510_v32 = vld [vmem:[#allocation2 + $0x2c0] sm:$0xff] }
  0xad   :  { %v857_v45 = vsel %vm772_vm1, %v854_v53, %v856_v23  ;;  %v10658_v23 = vsel %vm2612_vm2, %v2613_v60, %v14881_v10  ;;  %v506_v10 = vld [vmem:[#allocation2 + $0x2a0] sm:$0xff] }
  0xae   :  { %8498 = vmatmul.mubr.msk.f32.gmra.mxu0 %vm21_vm0, %v10537_v13 }
  0xaf   :  { %8647 = vmatmul.mubr.msk.f32.gmra.mxu1 %vm21_vm0, %v842_v16  ;;  %8500 = vmatprep.mubr.msk.f32.mxu0 %vm21_vm0, %v10545_v28  ;;  %v2618_v16 = vrot.slane %v10039_v29, 1  ;;  %v305_v29 = vld [vmem:[%s14870_s0 + $0x298] sm:$0xff] }
  0xb0   :  { %8649 = vmatprep.mubr.msk.f32.mxu1 %vm21_vm0, %v845_v31  ;;  %v852_v31 = vsel %vm772_vm1, %v849_v22, %v851_v49  ;;  %405 = vst.msk [vmem:[#allocation2 + $0x530] sm:$0xff] %vm21_vm0, %v305_v29  ;;  %v306_v22 = vld [vmem:[%s14870_s0 + $0x2a0] sm:$0xff]  ;;  %v307_v49 = vld [vmem:[%s14870_s0 + $0x2a8] sm:$0xff]  ;;  %v861_v29 = vrot.slane %v10565_v50, 7 }
  0xb1   :  { %406 = vst.msk [vmem:[#allocation2 + $0x548] sm:$0xff] %vm21_vm0, %v306_v22  ;;  %407 = vst.msk [vmem:[#allocation2 + $0x550] sm:$0xff] %vm21_vm0, %v307_v49  ;;  %v863_v22 = vrot.slane %v494_v37, 7  ;;  %v311_v49 = vld [vmem:[%s14870_s0 + $0x2c8] sm:$0xff]  ;;  %v10663_v37 = vsel %vm2612_vm2, %v2618_v16, %v14880_v43  ;;  %v10685_v16 = vsel %vm2612_vm2, %v2628_v5, %v14878_v6  ;;  %v868_v6 = vrot.slane %v498_v8, 7 }
  0xb2   :  { %8501 = vmatmul.mubr.msk.f32.gmra.mxu0 %vm21_vm0, %v10565_v50  ;;  %411 = vst.msk [vmem:[#allocation2 + $0x590] sm:$0xff] %vm21_vm0, %v311_v49  ;;  %15186 = vst [vmem:[#allocation19_spill] sm:$0xff] %v10663_v37  ;;  %v866_v49 = vrot.slane %v10596_v18, 7  ;;  %v874_v8 = vrot.slane %v10647_v2, 7 }
  0xb3   :  { %8650 = vmatmul.mubr.msk.f32.gmra.mxu1 %vm21_vm0, %v847_v52  ;;  %8503 = vmatprep.mubr.msk.f32.mxu0 %vm21_vm0, %v10569_v54  ;;  %v855_v52 = vsel %vm772_vm1, %v853_v62, %v854_v53  ;;  %v2623_v62 = vrot.slane %v10051_v34, 1  ;;  %v10636_v34 = vld [vmem:[#allocation2 + $0x270] sm:$0xff]  ;;  %15188 = vst [vmem:[#allocation21_spill] sm:$0xff] %v10685_v16  ;;  %v865_v5 = vsel %vm772_vm1, %v863_v22, %v864_v3  ;;  %v1011_v16 = vrot.slane %v10029_v27, 7 }
  0xb4   :  { %8652 = vmatprep.mubr.msk.f32.mxu1 %vm21_vm0, %v850_v55  ;;  %v858_v55 = vrot.slane %v490_v4, 7  ;;  %v14879_v4 = vrot.slane %v10068_v41, 1  ;;  %v312_v53 = vld [vmem:[%s14870_s0 + $0x2d0] sm:$0xff]  ;;  %v1021_v41 = vrot.slane %v10070_v42, 7 }
  0xb5   :  { %412 = vst.msk [vmem:[#allocation2 + $0x5a8] sm:$0xff] %vm21_vm0, %v312_v53  ;;  %v862_v53 = vsel %vm772_vm1, %v859_v19, %v861_v29  ;;  %v871_v29 = vrot.slane %v10636_v34, 7  ;;  %v10712_v22 = vld [vmem:[#allocation2 + $0x2b0] sm:$0xff] }
  0xb6   :  { %8504 = vmatmul.mubr.msk.f32.gmra.mxu0 %vm21_vm0, %v10596_v18  ;;  %v10680_v60 = vsel %vm2612_vm2, %v2623_v62, %v14879_v4  ;;  %v315_v62 = vld [vmem:[%s14870_s0 + $0x2e8] sm:$0xff]  ;;  %v502_v4 = vld [vmem:[#allocation2 + $0x280] sm:$0xff] }
  0xb7   :  { %8653 = vmatmul.mubr.msk.f32.gmra.mxu1 %vm21_vm0, %v852_v31  ;;  %8506 = vmatprep.mubr.msk.f32.mxu0 %vm21_vm0, %v10606_v46  ;;  %v310_v31 = vld [vmem:[%s14870_s0 + $0x2c0] sm:$0xff]  ;;  %15187 = vst [vmem:[#allocation20_spill] sm:$0xff] %v10680_v60  ;;  %415 = vst.msk [vmem:[#allocation2 + $0x5d0] sm:$0xff] %vm21_vm0, %v315_v62  ;;  %v10716_v62 = vld [vmem:[#allocation2 + $0x2c8] sm:$0xff]  ;;  %v873_v43 = vrot.slane %v502_v4, 7  ;;  %v2638_v60 = vrot.slane %v10166_v14, 1 }
  0xb8   :  { %8655 = vmatprep.mubr.msk.f32.mxu1 %vm21_vm0, %v855_v52  ;;  %v860_v52 = vsel %vm772_vm1, %v858_v55, %v859_v19  ;;  %410 = vst.msk [vmem:[#allocation2 + $0x588] sm:$0xff] %vm21_vm0, %v310_v31  ;;  %v313_v55 = vld [vmem:[%s14870_s0 + $0x2d8] sm:$0xff]  ;;  %v314_v31 = vld [vmem:[%s14870_s0 + $0x2e0] sm:$0xff] }
  0xb9   :  { %413 = vst.msk [vmem:[#allocation2 + $0x5b0] sm:$0xff] %vm21_vm0, %v313_v55  ;;  %414 = vst.msk [vmem:[#allocation2 + $0x5c8] sm:$0xff] %vm21_vm0, %v314_v31  ;;  %v869_v55 = vrot.slane %v10606_v46, 7  ;;  %v10698_v31 = vld [vmem:[#allocation2 + $0x2a8] sm:$0xff]  ;;  %v3947_v19 = vld [vmem:[%s14873_s3 + $0x38] sm:$0xff] }
  0xba   :  { %8507 = vmatmul.mubr.msk.f32.gmra.mxu0 %vm21_vm0, %v10636_v34  ;;  %8915 = vmatprep.subr.mxu1 %v3947_v19 }
  0xbb   :  { %8656 = vmatmul.mubr.msk.f32.gmra.mxu1 %vm21_vm0, %v857_v45  ;;  %8509 = vmatprep.mubr.msk.f32.mxu0 %vm21_vm0, %v10647_v2  ;;  %v10691_v45 = vld [vmem:[#allocation2 + $0x290] sm:$0xff]  ;;  %v872_v27 = vsel %vm772_vm1, %v869_v55, %v871_v29  ;;  %v2643_v29 = vrot.slane %v10186_v25, 1 }
  0xbc   :  { %8658 = vmatprep.mubr.msk.f32.mxu1 %vm21_vm0, %v860_v52  ;;  %v867_v52 = vsel %vm772_vm1, %v864_v3, %v866_v49  ;;  %8916 = vmatpush3.msra.mxu1 %v3947_v19  ;;  %v1016_v3 = vrot.slane %v10047_v33, 7  ;;  %v2633_v49 = vrot.slane %v10121_v61, 1  ;;  %v876_v4 = vrot.slane %v10691_v45, 7 }
  0xbd   :  { %v875_v33 = vsel %vm772_vm1, %v873_v43, %v874_v8  ;;  %v878_v61 = vrot.slane %v506_v10, 7  ;;  %v2648_v43 = vrot.slane %v10211_v47, 1 }
  0xbe   :  { %8510 = vmatmul.mubr.msk.f32.gmra.mxu0 %vm21_vm0, %v10691_v45 }
  0xbf   :  { %8659 = vmatmul.mubr.msk.f32.gmra.mxu1 %vm21_vm0, %v862_v53  ;;  %8512 = vmatprep.mubr.msk.f32.mxu0 %vm21_vm0, %v10698_v31  ;;  %v870_v53 = vsel %vm772_vm1, %v868_v6, %v869_v55  ;;  %v10731_v6 = vld [vmem:[#allocation2 + $0x2d0] sm:$0xff] }
  0xc0   :  { %8661 = vmatprep.mubr.msk.f32.mxu1 %vm21_vm0, %v865_v5  ;;  %v879_v5 = vrot.slane %v10698_v31, 7  ;;  %v3946_v55 = vld [vmem:[%s14873_s3 + $0x30] sm:$0xff] }
  0xc2   :  { %8513 = vmatmul.mubr.msk.f32.gmra.mxu0 %vm21_vm0, %v10712_v22 }
  0xc3   :  { %8662 = vmatmul.mubr.msk.f32.gmra.mxu1 %vm21_vm0, %v867_v52  ;;  %8515 = vmatprep.mubr.msk.f32.mxu0 %vm21_vm0, %v10716_v62  ;;  %v10736_v52 = vld [vmem:[#allocation2 + $0x2e8] sm:$0xff] }
  0xc4   :  { %8664 = vmatprep.mubr.msk.f32.mxu1 %vm21_vm0, %v870_v53 }
  0xc6   :  { %8516 = vmatmul.mubr.msk.f32.gmra.mxu0 %vm21_vm0, %v10731_v6 }
  0xc7   :  { %8665 = vmatmul.mubr.msk.f32.gmra.mxu1 %vm21_vm0, %v872_v27 }
  0xc8   :  { %10 = vsyncpa [#allocation4], 0  ;;  %v2653_v42 = vrot.slane %v10252_v0, 1  ;;  %v881_v14 = vrot.slane %v10712_v22, 7  ;;  %8518 = vmatprep.mubr.msk.f32.mxu0 %vm21_vm0, %v10736_v52  ;;  %8667 = vmatprep.mubr.msk.f32.mxu1 %vm21_vm0, %v875_v33  ;;  %v10758_v25 = vld [vmem:[#allocation2 + $0x2f0] sm:$0xff]  ;;  %v877_v47 = vsel %vm772_vm1, %v874_v8, %v876_v4  ;;  %v15189_v10 = vrot.slane %v10017_v24, 7 }
  0xc9   :  { %v884_v27 = vrot.slane %v10716_v62, 7  ;;  %v10767_v56 = vld [vmem:[#allocation2 + $0x308] sm:$0xff]  ;;  %v880_v0 = vsel %vm772_vm1, %v878_v61, %v879_v5  ;;  %v883_v53 = vrot.slane %v510_v32, 7  ;;  %v514_v37 = vld [vmem:[#allocation2 + $0x2e0] sm:$0xff]  ;;  %v15191_v26 = vrot.slane %v10155_v9, 1  ;;  %8917 = vmatprep.subr.mxu1 %v3946_v55 }
  0xca   :  { %v10764_v19 = vsel %vm772_vm1, %v15189_v10, %v1011_v16  ;;  %v2658_v4 = vrot.slane %v10291_v17, 1  ;;  %v15192_v10 = vrot.slane %v10041_v30, 7  ;;  %8918 = vmatpush3.msra.mxu1 %v3946_v55  ;;  %v2663_v32 = vrot.slane %v10314_v39, 1  ;;  %8519 = vmatmul.mubr.msk.f32.gmra.mxu0 %vm21_vm0, %v10758_v25  ;;  %v10797_v39 = vld [vmem:[#allocation2 + $0x310] sm:$0xff] }
  0xcb   :  { %15190 = vst [vmem:[#allocation22_spill] sm:$0xff] %v10764_v19  ;;  %v10773_v33 = vsel %vm2612_vm2, %v2633_v49, %v15191_v26  ;;  %8668 = vmatmul.mubr.msk.f32.gmra.mxu1 %vm21_vm0, %v877_v47  ;;  %v15193_v26 = vrot.slane %v10182_v20, 1  ;;  %v886_v49 = vrot.slane %v10731_v6, 7  ;;  %8521 = vmatprep.mubr.msk.f32.mxu0 %vm21_vm0, %v10767_v56  ;;  %v888_v55 = vrot.slane %v514_v37, 7 }
  0xcc   :  { %v10781_v19 = vsel %vm772_vm1, %v15192_v10, %v1016_v3  ;;  %8670 = vmatprep.mubr.msk.f32.mxu1 %vm21_vm0, %v880_v0  ;;  %v882_v3 = vsel %vm772_vm1, %v879_v5, %v881_v14  ;;  %v15194_v10 = vrot.slane %v10053_v35, 7  ;;  %v885_v61 = vsel %vm772_vm1, %v883_v53, %v884_v27  ;;  %v518_v5 = vld [vmem:[#allocation2 + $0x300] sm:$0xff] }
  0xcd   :  { %v10791_v17 = vsel %vm2612_vm2, %v2638_v60, %v15193_v26  ;;  %v889_v60 = vrot.slane %v10736_v52, 7  ;;  %v10806_v26 = vld [vmem:[#allocation2 + $0x328] sm:$0xff]  ;;  %v15195_v16 = vrot.slane %v10203_v40, 1  ;;  %v15196_v8 = vrot.slane %v10240_v58, 1 }
  0xce   :  { %v10803_v47 = vsel %vm772_vm1, %v15194_v10, %v1021_v41  ;;  %v15197_v41 = vrot.slane %v10283_v12, 1  ;;  %v15198_v10 = vrot.slane %v10310_v36, 1  ;;  %8522 = vmatmul.mubr.msk.f32.gmra.mxu0 %vm21_vm0, %v10797_v39  ;;  %v522_v36 = vld [vmem:[#allocation2 + $0x320] sm:$0xff]  ;;  %vm3948_vm3 = vcmask 523264  }
  0xcf   :  { %v10812_v0 = vsel %vm2612_vm2, %v2643_v29, %v15195_v16  ;;  %v10817_v37 = vsel %vm2612_vm2, %v2648_v43, %v15196_v8  ;;  %8671 = vmatmul.mubr.msk.f32.gmra.mxu1 %vm21_vm0, %v882_v3  ;;  %v2668_v29 = vrot.slane %v10342_v57, 1  ;;  %v891_v8 = vrot.slane %v10758_v25, 7  ;;  %8524 = vmatprep.mubr.msk.f32.mxu0 %vm21_vm0, %v10806_v26 }
  0xd0   :  { %v10822_v14 = vsel %vm2612_vm2, %v2653_v42, %v15197_v41  ;;  %v10827_v53 = vsel %vm2612_vm2, %v2658_v4, %v15198_v10  ;;  %8673 = vmatprep.mubr.msk.f32.mxu1 %vm21_vm0, %v885_v61  ;;  %v10838_v42 = vld [vmem:[#allocation2 + $0x330] sm:$0xff]  ;;  %v887_v4 = vsel %vm772_vm1, %v884_v27, %v886_v49  ;;  %v894_v16 = vrot.slane %v10767_v56, 7  ;;  %v10842_v41 = vld [vmem:[#allocation2 + $0x348] sm:$0xff] }
  0xd1   :  { %15199 = vst [vmem:[#allocation23_spill] sm:$0xff] %v10827_v53  ;;  %v890_v3 = vsel %vm772_vm1, %v888_v55, %v889_v60  ;;  %v893_v57 = vrot.slane %v518_v5, 7  ;;  %v15200_v10 = vrot.slane %v10331_v51, 1  ;;  %v2673_v27 = vrot.slane %v10383_v15, 1  ;;  %v10859_v55 = vld [vmem:[#allocation2 + $0x350] sm:$0xff]  ;;  %v538_v53 = vld [vmem:[#allocation2 + $0x3a0] sm:$0xff] }
  0xd2   :  { %8525 = vmatmul.mubr.msk.f32.gmra.mxu0 %vm21_vm0, %v10838_v42  ;;  %v896_v49 = vrot.slane %v10797_v39, 7  ;;  %v899_v5 = vrot.slane %v10806_v26, 7  ;;  %v898_v15 = vrot.slane %v522_v36, 7  ;;  %v15202_v61 = vrot.slane %v10371_v7, 1  ;;  %v10880_v36 = vld [vmem:[#allocation2 + $0x370] sm:$0xff] }
  0xd3   :  { %v10848_v43 = vsel %vm2612_vm2, %v2663_v32, %v15200_v10  ;;  %8674 = vmatmul.mubr.msk.f32.gmra.mxu1 %vm21_vm0, %v887_v4  ;;  %8527 = vmatprep.mubr.msk.f32.mxu0 %vm21_vm0, %v10842_v41  ;;  %v892_v32 = vsel %vm772_vm1, %v889_v60, %v891_v8  ;;  %v10863_v10 = vld [vmem:[#allocation2 + $0x368] sm:$0xff]  ;;  %v895_v4 = vsel %vm772_vm1, %v893_v57, %v894_v16  ;;  %v2678_v60 = vrot.slane %v10418_v48, 1 }
  0xd4   :  { %15201 = vst [vmem:[#allocation24_spill] sm:$0xff] %v10848_v43  ;;  %8676 = vmatprep.mubr.msk.f32.mxu1 %vm21_vm0, %v890_v3  ;;  %v10869_v51 = vsel %vm2612_vm2, %v2668_v29, %v15202_v61  ;;  %v526_v43 = vld [vmem:[#allocation2 + $0x340] sm:$0xff]  ;;  %v901_v3 = vrot.slane %v10838_v42, 7  ;;  %v897_v29 = vsel %vm772_vm1, %v894_v16, %v896_v49  ;;  %v904_v57 = vrot.slane %v10842_v41, 7  ;;  %v10884_v61 = vld [vmem:[#allocation2 + $0x388] sm:$0xff] }
  0xd5   :  { %15203 = vst [vmem:[#allocation25_spill] sm:$0xff] %v10869_v51  ;;  %v903_v48 = vrot.slane %v526_v43, 7  ;;  %v15204_v8 = vrot.slane %v10410_v38, 1  ;;  %v530_v51 = vld [vmem:[#allocation2 + $0x360] sm:$0xff]  ;;  %v2683_v16 = vrot.slane %v10441_v63, 1  ;;  %v10901_v43 = vld [vmem:[#allocation2 + $0x390] sm:$0xff] }
  0xd6   :  { %8528 = vmatmul.mubr.msk.f32.gmra.mxu0 %vm21_vm0, %v10859_v55  ;;  %v908_v63 = vrot.slane %v530_v51, 7  ;;  %v15206_v49 = vrot.slane %v10437_v59, 1  ;;  %v911_v51 = vrot.slane %v10880_v36, 7  ;;  %v10929_v59 = vld [vmem:[#allocation2 + $0x3c8] sm:$0xff]  ;;  %vm4814_vm4 = vcmask 7168  }
  0xd7   :  { %8677 = vmatmul.mubr.msk.f32.gmra.mxu1 %vm21_vm0, %v892_v32  ;;  %8530 = vmatprep.mubr.msk.f32.mxu0 %vm21_vm0, %v10863_v10  ;;  %v900_v32 = vsel %vm772_vm1, %v898_v15, %v899_v5  ;;  %v10890_v7 = vsel %vm2612_vm2, %v2673_v27, %v15204_v8  ;;  %v902_v27 = vsel %vm772_vm1, %v899_v5, %v901_v3  ;;  %v909_v15 = vrot.slane %v10863_v10, 7  ;;  %v10905_v8 = vld [vmem:[#allocation2 + $0x3a8] sm:$0xff] }
  0xd8   :  { %8679 = vmatprep.mubr.msk.f32.mxu1 %vm21_vm0, %v895_v4  ;;  %15205 = vst [vmem:[#allocation26_spill] sm:$0xff] %v10890_v7  ;;  %v906_v4 = vrot.slane %v10859_v55, 7  ;;  %v10911_v38 = vsel %vm2612_vm2, %v2678_v60, %v15206_v49  ;;  %v534_v7 = vld [vmem:[#allocation2 + $0x380] sm:$0xff]  ;;  %v2688_v5 = vrot.slane %v10473_v21, 1  ;;  %v10925_v60 = vld [vmem:[#allocation2 + $0x3b0] sm:$0xff]  ;;  %v914_v49 = vrot.slane %v10884_v61, 7 }
  0xd9   :  { %15207 = vst [vmem:[#allocation27_spill] sm:$0xff] %v10911_v38  ;;  %15208 = vst [vmem:[#allocation28_spill] sm:$0xff] %v10925_v60  ;;  %v913_v21 = vrot.slane %v534_v7, 7  ;;  %v15209_v3 = vrot.slane %v10462_v11, 1  ;;  %v10946_v7 = vld [vmem:[#allocation2 + $0x3d0] sm:$0xff]  ;;  %v542_v11 = vld [vmem:[#allocation2 + $0x3c0] sm:$0xff] }
  0xda   :  { %8531 = vmatmul.mubr.msk.f32.gmra.mxu0 %vm21_vm0, %v10880_v36  ;;  %15210 = vst [vmem:[#allocation29_spill] sm:$0xff] %v10946_v7  ;;  %vm7273_vm5 = vcmask 1041409   ;;  %vm7275_vm6 = vcmask 1042434   ;;  %vm7277_vm7 = vcmask 1043459   ;;  %vm7279_vm8 = vcmask 1044484  }
  0xdb   :  { %8680 = vmatmul.mubr.msk.f32.gmra.mxu1 %vm21_vm0, %v897_v29  ;;  %8533 = vmatprep.mubr.msk.f32.mxu0 %vm21_vm0, %v10884_v61  ;;  %v905_v29 = vsel %vm772_vm1, %v903_v48, %v904_v57  ;;  %v907_v48 = vsel %vm772_vm1, %v904_v57, %v906_v4  ;;  %v10935_v38 = vsel %vm2612_vm2, %v2683_v16, %v15209_v3  ;;  %v2693_v57 = vrot.slane %v10514_v1, 1 }
  0xdc   :  { %8682 = vmatprep.mubr.msk.f32.mxu1 %vm21_vm0, %v900_v32  ;;  %v3945_v32 = vld [vmem:[%s14873_s3 + $0x28] sm:$0xff]  ;;  %v912_v16 = vsel %vm772_vm1, %v909_v15, %v911_v51  ;;  %v915_v3 = vsel %vm772_vm1, %v913_v21, %v914_v49  ;;  %v918_v1 = vrot.slane %v538_v53, 7  ;;  %v10967_v53 = vld [vmem:[#allocation2 + $0x3f0] sm:$0xff]  ;;  %v924_v21 = vrot.slane %v10929_v59, 7 }
  0xdd   :  { %8919 = vmatprep.subr.mxu1 %v3945_v32  ;;  %15213 = vst [vmem:[#allocation31_spill] sm:$0xff] %v10967_v53  ;;  %vm9487_vm9 = vmmov 0   ;;  %vm7281_vm10 = vcmask 1045509   ;;  %vm7283_vm11 = vcmask 1046534   ;;  %vm7285_vm12 = vcmask 1047559  }
  0xde   :  { %8534 = vmatmul.mubr.msk.f32.gmra.mxu0 %vm21_vm0, %v10901_v43  ;;  %8920 = vmatpush3.msra.mxu1 %v3945_v32  ;;  %v10950_v32 = vld [vmem:[#allocation2 + $0x3e8] sm:$0xff]  ;;  %vm7445_vm13 = vcmask 1024   ;;  %vm7565_vm14 = vcmask 517120   ;;  %vm7574_vm15 = vcmask 516096  }
  0xdf   :  { %8683 = vmatmul.mubr.msk.f32.gmra.mxu1 %vm21_vm0, %v902_v27  ;;  %8536 = vmatprep.mubr.msk.f32.mxu0 %vm21_vm0, %v10905_v8  ;;  %v910_v27 = vsel %vm772_vm1, %v908_v63, %v909_v15  ;;  %v919_v63 = vrot.slane %v10905_v8, 7  ;;  %v2698_v15 = vrot.slane %v10545_v28, 1  ;;  %v15214_v28 = vrot.slane %v10537_v13, 1 }
  0xe0   :  { %8685 = vmatprep.mubr.msk.f32.mxu1 %vm21_vm0, %v905_v29  ;;  %v916_v29 = vrot.slane %v10901_v43, 7 }
  0xe1   :  { %v10975_v51 = vsel %vm2612_vm2, %v2693_v57, %v15214_v28  ;;  %v10987_v28 = vld [vmem:[#allocation2 + $0x428] sm:$0xff] }
  0xe2   :  { %8537 = vmatmul.mubr.msk.f32.gmra.mxu0 %vm21_vm0, %v10925_v60  ;;  %15215 = vst [vmem:[#allocation32_spill] sm:$0xff] %v10975_v51  ;;  %v550_v51 = vld [vmem:[#allocation2 + $0x400] sm:$0xff] }
  0xe3   :  { %8686 = vmatmul.mubr.msk.f32.gmra.mxu1 %vm21_vm0, %v907_v48  ;;  %8539 = vmatprep.mubr.msk.f32.mxu0 %vm21_vm0, %v10929_v59  ;;  %v15211_v48 = vrot.slane %v10488_v44, 1  ;;  %v923_v44 = vrot.slane %v542_v11, 7  ;;  %v552_v11 = vld [vmem:[#allocation2 + $0x410] sm:$0xff] }
  0xe4   :  { %8688 = vmatprep.mubr.msk.f32.mxu1 %vm21_vm0, %v910_v27  ;;  %v921_v27 = vrot.slane %v10925_v60, 7 }
  0xe5   :  { %v10956_v4 = vsel %vm2612_vm2, %v2688_v5, %v15211_v48  ;;  %v917_v5 = vsel %vm772_vm1, %v914_v49, %v916_v29  ;;  %v551_v48 = vld [vmem:[#allocation2 + $0x408] sm:$0xff]  ;;  %v926_v29 = vrot.slane %v10946_v7, 7  ;;  %v925_v13 = vsel %vm772_vm1, %v923_v44, %v924_v21  ;;  %v556_v44 = vld [vmem:[#allocation2 + $0x430] sm:$0xff] }
  0xe6   :  { %15212 = vst [vmem:[#allocation30_spill] sm:$0xff] %v10956_v4  ;;  %8540 = vmatmul.mubr.msk.f32.gmra.mxu0 %vm21_vm0, %v10946_v7  ;;  %v546_v4 = vld [vmem:[#allocation2 + $0x3e0] sm:$0xff]  ;;  %v922_v57 = vsel %vm772_vm1, %v919_v63, %v921_v27  ;;  %v931_v27 = vrot.slane %v10967_v53, 7 }
  0xe7   :  { %8689 = vmatmul.mubr.msk.f32.gmra.mxu1 %vm21_vm0, %v912_v16  ;;  %8542 = vmatprep.mubr.msk.f32.mxu0 %vm21_vm0, %v10950_v32  ;;  %v920_v16 = vsel %vm772_vm1, %v918_v1, %v919_v63  ;;  %v929_v1 = vrot.slane %v10950_v32, 7 }
  0xe8   :  { %8691 = vmatprep.mubr.msk.f32.mxu1 %vm21_vm0, %v915_v3  ;;  %v2703_v3 = vrot.slane %v10569_v54, 1  ;;  %v15216_v54 = vrot.slane %v10565_v50, 1 }
  0xea   :  { %8543 = vmatmul.mubr.msk.f32.gmra.mxu0 %vm21_vm0, %v10967_v53  ;;  %v10993_v49 = vsel %vm2612_vm2, %v2698_v15, %v15216_v54  ;;  %v934_v15 = vrot.slane %v551_v48, 7  ;;  %v11004_v54 = vld [vmem:[#allocation2 + $0x448] sm:$0xff] }
  0xeb   :  { %8692 = vmatmul.mubr.msk.f32.gmra.mxu1 %vm21_vm0, %v917_v5  ;;  %8545 = vmatprep.mubr.msk.f32.mxu0 %vm21_vm0, %v551_v48  ;;  %v928_v5 = vrot.slane %v546_v4, 7  ;;  %15217 = vst [vmem:[#allocation33_spill] sm:$0xff] %v10993_v49  ;;  %v927_v4 = vsel %vm772_vm1, %v924_v21, %v926_v29  ;;  %v554_v49 = vld [vmem:[#allocation2 + $0x420] sm:$0xff]  ;;  %v936_v48 = vrot.slane %v552_v11, 7  ;;  %v932_v29 = vsel %vm772_vm1, %v929_v1, %v931_v27 }
  0xec   :  { %8694 = vmatprep.mubr.msk.f32.mxu1 %vm21_vm0, %v920_v16  ;;  %v2708_v16 = vrot.slane %v10606_v46, 1  ;;  %v15218_v46 = vrot.slane %v10596_v18, 1  ;;  %v3944_v27 = vld [vmem:[%s14873_s3 + $0x20] sm:$0xff] }
  0xed   :  { %v930_v50 = vsel %vm772_vm1, %v928_v5, %v929_v1  ;;  %v11021_v5 = vld [vmem:[#allocation2 + $0x468] sm:$0xff]  ;;  %8921 = vmatprep.subr.mxu1 %v3944_v27 }
  0xee   :  { %8546 = vmatmul.mubr.msk.f32.gmra.mxu0 %vm21_vm0, %v552_v11  ;;  %v11010_v63 = vsel %vm2612_vm2, %v2703_v3, %v15218_v46  ;;  %v939_v3 = vrot.slane %v10987_v28, 7  ;;  %v558_v11 = vld [vmem:[#allocation2 + $0x440] sm:$0xff]  ;;  %8922 = vmatpush3.msra.mxu1 %v3944_v27  ;;  %v11060_v27 = vld [vmem:[#allocation2 + $0x4a8] sm:$0xff] }
  0xef   :  { %8695 = vmatmul.mubr.msk.f32.gmra.mxu1 %vm21_vm0, %v922_v57  ;;  %8548 = vmatprep.mubr.msk.f32.mxu0 %vm21_vm0, %v10987_v28  ;;  %v933_v57 = vrot.slane %v550_v51, 7  ;;  %v560_v51 = vld [vmem:[#allocation2 + $0x450] sm:$0xff]  ;;  %v941_v28 = vrot.slane %v556_v44, 7  ;;  %15223 = vst [vmem:[#allocation36_spill] sm:$0xff] %v11060_v27 }
  0xf0   :  { %8697 = vmatprep.mubr.msk.f32.mxu1 %vm21_vm0, %v925_v13  ;;  %v2713_v13 = vrot.slane %v10647_v2, 1  ;;  %v15219_v2 = vrot.slane %v10636_v34, 1 }
  0xf1   :  { %v935_v46 = vsel %vm772_vm1, %v933_v57, %v934_v15  ;;  %v944_v57 = vrot.slane %v11004_v54, 7 }
  0xf2   :  { %8549 = vmatmul.mubr.msk.f32.gmra.mxu0 %vm21_vm0, %v556_v44  ;;  %v11027_v21 = vsel %vm2612_vm2, %v2708_v16, %v15219_v2  ;;  %v937_v16 = vsel %vm772_vm1, %v934_v15, %v936_v48  ;;  %v943_v2 = vrot.slane %v558_v11, 7  ;;  %v15221_v44 = vrot.slane %v10691_v45, 1 }
  0xf3   :  { %8698 = vmatmul.mubr.msk.f32.gmra.mxu1 %vm21_vm0, %v927_v4  ;;  %8551 = vmatprep.mubr.msk.f32.mxu0 %vm21_vm0, %v11004_v54  ;;  %v938_v4 = vrot.slane %v554_v49, 7  ;;  %v11036_v49 = vld [vmem:[#allocation2 + $0x470] sm:$0xff]  ;;  %v2723_v15 = vrot.slane %v10716_v62, 1  ;;  %v946_v48 = vrot.slane %v560_v51, 7  ;;  %v949_v11 = vrot.slane %v11021_v5, 7 }
  0xf4   :  { %8700 = vmatprep.mubr.msk.f32.mxu1 %vm21_vm0, %v930_v50  ;;  %v2718_v50 = vrot.slane %v10698_v31, 1  ;;  %15220 = vst [vmem:[#allocation34_spill] sm:$0xff] %v11036_v49  ;;  %v11047_v1 = vsel %vm2612_vm2, %v2713_v13, %v15221_v44  ;;  %v942_v13 = vsel %vm772_vm1, %v939_v3, %v941_v28  ;;  %v945_v44 = vsel %vm772_vm1, %v943_v2, %v944_v57 }
  0xf5   :  { %v940_v31 = vsel %vm772_vm1, %v938_v4, %v939_v3  ;;  %v11056_v4 = vld [vmem:[#allocation2 + $0x490] sm:$0xff]  ;;  %v15224_v62 = vrot.slane %v10712_v22, 1  ;;  %v2728_v3 = vrot.slane %v10736_v52, 1  ;;  %v951_v28 = vrot.slane %v11036_v49, 7 }
  0xf6   :  { %8552 = vmatmul.mubr.msk.f32.gmra.mxu0 %vm21_vm0, %v560_v51  ;;  %15222 = vst [vmem:[#allocation35_spill] sm:$0xff] %v11056_v4  ;;  %v566_v51 = vld [vmem:[#allocation2 + $0x480] sm:$0xff]  ;;  %v15227_v52 = vrot.slane %v10731_v6, 1 }
  0xf7   :  { %8701 = vmatmul.mubr.msk.f32.gmra.mxu1 %vm21_vm0, %v932_v29  ;;  %8554 = vmatprep.mubr.msk.f32.mxu0 %vm21_vm0, %v11021_v5  ;;  %v567_v29 = vld [vmem:[#allocation2 + $0x488] sm:$0xff]  ;;  %v11066_v54 = vsel %vm2612_vm2, %v2718_v50, %v15224_v62  ;;  %v947_v50 = vsel %vm772_vm1, %v944_v57, %v946_v48  ;;  %v953_v62 = vrot.slane %v566_v51, 7  ;;  %v11097_v48 = vld [vmem:[#allocation2 + $0x4d0] sm:$0xff] }
  0xf8   :  { %8703 = vmatprep.mubr.msk.f32.mxu1 %vm21_vm0, %v935_v46  ;;  %v562_v46 = vld [vmem:[#allocation2 + $0x460] sm:$0xff]  ;;  %v954_v2 = vrot.slane %v567_v29, 7  ;;  %v11086_v5 = vsel %vm2612_vm2, %v2723_v15, %v15227_v52  ;;  %15228 = vst [vmem:[#allocation39_spill] sm:$0xff] %v11097_v48  ;;  %v952_v15 = vsel %vm772_vm1, %v949_v11, %v951_v28  ;;  %v11101_v51 = vld [vmem:[#allocation2 + $0x4e8] sm:$0xff]  ;;  %v15230_v52 = vrot.slane %v10758_v25, 1 }
  0xf9   :  { %15229 = vst [vmem:[#allocation40_spill] sm:$0xff] %v11101_v51  ;;  %v15233_v28 = vrot.slane %v10797_v39, 1 }
  0xfa   :  { %8555 = vmatmul.mubr.msk.f32.gmra.mxu0 %vm21_vm0, %v11036_v49  ;;  %v570_v49 = vld [vmem:[#allocation2 + $0x4a0] sm:$0xff]  ;;  %v11107_v57 = vsel %vm2612_vm2, %v2728_v3, %v15230_v52  ;;  %v11122_v52 = vld [vmem:[#allocation2 + $0x508] sm:$0xff] }
  0xfb   :  { %8704 = vmatmul.mubr.msk.f32.gmra.mxu1 %vm21_vm0, %v937_v16  ;;  %8557 = vmatprep.mubr.msk.f32.mxu0 %vm21_vm0, %v567_v29  ;;  %v948_v16 = vrot.slane %v562_v46, 7  ;;  %v11080_v46 = vld [vmem:[#allocation2 + $0x4c8] sm:$0xff]  ;;  %v956_v29 = vrot.slane %v11056_v4, 7  ;;  %15232 = vst [vmem:[#allocation42_spill] sm:$0xff] %v11122_v52 }
  0xfc   :  { %8706 = vmatprep.mubr.msk.f32.mxu1 %vm21_vm0, %v940_v31  ;;  %v11077_v31 = vld [vmem:[#allocation2 + $0x4b0] sm:$0xff]  ;;  %15226 = vst [vmem:[#allocation38_spill] sm:$0xff] %v11080_v46 }
  0xfd   :  { %15225 = vst [vmem:[#allocation37_spill] sm:$0xff] %v11077_v31  ;;  %v957_v3 = vsel %vm772_vm1, %v954_v2, %v956_v29  ;;  %v15236_v29 = vrot.slane %v10838_v42, 1 }
  0xfe   :  { %8558 = vmatmul.mubr.msk.f32.gmra.mxu0 %vm21_vm0, %v11056_v4  ;;  %v574_v4 = vld [vmem:[#allocation2 + $0x4c0] sm:$0xff] }
  0xff   :  { %8707 = vmatmul.mubr.msk.f32.gmra.mxu1 %vm21_vm0, %v942_v13  ;;  %8560 = vmatprep.mubr.msk.f32.mxu0 %vm21_vm0, %v11060_v27  ;;  %v950_v13 = vsel %vm772_vm1, %v948_v16, %v949_v11  ;;  %v959_v16 = vrot.slane %v11060_v27, 7  ;;  %v2738_v11 = vrot.slane %v10806_v26, 1  ;;  %v963_v26 = vrot.slane %v574_v4, 7  ;;  %v578_v27 = vld [vmem:[#allocation2 + $0x4e0] sm:$0xff]  ;;  %v11139_v4 = vld [vmem:[#allocation2 + $0x510] sm:$0xff] }
 0x100   :  { %8709 = vmatprep.mubr.msk.f32.mxu1 %vm21_vm0, %v945_v44  ;;  %v2733_v44 = vrot.slane %v10767_v56, 1  ;;  %v958_v56 = vrot.slane %v570_v49, 7  ;;  %v11118_v49 = vld [vmem:[#allocation2 + $0x4f0] sm:$0xff]  ;;  %15234 = vst [vmem:[#allocation43_spill] sm:$0xff] %v11139_v4 }
 0x101   :  { %15231 = vst [vmem:[#allocation41_spill] sm:$0xff] %v11118_v49 }
 0x102   :  { %8561 = vmatmul.mubr.msk.f32.gmra.mxu0 %vm21_vm0, %v11077_v31 }
 0x103   :  { %8710 = vmatmul.mubr.msk.f32.gmra.mxu1 %vm21_vm0, %v947_v50  ;;  %8563 = vmatprep.mubr.msk.f32.mxu0 %vm21_vm0, %v11080_v46  ;;  %v955_v50 = vsel %vm772_vm1, %v953_v62, %v954_v2  ;;  %v964_v62 = vrot.slane %v11080_v46, 7  ;;  %v2743_v2 = vrot.slane %v10842_v41, 1  ;;  %v968_v41 = vrot.slane %v578_v27, 7  ;;  %v582_v46 = vld [vmem:[#allocation2 + $0x500] sm:$0xff]  ;;  %v11160_v27 = vld [vmem:[#allocation2 + $0x530] sm:$0xff] }
 0x104   :  { %8712 = vmatprep.mubr.msk.f32.mxu1 %vm21_vm0, %v950_v13  ;;  %v961_v13 = vrot.slane %v11077_v31, 7  ;;  %v11128_v31 = vsel %vm2612_vm2, %v2733_v44, %v15233_v28  ;;  %v11143_v28 = vld [vmem:[#allocation2 + $0x528] sm:$0xff]  ;;  %15237 = vst [vmem:[#allocation45_spill] sm:$0xff] %v11160_v27 }
 0x105   :  { %15235 = vst [vmem:[#allocation44_spill] sm:$0xff] %v11143_v28 }
 0x106   :  { %8564 = vmatmul.mubr.msk.f32.gmra.mxu0 %vm21_vm0, %v11097_v48  ;;  %v962_v44 = vsel %vm772_vm1, %v959_v16, %v961_v13  ;;  %v973_v13 = vrot.slane %v582_v46, 7  ;;  %v11184_v46 = vld [vmem:[#allocation2 + $0x550] sm:$0xff] }
 0x107   :  { %8713 = vmatmul.mubr.msk.f32.gmra.mxu1 %vm21_vm0, %v952_v15  ;;  %8566 = vmatprep.mubr.msk.f32.mxu0 %vm21_vm0, %v11101_v51  ;;  %v960_v15 = vsel %vm772_vm1, %v958_v56, %v959_v16  ;;  %v969_v56 = vrot.slane %v11101_v51, 7  ;;  %v2748_v16 = vrot.slane %v10863_v10, 1  ;;  %v11167_v10 = vld [vmem:[#allocation2 + $0x548] sm:$0xff]  ;;  %v586_v51 = vld [vmem:[#allocation2 + $0x520] sm:$0xff]  ;;  %15240 = vst [vmem:[#allocation47_spill] sm:$0xff] %v11184_v46 }
 0x108   :  { %8715 = vmatprep.mubr.msk.f32.mxu1 %vm21_vm0, %v955_v50  ;;  %v966_v50 = vrot.slane %v11097_v48, 7  ;;  %v11149_v48 = vsel %vm2612_vm2, %v2738_v11, %v15236_v29  ;;  %v974_v29 = vrot.slane %v11122_v52, 7  ;;  %15238 = vst [vmem:[#allocation46_spill] sm:$0xff] %v11167_v10 }
 0x10a   :  { %8567 = vmatmul.mubr.msk.f32.gmra.mxu0 %vm21_vm0, %v11118_v49  ;;  %v967_v11 = vsel %vm772_vm1, %v964_v62, %v966_v50  ;;  %v15242_v50 = vrot.slane %v10880_v36, 1 }
 0x10b   :  { %8716 = vmatmul.mubr.msk.f32.gmra.mxu1 %vm21_vm0, %v957_v3  ;;  %8569 = vmatprep.mubr.msk.f32.mxu0 %vm21_vm0, %v11122_v52  ;;  %v965_v3 = vsel %vm772_vm1, %v963_v26, %v964_v62  ;;  %v3943_v26 = vld [vmem:[%s14873_s3 + $0x18] sm:$0xff]  ;;  %v2753_v62 = vrot.slane %v10884_v61, 1  ;;  %v978_v61 = vrot.slane %v586_v51, 7  ;;  %v590_v52 = vld [vmem:[#allocation2 + $0x540] sm:$0xff]  ;;  %v11205_v51 = vld [vmem:[#allocation2 + $0x570] sm:$0xff] }
 0x10c   :  { %8718 = vmatprep.mubr.msk.f32.mxu1 %vm21_vm0, %v960_v15  ;;  %v971_v15 = vrot.slane %v11118_v49, 7  ;;  %8923 = vmatprep.subr.mxu1 %v3943_v26  ;;  %v15239_v49 = vrot.slane %v10859_v55, 1  ;;  %15243 = vst [vmem:[#allocation49_spill] sm:$0xff] %v11205_v51 }
 0x10d   :  { %8924 = vmatpush3.msra.mxu1 %v3943_v26  ;;  %v11188_v26 = vld [vmem:[#allocation2 + $0x568] sm:$0xff] }
 0x10e   :  { %8570 = vmatmul.mubr.msk.f32.gmra.mxu0 %vm21_vm0, %v11139_v4  ;;  %15241 = vst [vmem:[#allocation48_spill] sm:$0xff] %v11188_v26 }
 0x10f   :  { %8719 = vmatmul.mubr.msk.f32.gmra.mxu1 %vm21_vm0, %v962_v44  ;;  %8572 = vmatprep.mubr.msk.f32.mxu0 %vm21_vm0, %v11143_v28  ;;  %v970_v44 = vsel %vm772_vm1, %v968_v41, %v969_v56  ;;  %v976_v41 = vrot.slane %v11139_v4, 7  ;;  %v11194_v4 = vsel %vm2612_vm2, %v2748_v16, %v15242_v50  ;;  %v11209_v50 = vld [vmem:[#allocation2 + $0x588] sm:$0xff] }
 0x110   :  { %8721 = vmatprep.mubr.msk.f32.mxu1 %vm21_vm0, %v965_v3  ;;  %v11173_v3 = vsel %vm2612_vm2, %v2743_v2, %v15239_v49  ;;  %v972_v49 = vsel %vm772_vm1, %v969_v56, %v971_v15  ;;  %v979_v2 = vrot.slane %v11143_v28, 7  ;;  %v2758_v56 = vrot.slane %v10905_v8, 1  ;;  %15244 = vst [vmem:[#allocation50_spill] sm:$0xff] %v11209_v50  ;;  %v594_v28 = vld [vmem:[#allocation2 + $0x560] sm:$0xff] }
 0x111   :  { %v977_v16 = vsel %vm772_vm1, %v974_v29, %v976_v41  ;;  %v983_v8 = vrot.slane %v590_v52, 7  ;;  %v15245_v15 = vrot.slane %v10901_v43, 1  ;;  %v11226_v52 = vld [vmem:[#allocation2 + $0x590] sm:$0xff]  ;;  %v15248_v41 = vrot.slane %v10925_v60, 1  ;;  %v602_v60 = vld [vmem:[#allocation2 + $0x5a0] sm:$0xff] }
 0x112   :  { %8573 = vmatmul.mubr.msk.f32.gmra.mxu0 %vm21_vm0, %v11160_v27  ;;  %15246 = vst [vmem:[#allocation51_spill] sm:$0xff] %v11226_v52 }
 0x113   :  { %8722 = vmatmul.mubr.msk.f32.gmra.mxu1 %vm21_vm0, %v967_v11  ;;  %8575 = vmatprep.mubr.msk.f32.mxu0 %vm21_vm0, %v11167_v10  ;;  %v975_v11 = vsel %vm772_vm1, %v973_v13, %v974_v29  ;;  %v984_v13 = vrot.slane %v11167_v10, 7  ;;  %v2763_v29 = vrot.slane %v10929_v59, 1  ;;  %v988_v59 = vrot.slane %v594_v28, 7  ;;  %v598_v10 = vld [vmem:[#allocation2 + $0x580] sm:$0xff]  ;;  %v11247_v28 = vld [vmem:[#allocation2 + $0x5b0] sm:$0xff] }
 0x114   :  { %8724 = vmatprep.mubr.msk.f32.mxu1 %vm21_vm0, %v970_v44  ;;  %v981_v44 = vrot.slane %v11160_v27, 7  ;;  %v11215_v27 = vsel %vm2612_vm2, %v2753_v62, %v15245_v15  ;;  %v11230_v15 = vld [vmem:[#allocation2 + $0x5a8] sm:$0xff] }
 0x115   :  { %15247 = vst [vmem:[#allocation52_spill] sm:$0xff] %v11230_v15 }
 0x116   :  { %8576 = vmatmul.mubr.msk.f32.gmra.mxu0 %vm21_vm0, %v11184_v46  ;;  %v982_v62 = vsel %vm772_vm1, %v979_v2, %v981_v44  ;;  %v15249_v44 = vrot.slane %v10946_v7, 1  ;;  %v606_v7 = vld [vmem:[#allocation2 + $0x5c0] sm:$0xff] }
 0x117   :  { %8725 = vmatmul.mubr.msk.f32.gmra.mxu1 %vm21_vm0, %v972_v49  ;;  %8578 = vmatprep.mubr.msk.f32.mxu0 %vm21_vm0, %v11188_v26  ;;  %v980_v49 = vsel %vm772_vm1, %v978_v61, %v979_v2  ;;  %v989_v61 = vrot.slane %v11188_v26, 7  ;;  %v2768_v2 = vrot.slane %v10950_v32, 1  ;;  %v993_v32 = vrot.slane %v598_v10, 7  ;;  %v425_v26 = vld [vmem:[#allocation2 + $0x18] sm:$0xff]  ;;  %v11266_v10 = vld [vmem:[#allocation2 + $0x5d0] sm:$0xff] }
 0x118   :  { %8727 = vmatprep.mubr.msk.f32.mxu1 %vm21_vm0, %v975_v11  ;;  %v986_v11 = vrot.slane %v11184_v46, 7  ;;  %v11236_v46 = vsel %vm2612_vm2, %v2758_v56, %v15248_v41  ;;  %v11251_v41 = vld [vmem:[#allocation2 + $0x5c8] sm:$0xff]  ;;  %15250 = vst [vmem:[#allocation53_spill] sm:$0xff] %v11266_v10 }
 0x11a   :  { %8579 = vmatmul.mubr.msk.f32.gmra.mxu0 %vm21_vm0, %v11205_v51  ;;  %v987_v56 = vsel %vm772_vm1, %v984_v13, %v986_v11 }
 0x11b   :  { %8728 = vmatmul.mubr.msk.f32.gmra.mxu1 %vm21_vm0, %v977_v16  ;;  %8581 = vmatprep.mubr.msk.f32.mxu0 %vm21_vm0, %v11209_v50  ;;  %v985_v16 = vsel %vm772_vm1, %v983_v8, %v984_v13  ;;  %v994_v8 = vrot.slane %v11209_v50, 7  ;;  %v996_v13 = vrot.slane %v11226_v52, 7  ;;  %v429_v50 = vld [vmem:[#allocation2 + $0x38] sm:$0xff] }
 0x11c   :  { %8730 = vmatprep.mubr.msk.f32.mxu1 %vm21_vm0, %v980_v49  ;;  %v991_v49 = vrot.slane %v11205_v51, 7  ;;  %v11257_v51 = vsel %vm2612_vm2, %v2763_v29, %v15249_v44  ;;  %v999_v29 = vrot.slane %v11230_v15, 7  ;;  %v998_v44 = vrot.slane %v602_v60, 7 }
 0x11d   :  { %v997_v60 = vsel %vm772_vm1, %v994_v8, %v996_v13 }
 0x11e   :  { %8582 = vmatmul.mubr.msk.f32.gmra.mxu0 %vm21_vm0, %v11226_v52  ;;  %v992_v11 = vsel %vm772_vm1, %v989_v61, %v991_v49 }
 0x11f   :  { %8731 = vmatmul.mubr.msk.f32.gmra.mxu1 %vm21_vm0, %v982_v62  ;;  %8584 = vmatprep.mubr.msk.f32.mxu0 %vm21_vm0, %v11230_v15  ;;  %v990_v62 = vsel %vm772_vm1, %v988_v59, %v989_v61  ;;  %v995_v59 = vsel %vm772_vm1, %v993_v32, %v994_v8  ;;  %v1001_v61 = vrot.slane %v11247_v28, 7  ;;  %v1004_v32 = vrot.slane %v11251_v41, 7 }
 0x120   :  { %8733 = vmatprep.mubr.msk.f32.mxu1 %vm21_vm0, %v985_v16  ;;  %v2616_v16 = vrot.slane %v425_v26, 1  ;;  %v15252_v26 = vld [vmem:[#allocation6_spill] sm:$0xff]  ;;  %v1003_v15 = vrot.slane %v606_v7, 7  ;;  %v15255_v7 = vld [vmem:[#allocation7_spill] sm:$0xff] }
 0x121   :  { %v15253_v49 = vrot.slane %v15252_v26, 1  ;;  %v1002_v8 = vsel %vm772_vm1, %v999_v29, %v1001_v61  ;;  %v15256_v13 = vrot.slane %v15255_v7, 1 }
 0x122   :  { %8585 = vmatmul.mubr.msk.f32.gmra.mxu0 %vm21_vm0, %v11247_v28  ;;  %v1005_v26 = vsel %vm772_vm1, %v1003_v15, %v1004_v32 }
 0x123   :  { %8734 = vmatmul.mubr.msk.f32.gmra.mxu1 %vm21_vm0, %v987_v56  ;;  %8587 = vmatprep.mubr.msk.f32.mxu0 %vm21_vm0, %v11251_v41  ;;  %v15251_v56 = vrot.slane %v10967_v53, 1  ;;  %v610_v53 = vld [vmem:[#allocation2 + $0x5e0] sm:$0xff] }
 0x124   :  { %8736 = vmatprep.mubr.msk.f32.mxu1 %vm21_vm0, %v990_v62  ;;  %v2621_v62 = vrot.slane %v429_v50, 1  ;;  %v15254_v50 = vld [vmem:[#allocation19_spill] sm:$0xff] }
 0x125   :  { %v11274_v52 = vsel %vm2612_vm2, %v2768_v2, %v15251_v56  ;;  %v2617_v2 = vsel %vm2612_vm2, %v15253_v49, %v2616_v16  ;;  %v1000_v56 = vsel %vm772_vm1, %v998_v44, %v999_v29  ;;  %v1008_v49 = vrot.slane %v610_v53, 7  ;;  %v15258_v29 = vld [vmem:[#allocation20_spill] sm:$0xff] }
 0x126   :  { %8588 = vmatmul.mubr.msk.f32.gmra.mxu0 %vm21_vm0, %v11266_v10  ;;  %v2622_v16 = vsel %vm2612_vm2, %v15256_v13, %v2621_v62  ;;  %v15259_v53 = vld [vmem:[#allocation8_spill] sm:$0xff] }
 0x127   :  { %8737 = vmatmul.mubr.msk.f32.gmra.mxu1 %vm21_vm0, %v992_v11  ;;  %8765 = vmatprep.mubr.msk.f32.mxu0 %vm21_vm0, %v10658_v23  ;;  %v433_v11 = vld [vmem:[#allocation2 + $0x58] sm:$0xff]  ;;  %v1006_v23 = vrot.slane %v11266_v10, 7  ;;  %v15260_v61 = vrot.slane %v15259_v53, 1  ;;  %v15268_v53 = vrot.slane %v10041_v30, 7  ;;  %v15271_v30 = vrot.slane %v10155_v9, 1 }
 0x128   :  { %8739 = vmatprep.mubr.msk.f32.mxu1 %vm21_vm0, %v995_v59  ;;  %v3942_v59 = vld [vmem:[%s14873_s3 + $0x10] sm:$0xff]  ;;  %v2626_v44 = vrot.slane %v433_v11, 1  ;;  %v15274_v9 = vrot.slane %v10182_v20, 1  ;;  %v15275_v20 = vrot.slane %v10203_v40, 1  ;;  %v15278_v40 = vrot.slane %v10240_v58, 1 }
 0x129   :  { %8925 = vmatprep.subr.mxu1 %v3942_v59  ;;  %v1007_v15 = vsel %vm772_vm1, %v1004_v32, %v1006_v23  ;;  %v15264_v32 = vld [vmem:[#allocation21_spill] sm:$0xff]  ;;  %v15281_v58 = vrot.slane %v10283_v12, 1 }
 0x12a   :  { %8766 = vmatmul.mubr.msk.f32.vlgmr.msra.gmra.mxu0 %vm21_vm0, %v2617_v2  ;;  %v614_v2 = vld [vmem:[#allocation2 + $0x600] sm:$0xff]  ;;  %8926 = vmatpush3.msra.mxu1 %v3942_v59  ;;  %v2627_v62 = vsel %vm2612_vm2, %v15260_v61, %v2626_v44 }
 0x12b   :  { %8740 = vmatmul.mubr.msk.f32.gmra.mxu1 %vm21_vm0, %v997_v60  ;;  %8768 = vmatprep.mubr.msk.f32.mxu0 %vm21_vm0, %v15254_v50  ;;  %v437_v60 = vld [vmem:[#allocation2 + $0x78] sm:$0xff]  ;;  %v1013_v13 = vrot.slane %v614_v2, 7 }
 0x12c   :  { %8742 = vmatprep.mubr.msk.f32.mxu1 %vm21_vm0, %v1000_v56  ;;  %v2631_v11 = vrot.slane %v437_v60, 1  ;;  %v15265_v23 = vld [vmem:[#allocation9_spill] sm:$0xff] }
 0x12e   :  { %v11303_v10 = vpop.f32.mrf.mxu0  ;;  %8769 = vmatmul.mubr.msk.f32.gmra.mxu0 %vm21_vm0, %v2622_v16  ;;  %v441_v16 = vld [vmem:[#allocation2 + $0x98] sm:$0xff] }
 0x12f   :  { %v11305_v56 = vpop.f32.mrf.mxu1  ;;  %8743 = vmatmul.mubr.msk.f32.gmra.mxu1 %vm21_vm0, %v1002_v8  ;;  %8771 = vmatprep.mubr.msk.f32.mxu0 %vm21_vm0, %v15258_v29  ;;  %v15262_v8 = vrot.slane %v10017_v24, 7  ;;  %v15266_v24 = vrot.slane %v15265_v23, 1  ;;  %v15273_v23 = vrot.slane %v10053_v35, 7 }
 0x130   :  { %15257 = vst [vmem:[#allocation6_spill] sm:$0xff] %v11305_v56  ;;  %8745 = vmatprep.mubr.msk.f32.mxu1 %vm21_vm0, %v1005_v26  ;;  %v11316_v59 = vpop.f32.mrf.mxu0  ;;  %v618_v26 = vld [vmem:[#allocation2 + $0x620] sm:$0xff] }
 0x131   :  { %v11318_v50 = vpop.f32.mrf.mxu1  ;;  %v1010_v7 = vsel %vm772_vm1, %v1008_v49, %v15262_v8  ;;  %v2632_v44 = vsel %vm2612_vm2, %v15266_v24, %v2631_v11  ;;  %v2636_v49 = vrot.slane %v441_v16, 1  ;;  %v1018_v61 = vrot.slane %v618_v26, 7 }
 0x132   :  { %15261 = vst [vmem:[#allocation19_spill] sm:$0xff] %v11318_v50  ;;  %v11323_v56 = vpop.f32.mrf.mxu0  ;;  %8772 = vmatmul.mubr.msk.f32.gmra.mxu0 %vm21_vm0, %v2627_v62  ;;  %v445_v62 = vld [vmem:[#allocation2 + $0xb8] sm:$0xff] }
 0x133   :  { %v11325_v29 = vpop.f32.mrf.mxu1  ;;  %8746 = vmatmul.mubr.msk.f32.gmra.mxu1 %vm21_vm0, %v1007_v15  ;;  %8774 = vmatprep.mubr.msk.f32.mxu0 %vm21_vm0, %v15264_v32  ;;  %v1015_v15 = vsel %vm772_vm1, %v1013_v13, %v15268_v53  ;;  %v15270_v32 = vld [vmem:[#allocation22_spill] sm:$0xff]  ;;  %v2637_v11 = vsel %vm2612_vm2, %v15271_v30, %v2636_v49  ;;  %v2641_v13 = vrot.slane %v445_v62, 1  ;;  %v1020_v24 = vsel %vm772_vm1, %v1018_v61, %v15273_v23  ;;  %v449_v53 = vld [vmem:[#allocation2 + $0xd8] sm:$0xff] }
 0x134   :  { %15263 = vst [vmem:[#allocation7_spill] sm:$0xff] %v11325_v29  ;;  %8748 = vmatprep.mubr.msk.f32.mxu1 %vm21_vm0, %v1010_v7  ;;  %v11335_v60 = vpop.f32.mrf.mxu0  ;;  %v453_v62 = vld [vmem:[#allocation2 + $0xf8] sm:$0xff] }
 0x135   :  { %v11337_v2 = vpop.f32.mrf.mxu1  ;;  %v2642_v35 = vsel %vm2612_vm2, %v15274_v9, %v2641_v13  ;;  %v2651_v30 = vrot.slane %v453_v62, 1  ;;  %v457_v23 = vld [vmem:[#allocation2 + $0x118] sm:$0xff] }
 0x136   :  { %15267 = vst [vmem:[#allocation20_spill] sm:$0xff] %v11337_v2  ;;  %v11342_v8 = vpop.f32.mrf.mxu0  ;;  %8775 = vmatmul.mubr.msk.f32.gmra.mxu0 %vm21_vm0, %v2632_v44  ;;  %v2656_v9 = vrot.slane %v457_v23, 1  ;;  %v461_v62 = vld [vmem:[#allocation2 + $0x138] sm:$0xff] }
 0x137   :  { %v11344_v7 = vpop.f32.mrf.mxu1  ;;  %8749 = vmatmul.mubr.msk.f32.gmra.mxu1 %vm21_vm0, %v15270_v32  ;;  %8777 = vmatprep.mubr.msk.f32.mxu0 %vm21_vm0, %v10773_v33  ;;  %v2646_v33 = vrot.slane %v449_v53, 1  ;;  %v469_v29 = vld [vmem:[#allocation2 + $0x178] sm:$0xff] }
 0x138   :  { %15269 = vst [vmem:[#allocation8_spill] sm:$0xff] %v11344_v7  ;;  %8751 = vmatprep.mubr.msk.f32.mxu1 %vm21_vm0, %v1015_v15  ;;  %v11355_v16 = vpop.f32.mrf.mxu0 }
 0x139   :  { %v11357_v26 = vpop.f32.mrf.mxu1 }
 0x13a   :  { %15272 = vst [vmem:[#allocation21_spill] sm:$0xff] %v11357_v26  ;;  %v11362_v44 = vpop.f32.mrf.mxu0  ;;  %8778 = vmatmul.mubr.msk.f32.gmra.mxu0 %vm21_vm0, %v2637_v11 }
 0x13b   :  { %v11364_v15 = vpop.f32.mrf.mxu1  ;;  %8752 = vmatmul.mubr.msk.f32.gmra.mxu1 %vm21_vm0, %v10781_v19  ;;  %8780 = vmatprep.mubr.msk.f32.mxu0 %vm21_vm0, %v10791_v17  ;;  %v2647_v17 = vsel %vm2612_vm2, %v15275_v20, %v2646_v33 }
 0x13c   :  { %8754 = vmatprep.mubr.msk.f32.mxu1 %vm21_vm0, %v1020_v24  ;;  %v11375_v49 = vpop.f32.mrf.mxu0  ;;  %v3941_v24 = vld [vmem:[%s14873_s3 + $0x8] sm:$0xff] }
 0x13d   :  { %v11377_v61 = vpop.f32.mrf.mxu1  ;;  %8927 = vmatprep.subr.mxu1 %v3941_v24 }
 0x13e   :  { %v11379_v32 = vpop.f32.mrf.mxu0  ;;  %8781 = vmatmul.mubr.msk.f32.gmra.mxu0 %vm21_vm0, %v2642_v35  ;;  %8928 = vmatpush3.msra.mxu1 %v3941_v24  ;;  %v465_v24 = vld [vmem:[#allocation2 + $0x158] sm:$0xff] }
 0x13f   :  { %v11381_v19 = vpop.f32.mrf.mxu1  ;;  %8755 = vmatmul.mubr.msk.f32.gmra.mxu1 %vm21_vm0, %v10803_v47  ;;  %8783 = vmatprep.mubr.msk.f32.mxu0 %vm21_vm0, %v10812_v0  ;;  %v2652_v0 = vsel %vm2612_vm2, %v15278_v40, %v2651_v30 }
 0x140   :  { %v11391_v11 = vpop.f32.mrf.mxu0 }
 0x141   :  { %15276 = vst [vmem:[#allocation9_spill] sm:$0xff] %v11391_v11  ;;  %v11393_v13 = vpop.f32.mrf.mxu1 }
 0x142   :  { %v11398_v47 = vpop.f32.mrf.mxu0  ;;  %8784 = vmatmul.mubr.msk.f32.gmra.mxu0 %vm21_vm0, %v2647_v17  ;;  %v2661_v17 = vrot.slane %v461_v62, 1 }
 0x143   :  { %15277 = vst [vmem:[#allocation22_spill] sm:$0xff] %v11398_v47  ;;  %v11400_v53 = vpop.f32.mrf.mxu1  ;;  %8786 = vmatprep.mubr.msk.f32.mxu0 %vm21_vm0, %v10817_v37  ;;  %v2657_v37 = vsel %vm2612_vm2, %v15281_v58, %v2656_v9  ;;  %v2666_v9 = vrot.slane %v465_v24, 1 }
 0x144   :  { %v11408_v35 = vpop.f32.mrf.mxu0 }
 0x145   :  { %15279 = vst [vmem:[#allocation54_spill] sm:$0xff] %v11408_v35  ;;  %v11410_v33 = vpop.f32.mrf.mxu1 }
 0x146   :  { %v11412_v20 = vpop.f32.mrf.mxu0  ;;  %8787 = vmatmul.mubr.msk.f32.gmra.mxu0 %vm21_vm0, %v2652_v0  ;;  %v15285_v0 = vld [vmem:[#allocation23_spill] sm:$0xff] }
 0x147   :  { %15280 = vst [vmem:[#allocation55_spill] sm:$0xff] %v11412_v20  ;;  %v11414_v26 = vpop.f32.mrf.mxu1  ;;  %8789 = vmatprep.mubr.msk.f32.mxu0 %vm21_vm0, %v10822_v14  ;;  %v15286_v14 = vld [vmem:[#allocation10_spill] sm:$0xff] }
 0x148   :  { %v11422_v30 = vpop.f32.mrf.mxu0  ;;  %v15287_v2 = vrot.slane %v15286_v14, 1 }
 0x149   :  { %15282 = vst [vmem:[#allocation56_spill] sm:$0xff] %v11422_v30  ;;  %v11424_v23 = vpop.f32.mrf.mxu1 }
 0x14a   :  { %v11426_v40 = vpop.f32.mrf.mxu0  ;;  %8790 = vmatmul.mubr.msk.f32.gmra.mxu0 %vm21_vm0, %v2657_v37  ;;  %v2662_v12 = vsel %vm2612_vm2, %v15287_v2, %v2661_v17  ;;  %v15292_v37 = vld [vmem:[#allocation24_spill] sm:$0xff]  ;;  %v2671_v2 = vrot.slane %v469_v29, 1 }
 0x14b   :  { %15283 = vst [vmem:[#allocation57_spill] sm:$0xff] %v11426_v40  ;;  %v11428_v7 = vpop.f32.mrf.mxu1  ;;  %8792 = vmatprep.mubr.msk.f32.mxu0 %vm21_vm0, %v15285_v0  ;;  %v15293_v0 = vld [vmem:[#allocation11_spill] sm:$0xff] }
 0x14c   :  { %15284 = vst [vmem:[#allocation58_spill] sm:$0xff] %v11428_v7  ;;  %v11436_v62 = vpop.f32.mrf.mxu0  ;;  %v15294_v30 = vrot.slane %v15293_v0, 1  ;;  %v501_v7 = vld [vmem:[#allocation2 + $0x278] sm:$0xff] }
 0x14d   :  { %15288 = vst [vmem:[#allocation23_spill] sm:$0xff] %v11436_v62  ;;  %v11438_v58 = vpop.f32.mrf.mxu1  ;;  %v473_v62 = vld [vmem:[#allocation2 + $0x198] sm:$0xff] }
 0x14e   :  { %15289 = vst [vmem:[#allocation10_spill] sm:$0xff] %v11438_v58  ;;  %v11440_v50 = vpop.f32.mrf.mxu0  ;;  %8793 = vmatmul.mubr.msk.f32.gmra.mxu0 %vm21_vm0, %v2662_v12  ;;  %v2667_v14 = vsel %vm2612_vm2, %v15294_v30, %v2666_v9  ;;  %v15299_v12 = vld [vmem:[#allocation25_spill] sm:$0xff]  ;;  %v2676_v30 = vrot.slane %v473_v62, 1  ;;  %v11538_v58 = vld [vmem:[#allocation2 + $0x630] sm:$0xff] }
 0x14f   :  { %15290 = vst [vmem:[#allocation59_spill] sm:$0xff] %v11440_v50  ;;  %v11442_v40 = vpop.f32.mrf.mxu1  ;;  %8795 = vmatprep.mubr.msk.f32.mxu0 %vm21_vm0, %v15292_v37  ;;  %v15300_v37 = vld [vmem:[#allocation12_spill] sm:$0xff] }
 0x150   :  { %15291 = vst [vmem:[#allocation60_spill] sm:$0xff] %v11442_v40  ;;  %v11450_v17 = vpop.f32.mrf.mxu0  ;;  %v15301_v35 = vrot.slane %v15300_v37, 1  ;;  %v481_v62 = vld [vmem:[#allocation2 + $0x1d8] sm:$0xff] }
 0x151   :  { %15295 = vst [vmem:[#allocation24_spill] sm:$0xff] %v11450_v17  ;;  %v11452_v24 = vpop.f32.mrf.mxu1  ;;  %v477_v17 = vld [vmem:[#allocation2 + $0x1b8] sm:$0xff] }
 0x152   :  { %15296 = vst [vmem:[#allocation11_spill] sm:$0xff] %v11452_v24  ;;  %v11454_v20 = vpop.f32.mrf.mxu0  ;;  %8796 = vmatmul.mubr.msk.f32.gmra.mxu0 %vm21_vm0, %v2667_v14  ;;  %v2672_v0 = vsel %vm2612_vm2, %v15301_v35, %v2671_v2  ;;  %v15306_v14 = vld [vmem:[#allocation13_spill] sm:$0xff]  ;;  %v2681_v37 = vrot.slane %v477_v17, 1 }
 0x153   :  { %15297 = vst [vmem:[#allocation61_spill] sm:$0xff] %v11454_v20  ;;  %v11456_v50 = vpop.f32.mrf.mxu1  ;;  %8798 = vmatprep.mubr.msk.f32.mxu0 %vm21_vm0, %v15299_v12  ;;  %v15305_v20 = vld [vmem:[#allocation26_spill] sm:$0xff] }
 0x154   :  { %15298 = vst [vmem:[#allocation62_spill] sm:$0xff] %v11456_v50  ;;  %v11464_v29 = vpop.f32.mrf.mxu0  ;;  %v15307_v50 = vrot.slane %v15306_v14, 1  ;;  %v2686_v14 = vrot.slane %v481_v62, 1 }
 0x155   :  { %15302 = vst [vmem:[#allocation25_spill] sm:$0xff] %v11464_v29  ;;  %v11466_v9 = vpop.f32.mrf.mxu1 }
 0x156   :  { %15303 = vst [vmem:[#allocation12_spill] sm:$0xff] %v11466_v9  ;;  %v11468_v24 = vpop.f32.mrf.mxu0  ;;  %8799 = vmatmul.mubr.msk.f32.gmra.mxu0 %vm21_vm0, %v2672_v0  ;;  %v2677_v12 = vsel %vm2612_vm2, %v15307_v50, %v2676_v30  ;;  %v15312_v0 = vld [vmem:[#allocation14_spill] sm:$0xff] }
 0x157   :  { %15304 = vst [vmem:[#allocation63_spill] sm:$0xff] %v11468_v24  ;;  %8801 = vmatprep.mubr.msk.f32.mxu0 %vm21_vm0, %v15305_v20  ;;  %v11476_v40 = vpop.f32.mrf.mxu1  ;;  %v15311_v24 = vld [vmem:[#allocation27_spill] sm:$0xff]  ;;  %v15313_v29 = vrot.slane %v15312_v0, 1  ;;  %v3940_v50 = vld [vmem:[%s14873_s3] sm:$0xff] }
 0x158   :  { %15308 = vst [vmem:[#allocation26_spill] sm:$0xff] %v11476_v40  ;;  %v11478_v35 = vpop.f32.mrf.mxu0  ;;  %8929 = vmatprep.subr.mxu1 %v3940_v50  ;;  %v9448_v0 = vld [vmem:[#allocation2 + $0x5e8] sm:$0xff] }
 0x159   :  { %15309 = vst [vmem:[#allocation13_spill] sm:$0xff] %v11478_v35  ;;  %v2682_v20 = vsel %vm2612_vm2, %v15313_v29, %v2681_v37  ;;  %v11491_v17 = vpop.f32.mrf.mxu1  ;;  %v485_v35 = vld [vmem:[#allocation2 + $0x1f8] sm:$0xff]  ;;  %8930 = vmatpush3.msra.mxu1 %v3940_v50 }
 0x15a   :  { %v11480_v2 = vpop.f32.mrf.mxu0  ;;  %8802 = vmatmul.mubr.msk.f32.gmra.mxu0 %vm21_vm0, %v2677_v12  ;;  %15314 = vst [vmem:[#allocation27_spill] sm:$0xff] %v11491_v17  ;;  %v2691_v62 = vrot.slane %v485_v35, 1  ;;  %v11503_v17 = vld [vmem:[#allocation2 + $0x5f0] sm:$0xff] }
 0x15b   :  { %15310 = vst [vmem:[#allocation64_spill] sm:$0xff] %v11480_v2  ;;  %8804 = vmatprep.mubr.msk.f32.mxu0 %vm21_vm0, %v15311_v24  ;;  %v15317_v24 = vld [vmem:[#allocation15_spill] sm:$0xff]  ;;  %v2848_v2 = vrot.slane %v9448_v0, 1  ;;  %v11506_v40 = vpop.f32.mrf.mxu1 }
 0x15c   :  { %v11493_v30 = vpop.f32.mrf.mxu0  ;;  %v15318_v29 = vrot.slane %v15317_v24, 1  ;;  %15319 = vst [vmem:[#allocation15_spill] sm:$0xff] %v11506_v40  ;;  %v9450_v0 = vld [vmem:[#allocation2 + $0x608] sm:$0xff] }
 0x15d   :  { %15315 = vst [vmem:[#allocation14_spill] sm:$0xff] %v11493_v30  ;;  %v2853_v9 = vrot.slane %v9450_v0, 1  ;;  %v11518_v30 = vld [vmem:[#allocation2 + $0x610] sm:$0xff] }
 0x15e   :  { %v11495_v12 = vpop.f32.mrf.mxu0  ;;  %8805 = vmatmul.mubr.msk.f32.gmra.mxu0 %vm21_vm0, %v2682_v20  ;;  %v2687_v37 = vsel %vm2612_vm2, %v15318_v29, %v2686_v14  ;;  %v15323_v14 = vld [vmem:[#allocation16_spill] sm:$0xff] }
 0x15f   :  { %15316 = vst [vmem:[#allocation65_spill] sm:$0xff] %v11495_v12  ;;  %8807 = vmatprep.mubr.msk.f32.mxu0 %vm21_vm0, %v10935_v38  ;;  %v489_v12 = vld [vmem:[#allocation2 + $0x218] sm:$0xff]  ;;  %v15322_v38 = vld [vmem:[#allocation30_spill] sm:$0xff]  ;;  %v15324_v35 = vrot.slane %v15323_v14, 1 }
 0x160   :  { %v11508_v50 = vpop.f32.mrf.mxu0  ;;  %v2696_v29 = vrot.slane %v489_v12, 1  ;;  %v15329_v12 = vld [vmem:[#allocation32_spill] sm:$0xff] }
 0x161   :  { %15320 = vst [vmem:[#allocation66_spill] sm:$0xff] %v11508_v50  ;;  %v2692_v24 = vsel %vm2612_vm2, %v15324_v35, %v2691_v62  ;;  %v11521_v50 = vpop.f32.mrf.mxu1  ;;  %v15330_v62 = vld [vmem:[#allocation17_spill] sm:$0xff] }
 0x162   :  { %v11510_v20 = vpop.f32.mrf.mxu0  ;;  %8808 = vmatmul.mubr.msk.f32.gmra.mxu0 %vm21_vm0, %v2687_v37  ;;  %15325 = vst [vmem:[#allocation30_spill] sm:$0xff] %v11521_v50  ;;  %v15327_v37 = vrot.slane %v11503_v17, 1  ;;  %v15331_v35 = vrot.slane %v15330_v62, 1  ;;  %v9452_v50 = vld [vmem:[#allocation2 + $0x628] sm:$0xff] }
 0x163   :  { %15321 = vst [vmem:[#allocation67_spill] sm:$0xff] %v11510_v20  ;;  %8810 = vmatprep.mubr.msk.f32.mxu0 %vm21_vm0, %v15322_v38  ;;  %v493_v20 = vld [vmem:[#allocation2 + $0x238] sm:$0xff] }
 0x164   :  { %v11523_v47 = vpop.f32.mrf.mxu0  ;;  %v11528_v38 = vsel %vm2612_vm2, %v2848_v2, %v15327_v37  ;;  %v2697_v0 = vsel %vm2612_vm2, %v15331_v35, %v2696_v29  ;;  %v2701_v40 = vrot.slane %v493_v20, 1  ;;  %v11541_v2 = vpop.f32.mrf.mxu1  ;;  %v15336_v20 = vld [vmem:[#allocation33_spill] sm:$0xff] }
 0x165   :  { %15326 = vst [vmem:[#allocation16_spill] sm:$0xff] %v11523_v47  ;;  %v2858_v47 = vrot.slane %v9452_v50, 1  ;;  %15332 = vst [vmem:[#allocation32_spill] sm:$0xff] %v11541_v2  ;;  %v15337_v50 = vld [vmem:[#allocation18_spill] sm:$0xff] }
 0x166   :  { %v11530_v14 = vpop.f32.mrf.mxu0  ;;  %8811 = vmatmul.mubr.msk.f32.gmra.mxu0 %vm21_vm0, %v2692_v24  ;;  %v15334_v24 = vrot.slane %v11518_v30, 1  ;;  %v15338_v29 = vrot.slane %v15337_v50, 1  ;;  %v11558_v2 = vpop.f32.mrf.mxu1 }
 0x167   :  { %15328 = vst [vmem:[#allocation68_spill] sm:$0xff] %v11530_v14  ;;  %8813 = vmatprep.mubr.msk.f32.mxu0 %vm21_vm0, %v15329_v12  ;;  %v497_v14 = vld [vmem:[#allocation2 + $0x258] sm:$0xff] }
 0x168   :  { %v11543_v37 = vpop.f32.mrf.mxu0  ;;  %v11548_v12 = vsel %vm2612_vm2, %v2853_v9, %v15334_v24  ;;  %v2702_v35 = vsel %vm2612_vm2, %v15338_v29, %v2701_v40  ;;  %v2706_v11 = vrot.slane %v497_v14, 1  ;;  %v15340_v9 = vrot.slane %v11538_v58, 1  ;;  %v505_v29 = vld [vmem:[#allocation2 + $0x298] sm:$0xff] }
 0x169   :  { %15333 = vst [vmem:[#allocation17_spill] sm:$0xff] %v11543_v37  ;;  %v15341_v40 = vrot.slane %v10596_v18, 1  ;;  %v2716_v18 = vrot.slane %v505_v29, 1  ;;  %v513_v29 = vld [vmem:[#allocation2 + $0x2d8] sm:$0xff] }
 0x16a   :  { %v11550_v62 = vpop.f32.mrf.mxu0  ;;  %8814 = vmatmul.mubr.msk.f32.gmra.mxu0 %vm21_vm0, %v2697_v0  ;;  %v11565_v24 = vsel %vm2612_vm2, %v2858_v47, %v15340_v9  ;;  %v2711_v0 = vrot.slane %v501_v7, 1  ;;  %v15342_v47 = vrot.slane %v10636_v34, 1 }
 0x16b   :  { %15335 = vst [vmem:[#allocation69_spill] sm:$0xff] %v11550_v62  ;;  %8816 = vmatprep.mubr.msk.f32.mxu0 %vm21_vm0, %v15336_v20  ;;  %v2707_v14 = vsel %vm2612_vm2, %v15341_v40, %v2706_v11  ;;  %v11575_v20 = vpop.f32.mrf.mxu1  ;;  %v509_v11 = vld [vmem:[#allocation2 + $0x2b8] sm:$0xff]  ;;  %v15344_v40 = vrot.slane %v10691_v45, 1  ;;  %v2726_v45 = vrot.slane %v513_v29, 1 }
 0x16c   :  { %v11560_v37 = vpop.f32.mrf.mxu0  ;;  %v2721_v34 = vrot.slane %v509_v11, 1  ;;  %v517_v11 = vld [vmem:[#allocation2 + $0x2f8] sm:$0xff] }
 0x16d   :  { %15339 = vst [vmem:[#allocation33_spill] sm:$0xff] %v11560_v37  ;;  %v521_v29 = vld [vmem:[#allocation2 + $0x318] sm:$0xff] }
 0x16e   :  { %v11567_v62 = vpop.f32.mrf.mxu0  ;;  %8817 = vmatmul.mubr.msk.f32.gmra.mxu0 %vm21_vm0, %v2702_v35  ;;  %v11587_v35 = vpop.f32.mrf.mxu1 }
 0x16f   :  { %8819 = vmatprep.mubr.msk.f32.mxu0 %vm21_vm0, %v11010_v63  ;;  %v2712_v63 = vsel %vm2612_vm2, %v15342_v47, %v2711_v0 }
 0x170   :  { %v11577_v50 = vpop.f32.mrf.mxu0 }
 0x172   :  { %v11579_v37 = vpop.f32.mrf.mxu0  ;;  %8820 = vmatmul.mubr.msk.f32.gmra.mxu0 %vm21_vm0, %v2707_v14  ;;  %v11599_v14 = vpop.f32.mrf.mxu1 }
 0x173   :  { %8822 = vmatprep.mubr.msk.f32.mxu0 %vm21_vm0, %v11027_v21  ;;  %v2717_v21 = vsel %vm2612_vm2, %v15344_v40, %v2716_v18 }
 0x174   :  { %v11589_v7 = vpop.f32.mrf.mxu0 }
 0x176   :  { %v11591_v9 = vpop.f32.mrf.mxu0  ;;  %8823 = vmatmul.mubr.msk.f32.gmra.mxu0 %vm21_vm0, %v2712_v63  ;;  %v15347_v63 = vrot.slane %v10712_v22, 1  ;;  %v2731_v22 = vrot.slane %v517_v11, 1  ;;  %v525_v11 = vld [vmem:[#allocation2 + $0x338] sm:$0xff] }
 0x177   :  { %15343 = vst [vmem:[#allocation18_spill] sm:$0xff] %v11591_v9  ;;  %8825 = vmatprep.mubr.msk.f32.mxu0 %vm21_vm0, %v11047_v1  ;;  %v11611_v9 = vpop.f32.mrf.mxu1 }
 0x178   :  { %v11601_v0 = vpop.f32.mrf.mxu0  ;;  %v2722_v1 = vsel %vm2612_vm2, %v15347_v63, %v2721_v34 }
 0x179   :  { %15345 = vst [vmem:[#allocation70_spill] sm:$0xff] %v11601_v0 }
 0x17a   :  { %v11603_v47 = vpop.f32.mrf.mxu0  ;;  %8826 = vmatmul.mubr.msk.f32.gmra.mxu0 %vm21_vm0, %v2717_v21  ;;  %v15350_v21 = vrot.slane %v10731_v6, 1  ;;  %v2736_v6 = vrot.slane %v521_v29, 1  ;;  %v529_v29 = vld [vmem:[#allocation2 + $0x358] sm:$0xff] }
 0x17b   :  { %15346 = vst [vmem:[#allocation71_spill] sm:$0xff] %v11603_v47  ;;  %8828 = vmatprep.mubr.msk.f32.mxu0 %vm21_vm0, %v11066_v54  ;;  %v11623_v47 = vpop.f32.mrf.mxu1 }
 0x17c   :  { %v11613_v18 = vpop.f32.mrf.mxu0  ;;  %v2727_v54 = vsel %vm2612_vm2, %v15350_v21, %v2726_v45 }
 0x17d   :  { %15348 = vst [vmem:[#allocation72_spill] sm:$0xff] %v11613_v18 }
 0x17e   :  { %v11615_v40 = vpop.f32.mrf.mxu0  ;;  %8829 = vmatmul.mubr.msk.f32.gmra.mxu0 %vm21_vm0, %v2722_v1  ;;  %v15353_v1 = vrot.slane %v10758_v25, 1  ;;  %v2741_v25 = vrot.slane %v525_v11, 1  ;;  %v533_v11 = vld [vmem:[#allocation2 + $0x378] sm:$0xff] }
 0x17f   :  { %15349 = vst [vmem:[#allocation73_spill] sm:$0xff] %v11615_v40  ;;  %8831 = vmatprep.mubr.msk.f32.mxu0 %vm21_vm0, %v11086_v5  ;;  %v11635_v40 = vpop.f32.mrf.mxu1 }
 0x180   :  { %v11625_v34 = vpop.f32.mrf.mxu0  ;;  %v2732_v5 = vsel %vm2612_vm2, %v15353_v1, %v2731_v22 }
 0x181   :  { %15351 = vst [vmem:[#allocation74_spill] sm:$0xff] %v11625_v34 }
 0x182   :  { %v11627_v63 = vpop.f32.mrf.mxu0  ;;  %8832 = vmatmul.mubr.msk.f32.gmra.mxu0 %vm21_vm0, %v2727_v54  ;;  %v15356_v54 = vrot.slane %v10797_v39, 1  ;;  %v2746_v39 = vrot.slane %v529_v29, 1  ;;  %v537_v29 = vld [vmem:[#allocation2 + $0x398] sm:$0xff] }
 0x183   :  { %15352 = vst [vmem:[#allocation75_spill] sm:$0xff] %v11627_v63  ;;  %8834 = vmatprep.mubr.msk.f32.mxu0 %vm21_vm0, %v11107_v57  ;;  %v11647_v63 = vpop.f32.mrf.mxu1 }
 0x184   :  { %v11637_v45 = vpop.f32.mrf.mxu0  ;;  %v2737_v57 = vsel %vm2612_vm2, %v15356_v54, %v2736_v6 }
 0x185   :  { %15354 = vst [vmem:[#allocation76_spill] sm:$0xff] %v11637_v45  ;;  %v557_v45 = vld [vmem:[#allocation2 + $0x438] sm:$0xff] }
 0x186   :  { %v11639_v21 = vpop.f32.mrf.mxu0  ;;  %8835 = vmatmul.mubr.msk.f32.gmra.mxu0 %vm21_vm0, %v2732_v5  ;;  %v15359_v5 = vrot.slane %v10838_v42, 1  ;;  %v2751_v42 = vrot.slane %v533_v11, 1  ;;  %v541_v11 = vld [vmem:[#allocation2 + $0x3b8] sm:$0xff] }
 0x187   :  { %15355 = vst [vmem:[#allocation77_spill] sm:$0xff] %v11639_v21  ;;  %8837 = vmatprep.mubr.msk.f32.mxu0 %vm21_vm0, %v11128_v31  ;;  %v11659_v21 = vpop.f32.mrf.mxu1 }
 0x188   :  { %v11649_v22 = vpop.f32.mrf.mxu0  ;;  %v2742_v31 = vsel %vm2612_vm2, %v15359_v5, %v2741_v25 }
 0x189   :  { %15357 = vst [vmem:[#allocation78_spill] sm:$0xff] %v11649_v22 }
 0x18a   :  { %v11651_v1 = vpop.f32.mrf.mxu0  ;;  %8838 = vmatmul.mubr.msk.f32.gmra.mxu0 %vm21_vm0, %v2737_v57  ;;  %v15362_v57 = vrot.slane %v10859_v55, 1  ;;  %v2756_v55 = vrot.slane %v537_v29, 1  ;;  %v545_v29 = vld [vmem:[#allocation2 + $0x3d8] sm:$0xff] }
 0x18b   :  { %15358 = vst [vmem:[#allocation79_spill] sm:$0xff] %v11651_v1  ;;  %8840 = vmatprep.mubr.msk.f32.mxu0 %vm21_vm0, %v11149_v48  ;;  %v11671_v1 = vpop.f32.mrf.mxu1 }
 0x18c   :  { %v11661_v6 = vpop.f32.mrf.mxu0  ;;  %v2747_v48 = vsel %vm2612_vm2, %v15362_v57, %v2746_v39 }
 0x18d   :  { %15360 = vst [vmem:[#allocation80_spill] sm:$0xff] %v11661_v6  ;;  %v553_v6 = vld [vmem:[#allocation2 + $0x418] sm:$0xff] }
 0x18e   :  { %v11663_v54 = vpop.f32.mrf.mxu0  ;;  %8841 = vmatmul.mubr.msk.f32.gmra.mxu0 %vm21_vm0, %v2742_v31  ;;  %v15365_v31 = vrot.slane %v10880_v36, 1  ;;  %v2761_v36 = vrot.slane %v541_v11, 1  ;;  %v549_v11 = vld [vmem:[#allocation2 + $0x3f8] sm:$0xff] }
 0x18f   :  { %15361 = vst [vmem:[#allocation81_spill] sm:$0xff] %v11663_v54  ;;  %8843 = vmatprep.mubr.msk.f32.mxu0 %vm21_vm0, %v11173_v3  ;;  %v11683_v54 = vpop.f32.mrf.mxu1 }
 0x190   :  { %v11673_v25 = vpop.f32.mrf.mxu0  ;;  %v2752_v3 = vsel %vm2612_vm2, %v15365_v31, %v2751_v42 }
 0x191   :  { %15363 = vst [vmem:[#allocation82_spill] sm:$0xff] %v11673_v25 }
 0x192   :  { %v11675_v5 = vpop.f32.mrf.mxu0  ;;  %8844 = vmatmul.mubr.msk.f32.gmra.mxu0 %vm21_vm0, %v2747_v48  ;;  %v15368_v48 = vrot.slane %v10901_v43, 1  ;;  %v2766_v43 = vrot.slane %v545_v29, 1 }
 0x193   :  { %15364 = vst [vmem:[#allocation83_spill] sm:$0xff] %v11675_v5  ;;  %8846 = vmatprep.mubr.msk.f32.mxu0 %vm21_vm0, %v11194_v4  ;;  %v11695_v5 = vpop.f32.mrf.mxu1 }
 0x194   :  { %v11685_v39 = vpop.f32.mrf.mxu0  ;;  %v2757_v4 = vsel %vm2612_vm2, %v15368_v48, %v2756_v55 }
 0x195   :  { %15366 = vst [vmem:[#allocation84_spill] sm:$0xff] %v11685_v39  ;;  %v11707_v39 = vpop.f32.mrf.mxu1 }
 0x196   :  { %v11687_v57 = vpop.f32.mrf.mxu0  ;;  %8847 = vmatmul.mubr.msk.f32.gmra.mxu0 %vm21_vm0, %v2752_v3  ;;  %v15371_v3 = vld [vmem:[#allocation28_spill] sm:$0xff] }
 0x197   :  { %15367 = vst [vmem:[#allocation85_spill] sm:$0xff] %v11687_v57  ;;  %8849 = vmatprep.mubr.msk.f32.mxu0 %vm21_vm0, %v11215_v27  ;;  %v15372_v57 = vrot.slane %v15371_v3, 1  ;;  %v2771_v3 = vrot.slane %v549_v11, 1  ;;  %v11719_v25 = vpop.f32.mrf.mxu1 }
 0x198   :  { %v11697_v42 = vpop.f32.mrf.mxu0 }
 0x199   :  { %15369 = vst [vmem:[#allocation86_spill] sm:$0xff] %v11697_v42  ;;  %v2762_v27 = vsel %vm2612_vm2, %v15372_v57, %v2761_v36  ;;  %v9454_v42 = vld [vmem:[#allocation2 + $0x408] sm:$0xff]  ;;  %v9455_v36 = vld [vmem:[#allocation2 + $0x410] sm:$0xff]  ;;  %v11731_v22 = vpop.f32.mrf.mxu1 }
 0x19a   :  { %v11699_v31 = vpop.f32.mrf.mxu0  ;;  %8850 = vmatmul.mubr.msk.f32.gmra.mxu0 %vm21_vm0, %v2757_v4  ;;  %v15375_v4 = vld [vmem:[#allocation29_spill] sm:$0xff]  ;;  %v2773_v57 = vrot.slane %v9454_v42, 1  ;;  %v2774_v29 = vrot.slane %v9455_v36, 1  ;;  %v9456_v42 = vld [vmem:[#allocation2 + $0x428] sm:$0xff] }
 0x19b   :  { %15370 = vst [vmem:[#allocation87_spill] sm:$0xff] %v11699_v31  ;;  %8852 = vmatprep.mubr.msk.f32.mxu0 %vm21_vm0, %v11236_v46  ;;  %v15376_v31 = vrot.slane %v15375_v4, 1  ;;  %v2778_v11 = vrot.slane %v9456_v42, 1  ;;  %v9457_v4 = vld [vmem:[#allocation2 + $0x430] sm:$0xff] }
 0x19c   :  { %v11709_v55 = vpop.f32.mrf.mxu0  ;;  %v2779_v36 = vrot.slane %v9457_v4, 1  ;;  %v11741_v4 = vpop.f32.mrf.mxu1 }
 0x19d   :  { %15373 = vst [vmem:[#allocation28_spill] sm:$0xff] %v11709_v55  ;;  %v2767_v46 = vsel %vm2612_vm2, %v15376_v31, %v2766_v43  ;;  %v2776_v43 = vrot.slane %v553_v6, 1  ;;  %v2781_v6 = vrot.slane %v557_v45, 1 }
 0x19e   :  { %v11711_v48 = vpop.f32.mrf.mxu0  ;;  %8853 = vmatmul.mubr.msk.f32.gmra.mxu0 %vm21_vm0, %v2762_v27 }
 0x19f   :  { %15374 = vst [vmem:[#allocation88_spill] sm:$0xff] %v11711_v48  ;;  %8855 = vmatprep.mubr.msk.f32.mxu0 %vm21_vm0, %v11257_v51  ;;  %v15379_v51 = vld [vmem:[#allocation31_spill] sm:$0xff] }
 0x1a0   :  { %v11721_v55 = vpop.f32.mrf.mxu0  ;;  %v15380_v27 = vrot.slane %v15379_v51, 1 }
 0x1a1   :  { %15377 = vst [vmem:[#allocation29_spill] sm:$0xff] %v11721_v55 }
 0x1a2   :  { %v11723_v48 = vpop.f32.mrf.mxu0  ;;  %8856 = vmatmul.mubr.msk.f32.gmra.mxu0 %vm21_vm0, %v2767_v46  ;;  %v2772_v31 = vsel %vm2612_vm2, %v15380_v27, %v2771_v3  ;;  %v9458_v3 = vld [vmem:[#allocation2 + $0x448] sm:$0xff]  ;;  %v9459_v27 = vld [vmem:[#allocation2 + $0x450] sm:$0xff] }
 0x1a3   :  { %15378 = vst [vmem:[#allocation89_spill] sm:$0xff] %v11723_v48  ;;  %8858 = vmatprep.mubr.msk.f32.mxu0 %vm21_vm0, %v11274_v52  ;;  %v2775_v48 = vsel %vm2612_vm2, %v2773_v57, %v2774_v29  ;;  %v2777_v52 = vsel %vm2612_vm2, %v2774_v29, %v2776_v43  ;;  %v2783_v51 = vrot.slane %v9458_v3, 1  ;;  %v2784_v42 = vrot.slane %v9459_v27, 1  ;;  %v9460_v29 = vld [vmem:[#allocation2 + $0x468] sm:$0xff]  ;;  %v11752_v27 = vpop.f32.mrf.mxu1 }
 0x1a4   :  { %v11733_v55 = vpop.f32.mrf.mxu0  ;;  %v2780_v57 = vsel %vm2612_vm2, %v2778_v11, %v2779_v36  ;;  %v15385_v43 = vld [vmem:[#allocation34_spill] sm:$0xff] }
 0x1a5   :  { %15381 = vst [vmem:[#allocation31_spill] sm:$0xff] %v11733_v55  ;;  %v561_v55 = vld [vmem:[#allocation2 + $0x458] sm:$0xff]  ;;  %v2789_v3 = vrot.slane %v15385_v43, 1  ;;  %15386 = vst [vmem:[#allocation34_spill] sm:$0xff] %v11752_v27  ;;  %v2785_v11 = vsel %vm2612_vm2, %v2783_v51, %v2784_v42  ;;  %v11763_v43 = vpop.f32.mrf.mxu1 }
 0x1a6   :  { %v11736_v46 = vpop.f32.mrf.mxu0  ;;  %8859 = vmatmul.mubr.msk.f32.gmra.mxu0 %vm21_vm0, %v2772_v31  ;;  %v2786_v45 = vrot.slane %v561_v55, 1  ;;  %v2788_v31 = vrot.slane %v9460_v29, 1 }
 0x1a7   :  { %15382 = vst [vmem:[#allocation90_spill] sm:$0xff] %v11736_v46  ;;  %8861 = vmatprep.mubr.msk.f32.mxu0 %vm21_vm0, %v2775_v48  ;;  %v2782_v48 = vsel %vm2612_vm2, %v2779_v36, %v2781_v6 }
 0x1a8   :  { %v11743_v34 = vpop.f32.mrf.mxu0  ;;  %v2787_v36 = vsel %vm2612_vm2, %v2784_v42, %v2786_v45  ;;  %v2790_v51 = vsel %vm2612_vm2, %v2788_v31, %v2789_v3 }
 0x1a9   :  { %15383 = vst [vmem:[#allocation91_spill] sm:$0xff] %v11743_v34  ;;  %v565_v34 = vld [vmem:[#allocation2 + $0x478] sm:$0xff] }
 0x1aa   :  { %v11746_v18 = vpop.f32.mrf.mxu0  ;;  %8862 = vmatmul.mubr.msk.f32.gmra.mxu0 %vm21_vm0, %v2777_v52  ;;  %v2791_v55 = vrot.slane %v565_v34, 1  ;;  %v9461_v52 = vld [vmem:[#allocation2 + $0x488] sm:$0xff] }
 0x1ab   :  { %15384 = vst [vmem:[#allocation92_spill] sm:$0xff] %v11746_v18  ;;  %8864 = vmatprep.mubr.msk.f32.mxu0 %vm21_vm0, %v2780_v57  ;;  %v2793_v6 = vrot.slane %v9461_v52, 1  ;;  %v15389_v57 = vld [vmem:[#allocation35_spill] sm:$0xff] }
 0x1ac   :  { %v11754_v46 = vpop.f32.mrf.mxu0  ;;  %v2794_v29 = vrot.slane %v15389_v57, 1  ;;  %15390 = vst [vmem:[#allocation35_spill] sm:$0xff] %v11763_v43  ;;  %v2792_v42 = vsel %vm2612_vm2, %v2789_v3, %v2791_v55  ;;  %v11775_v57 = vpop.f32.mrf.mxu1 }
 0x1ad   :  { %15387 = vst [vmem:[#allocation93_spill] sm:$0xff] %v11754_v46  ;;  %v569_v46 = vld [vmem:[#allocation2 + $0x498] sm:$0xff] }
 0x1ae   :  { %v11757_v0 = vpop.f32.mrf.mxu0  ;;  %8865 = vmatmul.mubr.msk.f32.gmra.mxu0 %vm21_vm0, %v2782_v48  ;;  %v2796_v34 = vrot.slane %v569_v46, 1  ;;  %v15393_v48 = vld [vmem:[#allocation36_spill] sm:$0xff]  ;;  %v2795_v31 = vsel %vm2612_vm2, %v2793_v6, %v2794_v29 }
 0x1af   :  { %15388 = vst [vmem:[#allocation94_spill] sm:$0xff] %v11757_v0  ;;  %8867 = vmatprep.mubr.msk.f32.mxu0 %vm21_vm0, %v2785_v11  ;;  %v2798_v45 = vrot.slane %v15393_v48, 1  ;;  %v15394_v11 = vld [vmem:[#allocation37_spill] sm:$0xff]  ;;  %15395 = vst [vmem:[#allocation36_spill] sm:$0xff] %v11775_v57 }
 0x1b0   :  { %v11765_v18 = vpop.f32.mrf.mxu0  ;;  %v2799_v52 = vrot.slane %v15394_v11, 1  ;;  %v2797_v3 = vsel %vm2612_vm2, %v2794_v29, %v2796_v34  ;;  %v11787_v11 = vpop.f32.mrf.mxu1 }
 0x1b1   :  { %15391 = vst [vmem:[#allocation95_spill] sm:$0xff] %v11765_v18  ;;  %v573_v18 = vld [vmem:[#allocation2 + $0x4b8] sm:$0xff] }
 0x1b2   :  { %v11768_v27 = vpop.f32.mrf.mxu0  ;;  %8868 = vmatmul.mubr.msk.f32.gmra.mxu0 %vm21_vm0, %v2787_v36  ;;  %v2801_v46 = vrot.slane %v573_v18, 1  ;;  %v15398_v36 = vld [vmem:[#allocation38_spill] sm:$0xff]  ;;  %v2800_v6 = vsel %vm2612_vm2, %v2798_v45, %v2799_v52 }
 0x1b3   :  { %15392 = vst [vmem:[#allocation96_spill] sm:$0xff] %v11768_v27  ;;  %8870 = vmatprep.mubr.msk.f32.mxu0 %vm21_vm0, %v2790_v51  ;;  %v2803_v55 = vrot.slane %v15398_v36, 1  ;;  %v15399_v51 = vld [vmem:[#allocation39_spill] sm:$0xff]  ;;  %15400 = vst [vmem:[#allocation38_spill] sm:$0xff] %v11787_v11 }
 0x1b4   :  { %v11777_v0 = vpop.f32.mrf.mxu0  ;;  %v2804_v48 = vrot.slane %v15399_v51, 1  ;;  %v2802_v29 = vsel %vm2612_vm2, %v2799_v52, %v2801_v46  ;;  %v11799_v51 = vpop.f32.mrf.mxu1 }
 0x1b5   :  { %15396 = vst [vmem:[#allocation37_spill] sm:$0xff] %v11777_v0  ;;  %v577_v0 = vld [vmem:[#allocation2 + $0x4d8] sm:$0xff] }
 0x1b6   :  { %v11780_v43 = vpop.f32.mrf.mxu0  ;;  %8871 = vmatmul.mubr.msk.f32.gmra.mxu0 %vm21_vm0, %v2792_v42  ;;  %v2806_v18 = vrot.slane %v577_v0, 1  ;;  %v15403_v42 = vld [vmem:[#allocation40_spill] sm:$0xff]  ;;  %v2805_v45 = vsel %vm2612_vm2, %v2803_v55, %v2804_v48 }
 0x1b7   :  { %15397 = vst [vmem:[#allocation97_spill] sm:$0xff] %v11780_v43  ;;  %8873 = vmatprep.mubr.msk.f32.mxu0 %vm21_vm0, %v2795_v31  ;;  %v2808_v34 = vrot.slane %v15403_v42, 1  ;;  %v15404_v31 = vld [vmem:[#allocation41_spill] sm:$0xff]  ;;  %15405 = vst [vmem:[#allocation40_spill] sm:$0xff] %v11799_v51 }
 0x1b8   :  { %v11789_v27 = vpop.f32.mrf.mxu0  ;;  %v2809_v36 = vrot.slane %v15404_v31, 1  ;;  %v2807_v52 = vsel %vm2612_vm2, %v2804_v48, %v2806_v18  ;;  %v11811_v31 = vpop.f32.mrf.mxu1 }
 0x1b9   :  { %15401 = vst [vmem:[#allocation39_spill] sm:$0xff] %v11789_v27  ;;  %v581_v27 = vld [vmem:[#allocation2 + $0x4f8] sm:$0xff] }
 0x1ba   :  { %v11792_v57 = vpop.f32.mrf.mxu0  ;;  %8874 = vmatmul.mubr.msk.f32.gmra.mxu0 %vm21_vm0, %v2797_v3  ;;  %v2811_v0 = vrot.slane %v581_v27, 1  ;;  %v15408_v3 = vld [vmem:[#allocation42_spill] sm:$0xff]  ;;  %v2810_v55 = vsel %vm2612_vm2, %v2808_v34, %v2809_v36 }
 0x1bb   :  { %15402 = vst [vmem:[#allocation98_spill] sm:$0xff] %v11792_v57  ;;  %8876 = vmatprep.mubr.msk.f32.mxu0 %vm21_vm0, %v2800_v6  ;;  %v2813_v46 = vrot.slane %v15408_v3, 1  ;;  %v15409_v6 = vld [vmem:[#allocation43_spill] sm:$0xff]  ;;  %15410 = vst [vmem:[#allocation42_spill] sm:$0xff] %v11811_v31 }
 0x1bc   :  { %v11801_v43 = vpop.f32.mrf.mxu0  ;;  %v2814_v42 = vrot.slane %v15409_v6, 1  ;;  %v2812_v48 = vsel %vm2612_vm2, %v2809_v36, %v2811_v0  ;;  %v11823_v6 = vpop.f32.mrf.mxu1 }
 0x1bd   :  { %15406 = vst [vmem:[#allocation41_spill] sm:$0xff] %v11801_v43  ;;  %v585_v43 = vld [vmem:[#allocation2 + $0x518] sm:$0xff] }
 0x1be   :  { %v11804_v11 = vpop.f32.mrf.mxu0  ;;  %8877 = vmatmul.mubr.msk.f32.gmra.mxu0 %vm21_vm0, %v2802_v29  ;;  %v2816_v27 = vrot.slane %v585_v43, 1  ;;  %v15413_v29 = vld [vmem:[#allocation44_spill] sm:$0xff]  ;;  %v2815_v34 = vsel %vm2612_vm2, %v2813_v46, %v2814_v42 }
 0x1bf   :  { %15407 = vst [vmem:[#allocation99_spill] sm:$0xff] %v11804_v11  ;;  %8879 = vmatprep.mubr.msk.f32.mxu0 %vm21_vm0, %v2805_v45  ;;  %v2818_v18 = vrot.slane %v15413_v29, 1  ;;  %v15414_v45 = vld [vmem:[#allocation45_spill] sm:$0xff]  ;;  %15415 = vst [vmem:[#allocation44_spill] sm:$0xff] %v11823_v6 }
 0x1c0   :  { %v11813_v57 = vpop.f32.mrf.mxu0  ;;  %v2819_v3 = vrot.slane %v15414_v45, 1  ;;  %v2817_v36 = vsel %vm2612_vm2, %v2814_v42, %v2816_v27  ;;  %v11835_v45 = vpop.f32.mrf.mxu1 }
 0x1c1   :  { %15411 = vst [vmem:[#allocation43_spill] sm:$0xff] %v11813_v57  ;;  %v589_v57 = vld [vmem:[#allocation2 + $0x538] sm:$0xff] }
 0x1c2   :  { %v11816_v51 = vpop.f32.mrf.mxu0  ;;  %8880 = vmatmul.mubr.msk.f32.gmra.mxu0 %vm21_vm0, %v2807_v52  ;;  %v2821_v43 = vrot.slane %v589_v57, 1  ;;  %v15418_v52 = vld [vmem:[#allocation46_spill] sm:$0xff]  ;;  %v2820_v46 = vsel %vm2612_vm2, %v2818_v18, %v2819_v3 }
 0x1c3   :  { %15412 = vst [vmem:[#allocation100_spill] sm:$0xff] %v11816_v51  ;;  %8882 = vmatprep.mubr.msk.f32.mxu0 %vm21_vm0, %v2810_v55  ;;  %v2823_v0 = vrot.slane %v15418_v52, 1  ;;  %v15419_v55 = vld [vmem:[#allocation47_spill] sm:$0xff]  ;;  %15420 = vst [vmem:[#allocation46_spill] sm:$0xff] %v11835_v45 }
 0x1c4   :  { %v11825_v11 = vpop.f32.mrf.mxu0  ;;  %v2824_v29 = vrot.slane %v15419_v55, 1  ;;  %v2822_v42 = vsel %vm2612_vm2, %v2819_v3, %v2821_v43  ;;  %v11847_v55 = vpop.f32.mrf.mxu1 }
 0x1c5   :  { %15416 = vst [vmem:[#allocation45_spill] sm:$0xff] %v11825_v11  ;;  %v593_v11 = vld [vmem:[#allocation2 + $0x558] sm:$0xff] }
 0x1c6   :  { %v11828_v31 = vpop.f32.mrf.mxu0  ;;  %8883 = vmatmul.mubr.msk.f32.gmra.mxu0 %vm21_vm0, %v2812_v48  ;;  %v2826_v57 = vrot.slane %v593_v11, 1  ;;  %v15423_v48 = vld [vmem:[#allocation48_spill] sm:$0xff]  ;;  %v2825_v18 = vsel %vm2612_vm2, %v2823_v0, %v2824_v29 }
 0x1c7   :  { %15417 = vst [vmem:[#allocation101_spill] sm:$0xff] %v11828_v31  ;;  %8885 = vmatprep.mubr.msk.f32.mxu0 %vm21_vm0, %v2815_v34  ;;  %v2828_v27 = vrot.slane %v15423_v48, 1  ;;  %v15424_v34 = vld [vmem:[#allocation49_spill] sm:$0xff]  ;;  %15425 = vst [vmem:[#allocation48_spill] sm:$0xff] %v11847_v55 }
 0x1c8   :  { %v11837_v51 = vpop.f32.mrf.mxu0  ;;  %v2829_v52 = vrot.slane %v15424_v34, 1  ;;  %v2827_v3 = vsel %vm2612_vm2, %v2824_v29, %v2826_v57  ;;  %v11859_v34 = vpop.f32.mrf.mxu1 }
 0x1c9   :  { %15421 = vst [vmem:[#allocation47_spill] sm:$0xff] %v11837_v51  ;;  %v597_v51 = vld [vmem:[#allocation2 + $0x578] sm:$0xff] }
 0x1ca   :  { %v11840_v6 = vpop.f32.mrf.mxu0  ;;  %8886 = vmatmul.mubr.msk.f32.gmra.mxu0 %vm21_vm0, %v2817_v36  ;;  %v2831_v11 = vrot.slane %v597_v51, 1  ;;  %v15428_v36 = vld [vmem:[#allocation50_spill] sm:$0xff]  ;;  %v2830_v0 = vsel %vm2612_vm2, %v2828_v27, %v2829_v52 }
 0x1cb   :  { %15422 = vst [vmem:[#allocation102_spill] sm:$0xff] %v11840_v6  ;;  %8888 = vmatprep.mubr.msk.f32.mxu0 %vm21_vm0, %v2820_v46  ;;  %v2833_v43 = vrot.slane %v15428_v36, 1  ;;  %v15429_v46 = vld [vmem:[#allocation51_spill] sm:$0xff]  ;;  %v11871_v36 = vpop.f32.mrf.mxu1 }
 0x1cc   :  { %v11849_v31 = vpop.f32.mrf.mxu0  ;;  %v2834_v48 = vrot.slane %v15429_v46, 1  ;;  %v2832_v29 = vsel %vm2612_vm2, %v2829_v52, %v2831_v11  ;;  %v15434_v11 = vld [vmem:[#allocation53_spill] sm:$0xff] }
 0x1cd   :  { %15426 = vst [vmem:[#allocation49_spill] sm:$0xff] %v11849_v31  ;;  %v601_v31 = vld [vmem:[#allocation2 + $0x598] sm:$0xff] }
 0x1ce   :  { %v11852_v45 = vpop.f32.mrf.mxu0  ;;  %8889 = vmatmul.mubr.msk.f32.gmra.mxu0 %vm21_vm0, %v2822_v42  ;;  %v2836_v51 = vrot.slane %v601_v31, 1  ;;  %v15432_v42 = vld [vmem:[#allocation52_spill] sm:$0xff]  ;;  %v2835_v27 = vsel %vm2612_vm2, %v2833_v43, %v2834_v48 }
 0x1cf   :  { %15427 = vst [vmem:[#allocation103_spill] sm:$0xff] %v11852_v45  ;;  %8891 = vmatprep.mubr.msk.f32.mxu0 %vm21_vm0, %v2825_v18  ;;  %v2838_v57 = vrot.slane %v15432_v42, 1  ;;  %v2839_v18 = vrot.slane %v11247_v28, 1  ;;  %v2844_v28 = vrot.slane %v15434_v11, 1 }
 0x1d0   :  { %v11861_v6 = vpop.f32.mrf.mxu0  ;;  %v2837_v52 = vsel %vm2612_vm2, %v2834_v48, %v2836_v51 }
 0x1d1   :  { %15430 = vst [vmem:[#allocation50_spill] sm:$0xff] %v11861_v6  ;;  %v605_v6 = vld [vmem:[#allocation2 + $0x5b8] sm:$0xff]  ;;  %v2840_v43 = vsel %vm2612_vm2, %v2838_v57, %v2839_v18 }
 0x1d2   :  { %v11864_v55 = vpop.f32.mrf.mxu0  ;;  %8892 = vmatmul.mubr.msk.f32.gmra.mxu0 %vm21_vm0, %v2827_v3  ;;  %v2841_v31 = vrot.slane %v605_v6, 1  ;;  %v2843_v3 = vrot.slane %v11251_v41, 1 }
 0x1d3   :  { %15431 = vst [vmem:[#allocation51_spill] sm:$0xff] %v11864_v55  ;;  %8894 = vmatprep.mubr.msk.f32.mxu0 %vm21_vm0, %v2830_v0  ;;  %v11883_v0 = vpop.f32.mrf.mxu1 }
 0x1d4   :  { %v11873_v46 = vpop.f32.mrf.mxu0  ;;  %v2842_v48 = vsel %vm2612_vm2, %v2839_v18, %v2841_v31  ;;  %v2845_v51 = vsel %vm2612_vm2, %v2843_v3, %v2844_v28  ;;  %v15437_v3 = vrot.slane %v11503_v17, 1 }
 0x1d5   :  { %15433 = vst [vmem:[#allocation52_spill] sm:$0xff] %v11873_v46  ;;  %v609_v46 = vld [vmem:[#allocation2 + $0x5d8] sm:$0xff] }
 0x1d6   :  { %v11876_v45 = vpop.f32.mrf.mxu0  ;;  %8895 = vmatmul.mubr.msk.f32.gmra.mxu0 %vm21_vm0, %v2832_v29  ;;  %v2846_v6 = vrot.slane %v609_v46, 1  ;;  %v11893_v29 = vpop.f32.mrf.mxu1  ;;  %v617_v46 = vld [vmem:[#allocation2 + $0x618] sm:$0xff] }
 0x1d7   :  { %8897 = vmatprep.mubr.msk.f32.mxu0 %vm21_vm0, %v2835_v27  ;;  %v613_v27 = vld [vmem:[#allocation2 + $0x5f8] sm:$0xff] }
 0x1d8   :  { %v11885_v42 = vpop.f32.mrf.mxu0  ;;  %v2847_v57 = vsel %vm2612_vm2, %v2844_v28, %v2846_v6  ;;  %v621_v6 = vld [vmem:[#allocation2 + $0x638] sm:$0xff] }
 0x1d9   :  { %v2861_v17 = vrot.slane %v621_v6, 1  ;;  %v2079_v6 = vadd.f32 %v11381_v19, %v11323_v56  ;;  %v2089_v56 = vadd.f32 %v11400_v53, %v11342_v8 }
 0x1da   :  { %v11888_v55 = vpop.f32.mrf.mxu0  ;;  %8898 = vmatmul.mubr.msk.f32.gmra.mxu0 %vm21_vm0, %v2837_v52  ;;  %v2851_v52 = vrot.slane %v613_v27, 1 }
 0x1db   :  { %8900 = vmatprep.mubr.msk.f32.mxu0 %vm21_vm0, %v2840_v43  ;;  %v11903_v43 = vpop.f32.mrf.mxu1 }
 0x1dc   :  { %v11895_v41 = vpop.f32.mrf.mxu0 }
 0x1de   :  { %v11898_v11 = vpop.f32.mrf.mxu0  ;;  %8901 = vmatmul.mubr.msk.f32.gmra.mxu0 %vm21_vm0, %v2842_v48  ;;  %v2852_v48 = vsel %vm2612_vm2, %v15437_v3, %v2851_v52 }
 0x1df   :  { %15435 = vst [vmem:[#allocation53_spill] sm:$0xff] %v11898_v11  ;;  %8903 = vmatprep.mubr.msk.f32.mxu0 %vm21_vm0, %v2845_v51  ;;  %v2856_v51 = vrot.slane %v617_v46, 1  ;;  %v11915_v11 = vpop.f32.mrf.mxu1  ;;  %v2069_v46 = vadd.f32 %v11364_v15, %v11303_v10 }
 0x1e0   :  { %v11905_v18 = vpop.f32.mrf.mxu0 }
 0x1e2   :  { %v11907_v31 = vpop.f32.mrf.mxu0  ;;  %8904 = vmatmul.mubr.msk.f32.gmra.mxu0 %vm21_vm0, %v2847_v57  ;;  %v15439_v57 = vrot.slane %v11518_v30, 1  ;;  %v11939_v30 = vld [vmem:[%s14872_s2] ss:$0 sm:$0xff] }
 0x1e3   :  { %15436 = vst [vmem:[#allocation104_spill] sm:$0xff] %v11907_v31  ;;  %8906 = vmatprep.mubr.msk.f32.mxu0 %vm21_vm0, %v11528_v38  ;;  %v11927_v31 = vpop.f32.mrf.mxu1 }
 0x1e4   :  { %v11917_v28 = vpop.f32.mrf.mxu0  ;;  %v2857_v38 = vsel %vm2612_vm2, %v15439_v57, %v2856_v51 }
 0x1e5   :  { %v11946_v10 = vpop.f32.mrf.mxu1 }
 0x1e6   :  { %v11919_v27 = vpop.f32.mrf.mxu0  ;;  %8907 = vmatmul.mubr.msk.f32.gmra.mxu0 %vm21_vm0, %v2852_v48  ;;  %v2064_v48 = vadd.f32 %v11377_v61, %v11316_v59 }
 0x1e7   :  { %15438 = vst [vmem:[#allocation105_spill] sm:$0xff] %v11919_v27  ;;  %8909 = vmatprep.mubr.msk.f32.mxu0 %vm21_vm0, %v11548_v12  ;;  %v15440_v12 = vrot.slane %v11538_v58, 1 }
 0x1e8   :  { %v11929_v52 = vpop.f32.mrf.mxu0 }
 0x1e9   :  { %v2862_v51 = vsel %vm2612_vm2, %v15440_v12, %v2861_v17  ;;  %v11959_v17 = vpop.f32.mrf.mxu1 }
 0x1ea   :  { %v8767_v3 = vpop.f32.mrf.mxu0  ;;  %8910 = vmatmul.mubr.msk.f32.gmra.mxu0 %vm21_vm0, %v2857_v38 }
 0x1eb   :  { %v3634_v27 = vadd.f32 %v8767_v3, %v2069_v46  ;;  %8912 = vmatprep.mubr.msk.f32.mxu0 %vm21_vm0, %v11565_v24  ;;  %v2074_v24 = vadd.f32 %v11393_v13, %v11335_v60  ;;  %v2084_v13 = vadd.f32 %v11410_v33, %v11355_v16  ;;  %v11976_v8 = vpop.f32.mrf.mxu1 }
 0x1ec   :  { %v3134_v15 = vpop.f32.mrf.mxu0 }
 0x1ed   :  { %v3633_v59 = vadd.f32 %v3134_v15, %v2064_v48  ;;  %v11951_v61 = vadd.f32 %v11939_v30, %v3634_v27  ;;  %v2099_v15 = vadd.f32 %v11414_v26, %v11362_v44  ;;  %v11996_v26 = vpop.f32.mrf.mxu1 }
 0x1ee   :  { %v8770_v57 = vpop.f32.mrf.mxu0  ;;  %8913 = vmatmul.mubr.msk.f32.gmra.mxu0 %vm21_vm0, %v2862_v51 }
 0x1ef   :  { %15441 = vst [vmem:[#allocation106_spill] sm:$0xff] %v11951_v61  ;;  %v11957_v58 = vadd.f32 %v11939_v30, %v3633_v59  ;;  %v3636_v38 = vadd.f32 %v8770_v57, %v2079_v6  ;;  %v14921_v3 = vmax.f32 %v11951_v61, 0.0 }
 0x1f0   :  { %v3144_v46 = vpop.f32.mrf.mxu0 }
 0x1f1   :  { %15442 = vst [vmem:[#allocation107_spill] sm:$0xff] %v11957_v58  ;;  %v14922_v19 = vmax.f32 %v11957_v58, 0.0  ;;  %v3635_v27 = vadd.f32 %v3144_v46, %v2074_v24  ;;  %v11966_v48 = vadd.f32 %v11939_v30, %v3636_v38  ;;  %v2094_v24 = vadd.f32 %v11424_v23, %v11375_v49 }
 0x1f2   :  { %v8773_v60 = vpop.f32.mrf.mxu0 }
 0x1f3   :  { %15443 = vst [vmem:[#allocation108_spill] sm:$0xff] %v11966_v48  ;;  %v11971_v12 = vadd.f32 %v11939_v30, %v3635_v27  ;;  %v3638_v51 = vadd.f32 %v8773_v60, %v2089_v56  ;;  %8931 = vmatprep.mubr.msk.f32.mxu1 %vm3948_vm3, %v14922_v19  ;;  %v14920_v6 = vmax.f32 %v11966_v48, 0.0  ;;  %v15447_v56 = vld [vmem:[#allocation58_spill] sm:$0xff] }
 0x1f4   :  { %v3154_v53 = vpop.f32.mrf.mxu0  ;;  %8932 = vmatmul.mubr.msk.f32.vlgmr.msra.gmra.mxu1 %vm3948_vm3, %v14921_v3  ;;  %v2109_v27 = vadd.f32 %v15447_v56, %v11379_v32  ;;  %v12016_v32 = vpop.f32.mrf.mxu1 }
 0x1f5   :  { %15444 = vst [vmem:[#allocation109_spill] sm:$0xff] %v11971_v12  ;;  %v14918_v16 = vmax.f32 %v11971_v12, 0.0  ;;  %v3637_v33 = vadd.f32 %v3154_v53, %v2084_v13  ;;  %v11986_v59 = vadd.f32 %v11939_v30, %v3638_v51  ;;  %v15449_v53 = vld [vmem:[#allocation9_spill] sm:$0xff] }
 0x1f6   :  { %v8776_v57 = vpop.f32.mrf.mxu0 }
 0x1f7   :  { %15445 = vst [vmem:[#allocation110_spill] sm:$0xff] %v11986_v59  ;;  %v11991_v38 = vadd.f32 %v11939_v30, %v3637_v33  ;;  %v3640_v46 = vadd.f32 %v8776_v57, %v2099_v15  ;;  %8934 = vmatprep.mubr.msk.f32.mxu1 %vm3948_vm3, %v14918_v16  ;;  %v14925_v60 = vmax.f32 %v11986_v59, 0.0  ;;  %v15450_v15 = vld [vmem:[#allocation10_spill] sm:$0xff] }
 0x1f8   :  { %v3164_v44 = vpop.f32.mrf.mxu0  ;;  %8935 = vmatmul.mubr.msk.f32.gmra.mxu1 %vm3948_vm3, %v14920_v6  ;;  %v2104_v33 = vadd.f32 %v15450_v15, %v15449_v53  ;;  %v15456_v6 = vld [vmem:[#allocation11_spill] sm:$0xff] }
 0x1f9   :  { %15446 = vst [vmem:[#allocation111_spill] sm:$0xff] %v11991_v38  ;;  %v14919_v49 = vmax.f32 %v11991_v38, 0.0  ;;  %v3639_v23 = vadd.f32 %v3164_v44, %v2094_v24  ;;  %v12006_v13 = vadd.f32 %v11939_v30, %v3640_v46  ;;  %v15452_v46 = vld [vmem:[#allocation22_spill] sm:$0xff]  ;;  %v15453_v44 = vld [vmem:[#allocation60_spill] sm:$0xff] }
 0x1fa   :  { %v8779_v51 = vpop.f32.mrf.mxu0  ;;  %v2119_v56 = vadd.f32 %v15453_v44, %v15452_v46  ;;  %v12036_v46 = vpop.f32.mrf.mxu1 }
 0x1fb   :  { %15448 = vst [vmem:[#allocation58_spill] sm:$0xff] %v12006_v13  ;;  %v12011_v57 = vadd.f32 %v11939_v30, %v3639_v23  ;;  %v3642_v16 = vadd.f32 %v8779_v51, %v2109_v27  ;;  %8937 = vmatprep.mubr.msk.f32.mxu1 %vm3948_vm3, %v14919_v49  ;;  %v14930_v23 = vmax.f32 %v12006_v13, 0.0  ;;  %v15455_v49 = vld [vmem:[#allocation54_spill] sm:$0xff] }
 0x1fc   :  { %v3174_v24 = vpop.f32.mrf.mxu0  ;;  %8938 = vmatmul.mubr.msk.f32.gmra.mxu1 %vm3948_vm3, %v14925_v60  ;;  %v2114_v3 = vadd.f32 %v15456_v6, %v15455_v49  ;;  %v15462_v60 = vld [vmem:[#allocation12_spill] sm:$0xff] }
 0x1fd   :  { %15451 = vst [vmem:[#allocation9_spill] sm:$0xff] %v12011_v57  ;;  %v14924_v53 = vmax.f32 %v12011_v57, 0.0  ;;  %v3641_v15 = vadd.f32 %v3174_v24, %v2104_v33  ;;  %v12026_v27 = vadd.f32 %v11939_v30, %v3642_v16  ;;  %v15458_v16 = vld [vmem:[#allocation55_spill] sm:$0xff]  ;;  %v15459_v24 = vld [vmem:[#allocation62_spill] sm:$0xff] }
 0x1fe   :  { %v8782_v51 = vpop.f32.mrf.mxu0  ;;  %v2129_v44 = vadd.f32 %v15459_v24, %v15458_v16  ;;  %v12056_v16 = vpop.f32.mrf.mxu1 }
 0x1ff   :  { %15454 = vst [vmem:[#allocation10_spill] sm:$0xff] %v12026_v27  ;;  %v12031_v19 = vadd.f32 %v11939_v30, %v3641_v15  ;;  %v3644_v59 = vadd.f32 %v8782_v51, %v2119_v56  ;;  %8940 = vmatprep.mubr.msk.f32.mxu1 %vm3948_vm3, %v14924_v53  ;;  %v14935_v15 = vmax.f32 %v12026_v27, 0.0  ;;  %v15461_v53 = vld [vmem:[#allocation56_spill] sm:$0xff] }
 0x200   :  { %v3184_v33 = vpop.f32.mrf.mxu0  ;;  %8941 = vmatmul.mubr.msk.f32.gmra.mxu1 %vm3948_vm3, %v14930_v23  ;;  %v2124_v57 = vadd.f32 %v15462_v60, %v15461_v53  ;;  %v15468_v23 = vld [vmem:[#allocation27_spill] sm:$0xff] }
 0x201   :  { %15457 = vst [vmem:[#allocation22_spill] sm:$0xff] %v12031_v19  ;;  %v14929_v6 = vmax.f32 %v12031_v19, 0.0  ;;  %v3643_v49 = vadd.f32 %v3184_v33, %v2114_v3  ;;  %v12046_v56 = vadd.f32 %v11939_v30, %v3644_v59  ;;  %v15464_v59 = vld [vmem:[#allocation57_spill] sm:$0xff]  ;;  %v15465_v33 = vld [vmem:[#allocation26_spill] sm:$0xff] }
 0x202   :  { %v8785_v51 = vpop.f32.mrf.mxu0  ;;  %v2139_v24 = vadd.f32 %v15465_v33, %v15464_v59  ;;  %v12076_v59 = vpop.f32.mrf.mxu1 }
 0x203   :  { %15460 = vst [vmem:[#allocation60_spill] sm:$0xff] %v12046_v56  ;;  %v12051_v38 = vadd.f32 %v11939_v30, %v3643_v49  ;;  %v3646_v13 = vadd.f32 %v8785_v51, %v2129_v44  ;;  %8943 = vmatprep.mubr.msk.f32.mxu1 %vm3948_vm3, %v14929_v6  ;;  %v14940_v49 = vmax.f32 %v12046_v56, 0.0  ;;  %v15467_v6 = vld [vmem:[#allocation23_spill] sm:$0xff] }
 0x204   :  { %v3194_v3 = vpop.f32.mrf.mxu0  ;;  %8944 = vmatmul.mubr.msk.f32.gmra.mxu1 %vm3948_vm3, %v14935_v15  ;;  %v2134_v19 = vadd.f32 %v15468_v23, %v15467_v6  ;;  %v15474_v15 = vld [vmem:[#allocation30_spill] sm:$0xff] }
 0x205   :  { %15463 = vst [vmem:[#allocation54_spill] sm:$0xff] %v12051_v38  ;;  %v14934_v60 = vmax.f32 %v12051_v38, 0.0  ;;  %v3645_v53 = vadd.f32 %v3194_v3, %v2124_v57  ;;  %v12066_v44 = vadd.f32 %v11939_v30, %v3646_v13  ;;  %v15470_v13 = vld [vmem:[#allocation59_spill] sm:$0xff] }
 0x206   :  { %v8788_v51 = vpop.f32.mrf.mxu0  ;;  %v15471_v3 = vld [vmem:[#allocation15_spill] sm:$0xff] }
 0x207   :  { %15466 = vst [vmem:[#allocation11_spill] sm:$0xff] %v12066_v44  ;;  %v12071_v48 = vadd.f32 %v11939_v30, %v3645_v53  ;;  %v3648_v27 = vadd.f32 %v8788_v51, %v2139_v24  ;;  %8946 = vmatprep.mubr.msk.f32.mxu1 %vm3948_vm3, %v14934_v60  ;;  %v2149_v33 = vadd.f32 %v15471_v3, %v15470_v13  ;;  %v14944_v53 = vmax.f32 %v12066_v44, 0.0  ;;  %v15473_v60 = vld [vmem:[#allocation24_spill] sm:$0xff]  ;;  %v12096_v13 = vpop.f32.mrf.mxu1 }
 0x208   :  { %v3204_v57 = vpop.f32.mrf.mxu0  ;;  %8947 = vmatmul.mubr.msk.f32.gmra.mxu1 %vm3948_vm3, %v14940_v49  ;;  %v2144_v38 = vadd.f32 %v15474_v15, %v15473_v60 }
 0x209   :  { %15469 = vst [vmem:[#allocation55_spill] sm:$0xff] %v12071_v48  ;;  %v14939_v23 = vmax.f32 %v12071_v48, 0.0  ;;  %v3647_v6 = vadd.f32 %v3204_v57, %v2134_v19  ;;  %v12086_v24 = vadd.f32 %v11939_v30, %v3648_v27  ;;  %v15476_v27 = vld [vmem:[#allocation61_spill] sm:$0xff]  ;;  %v15477_v57 = vld [vmem:[#allocation32_spill] sm:$0xff] }
 0x20a   :  { %v8791_v51 = vpop.f32.mrf.mxu0  ;;  %v2159_v3 = vadd.f32 %v15477_v57, %v15476_v27  ;;  %v12116_v27 = vpop.f32.mrf.mxu1 }
 0x20b   :  { %15472 = vst [vmem:[#allocation62_spill] sm:$0xff] %v12086_v24  ;;  %v12091_v12 = vadd.f32 %v11939_v30, %v3647_v6  ;;  %v3650_v56 = vadd.f32 %v8791_v51, %v2149_v33  ;;  %8949 = vmatprep.mubr.msk.f32.mxu1 %vm3948_vm3, %v14939_v23  ;;  %v14947_v6 = vmax.f32 %v12086_v24, 0.0  ;;  %v15479_v23 = vld [vmem:[#allocation25_spill] sm:$0xff] }
 0x20c   :  { %v3214_v19 = vpop.f32.mrf.mxu0  ;;  %8950 = vmatmul.mubr.msk.f32.gmra.mxu1 %vm3948_vm3, %v14944_v53  ;;  %v2154_v49 = vadd.f32 %v11558_v2, %v15479_v23 }
 0x20d   :  { %15475 = vst [vmem:[#allocation56_spill] sm:$0xff] %v12091_v12  ;;  %v14943_v15 = vmax.f32 %v12091_v12, 0.0  ;;  %v3649_v60 = vadd.f32 %v3214_v19, %v2144_v38  ;;  %v12106_v33 = vadd.f32 %v11939_v30, %v3650_v56  ;;  %v15481_v56 = vld [vmem:[#allocation63_spill] sm:$0xff] }
 0x20e   :  { %v8794_v51 = vpop.f32.mrf.mxu0  ;;  %v2169_v19 = vadd.f32 %v11575_v20, %v15481_v56  ;;  %v12136_v20 = vpop.f32.mrf.mxu1 }
 0x20f   :  { %15478 = vst [vmem:[#allocation12_spill] sm:$0xff] %v12106_v33  ;;  %v12111_v48 = vadd.f32 %v11939_v30, %v3649_v60  ;;  %v3652_v44 = vadd.f32 %v8794_v51, %v2159_v3  ;;  %8952 = vmatprep.mubr.msk.f32.mxu1 %vm3948_vm3, %v14943_v15  ;;  %v14950_v57 = vmax.f32 %v12106_v33, 0.0  ;;  %v15483_v51 = vld [vmem:[#allocation13_spill] sm:$0xff] }
 0x210   :  { %v3224_v38 = vpop.f32.mrf.mxu0  ;;  %8953 = vmatmul.mubr.msk.f32.gmra.mxu1 %vm3948_vm3, %v14947_v6  ;;  %v2164_v15 = vadd.f32 %v11587_v35, %v15483_v51  ;;  %v15487_v51 = vld [vmem:[#allocation14_spill] sm:$0xff] }
 0x211   :  { %15480 = vst [vmem:[#allocation57_spill] sm:$0xff] %v12111_v48  ;;  %v14946_v2 = vmax.f32 %v12111_v48, 0.0  ;;  %v3651_v23 = vadd.f32 %v3224_v38, %v2154_v49  ;;  %v12126_v3 = vadd.f32 %v11939_v30, %v3652_v44  ;;  %v15485_v44 = vld [vmem:[#allocation64_spill] sm:$0xff] }
 0x212   :  { %v8797_v60 = vpop.f32.mrf.mxu0  ;;  %v2179_v38 = vadd.f32 %v11599_v14, %v15485_v44  ;;  %v12156_v14 = vpop.f32.mrf.mxu1 }
 0x213   :  { %15482 = vst [vmem:[#allocation26_spill] sm:$0xff] %v12126_v3  ;;  %v12131_v53 = vadd.f32 %v11939_v30, %v3651_v23  ;;  %v3654_v24 = vadd.f32 %v8797_v60, %v2169_v19  ;;  %8955 = vmatprep.mubr.msk.f32.mxu1 %vm3948_vm3, %v14946_v2  ;;  %v14953_v23 = vmax.f32 %v12126_v3, 0.0  ;;  %v2174_v2 = vadd.f32 %v11611_v9, %v15487_v51  ;;  %v15491_v51 = vld [vmem:[#allocation66_spill] sm:$0xff] }
 0x214   :  { %v3234_v49 = vpop.f32.mrf.mxu0  ;;  %8956 = vmatmul.mubr.msk.f32.gmra.mxu1 %vm3948_vm3, %v14950_v57 }
 0x215   :  { %15484 = vst [vmem:[#allocation23_spill] sm:$0xff] %v12131_v53  ;;  %v14949_v35 = vmax.f32 %v12131_v53, 0.0  ;;  %v3653_v56 = vadd.f32 %v3234_v49, %v2164_v15  ;;  %v12146_v19 = vadd.f32 %v11939_v30, %v3654_v24  ;;  %v15489_v24 = vld [vmem:[#allocation65_spill] sm:$0xff] }
 0x216   :  { %v8800_v60 = vpop.f32.mrf.mxu0  ;;  %v2189_v49 = vadd.f32 %v11623_v47, %v15489_v24  ;;  %v12176_v47 = vpop.f32.mrf.mxu1 }
 0x217   :  { %15486 = vst [vmem:[#allocation27_spill] sm:$0xff] %v12146_v19  ;;  %v12151_v6 = vadd.f32 %v11939_v30, %v3653_v56  ;;  %v3656_v33 = vadd.f32 %v8800_v60, %v2179_v38  ;;  %8958 = vmatprep.mubr.msk.f32.mxu1 %vm3948_vm3, %v14949_v35  ;;  %v14956_v56 = vmax.f32 %v12146_v19, 0.0  ;;  %v2184_v35 = vadd.f32 %v11635_v40, %v15491_v51  ;;  %v15495_v51 = vld [vmem:[#allocation16_spill] sm:$0xff] }
 0x218   :  { %v3244_v15 = vpop.f32.mrf.mxu0  ;;  %8959 = vmatmul.mubr.msk.f32.gmra.mxu1 %vm3948_vm3, %v14953_v23 }
 0x219   :  { %15488 = vst [vmem:[#allocation59_spill] sm:$0xff] %v12151_v6  ;;  %v14952_v9 = vmax.f32 %v12151_v6, 0.0  ;;  %v3655_v44 = vadd.f32 %v3244_v15, %v2174_v2  ;;  %v12166_v38 = vadd.f32 %v11939_v30, %v3656_v33  ;;  %v15493_v33 = vld [vmem:[#allocation67_spill] sm:$0xff] }
 0x21a   :  { %v8803_v60 = vpop.f32.mrf.mxu0  ;;  %v2199_v15 = vadd.f32 %v11647_v63, %v15493_v33  ;;  %v12196_v63 = vpop.f32.mrf.mxu1 }
 0x21b   :  { %15490 = vst [vmem:[#allocation15_spill] sm:$0xff] %v12166_v38  ;;  %v12171_v57 = vadd.f32 %v11939_v30, %v3655_v44  ;;  %v3658_v3 = vadd.f32 %v8803_v60, %v2189_v49  ;;  %8961 = vmatprep.mubr.msk.f32.mxu1 %vm3948_vm3, %v14952_v9  ;;  %v14959_v44 = vmax.f32 %v12166_v38, 0.0  ;;  %v2194_v9 = vadd.f32 %v11659_v21, %v15495_v51  ;;  %v15499_v51 = vld [vmem:[#allocation17_spill] sm:$0xff] }
 0x21c   :  { %v3254_v2 = vpop.f32.mrf.mxu0  ;;  %8962 = vmatmul.mubr.msk.f32.gmra.mxu1 %vm3948_vm3, %v14956_v56 }
 0x21d   :  { %15492 = vst [vmem:[#allocation24_spill] sm:$0xff] %v12171_v57  ;;  %v14955_v40 = vmax.f32 %v12171_v57, 0.0  ;;  %v3657_v24 = vadd.f32 %v3254_v2, %v2184_v35  ;;  %v12186_v49 = vadd.f32 %v11939_v30, %v3658_v3  ;;  %v15497_v3 = vld [vmem:[#allocation68_spill] sm:$0xff] }
 0x21e   :  { %v8806_v60 = vpop.f32.mrf.mxu0  ;;  %v2209_v2 = vadd.f32 %v11671_v1, %v15497_v3  ;;  %v12216_v1 = vpop.f32.mrf.mxu1 }
 0x21f   :  { %15494 = vst [vmem:[#allocation30_spill] sm:$0xff] %v12186_v49  ;;  %v12191_v23 = vadd.f32 %v11939_v30, %v3657_v24  ;;  %v3660_v19 = vadd.f32 %v8806_v60, %v2199_v15  ;;  %8964 = vmatprep.mubr.msk.f32.mxu1 %vm3948_vm3, %v14955_v40  ;;  %v14966_v24 = vmax.f32 %v12186_v49, 0.0  ;;  %v2204_v40 = vadd.f32 %v11683_v54, %v15499_v51  ;;  %v15503_v51 = vld [vmem:[#allocation33_spill] sm:$0xff] }
 0x220   :  { %v3264_v35 = vpop.f32.mrf.mxu0  ;;  %8965 = vmatmul.mubr.msk.f32.gmra.mxu1 %vm3948_vm3, %v14959_v44 }
 0x221   :  { %15496 = vst [vmem:[#allocation61_spill] sm:$0xff] %v12191_v23  ;;  %v14958_v21 = vmax.f32 %v12191_v23, 0.0  ;;  %v3659_v33 = vadd.f32 %v3264_v35, %v2194_v9  ;;  %v12206_v15 = vadd.f32 %v11939_v30, %v3660_v19  ;;  %v15501_v19 = vld [vmem:[#allocation69_spill] sm:$0xff] }
 0x222   :  { %v8809_v60 = vpop.f32.mrf.mxu0  ;;  %v2219_v35 = vadd.f32 %v11695_v5, %v15501_v19  ;;  %v12236_v5 = vpop.f32.mrf.mxu1 }
 0x223   :  { %15498 = vst [vmem:[#allocation32_spill] sm:$0xff] %v12206_v15  ;;  %v12211_v56 = vadd.f32 %v11939_v30, %v3659_v33  ;;  %v3662_v38 = vadd.f32 %v8809_v60, %v2209_v2  ;;  %8967 = vmatprep.mubr.msk.f32.mxu1 %vm3948_vm3, %v14958_v21  ;;  %v14963_v33 = vmax.f32 %v12206_v15, 0.0  ;;  %v2214_v21 = vadd.f32 %v11707_v39, %v15503_v51 }
 0x224   :  { %v3274_v9 = vpop.f32.mrf.mxu0  ;;  %8968 = vmatmul.mubr.msk.f32.gmra.mxu1 %vm3948_vm3, %v14966_v24 }
 0x225   :  { %15500 = vst [vmem:[#allocation25_spill] sm:$0xff] %v12211_v56  ;;  %v14961_v54 = vmax.f32 %v12211_v56, 0.0  ;;  %v3661_v3 = vadd.f32 %v3274_v9, %v2204_v40  ;;  %v12226_v2 = vadd.f32 %v11939_v30, %v3662_v38  ;;  %v2229_v38 = vadd.f32 %v11719_v25, %v11567_v62  ;;  %v12256_v62 = vpop.f32.mrf.mxu1 }
 0x226   :  { %v8812_v60 = vpop.f32.mrf.mxu0 }
 0x227   :  { %15502 = vst [vmem:[#allocation63_spill] sm:$0xff] %v12226_v2  ;;  %v12231_v44 = vadd.f32 %v11939_v30, %v3661_v3  ;;  %v3664_v49 = vadd.f32 %v8812_v60, %v2219_v35  ;;  %8970 = vmatprep.mubr.msk.f32.mxu1 %vm3948_vm3, %v14961_v54  ;;  %v14965_v19 = vmax.f32 %v12226_v2, 0.0  ;;  %v2224_v60 = vadd.f32 %v11731_v22, %v11577_v50 }
 0x228   :  { %v3284_v40 = vpop.f32.mrf.mxu0  ;;  %8971 = vmatmul.mubr.msk.f32.gmra.mxu1 %vm3948_vm3, %v14963_v33 }
 0x229   :  { %15504 = vst [vmem:[#allocation13_spill] sm:$0xff] %v12231_v44  ;;  %v14962_v39 = vmax.f32 %v12231_v44, 0.0  ;;  %v3663_v9 = vadd.f32 %v3284_v40, %v2214_v21  ;;  %v12246_v35 = vadd.f32 %v11939_v30, %v3664_v49  ;;  %v2239_v49 = vadd.f32 %v11741_v4, %v11579_v37  ;;  %v12276_v37 = vpop.f32.mrf.mxu1 }
 0x22a   :  { %v8815_v3 = vpop.f32.mrf.mxu0 }
 0x22b   :  { %15505 = vst [vmem:[#allocation64_spill] sm:$0xff] %v12246_v35  ;;  %v12251_v51 = vadd.f32 %v11939_v30, %v3663_v9  ;;  %v3666_v54 = vadd.f32 %v8815_v3, %v2229_v38  ;;  %8973 = vmatprep.mubr.msk.f32.mxu1 %vm3948_vm3, %v14962_v39  ;;  %v14970_v21 = vmax.f32 %v12246_v35, 0.0  ;;  %v15508_v9 = vld [vmem:[#allocation34_spill] sm:$0xff] }
 0x22c   :  { %v3294_v25 = vpop.f32.mrf.mxu0  ;;  %8974 = vmatmul.mubr.msk.f32.gmra.mxu1 %vm3948_vm3, %v14965_v19  ;;  %v2234_v3 = vadd.f32 %v15508_v9, %v11589_v7  ;;  %v15514_v19 = vld [vmem:[#allocation36_spill] sm:$0xff] }
 0x22d   :  { %15506 = vst [vmem:[#allocation14_spill] sm:$0xff] %v12251_v51  ;;  %v14964_v50 = vmax.f32 %v12251_v51, 0.0  ;;  %v3665_v22 = vadd.f32 %v3294_v25, %v2224_v60  ;;  %v12266_v40 = vadd.f32 %v11939_v30, %v3666_v54  ;;  %v15510_v54 = vld [vmem:[#allocation18_spill] sm:$0xff]  ;;  %v15511_v60 = vld [vmem:[#allocation35_spill] sm:$0xff] }
 0x22e   :  { %v8818_v38 = vpop.f32.mrf.mxu0  ;;  %v2249_v25 = vadd.f32 %v15511_v60, %v15510_v54  ;;  %v12296_v54 = vpop.f32.mrf.mxu1 }
 0x22f   :  { %15507 = vst [vmem:[#allocation65_spill] sm:$0xff] %v12266_v40  ;;  %v12271_v39 = vadd.f32 %v11939_v30, %v3665_v22  ;;  %v3668_v33 = vadd.f32 %v8818_v38, %v2239_v49  ;;  %8976 = vmatprep.mubr.msk.f32.mxu1 %vm3948_vm3, %v14964_v50  ;;  %v14975_v22 = vmax.f32 %v12266_v40, 0.0  ;;  %v15513_v50 = vld [vmem:[#allocation70_spill] sm:$0xff] }
 0x230   :  { %v3304_v4 = vpop.f32.mrf.mxu0  ;;  %8977 = vmatmul.mubr.msk.f32.gmra.mxu1 %vm3948_vm3, %v14970_v21  ;;  %v2244_v24 = vadd.f32 %v15514_v19, %v15513_v50  ;;  %v15520_v21 = vld [vmem:[#allocation40_spill] sm:$0xff] }
 0x231   :  { %15509 = vst [vmem:[#allocation66_spill] sm:$0xff] %v12271_v39  ;;  %v14969_v7 = vmax.f32 %v12271_v39, 0.0  ;;  %v3667_v9 = vadd.f32 %v3304_v4, %v2234_v3  ;;  %v12286_v49 = vadd.f32 %v11939_v30, %v3668_v33  ;;  %v15516_v33 = vld [vmem:[#allocation71_spill] sm:$0xff]  ;;  %v15517_v4 = vld [vmem:[#allocation38_spill] sm:$0xff] }
 0x232   :  { %v8821_v38 = vpop.f32.mrf.mxu0  ;;  %v2259_v60 = vadd.f32 %v15517_v4, %v15516_v33  ;;  %v12316_v33 = vpop.f32.mrf.mxu1 }
 0x233   :  { %15512 = vst [vmem:[#allocation67_spill] sm:$0xff] %v12286_v49  ;;  %v12291_v51 = vadd.f32 %v11939_v30, %v3667_v9  ;;  %v3670_v35 = vadd.f32 %v8821_v38, %v2249_v25  ;;  %8979 = vmatprep.mubr.msk.f32.mxu1 %vm3948_vm3, %v14969_v7  ;;  %v14980_v9 = vmax.f32 %v12286_v49, 0.0  ;;  %v15519_v7 = vld [vmem:[#allocation72_spill] sm:$0xff] }
 0x234   :  { %v3314_v3 = vpop.f32.mrf.mxu0  ;;  %8980 = vmatmul.mubr.msk.f32.gmra.mxu1 %vm3948_vm3, %v14975_v22  ;;  %v2254_v39 = vadd.f32 %v15520_v21, %v15519_v7  ;;  %v15526_v22 = vld [vmem:[#allocation44_spill] sm:$0xff] }
 0x235   :  { %15515 = vst [vmem:[#allocation16_spill] sm:$0xff] %v12291_v51  ;;  %v14974_v19 = vmax.f32 %v12291_v51, 0.0  ;;  %v3669_v50 = vadd.f32 %v3314_v3, %v2244_v24  ;;  %v12306_v25 = vadd.f32 %v11939_v30, %v3670_v35  ;;  %v15522_v35 = vld [vmem:[#allocation73_spill] sm:$0xff]  ;;  %v15523_v3 = vld [vmem:[#allocation42_spill] sm:$0xff] }
 0x236   :  { %v8824_v38 = vpop.f32.mrf.mxu0  ;;  %v2269_v4 = vadd.f32 %v15523_v3, %v15522_v35  ;;  %v12336_v35 = vpop.f32.mrf.mxu1 }
 0x237   :  { %15518 = vst [vmem:[#allocation68_spill] sm:$0xff] %v12306_v25  ;;  %v12311_v2 = vadd.f32 %v11939_v30, %v3669_v50  ;;  %v3672_v40 = vadd.f32 %v8824_v38, %v2259_v60  ;;  %8982 = vmatprep.mubr.msk.f32.mxu1 %vm3948_vm3, %v14974_v19  ;;  %v14985_v50 = vmax.f32 %v12306_v25, 0.0  ;;  %v15525_v19 = vld [vmem:[#allocation74_spill] sm:$0xff] }
 0x238   :  { %v3324_v24 = vpop.f32.mrf.mxu0  ;;  %8983 = vmatmul.mubr.msk.f32.gmra.mxu1 %vm3948_vm3, %v14980_v9  ;;  %v2264_v51 = vadd.f32 %v15526_v22, %v15525_v19  ;;  %v15532_v9 = vld [vmem:[#allocation48_spill] sm:$0xff] }
 0x239   :  { %15521 = vst [vmem:[#allocation17_spill] sm:$0xff] %v12311_v2  ;;  %v14979_v21 = vmax.f32 %v12311_v2, 0.0  ;;  %v3671_v7 = vadd.f32 %v3324_v24, %v2254_v39  ;;  %v12326_v60 = vadd.f32 %v11939_v30, %v3672_v40  ;;  %v15528_v40 = vld [vmem:[#allocation75_spill] sm:$0xff]  ;;  %v15529_v24 = vld [vmem:[#allocation46_spill] sm:$0xff] }
 0x23a   :  { %v8827_v38 = vpop.f32.mrf.mxu0  ;;  %v2279_v3 = vadd.f32 %v15529_v24, %v15528_v40  ;;  %v12356_v40 = vpop.f32.mrf.mxu1 }
 0x23b   :  { %15524 = vst [vmem:[#allocation69_spill] sm:$0xff] %v12326_v60  ;;  %v12331_v44 = vadd.f32 %v11939_v30, %v3671_v7  ;;  %v3674_v49 = vadd.f32 %v8827_v38, %v2269_v4  ;;  %8985 = vmatprep.mubr.msk.f32.mxu1 %vm3948_vm3, %v14979_v21  ;;  %v14988_v7 = vmax.f32 %v12326_v60, 0.0  ;;  %v15531_v21 = vld [vmem:[#allocation76_spill] sm:$0xff] }
 0x23c   :  { %v3334_v39 = vpop.f32.mrf.mxu0  ;;  %8986 = vmatmul.mubr.msk.f32.gmra.mxu1 %vm3948_vm3, %v14985_v50  ;;  %v2274_v2 = vadd.f32 %v15532_v9, %v15531_v21 }
 0x23d   :  { %15527 = vst [vmem:[#allocation33_spill] sm:$0xff] %v12331_v44  ;;  %v14984_v22 = vmax.f32 %v12331_v44, 0.0  ;;  %v3673_v19 = vadd.f32 %v3334_v39, %v2264_v51  ;;  %v12346_v4 = vadd.f32 %v11939_v30, %v3674_v49  ;;  %v15534_v49 = vld [vmem:[#allocation77_spill] sm:$0xff] }
 0x23e   :  { %v8830_v38 = vpop.f32.mrf.mxu0  ;;  %v2289_v39 = vadd.f32 %v11859_v34, %v15534_v49  ;;  %v12376_v34 = vpop.f32.mrf.mxu1 }
 0x23f   :  { %15530 = vst [vmem:[#allocation34_spill] sm:$0xff] %v12346_v4  ;;  %v12351_v15 = vadd.f32 %v11939_v30, %v3673_v19  ;;  %v3676_v25 = vadd.f32 %v8830_v38, %v2279_v3  ;;  %8988 = vmatprep.mubr.msk.f32.mxu1 %vm3948_vm3, %v14984_v22  ;;  %v14991_v24 = vmax.f32 %v12346_v4, 0.0  ;;  %v15536_v38 = vld [vmem:[#allocation78_spill] sm:$0xff] }
 0x240   :  { %v3344_v51 = vpop.f32.mrf.mxu0  ;;  %8989 = vmatmul.mubr.msk.f32.gmra.mxu1 %vm3948_vm3, %v14988_v7  ;;  %v2284_v22 = vadd.f32 %v11871_v36, %v15536_v38  ;;  %v15540_v38 = vld [vmem:[#allocation80_spill] sm:$0xff] }
 0x241   :  { %15533 = vst [vmem:[#allocation18_spill] sm:$0xff] %v12351_v15  ;;  %v14987_v9 = vmax.f32 %v12351_v15, 0.0  ;;  %v3675_v21 = vadd.f32 %v3344_v51, %v2274_v2  ;;  %v12366_v3 = vadd.f32 %v11939_v30, %v3676_v25  ;;  %v15538_v25 = vld [vmem:[#allocation79_spill] sm:$0xff] }
 0x242   :  { %v8833_v19 = vpop.f32.mrf.mxu0  ;;  %v2299_v51 = vadd.f32 %v11883_v0, %v15538_v25  ;;  %v12396_v0 = vpop.f32.mrf.mxu1 }
 0x243   :  { %15535 = vst [vmem:[#allocation35_spill] sm:$0xff] %v12366_v3  ;;  %v12371_v50 = vadd.f32 %v11939_v30, %v3675_v21  ;;  %v3678_v60 = vadd.f32 %v8833_v19, %v2289_v39  ;;  %8991 = vmatprep.mubr.msk.f32.mxu1 %vm3948_vm3, %v14987_v9  ;;  %v14994_v21 = vmax.f32 %v12366_v3, 0.0  ;;  %v2294_v9 = vadd.f32 %v11893_v29, %v15540_v38  ;;  %v15544_v38 = vld [vmem:[#allocation82_spill] sm:$0xff] }
 0x244   :  { %v3354_v2 = vpop.f32.mrf.mxu0  ;;  %8992 = vmatmul.mubr.msk.f32.gmra.mxu1 %vm3948_vm3, %v14991_v24 }
 0x245   :  { %15537 = vst [vmem:[#allocation70_spill] sm:$0xff] %v12371_v50  ;;  %v14990_v36 = vmax.f32 %v12371_v50, 0.0  ;;  %v3677_v49 = vadd.f32 %v3354_v2, %v2284_v22  ;;  %v12386_v39 = vadd.f32 %v11939_v30, %v3678_v60  ;;  %v15542_v60 = vld [vmem:[#allocation81_spill] sm:$0xff] }
 0x246   :  { %v8836_v19 = vpop.f32.mrf.mxu0  ;;  %v2309_v2 = vadd.f32 %v11903_v43, %v15542_v60  ;;  %v12416_v43 = vpop.f32.mrf.mxu1 }
 0x247   :  { %15539 = vst [vmem:[#allocation36_spill] sm:$0xff] %v12386_v39  ;;  %v12391_v7 = vadd.f32 %v11939_v30, %v3677_v49  ;;  %v3680_v15 = vadd.f32 %v8836_v19, %v2299_v51  ;;  %8994 = vmatprep.mubr.msk.f32.mxu1 %vm3948_vm3, %v14990_v36  ;;  %v14997_v49 = vmax.f32 %v12386_v39, 0.0  ;;  %v2304_v36 = vadd.f32 %v11915_v11, %v15544_v38  ;;  %v15548_v38 = vld [vmem:[#allocation84_spill] sm:$0xff] }
 0x248   :  { %v3364_v22 = vpop.f32.mrf.mxu0  ;;  %8995 = vmatmul.mubr.msk.f32.gmra.mxu1 %vm3948_vm3, %v14994_v21 }
 0x249   :  { %15541 = vst [vmem:[#allocation71_spill] sm:$0xff] %v12391_v7  ;;  %v14993_v29 = vmax.f32 %v12391_v7, 0.0  ;;  %v3679_v25 = vadd.f32 %v3364_v22, %v2294_v9  ;;  %v12406_v51 = vadd.f32 %v11939_v30, %v3680_v15  ;;  %v15546_v15 = vld [vmem:[#allocation83_spill] sm:$0xff] }
 0x24a   :  { %v8839_v19 = vpop.f32.mrf.mxu0  ;;  %v2319_v22 = vadd.f32 %v11927_v31, %v15546_v15  ;;  %v12436_v31 = vpop.f32.mrf.mxu1 }
 0x24b   :  { %15543 = vst [vmem:[#allocation38_spill] sm:$0xff] %v12406_v51  ;;  %v12411_v24 = vadd.f32 %v11939_v30, %v3679_v25  ;;  %v3682_v3 = vadd.f32 %v8839_v19, %v2309_v2  ;;  %8997 = vmatprep.mubr.msk.f32.mxu1 %vm3948_vm3, %v14993_v29  ;;  %v15000_v25 = vmax.f32 %v12406_v51, 0.0  ;;  %v2314_v29 = vadd.f32 %v11946_v10, %v15548_v38  ;;  %v15552_v38 = vld [vmem:[#allocation86_spill] sm:$0xff] }
 0x24c   :  { %v3374_v9 = vpop.f32.mrf.mxu0  ;;  %8998 = vmatmul.mubr.msk.f32.gmra.mxu1 %vm3948_vm3, %v14997_v49 }
 0x24d   :  { %15545 = vst [vmem:[#allocation72_spill] sm:$0xff] %v12411_v24  ;;  %v14996_v11 = vmax.f32 %v12411_v24, 0.0  ;;  %v3681_v60 = vadd.f32 %v3374_v9, %v2304_v36  ;;  %v12426_v2 = vadd.f32 %v11939_v30, %v3682_v3  ;;  %v15550_v3 = vld [vmem:[#allocation85_spill] sm:$0xff] }
 0x24e   :  { %v8842_v19 = vpop.f32.mrf.mxu0  ;;  %v2329_v9 = vadd.f32 %v11959_v17, %v15550_v3  ;;  %v12456_v17 = vpop.f32.mrf.mxu1 }
 0x24f   :  { %15547 = vst [vmem:[#allocation40_spill] sm:$0xff] %v12426_v2  ;;  %v12431_v21 = vadd.f32 %v11939_v30, %v3681_v60  ;;  %v3684_v39 = vadd.f32 %v8842_v19, %v2319_v22  ;;  %9000 = vmatprep.mubr.msk.f32.mxu1 %vm3948_vm3, %v14996_v11  ;;  %v15003_v60 = vmax.f32 %v12426_v2, 0.0  ;;  %v2324_v11 = vadd.f32 %v11976_v8, %v15552_v38  ;;  %v15556_v38 = vld [vmem:[#allocation28_spill] sm:$0xff] }
 0x250   :  { %v3384_v36 = vpop.f32.mrf.mxu0  ;;  %9001 = vmatmul.mubr.msk.f32.gmra.mxu1 %vm3948_vm3, %v15000_v25 }
 0x251   :  { %15549 = vst [vmem:[#allocation73_spill] sm:$0xff] %v12431_v21  ;;  %v14999_v10 = vmax.f32 %v12431_v21, 0.0  ;;  %v3683_v15 = vadd.f32 %v3384_v36, %v2314_v29  ;;  %v12446_v22 = vadd.f32 %v11939_v30, %v3684_v39  ;;  %v15554_v39 = vld [vmem:[#allocation87_spill] sm:$0xff] }
 0x252   :  { %v8845_v19 = vpop.f32.mrf.mxu0  ;;  %v2339_v36 = vadd.f32 %v11996_v26, %v15554_v39  ;;  %v12476_v26 = vpop.f32.mrf.mxu1 }
 0x253   :  { %15551 = vst [vmem:[#allocation42_spill] sm:$0xff] %v12446_v22  ;;  %v12451_v49 = vadd.f32 %v11939_v30, %v3683_v15  ;;  %v3686_v51 = vadd.f32 %v8845_v19, %v2329_v9  ;;  %9003 = vmatprep.mubr.msk.f32.mxu1 %vm3948_vm3, %v14999_v10  ;;  %v15006_v15 = vmax.f32 %v12446_v22, 0.0  ;;  %v2334_v10 = vadd.f32 %v12016_v32, %v15556_v38  ;;  %v15560_v38 = vld [vmem:[#allocation29_spill] sm:$0xff] }
 0x254   :  { %v3394_v29 = vpop.f32.mrf.mxu0  ;;  %9004 = vmatmul.mubr.msk.f32.gmra.mxu1 %vm3948_vm3, %v15003_v60 }
 0x255   :  { %15553 = vst [vmem:[#allocation74_spill] sm:$0xff] %v12451_v49  ;;  %v15002_v8 = vmax.f32 %v12451_v49, 0.0  ;;  %v3685_v3 = vadd.f32 %v3394_v29, %v2324_v11  ;;  %v12466_v9 = vadd.f32 %v11939_v30, %v3686_v51  ;;  %v15558_v51 = vld [vmem:[#allocation88_spill] sm:$0xff] }
 0x256   :  { %v8848_v19 = vpop.f32.mrf.mxu0  ;;  %v2349_v29 = vadd.f32 %v12036_v46, %v15558_v51  ;;  %v12496_v46 = vpop.f32.mrf.mxu1 }
 0x257   :  { %15555 = vst [vmem:[#allocation44_spill] sm:$0xff] %v12466_v9  ;;  %v12471_v25 = vadd.f32 %v11939_v30, %v3685_v3  ;;  %v3688_v21 = vadd.f32 %v8848_v19, %v2339_v36  ;;  %9006 = vmatprep.mubr.msk.f32.mxu1 %vm3948_vm3, %v15002_v8  ;;  %v15009_v3 = vmax.f32 %v12466_v9, 0.0  ;;  %v2344_v8 = vadd.f32 %v12056_v16, %v15560_v38  ;;  %v15564_v38 = vld [vmem:[#allocation31_spill] sm:$0xff] }
 0x258   :  { %v3404_v11 = vpop.f32.mrf.mxu0  ;;  %9007 = vmatmul.mubr.msk.f32.gmra.mxu1 %vm3948_vm3, %v15006_v15 }
 0x259   :  { %15557 = vst [vmem:[#allocation75_spill] sm:$0xff] %v12471_v25  ;;  %v15005_v32 = vmax.f32 %v12471_v25, 0.0  ;;  %v3687_v39 = vadd.f32 %v3404_v11, %v2334_v10  ;;  %v12486_v36 = vadd.f32 %v11939_v30, %v3688_v21  ;;  %v15562_v21 = vld [vmem:[#allocation89_spill] sm:$0xff] }
 0x25a   :  { %v8851_v19 = vpop.f32.mrf.mxu0  ;;  %v2359_v11 = vadd.f32 %v12076_v59, %v15562_v21  ;;  %v12516_v59 = vpop.f32.mrf.mxu1 }
 0x25b   :  { %15559 = vst [vmem:[#allocation46_spill] sm:$0xff] %v12486_v36  ;;  %v12491_v60 = vadd.f32 %v11939_v30, %v3687_v39  ;;  %v3690_v22 = vadd.f32 %v8851_v19, %v2349_v29  ;;  %9009 = vmatprep.mubr.msk.f32.mxu1 %vm3948_vm3, %v15005_v32  ;;  %v15012_v39 = vmax.f32 %v12486_v36, 0.0  ;;  %v2354_v32 = vadd.f32 %v12096_v13, %v15564_v38  ;;  %v15568_v38 = vld [vmem:[#allocation91_spill] sm:$0xff] }
 0x25c   :  { %v3414_v10 = vpop.f32.mrf.mxu0  ;;  %9010 = vmatmul.mubr.msk.f32.gmra.mxu1 %vm3948_vm3, %v15009_v3 }
 0x25d   :  { %15561 = vst [vmem:[#allocation76_spill] sm:$0xff] %v12491_v60  ;;  %v15008_v16 = vmax.f32 %v12491_v60, 0.0  ;;  %v3689_v51 = vadd.f32 %v3414_v10, %v2344_v8  ;;  %v12506_v29 = vadd.f32 %v11939_v30, %v3690_v22  ;;  %v15566_v22 = vld [vmem:[#allocation90_spill] sm:$0xff] }
 0x25e   :  { %v8854_v19 = vpop.f32.mrf.mxu0  ;;  %v2369_v10 = vadd.f32 %v12116_v27, %v15566_v22  ;;  %v12536_v27 = vpop.f32.mrf.mxu1 }
 0x25f   :  { %15563 = vst [vmem:[#allocation48_spill] sm:$0xff] %v12506_v29  ;;  %v12511_v15 = vadd.f32 %v11939_v30, %v3689_v51  ;;  %v3692_v25 = vadd.f32 %v8854_v19, %v2359_v11  ;;  %9012 = vmatprep.mubr.msk.f32.mxu1 %vm3948_vm3, %v15008_v16  ;;  %v15015_v51 = vmax.f32 %v12506_v29, 0.0  ;;  %v2364_v16 = vadd.f32 %v12136_v20, %v15568_v38  ;;  %v15572_v38 = vld [vmem:[#allocation93_spill] sm:$0xff] }
 0x260   :  { %v3424_v8 = vpop.f32.mrf.mxu0  ;;  %9013 = vmatmul.mubr.msk.f32.gmra.mxu1 %vm3948_vm3, %v15012_v39 }
 0x261   :  { %15565 = vst [vmem:[#allocation77_spill] sm:$0xff] %v12511_v15  ;;  %v15011_v13 = vmax.f32 %v12511_v15, 0.0  ;;  %v3691_v21 = vadd.f32 %v3424_v8, %v2354_v32  ;;  %v12526_v11 = vadd.f32 %v11939_v30, %v3692_v25  ;;  %v15570_v25 = vld [vmem:[#allocation92_spill] sm:$0xff] }
 0x262   :  { %v8857_v19 = vpop.f32.mrf.mxu0  ;;  %v2379_v8 = vadd.f32 %v12156_v14, %v15570_v25  ;;  %v12556_v14 = vpop.f32.mrf.mxu1 }
 0x263   :  { %15567 = vst [vmem:[#allocation78_spill] sm:$0xff] %v12526_v11  ;;  %v12531_v3 = vadd.f32 %v11939_v30, %v3691_v21  ;;  %v3694_v36 = vadd.f32 %v8857_v19, %v2369_v10  ;;  %9015 = vmatprep.mubr.msk.f32.mxu1 %vm3948_vm3, %v15011_v13  ;;  %v15018_v21 = vmax.f32 %v12526_v11, 0.0  ;;  %v2374_v13 = vadd.f32 %v12176_v47, %v15572_v38  ;;  %v15576_v38 = vld [vmem:[#allocation95_spill] sm:$0xff] }
 0x264   :  { %v3434_v32 = vpop.f32.mrf.mxu0  ;;  %9016 = vmatmul.mubr.msk.f32.gmra.mxu1 %vm3948_vm3, %v15015_v51 }
 0x265   :  { %15569 = vst [vmem:[#allocation79_spill] sm:$0xff] %v12531_v3  ;;  %v15014_v20 = vmax.f32 %v12531_v3, 0.0  ;;  %v3693_v22 = vadd.f32 %v3434_v32, %v2364_v16  ;;  %v12546_v10 = vadd.f32 %v11939_v30, %v3694_v36  ;;  %v15574_v36 = vld [vmem:[#allocation94_spill] sm:$0xff] }
 0x266   :  { %v8860_v19 = vpop.f32.mrf.mxu0  ;;  %v2389_v32 = vadd.f32 %v12196_v63, %v15574_v36  ;;  %v12576_v63 = vpop.f32.mrf.mxu1 }
 0x267   :  { %15571 = vst [vmem:[#allocation80_spill] sm:$0xff] %v12546_v10  ;;  %v12551_v39 = vadd.f32 %v11939_v30, %v3693_v22  ;;  %v3696_v29 = vadd.f32 %v8860_v19, %v2379_v8  ;;  %9018 = vmatprep.mubr.msk.f32.mxu1 %vm3948_vm3, %v15014_v20  ;;  %v15021_v22 = vmax.f32 %v12546_v10, 0.0  ;;  %v2384_v20 = vadd.f32 %v12216_v1, %v15576_v38  ;;  %v15580_v38 = vld [vmem:[#allocation37_spill] sm:$0xff] }
 0x268   :  { %v3444_v16 = vpop.f32.mrf.mxu0  ;;  %9019 = vmatmul.mubr.msk.f32.gmra.mxu1 %vm3948_vm3, %v15018_v21 }
 0x269   :  { %15573 = vst [vmem:[#allocation81_spill] sm:$0xff] %v12551_v39  ;;  %v15017_v47 = vmax.f32 %v12551_v39, 0.0  ;;  %v3695_v25 = vadd.f32 %v3444_v16, %v2374_v13  ;;  %v12566_v8 = vadd.f32 %v11939_v30, %v3696_v29  ;;  %v15578_v29 = vld [vmem:[#allocation96_spill] sm:$0xff] }
 0x26a   :  { %v8863_v19 = vpop.f32.mrf.mxu0  ;;  %v2399_v16 = vadd.f32 %v12236_v5, %v15578_v29  ;;  %v12596_v5 = vpop.f32.mrf.mxu1 }
 0x26b   :  { %15575 = vst [vmem:[#allocation82_spill] sm:$0xff] %v12566_v8  ;;  %v12571_v51 = vadd.f32 %v11939_v30, %v3695_v25  ;;  %v3698_v11 = vadd.f32 %v8863_v19, %v2389_v32  ;;  %9021 = vmatprep.mubr.msk.f32.mxu1 %vm3948_vm3, %v15017_v47  ;;  %v15024_v25 = vmax.f32 %v12566_v8, 0.0  ;;  %v2394_v47 = vadd.f32 %v12256_v62, %v15580_v38  ;;  %v15584_v38 = vld [vmem:[#allocation39_spill] sm:$0xff] }
 0x26c   :  { %v3454_v13 = vpop.f32.mrf.mxu0  ;;  %9022 = vmatmul.mubr.msk.f32.gmra.mxu1 %vm3948_vm3, %v15021_v22 }
 0x26d   :  { %15577 = vst [vmem:[#allocation83_spill] sm:$0xff] %v12571_v51  ;;  %v15020_v1 = vmax.f32 %v12571_v51, 0.0  ;;  %v3697_v36 = vadd.f32 %v3454_v13, %v2384_v20  ;;  %v12586_v32 = vadd.f32 %v11939_v30, %v3698_v11  ;;  %v15582_v11 = vld [vmem:[#allocation97_spill] sm:$0xff] }
 0x26e   :  { %v8866_v19 = vpop.f32.mrf.mxu0  ;;  %v2409_v13 = vadd.f32 %v12276_v37, %v15582_v11  ;;  %v12616_v37 = vpop.f32.mrf.mxu1 }
 0x26f   :  { %15579 = vst [vmem:[#allocation84_spill] sm:$0xff] %v12586_v32  ;;  %v12591_v21 = vadd.f32 %v11939_v30, %v3697_v36  ;;  %v3700_v10 = vadd.f32 %v8866_v19, %v2399_v16  ;;  %9024 = vmatprep.mubr.msk.f32.mxu1 %vm3948_vm3, %v15020_v1  ;;  %v15027_v36 = vmax.f32 %v12586_v32, 0.0  ;;  %v2404_v1 = vadd.f32 %v12296_v54, %v15584_v38  ;;  %v15588_v38 = vld [vmem:[#allocation41_spill] sm:$0xff] }
 0x270   :  { %v3464_v20 = vpop.f32.mrf.mxu0  ;;  %9025 = vmatmul.mubr.msk.f32.gmra.mxu1 %vm3948_vm3, %v15024_v25 }
 0x271   :  { %15581 = vst [vmem:[#allocation85_spill] sm:$0xff] %v12591_v21  ;;  %v15023_v62 = vmax.f32 %v12591_v21, 0.0  ;;  %v3699_v29 = vadd.f32 %v3464_v20, %v2394_v47  ;;  %v12606_v16 = vadd.f32 %v11939_v30, %v3700_v10  ;;  %v15586_v10 = vld [vmem:[#allocation98_spill] sm:$0xff] }
 0x272   :  { %v8869_v19 = vpop.f32.mrf.mxu0  ;;  %v2419_v20 = vadd.f32 %v12316_v33, %v15586_v10  ;;  %v12636_v33 = vpop.f32.mrf.mxu1 }
 0x273   :  { %15583 = vst [vmem:[#allocation86_spill] sm:$0xff] %v12606_v16  ;;  %v12611_v22 = vadd.f32 %v11939_v30, %v3699_v29  ;;  %v3702_v8 = vadd.f32 %v8869_v19, %v2409_v13  ;;  %9027 = vmatprep.mubr.msk.f32.mxu1 %vm3948_vm3, %v15023_v62  ;;  %v15030_v29 = vmax.f32 %v12606_v16, 0.0  ;;  %v2414_v62 = vadd.f32 %v12336_v35, %v15588_v38  ;;  %v15592_v38 = vld [vmem:[#allocation43_spill] sm:$0xff] }
 0x274   :  { %v3474_v47 = vpop.f32.mrf.mxu0  ;;  %9028 = vmatmul.mubr.msk.f32.gmra.mxu1 %vm3948_vm3, %v15027_v36 }
 0x275   :  { %15585 = vst [vmem:[#allocation87_spill] sm:$0xff] %v12611_v22  ;;  %v15026_v54 = vmax.f32 %v12611_v22, 0.0  ;;  %v3701_v11 = vadd.f32 %v3474_v47, %v2404_v1  ;;  %v12626_v13 = vadd.f32 %v11939_v30, %v3702_v8  ;;  %v15590_v8 = vld [vmem:[#allocation99_spill] sm:$0xff] }
 0x276   :  { %v8872_v19 = vpop.f32.mrf.mxu0  ;;  %v2429_v47 = vadd.f32 %v12356_v40, %v15590_v8  ;;  %v12656_v40 = vpop.f32.mrf.mxu1 }
 0x277   :  { %15587 = vst [vmem:[#allocation28_spill] sm:$0xff] %v12626_v13  ;;  %v12631_v25 = vadd.f32 %v11939_v30, %v3701_v11  ;;  %v3704_v21 = vadd.f32 %v8872_v19, %v2419_v20  ;;  %9030 = vmatprep.mubr.msk.f32.mxu1 %vm3948_vm3, %v15026_v54  ;;  %v15033_v11 = vmax.f32 %v12626_v13, 0.0  ;;  %v2424_v54 = vadd.f32 %v12376_v34, %v15592_v38  ;;  %v15596_v38 = vld [vmem:[#allocation45_spill] sm:$0xff] }
 0x278   :  { %v3484_v1 = vpop.f32.mrf.mxu0  ;;  %9031 = vmatmul.mubr.msk.f32.gmra.mxu1 %vm3948_vm3, %v15030_v29 }
 0x279   :  { %15589 = vst [vmem:[#allocation88_spill] sm:$0xff] %v12631_v25  ;;  %v15029_v35 = vmax.f32 %v12631_v25, 0.0  ;;  %v3703_v10 = vadd.f32 %v3484_v1, %v2414_v62  ;;  %v12646_v20 = vadd.f32 %v11939_v30, %v3704_v21  ;;  %v15594_v21 = vld [vmem:[#allocation100_spill] sm:$0xff] }
 0x27a   :  { %v8875_v19 = vpop.f32.mrf.mxu0  ;;  %v2439_v1 = vadd.f32 %v12396_v0, %v15594_v21  ;;  %v12676_v0 = vpop.f32.mrf.mxu1 }
 0x27b   :  { %15591 = vst [vmem:[#allocation29_spill] sm:$0xff] %v12646_v20  ;;  %v12651_v36 = vadd.f32 %v11939_v30, %v3703_v10  ;;  %v3706_v22 = vadd.f32 %v8875_v19, %v2429_v47  ;;  %9033 = vmatprep.mubr.msk.f32.mxu1 %vm3948_vm3, %v15029_v35  ;;  %v15036_v10 = vmax.f32 %v12646_v20, 0.0  ;;  %v2434_v35 = vadd.f32 %v12416_v43, %v15596_v38  ;;  %v15600_v38 = vld [vmem:[#allocation47_spill] sm:$0xff] }
 0x27c   :  { %v3494_v62 = vpop.f32.mrf.mxu0  ;;  %9034 = vmatmul.mubr.msk.f32.gmra.mxu1 %vm3948_vm3, %v15033_v11 }
 0x27d   :  { %15593 = vst [vmem:[#allocation89_spill] sm:$0xff] %v12651_v36  ;;  %v15032_v34 = vmax.f32 %v12651_v36, 0.0  ;;  %v3705_v8 = vadd.f32 %v3494_v62, %v2424_v54  ;;  %v12666_v47 = vadd.f32 %v11939_v30, %v3706_v22  ;;  %v15598_v22 = vld [vmem:[#allocation101_spill] sm:$0xff] }
 0x27e   :  { %v8878_v19 = vpop.f32.mrf.mxu0  ;;  %v2449_v62 = vadd.f32 %v12436_v31, %v15598_v22  ;;  %v12696_v31 = vpop.f32.mrf.mxu1 }
 0x27f   :  { %15595 = vst [vmem:[#allocation31_spill] sm:$0xff] %v12666_v47  ;;  %v12671_v29 = vadd.f32 %v11939_v30, %v3705_v8  ;;  %v3708_v25 = vadd.f32 %v8878_v19, %v2439_v1  ;;  %9036 = vmatprep.mubr.msk.f32.mxu1 %vm3948_vm3, %v15032_v34  ;;  %v15037_v8 = vmax.f32 %v12666_v47, 0.0  ;;  %v2444_v34 = vadd.f32 %v12456_v17, %v15600_v38 }
 0x280   :  { %v3504_v54 = vpop.f32.mrf.mxu0  ;;  %9037 = vmatmul.mubr.msk.f32.gmra.mxu1 %vm3948_vm3, %v15036_v10 }
 0x281   :  { %15597 = vst [vmem:[#allocation90_spill] sm:$0xff] %v12671_v29  ;;  %v15035_v43 = vmax.f32 %v12671_v29, 0.0  ;;  %v3707_v21 = vadd.f32 %v3504_v54, %v2434_v35  ;;  %v12686_v1 = vadd.f32 %v11939_v30, %v3708_v25  ;;  %v9486_v25 = vmov 0   ;;  %v15602_v54 = vld [vmem:[#allocation102_spill] sm:$0xff] }
 0x282   :  { %v8881_v19 = vpop.f32.mrf.mxu0  ;;  %9130 = vset.pattern.permute.xlu0 %v9486_v25  ;;  %v2459_v17 = vadd.f32 %v12476_v26, %v15602_v54  ;;  %9131 = vset.pattern.permute.xlu1 %v9486_v25  ;;  %v12716_v26 = vpop.f32.mrf.mxu1  ;;  %v12728_v25 = vld [vmem:[%s14872_s2] ss:$0 sm:$0xff] }
 0x283   :  { %15599 = vst [vmem:[#allocation91_spill] sm:$0xff] %v12686_v1  ;;  %v12691_v11 = vadd.f32 %v11939_v30, %v3707_v21  ;;  %v3710_v20 = vadd.f32 %v8881_v19, %v2449_v62  ;;  %9039 = vmatprep.mubr.msk.f32.mxu1 %vm3948_vm3, %v15035_v43  ;;  %v15039_v62 = vmax.f32 %v12686_v1, 0.0  ;;  %v15604_v43 = vld [vmem:[#allocation49_spill] sm:$0xff] }
 0x284   :  { %v3514_v35 = vpop.f32.mrf.mxu0  ;;  %9040 = vmatmul.mubr.msk.f32.gmra.mxu1 %vm3948_vm3, %v15037_v8  ;;  %v2454_v10 = vadd.f32 %v12496_v46, %v15604_v43 }
 0x285   :  { %15601 = vst [vmem:[#allocation92_spill] sm:$0xff] %v12691_v11  ;;  %v15040_v22 = vmax.f32 %v12691_v11, 0.0  ;;  %v3709_v21 = vadd.f32 %v3514_v35, %v2444_v34  ;;  %v12706_v19 = vadd.f32 %v11939_v30, %v3710_v20  ;;  %v15606_v20 = vld [vmem:[#allocation103_spill] sm:$0xff] }
 0x286   :  { %v8884_v38 = vpop.f32.mrf.mxu0  ;;  %v2469_v35 = vadd.f32 %v12516_v59, %v15606_v20 }
 0x287   :  { %15603 = vst [vmem:[#allocation93_spill] sm:$0xff] %v12706_v19  ;;  %v12711_v8 = vadd.f32 %v11939_v30, %v3709_v21  ;;  %v3712_v47 = vadd.f32 %v8884_v38, %v2459_v17  ;;  %9042 = vmatprep.mubr.msk.f32.mxu1 %vm3948_vm3, %v15040_v22  ;;  %v15057_v30 = vmax.f32 %v12706_v19, 0.0  ;;  %v15608_v21 = vld [vmem:[#allocation50_spill] sm:$0xff] }
 0x288   :  { %v3524_v34 = vpop.f32.mrf.mxu0  ;;  %9043 = vmatmul.mubr.msk.f32.gmra.mxu1 %vm3948_vm3, %v15039_v62  ;;  %v2464_v38 = vadd.f32 %v12536_v27, %v15608_v21  ;;  %v15612_v21 = vld [vmem:[#allocation52_spill] sm:$0xff] }
 0x289   :  { %15605 = vst [vmem:[#allocation94_spill] sm:$0xff] %v12711_v8  ;;  %v15041_v46 = vmax.f32 %v12711_v8, 0.0  ;;  %v3711_v43 = vadd.f32 %v3524_v34, %v2454_v10  ;;  %v12731_v54 = vadd.f32 %v12728_v25, %v3712_v47  ;;  %v2513_v10 = vpop.f32.mrf.mxu1  ;;  %v15610_v47 = vld [vmem:[#allocation51_spill] sm:$0xff] }
 0x28a   :  { %v8887_v17 = vpop.f32.mrf.mxu0  ;;  %v2479_v20 = vadd.f32 %v12556_v14, %v15610_v47 }
 0x28b   :  { %15607 = vst [vmem:[#allocation95_spill] sm:$0xff] %v12731_v54  ;;  %v12736_v62 = vadd.f32 %v12728_v25, %v3711_v43  ;;  %v3714_v59 = vadd.f32 %v8887_v17, %v2469_v35  ;;  %9045 = vmatprep.mubr.msk.f32.mxu1 %vm3948_vm3, %v15041_v46  ;;  %v15054_v43 = vmax.f32 %v12731_v54, 0.0  ;;  %v2474_v46 = vadd.f32 %v12576_v63, %v15612_v21  ;;  %v8747_v14 = vpop.f32.mrf.mxu1 }
 0x28c   :  { %v3534_v34 = vpop.f32.mrf.mxu0  ;;  %9046 = vmatmul.mubr.msk.f32.gmra.mxu1 %vm3948_vm3, %v15057_v30 }
 0x28d   :  { %15609 = vst [vmem:[#allocation96_spill] sm:$0xff] %v12736_v62  ;;  %v15044_v22 = vmax.f32 %v12736_v62, 0.0  ;;  %v3713_v27 = vadd.f32 %v3534_v34, %v2464_v38  ;;  %v12749_v35 = vadd.f32 %v12728_v25, %v3714_v59  ;;  %v2489_v38 = vadd.f32 %v12596_v5, %v11876_v45  ;;  %v2523_v45 = vpop.f32.mrf.mxu1 }
 0x28e   :  { %v8890_v17 = vpop.f32.mrf.mxu0 }
 0x28f   :  { %15611 = vst [vmem:[#allocation37_spill] sm:$0xff] %v12749_v35  ;;  %v12754_v8 = vadd.f32 %v12728_v25, %v3713_v27  ;;  %v3716_v19 = vadd.f32 %v8890_v17, %v2479_v20  ;;  %9048 = vmatprep.mubr.msk.f32.mxu1 %vm3948_vm3, %v15044_v22  ;;  %v15047_v34 = vmax.f32 %v12749_v35, 0.0  ;;  %v2484_v17 = vadd.f32 %v12616_v37, %v11885_v42 }
 0x290   :  { %v3544_v47 = vpop.f32.mrf.mxu0  ;;  %9049 = vmatmul.mubr.msk.f32.gmra.mxu1 %vm3948_vm3, %v15054_v43 }
 0x291   :  { %15613 = vst [vmem:[#allocation97_spill] sm:$0xff] %v12754_v8  ;;  %v15045_v59 = vmax.f32 %v12754_v8, 0.0  ;;  %v3715_v63 = vadd.f32 %v3544_v47, %v2474_v46  ;;  %v12767_v20 = vadd.f32 %v12728_v25, %v3716_v19  ;;  %v2499_v19 = vadd.f32 %v12636_v33, %v11888_v55  ;;  %v8750_v55 = vpop.f32.mrf.mxu1 }
 0x292   :  { %v8893_v27 = vpop.f32.mrf.mxu0 }
 0x293   :  { %15614 = vst [vmem:[#allocation39_spill] sm:$0xff] %v12767_v20  ;;  %v12772_v21 = vadd.f32 %v12728_v25, %v3715_v63  ;;  %v3718_v22 = vadd.f32 %v8893_v27, %v2489_v38  ;;  %9051 = vmatprep.mubr.msk.f32.mxu1 %vm3948_vm3, %v15045_v59  ;;  %v15049_v37 = vmax.f32 %v12767_v20, 0.0  ;;  %v2494_v63 = vadd.f32 %v12656_v40, %v11895_v41 }
 0x294   :  { %v3554_v5 = vpop.f32.mrf.mxu0  ;;  %9052 = vmatmul.mubr.msk.f32.gmra.mxu1 %vm3948_vm3, %v15047_v34 }
 0x295   :  { %15615 = vst [vmem:[#allocation98_spill] sm:$0xff] %v12772_v21  ;;  %v15046_v46 = vmax.f32 %v12772_v21, 0.0  ;;  %v3717_v42 = vadd.f32 %v3554_v5, %v2484_v17  ;;  %v12785_v47 = vadd.f32 %v12728_v25, %v3718_v22  ;;  %v15618_v22 = vld [vmem:[#allocation53_spill] sm:$0xff] }
 0x296   :  { %v8896_v38 = vpop.f32.mrf.mxu0  ;;  %v2509_v17 = vadd.f32 %v12676_v0, %v15618_v22  ;;  %v2533_v0 = vpop.f32.mrf.mxu1 }
 0x297   :  { %15616 = vst [vmem:[#allocation41_spill] sm:$0xff] %v12785_v47  ;;  %v12790_v27 = vadd.f32 %v12728_v25, %v3717_v42  ;;  %v3720_v59 = vadd.f32 %v8896_v38, %v2499_v19  ;;  %9054 = vmatprep.mubr.msk.f32.mxu1 %vm3948_vm3, %v15046_v46  ;;  %v15050_v40 = vmax.f32 %v12785_v47, 0.0  ;;  %v2504_v38 = vadd.f32 %v12696_v31, %v11905_v18 }
 0x298   :  { %v3564_v33 = vpop.f32.mrf.mxu0  ;;  %9055 = vmatmul.mubr.msk.f32.gmra.mxu1 %vm3948_vm3, %v15049_v37 }
 0x299   :  { %15617 = vst [vmem:[#allocation99_spill] sm:$0xff] %v12790_v27  ;;  %v15048_v5 = vmax.f32 %v12790_v27, 0.0  ;;  %v3719_v41 = vadd.f32 %v3564_v33, %v2494_v63  ;;  %v12803_v19 = vadd.f32 %v12728_v25, %v3720_v59  ;;  %v15621_v59 = vld [vmem:[#allocation104_spill] sm:$0xff] }
 0x29a   :  { %v8899_v42 = vpop.f32.mrf.mxu0  ;;  %v2519_v63 = vadd.f32 %v12716_v26, %v15621_v59  ;;  %v8753_v26 = vpop.f32.mrf.mxu1 }
 0x29b   :  { %15619 = vst [vmem:[#allocation43_spill] sm:$0xff] %v12803_v19  ;;  %v12808_v46 = vadd.f32 %v12728_v25, %v3719_v41  ;;  %v3722_v34 = vadd.f32 %v8899_v42, %v2509_v17  ;;  %9057 = vmatprep.mubr.msk.f32.mxu1 %vm3948_vm3, %v15048_v5  ;;  %v15052_v31 = vmax.f32 %v12803_v19, 0.0  ;;  %v2514_v42 = vadd.f32 %v2513_v10, %v11917_v28 }
 0x29c   :  { %v3574_v22 = vpop.f32.mrf.mxu0  ;;  %9058 = vmatmul.mubr.msk.f32.gmra.mxu1 %vm3948_vm3, %v15050_v40 }
 0x29d   :  { %15620 = vst [vmem:[#allocation100_spill] sm:$0xff] %v12808_v46  ;;  %v15051_v33 = vmax.f32 %v12808_v46, 0.0  ;;  %v3721_v18 = vadd.f32 %v3574_v22, %v2504_v38  ;;  %v12821_v17 = vadd.f32 %v12728_v25, %v3722_v34  ;;  %v15624_v38 = vld [vmem:[#allocation105_spill] sm:$0xff] }
 0x29e   :  { %v8902_v41 = vpop.f32.mrf.mxu0  ;;  %v2529_v34 = vadd.f32 %v8747_v14, %v15624_v38  ;;  %v2543_v14 = vpop.f32.mrf.mxu1 }
 0x29f   :  { %15622 = vst [vmem:[#allocation45_spill] sm:$0xff] %v12821_v17  ;;  %v12825_v5 = vadd.f32 %v12728_v25, %v3721_v18  ;;  %v3724_v37 = vadd.f32 %v8902_v41, %v2519_v63  ;;  %9060 = vmatprep.mubr.msk.f32.mxu1 %vm3948_vm3, %v15051_v33  ;;  %v15055_v28 = vmax.f32 %v12821_v17, 0.0  ;;  %v2524_v18 = vadd.f32 %v2523_v45, %v11929_v52 }
 0x2a0   :  { %v3584_v59 = vpop.f32.mrf.mxu0  ;;  %9061 = vmatmul.mubr.msk.f32.gmra.mxu1 %vm3948_vm3, %v15052_v31 }
 0x2a1   :  { %15623 = vst [vmem:[#allocation101_spill] sm:$0xff] %v12825_v5  ;;  %v15053_v22 = vmax.f32 %v12825_v5, 0.0  ;;  %v3723_v40 = vadd.f32 %v3584_v59, %v2514_v42  ;;  %v12837_v10 = vadd.f32 %v12728_v25, %v3724_v37  ;;  %v15627_v42 = vld [vmem:[#allocation6_spill] sm:$0xff] }
 0x2a2   :  { %v8905_v63 = vpop.f32.mrf.mxu0  ;;  %v2539_v37 = vadd.f32 %v8750_v55, %v15627_v42  ;;  %v8756_v55 = vpop.f32.mrf.mxu1 }
 0x2a3   :  { %15625 = vst [vmem:[#allocation47_spill] sm:$0xff] %v12837_v10  ;;  %v12841_v41 = vadd.f32 %v12728_v25, %v3723_v40  ;;  %v3726_v33 = vadd.f32 %v8905_v63, %v2529_v34  ;;  %9063 = vmatprep.mubr.msk.f32.mxu1 %vm3948_vm3, %v15053_v22  ;;  %v15058_v52 = vmax.f32 %v12837_v10, 0.0  ;;  %v15629_v34 = vld [vmem:[#allocation19_spill] sm:$0xff] }
 0x2a4   :  { %v3594_v38 = vpop.f32.mrf.mxu0  ;;  %9064 = vmatmul.mubr.msk.f32.gmra.mxu1 %vm3948_vm3, %v15055_v28  ;;  %v2534_v63 = vadd.f32 %v2533_v0, %v15629_v34 }
 0x2a5   :  { %15626 = vst [vmem:[#allocation102_spill] sm:$0xff] %v12841_v41  ;;  %v15056_v59 = vmax.f32 %v12841_v41, 0.0  ;;  %v3725_v31 = vadd.f32 %v3594_v38, %v2524_v18  ;;  %v12853_v45 = vadd.f32 %v12728_v25, %v3726_v33  ;;  %v15631_v18 = vld [vmem:[#allocation7_spill] sm:$0xff] }
 0x2a6   :  { %v8908_v40 = vpop.f32.mrf.mxu0  ;;  %v2549_v33 = vadd.f32 %v8753_v26, %v15631_v18  ;;  %v2553_v26 = vpop.f32.mrf.mxu1 }
 0x2a7   :  { %15628 = vst [vmem:[#allocation49_spill] sm:$0xff] %v12853_v45  ;;  %v12857_v22 = vadd.f32 %v12728_v25, %v3725_v31  ;;  %v3728_v43 = vadd.f32 %v8908_v40, %v2539_v37  ;;  %9066 = vmatprep.mubr.msk.f32.mxu1 %vm3948_vm3, %v15056_v59  ;;  %v15065_v0 = vmax.f32 %v12853_v45, 0.0  ;;  %v15633_v40 = vld [vmem:[#allocation20_spill] sm:$0xff] }
 0x2a8   :  { %v3604_v42 = vpop.f32.mrf.mxu0  ;;  %9067 = vmatmul.mubr.msk.f32.gmra.mxu1 %vm3948_vm3, %v15058_v52  ;;  %v2544_v34 = vadd.f32 %v2543_v14, %v15633_v40 }
 0x2a9   :  { %15630 = vst [vmem:[#allocation103_spill] sm:$0xff] %v12857_v22  ;;  %v15059_v38 = vmax.f32 %v12857_v22, 0.0  ;;  %v3727_v28 = vadd.f32 %v3604_v42, %v2534_v63  ;;  %v12869_v31 = vadd.f32 %v12728_v25, %v3728_v43  ;;  %v15635_v63 = vld [vmem:[#allocation8_spill] sm:$0xff] }
 0x2aa   :  { %v8911_v37 = vpop.f32.mrf.mxu0  ;;  %v2559_v43 = vadd.f32 %v8756_v55, %v15635_v63 }
 0x2ab   :  { %15632 = vst [vmem:[#allocation50_spill] sm:$0xff] %v12869_v31  ;;  %v12873_v59 = vadd.f32 %v12728_v25, %v3727_v28  ;;  %v3730_v30 = vadd.f32 %v8911_v37, %v2549_v33  ;;  %9069 = vmatprep.mubr.msk.f32.mxu1 %vm3948_vm3, %v15059_v38  ;;  %v15063_v14 = vmax.f32 %v12869_v31, 0.0  ;;  %v15637_v37 = vld [vmem:[#allocation21_spill] sm:$0xff] }
 0x2ac   :  { %v3614_v18 = vpop.f32.mrf.mxu0  ;;  %9070 = vmatmul.mubr.msk.f32.gmra.mxu1 %vm3948_vm3, %v15065_v0  ;;  %v2554_v40 = vadd.f32 %v2553_v26, %v15637_v37 }
 0x2ad   :  { %15634 = vst [vmem:[#allocation51_spill] sm:$0xff] %v12873_v59  ;;  %v15064_v42 = vmax.f32 %v12873_v59, 0.0  ;;  %v3729_v52 = vadd.f32 %v3614_v18, %v2544_v34  ;;  %v12885_v28 = vadd.f32 %v12728_v25, %v3730_v30 }
 0x2ae   :  { %v8914_v33 = vpop.f32.mrf.mxu0 }
 0x2af   :  { %15636 = vst [vmem:[#allocation52_spill] sm:$0xff] %v12885_v28  ;;  %v12889_v38 = vadd.f32 %v12728_v25, %v3729_v52  ;;  %v3732_v22 = vadd.f32 %v8914_v33, %v2559_v43  ;;  %9072 = vmatprep.mubr.msk.f32.mxu1 %vm3948_vm3, %v15064_v42  ;;  %v15061_v18 = vmax.f32 %v12885_v28, 0.0 }
 0x2b0   :  { %v3624_v55 = vpop.f32.mrf.mxu0  ;;  %9073 = vmatmul.mubr.msk.f32.gmra.mxu1 %vm3948_vm3, %v15063_v14 }
 0x2b1   :  { %15638 = vst [vmem:[#allocation53_spill] sm:$0xff] %v12889_v38  ;;  %v15062_v34 = vmax.f32 %v12889_v38, 0.0  ;;  %v3731_v30 = vadd.f32 %v3624_v55, %v2554_v40  ;;  %v12900_v26 = vadd.f32 %v12728_v25, %v3732_v22 }
 0x2b3   :  { %15639 = vst [vmem:[#allocation104_spill] sm:$0xff] %v12900_v26  ;;  %v12903_v52 = vadd.f32 %v12728_v25, %v3731_v30  ;;  %9075 = vmatprep.mubr.msk.f32.mxu1 %vm3948_vm3, %v15062_v34  ;;  %v15071_v33 = vmax.f32 %v12900_v26, 0.0 }
 0x2b4   :  { %v8933_v63 = vpop.f32.mrf.mxu1  ;;  %9076 = vmatmul.mubr.msk.f32.gmra.mxu1 %vm3948_vm3, %v15061_v18 }
 0x2b5   :  { %15640 = vst [vmem:[#allocation105_spill] sm:$0xff] %v12903_v52  ;;  %v15070_v43 = vmax.f32 %v12903_v52, 0.0  ;;  %v4816_v22 = vsel %vm4814_vm4, %v8933_v63, -inf }
 0x2b6   :  { %v4315_v37 = vpop.f32.mrf.mxu1 }
 0x2b7   :  { %v4815_v25 = vsel %vm4814_vm4, %v4315_v37, -inf  ;;  %9078 = vmatprep.mubr.msk.f32.mxu1 %vm3948_vm3, %v15070_v43 }
 0x2b8   :  { %v4817_v40 = vmax.f32 %v4815_v25, %v4816_v22  ;;  %v8936_v55 = vpop.f32.mrf.mxu1  ;;  %9079 = vmatmul.mubr.msk.f32.gmra.mxu1 %vm3948_vm3, %v15071_v33 }
 0x2b9   :  { %v4825_v34 = vsel %vm4814_vm4, %v8936_v55, -inf }
 0x2ba   :  { %v4818_v30 = vrot.slane %v4817_v40, 4  ;;  %v4325_v18 = vpop.f32.mrf.mxu1 }
 0x2bb   :  { %v4824_v14 = vsel %vm4814_vm4, %v4325_v18, -inf }
 0x2bc   :  { %v4819_v42 = vmax.f32 %v4817_v40, %v4818_v30  ;;  %v4826_v0 = vmax.f32 %v4824_v14, %v4825_v34  ;;  %v12923_v28 = vpop.f32.mrf.mxu1 }
 0x2bd   :  { %v4834_v22 = vsel %vm4814_vm4, %v12923_v28, -inf }
 0x2be   :  { %v4820_v38 = vrot.slane %v4819_v42, 2  ;;  %v4827_v52 = vrot.slane %v4826_v0, 4  ;;  %v4335_v31 = vpop.f32.mrf.mxu1 }
 0x2bf   :  { %v4833_v25 = vsel %vm4814_vm4, %v4335_v31, -inf }
 0x2c0   :  { %v4821_v43 = vmax.f32 %v4819_v42, %v4820_v38  ;;  %v4828_v33 = vmax.f32 %v4826_v0, %v4827_v52  ;;  %v4835_v26 = vmax.f32 %v4833_v25, %v4834_v22  ;;  %v12928_v59 = vpop.f32.mrf.mxu1 }
 0x2c1   :  { %v4843_v14 = vsel %vm4814_vm4, %v12928_v59, -inf }
 0x2c2   :  { %v4822_v45 = vrot.slane %v4821_v43, 1  ;;  %v4829_v10 = vrot.slane %v4828_v33, 2  ;;  %v4836_v41 = vrot.slane %v4835_v26, 4  ;;  %v12930_v40 = vpop.f32.mrf.mxu1 }
 0x2c3   :  { %v4842_v34 = vsel %vm4814_vm4, %v12930_v40, -inf }
 0x2c4   :  { %v4823_v30 = vmax.f32 %v4821_v43, %v4822_v45  ;;  %v4830_v17 = vmax.f32 %v4828_v33, %v4829_v10  ;;  %v4837_v5 = vmax.f32 %v4835_v26, %v4836_v41  ;;  %v4844_v19 = vmax.f32 %v4842_v34, %v4843_v14  ;;  %v12936_v38 = vpop.f32.mrf.mxu1 }
 0x2c5   :  { %v4852_v10 = vsel %vm4814_vm4, %v12936_v38, -inf }
 0x2c6   :  { %v5265_v0 = vsub.f32 %v4315_v37, %v4823_v30  ;;  %v5266_v42 = vsub.f32 %v8933_v63, %v4823_v30  ;;  %v4831_v52 = vrot.slane %v4830_v17, 1  ;;  %v4838_v22 = vrot.slane %v4837_v5, 2  ;;  %v12938_v25 = vpop.f32.mrf.mxu1 }
 0x2c7   :  { %v4845_v46 = vrot.slane %v4844_v19, 4  ;;  %v4851_v27 = vsel %vm4814_vm4, %v12938_v25, -inf }
 0x2c8   :  { %v5365_v8 = vmul.f32 1.442695, %v5265_v0  ;;  %v4832_v47 = vmax.f32 %v4830_v17, %v4831_v52  ;;  %v4839_v21 = vmax.f32 %v4837_v5, %v4838_v22  ;;  %v12944_v41 = vpop.f32.mrf.mxu1  ;;  %v5367_v45 = vmul.f32 1.442695, %v5266_v42 }
 0x2c9   :  { %v4846_v26 = vmax.f32 %v4844_v19, %v4845_v46  ;;  %v4853_v43 = vmax.f32 %v4851_v27, %v4852_v10  ;;  %v4861_v14 = vsel %vm4814_vm4, %v12944_v41, -inf }
 0x2ca   :  { %v5267_v63 = vsub.f32 %v4325_v18, %v4832_v47  ;;  %v5268_v33 = vsub.f32 %v8936_v55, %v4832_v47  ;;  %v4840_v37 = vrot.slane %v4839_v21, 1  ;;  %v12948_v34 = vpop.f32.mrf.mxu1  ;;  %9132 = vpow2.f32 %v5365_v8 }
 0x2cb   :  { %v4847_v30 = vrot.slane %v4846_v26, 2  ;;  %v4854_v17 = vrot.slane %v4853_v43, 4  ;;  %v4860_v5 = vsel %vm4814_vm4, %v12948_v34, -inf  ;;  %9134 = vpow2.f32 %v5367_v45 }
 0x2cc   :  { %v5369_v0 = vmul.f32 1.442695, %v5267_v63  ;;  %v5371_v52 = vmul.f32 1.442695, %v5268_v33  ;;  %v4841_v22 = vmax.f32 %v4839_v21, %v4840_v37  ;;  %v4862_v42 = vmax.f32 %v4860_v5, %v4861_v14  ;;  %v12952_v46 = vpop.f32.mrf.mxu1 }
 0x2cd   :  { %v4848_v47 = vmax.f32 %v4846_v26, %v4847_v30  ;;  %v4855_v27 = vmax.f32 %v4853_v43, %v4854_v17  ;;  %v4870_v19 = vsel %vm4814_vm4, %v12952_v46, -inf }
 0x2ce   :  { %9136 = vpow2.f32 %v5369_v0  ;;  %v5269_v18 = vsub.f32 %v4335_v31, %v4841_v22  ;;  %v5270_v8 = vsub.f32 %v12923_v28, %v4841_v22  ;;  %v4863_v55 = vrot.slane %v4862_v42, 4  ;;  %v12957_v10 = vpop.f32.mrf.mxu1 }
 0x2cf   :  { %9138 = vpow2.f32 %v5371_v52  ;;  %v4849_v63 = vrot.slane %v4848_v47, 1  ;;  %v4856_v33 = vrot.slane %v4855_v27, 2  ;;  %v4869_v21 = vsel %vm4814_vm4, %v12957_v10, -inf }
 0x2d0   :  { %v5373_v37 = vmul.f32 1.442695, %v5269_v18  ;;  %v5375_v45 = vmul.f32 1.442695, %v5270_v8  ;;  %v4864_v26 = vmax.f32 %v4862_v42, %v4863_v55  ;;  %v4871_v43 = vmax.f32 %v4869_v21, %v4870_v19  ;;  %v12961_v14 = vpop.f32.mrf.mxu1 }
 0x2d1   :  { %v4850_v30 = vmax.f32 %v4848_v47, %v4849_v63  ;;  %v4857_v17 = vmax.f32 %v4855_v27, %v4856_v33  ;;  %v4879_v42 = vsel %vm4814_vm4, %v12961_v14, -inf }
 0x2d2   :  { %9140 = vpow2.f32 %v5373_v37  ;;  %v4865_v31 = vrot.slane %v4864_v26, 2  ;;  %v4872_v28 = vrot.slane %v4871_v43, 4  ;;  %v12963_v5 = vpop.f32.mrf.mxu1 }
 0x2d3   :  { %9142 = vpow2.f32 %v5375_v45  ;;  %v5271_v0 = vsub.f32 %v12930_v40, %v4850_v30  ;;  %v5272_v52 = vsub.f32 %v12928_v59, %v4850_v30  ;;  %v4858_v22 = vrot.slane %v4857_v17, 1 }
 0x2d4   :  { %v4866_v35 = vmax.f32 %v4864_v26, %v4865_v31  ;;  %v4873_v18 = vmax.f32 %v4871_v43, %v4872_v28  ;;  %v4878_v47 = vsel %vm4814_vm4, %v12963_v5, -inf  ;;  %v12971_v27 = vpop.f32.mrf.mxu1 }
 0x2d5   :  { %v5377_v19 = vmul.f32 1.442695, %v5271_v0  ;;  %v5379_v8 = vmul.f32 1.442695, %v5272_v52  ;;  %v4859_v55 = vmax.f32 %v4857_v17, %v4858_v22  ;;  %v4880_v63 = vmax.f32 %v4878_v47, %v4879_v42 }
 0x2d6   :  { %v4867_v33 = vrot.slane %v4866_v35, 1  ;;  %v4874_v21 = vrot.slane %v4873_v18, 2  ;;  %v12973_v40 = vpop.f32.mrf.mxu1 }
 0x2d7   :  { %9144 = vpow2.f32 %v5377_v19  ;;  %v5273_v59 = vsub.f32 %v12938_v25, %v4859_v55  ;;  %v5274_v37 = vsub.f32 %v12936_v38, %v4859_v55  ;;  %v4881_v45 = vrot.slane %v4880_v63, 4  ;;  %v12977_v26 = vpop.eup %9132 }
 0x2d8   :  { %9146 = vpow2.f32 %v5379_v8  ;;  %v4868_v43 = vmax.f32 %v4866_v35, %v4867_v33  ;;  %v4875_v30 = vmax.f32 %v4873_v18, %v4874_v21  ;;  %v12979_v31 = vpop.f32.mrf.mxu1  ;;  %v12981_v52 = vpop.eup %9134  ;;  %v4887_v35 = vsel %vm4814_vm4, %v12973_v40, -inf }
 0x2d9   :  { %v5381_v28 = vmul.f32 1.442695, %v5273_v59  ;;  %v5383_v17 = vmul.f32 1.442695, %v5274_v37  ;;  %v4882_v0 = vmax.f32 %v4880_v63, %v4881_v45  ;;  %v5565_v8 = vsel %vm4814_vm4, %v12977_v26, 0.0 }
 0x2da   :  { %v5275_v22 = vsub.f32 %v12948_v34, %v4868_v43  ;;  %v5276_v42 = vsub.f32 %v12944_v41, %v4868_v43  ;;  %v4876_v25 = vrot.slane %v4875_v30, 1  ;;  %v12985_v47 = vpop.f32.mrf.mxu1  ;;  %v4888_v41 = vsel %vm4814_vm4, %v12971_v27, -inf }
 0x2db   :  { %v12987_v38 = vpop.eup %9136  ;;  %9148 = vpow2.f32 %v5381_v28  ;;  %v4883_v19 = vrot.slane %v4882_v0, 2  ;;  %v5566_v63 = vsel %vm4814_vm4, %v12981_v52, 0.0  ;;  %v4889_v43 = vmax.f32 %v4887_v35, %v4888_v41 }
 0x2dc   :  { %v12991_v18 = vpop.eup %9138  ;;  %9150 = vpow2.f32 %v5383_v17  ;;  %v5385_v55 = vmul.f32 1.442695, %v5275_v22  ;;  %v12997_v34 = vpop.f32.mrf.mxu1  ;;  %v5387_v33 = vmul.f32 1.442695, %v5276_v42  ;;  %v4877_v21 = vmax.f32 %v4875_v30, %v4876_v25 }
 0x2dd   :  { %v4884_v59 = vmax.f32 %v4882_v0, %v4883_v19  ;;  %v5574_v37 = vsel %vm4814_vm4, %v12987_v38, 0.0  ;;  %v5575_v45 = vsel %vm4814_vm4, %v12991_v18, 0.0  ;;  %v4897_v28 = vsel %vm4814_vm4, %v12979_v31, -inf }
 0x2de   :  { %v13007_v17 = vpop.f32.mrf.mxu1  ;;  %9152 = vpow2.f32 %v5385_v55  ;;  %v5277_v20 = vsub.f32 %v12957_v10, %v4877_v21  ;;  %v5278_v30 = vsub.f32 %v12952_v46, %v4877_v21  ;;  %v4890_v19 = vrot.slane %v4889_v43, 4 }
 0x2df   :  { %v13009_v22 = vpop.eup %9140  ;;  %v4885_v0 = vrot.slane %v4884_v59, 1  ;;  %9154 = vpow2.f32 %v5387_v33  ;;  %v4896_v35 = vsel %vm4814_vm4, %v12985_v47, -inf  ;;  %v5567_v46 = vadd.f32 %v5566_v63, %v5565_v8 }
 0x2e0   :  { %v13013_v42 = vpop.eup %9142  ;;  %v5583_v25 = vsel %vm4814_vm4, %v13009_v22, 0.0  ;;  %v13019_v41 = vpop.f32.mrf.mxu1  ;;  %v5389_v54 = vmul.f32 1.442695, %v5277_v20  ;;  %v5391_v10 = vmul.f32 1.442695, %v5278_v30  ;;  %v4891_v21 = vmax.f32 %v4889_v43, %v4890_v19 }
 0x2e1   :  { %v5584_v55 = vsel %vm4814_vm4, %v13013_v42, 0.0  ;;  %v4886_v62 = vmax.f32 %v4884_v59, %v4885_v0  ;;  %v4898_v1 = vmax.f32 %v4896_v35, %v4897_v28  ;;  %v5576_v29 = vadd.f32 %v5575_v45, %v5574_v37 }
 0x2e2   :  { %v13023_v11 = vpop.f32.mrf.mxu1  ;;  %v5585_v36 = vadd.f32 %v5584_v55, %v5583_v25  ;;  %9156 = vpow2.f32 %v5389_v54  ;;  %v4892_v16 = vrot.slane %v4891_v21, 2  ;;  %v4906_v20 = vsel %vm4814_vm4, %v12997_v34, -inf }
 0x2e3   :  { %v5279_v33 = vsub.f32 %v12963_v5, %v4886_v62  ;;  %v5280_v32 = vsub.f32 %v12961_v14, %v4886_v62  ;;  %v4899_v51 = vrot.slane %v4898_v1, 4  ;;  %9158 = vpow2.f32 %v5391_v10 }
 0x2e4   :  { %v13027_v13 = vpop.eup %9144  ;;  %v13031_v59 = vpop.f32.mrf.mxu1  ;;  %v4905_v62 = vsel %vm4814_vm4, %v13007_v17, -inf  ;;  %v4893_v5 = vmax.f32 %v4891_v21, %v4892_v16  ;;  %v5568_v28 = vrot.slane %v5567_v46, 4  ;;  %v5577_v25 = vrot.slane %v5576_v29, 4 }
 0x2e5   :  { %v13033_v8 = vpop.eup %9146  ;;  %v5592_v63 = vsel %vm4814_vm4, %v13027_v13, 0.0  ;;  %v5393_v37 = vmul.f32 1.442695, %v5279_v33  ;;  %v5395_v14 = vmul.f32 1.442695, %v5280_v32  ;;  %v4900_v45 = vmax.f32 %v4898_v1, %v4899_v51 }
 0x2e6   :  { %v5593_v54 = vsel %vm4814_vm4, %v13033_v8, 0.0  ;;  %v13041_v43 = vpop.f32.mrf.mxu1  ;;  %v4907_v30 = vmax.f32 %v4905_v62, %v4906_v20  ;;  %v5586_v19 = vrot.slane %v5585_v36, 4  ;;  %v4894_v35 = vrot.slane %v4893_v5, 1 }
 0x2e7   :  { %v4901_v55 = vrot.slane %v4900_v45, 2  ;;  %v5594_v39 = vadd.f32 %v5593_v54, %v5592_v63  ;;  %9160 = vpow2.f32 %v5393_v37  ;;  %v4914_v51 = vsel %vm4814_vm4, %v13023_v11, -inf }
 0x2e8   :  { %v13043_v0 = vpop.eup %9148  ;;  %v13045_v10 = vpop.f32.mrf.mxu1  ;;  %v4908_v3 = vrot.slane %v4907_v30, 4  ;;  %9162 = vpow2.f32 %v5395_v14  ;;  %v4895_v32 = vmax.f32 %v4893_v5, %v4894_v35  ;;  %v4915_v1 = vsel %vm4814_vm4, %v13019_v41, -inf }
 0x2e9   :  { %v13047_v33 = vpop.eup %9150  ;;  %v4902_v16 = vmax.f32 %v4900_v45, %v4901_v55  ;;  %v5601_v20 = vsel %vm4814_vm4, %v13043_v0, 0.0  ;;  %v4916_v37 = vmax.f32 %v4914_v51, %v4915_v1  ;;  %v13067_v55 = vadd.f32 %v5586_v19, %v5585_v36 }
 0x2ea   :  { %v13053_v21 = vpop.f32.mrf.mxu1  ;;  %v5602_v62 = vsel %vm4814_vm4, %v13047_v33, 0.0  ;;  %v4909_v63 = vmax.f32 %v4907_v30, %v4908_v3  ;;  %v5281_v15 = vsub.f32 %v12973_v40, %v4895_v32  ;;  %v5282_v14 = vsub.f32 %v12971_v27, %v4895_v32 }
 0x2eb   :  { %v13059_v54 = vpop.eup %9152  ;;  %v4903_v5 = vrot.slane %v4902_v16, 1  ;;  %v13069_v9 = vadd.f32 %v5568_v28, %v5567_v46  ;;  %v5603_v49 = vadd.f32 %v5602_v62, %v5601_v20  ;;  %v13073_v51 = vadd.f32 %v5577_v25, %v5576_v29 }
 0x2ec   :  { %v13063_v45 = vpop.f32.mrf.mxu1  ;;  %v13065_v35 = vpop.eup %9154  ;;  %v4910_v60 = vrot.slane %v4909_v63, 2  ;;  %v5397_v2 = vmul.f32 1.442695, %v5281_v15  ;;  %v5595_v40 = vrot.slane %v5594_v39, 4  ;;  %v4917_v27 = vrot.slane %v4916_v37, 4 }
 0x2ed   :  { %v4904_v3 = vmax.f32 %v4902_v16, %v4903_v5  ;;  %v5399_v32 = vmul.f32 1.442695, %v5282_v14  ;;  %v4923_v36 = vsel %vm4814_vm4, %v13041_v43, -inf  ;;  %v5610_v29 = vsel %vm4814_vm4, %v13059_v54, 0.0 }
 0x2ee   :  { %v13071_v30 = vpop.f32.mrf.mxu1  ;;  %v4911_v1 = vmax.f32 %v4909_v63, %v4910_v60  ;;  %v5611_v60 = vsel %vm4814_vm4, %v13065_v35, 0.0  ;;  %9164 = vpow2.f32 %v5397_v2  ;;  %v4924_v16 = vsel %vm4814_vm4, %v13031_v59, -inf }
 0x2ef   :  { %v5283_v24 = vsub.f32 %v12985_v47, %v4904_v3  ;;  %v5284_v7 = vsub.f32 %v12979_v31, %v4904_v3  ;;  %v13081_v28 = vpop.eup %9156  ;;  %v5604_v47 = vrot.slane %v5603_v49, 4  ;;  %v4918_v14 = vmax.f32 %v4916_v37, %v4917_v27 }
 0x2f0   :  { %v13079_v46 = vpop.f32.mrf.mxu1  ;;  %v4912_v25 = vrot.slane %v4911_v1, 1  ;;  %v13088_v19 = vpop.eup %9158  ;;  %v4925_v5 = vmax.f32 %v4923_v36, %v4924_v16  ;;  %v13094_v3 = vadd.f32 %v5595_v40, %v5594_v39  ;;  %v5612_v15 = vadd.f32 %v5611_v60, %v5610_v29 }
 0x2f1   :  { %v5401_v31 = vmul.f32 1.442695, %v5283_v24  ;;  %v5403_v62 = vmul.f32 1.442695, %v5284_v7  ;;  %9166 = vpow2.f32 %v5399_v32  ;;  %v4932_v50 = vsel %vm4814_vm4, %v13053_v21, -inf }
 0x2f2   :  { %v13092_v20 = vpop.f32.mrf.mxu1  ;;  %v4913_v63 = vmax.f32 %v4911_v1, %v4912_v25  ;;  %v5619_v24 = vsel %vm4814_vm4, %v13081_v28, 0.0  ;;  %v5620_v2 = vsel %vm4814_vm4, %v13088_v19, 0.0  ;;  %v4919_v40 = vrot.slane %v4918_v14, 2 }
 0x2f3   :  { %9168 = vpow2.f32 %v5401_v31  ;;  %v4926_v1 = vrot.slane %v4925_v5, 4  ;;  %v4933_v27 = vsel %vm4814_vm4, %v13045_v10, -inf  ;;  %v13114_v29 = vadd.f32 %v5604_v47, %v5603_v49 }
 0x2f4   :  { %v13098_v4 = vpop.f32.mrf.mxu1  ;;  %v5285_v7 = vsub.f32 %v13007_v17, %v4913_v63  ;;  %v13105_v37 = vpop.eup %9160  ;;  %v5286_v39 = vsub.f32 %v12997_v34, %v4913_v63  ;;  %9170 = vpow2.f32 %v5403_v62  ;;  %v4934_v25 = vmax.f32 %v4932_v50, %v4933_v27 }
 0x2f5   :  { %15641 = vst [vmem:[#allocation6_spill] sm:$0xff] %v13105_v37  ;;  %v13112_v36 = vpop.eup %9162  ;;  %v5613_v31 = vrot.slane %v5612_v15, 4  ;;  %v4920_v16 = vmax.f32 %v4918_v14, %v4919_v40  ;;  %v4927_v44 = vmax.f32 %v4925_v5, %v4926_v1  ;;  %v5621_v34 = vadd.f32 %v5620_v2, %v5619_v24 }
 0x2f6   :  { %v13110_v32 = vpop.f32.mrf.mxu1  ;;  %15642 = vst [vmem:[#allocation19_spill] sm:$0xff] %v13112_v36  ;;  %v5405_v60 = vmul.f32 1.442695, %v5285_v7  ;;  %v5407_v17 = vmul.f32 1.442695, %v5286_v39  ;;  %v5628_v63 = vsel %vm4814_vm4, %v13105_v37, 0.0 }
 0x2f7   :  { %v4935_v23 = vrot.slane %v4934_v25, 4  ;;  %v4942_v57 = vsel %vm4814_vm4, %v13063_v45, -inf  ;;  %v4921_v49 = vrot.slane %v4920_v16, 1  ;;  %v4928_v47 = vrot.slane %v4927_v44, 2 }
 0x2f8   :  { %v13116_v56 = vpop.f32.mrf.mxu1  ;;  %9172 = vpow2.f32 %v5405_v60  ;;  %v4941_v50 = vsel %vm4814_vm4, %v13071_v30, -inf  ;;  %v5629_v14 = vsel %vm4814_vm4, %v13112_v36, 0.0  ;;  %v4951_v39 = vsel %vm4814_vm4, %v13079_v46, -inf }
 0x2f9   :  { %9174 = vpow2.f32 %v5407_v17  ;;  %v4936_v5 = vmax.f32 %v4934_v25, %v4935_v23  ;;  %v4943_v24 = vmax.f32 %v4941_v50, %v4942_v57  ;;  %v4922_v2 = vmax.f32 %v4920_v16, %v4921_v49 }
 0x2fa   :  { %v13124_v62 = vpop.f32.mrf.mxu1  ;;  %v4929_v7 = vmax.f32 %v4927_v44, %v4928_v47  ;;  %v4950_v40 = vsel %vm4814_vm4, %v13092_v20, -inf  ;;  %v13134_v27 = vadd.f32 %v5613_v31, %v5612_v15  ;;  %v5622_v48 = vrot.slane %v5621_v34, 4 }
 0x2fb   :  { %v4937_v60 = vrot.slane %v4936_v5, 2  ;;  %v4944_v6 = vrot.slane %v4943_v24, 4  ;;  %v4952_v53 = vmax.f32 %v4950_v40, %v4951_v39  ;;  %v5287_v17 = vsub.f32 %v13023_v11, %v4922_v2  ;;  %v13140_v25 = vpop.eup %9164 }
 0x2fc   :  { %v13132_v1 = vpop.f32.mrf.mxu1  ;;  %v5288_v57 = vsub.f32 %v13019_v41, %v4922_v2  ;;  %v4930_v23 = vrot.slane %v4929_v7, 1  ;;  %15643 = vst [vmem:[#allocation7_spill] sm:$0xff] %v13140_v25  ;;  %v5630_v16 = vadd.f32 %v5629_v14, %v5628_v63  ;;  %v4960_v63 = vsel %vm4814_vm4, %v13098_v4, -inf }
 0x2fd   :  { %v4938_v49 = vmax.f32 %v4936_v5, %v4937_v60  ;;  %v4945_v47 = vmax.f32 %v4943_v24, %v4944_v6  ;;  %v4953_v50 = vrot.slane %v4952_v53, 4  ;;  %v5409_v31 = vmul.f32 1.442695, %v5287_v17 }
 0x2fe   :  { %v13138_v44 = vpop.f32.mrf.mxu1  ;;  %v5411_v12 = vmul.f32 1.442695, %v5288_v57  ;;  %v4931_v61 = vmax.f32 %v4929_v7, %v4930_v23  ;;  %v13145_v40 = vpop.eup %9166  ;;  %v13151_v6 = vadd.f32 %v5622_v48, %v5621_v34  ;;  %v5631_v24 = vrot.slane %v5630_v16, 4 }
 0x2ff   :  { %15644 = vst [vmem:[#allocation20_spill] sm:$0xff] %v13145_v40  ;;  %v4939_v41 = vrot.slane %v4938_v49, 1  ;;  %v4946_v2 = vrot.slane %v4945_v47, 2  ;;  %v4954_v58 = vmax.f32 %v4952_v53, %v4953_v50  ;;  %9176 = vpow2.f32 %v5409_v31 }
 0x300   :  { %v13143_v39 = vpop.f32.mrf.mxu1  ;;  %v13148_v36 = vpop.eup %9168  ;;  %v5289_v14 = vsub.f32 %v13041_v43, %v4931_v61  ;;  %9178 = vpow2.f32 %v5411_v12  ;;  %v5290_v7 = vsub.f32 %v13031_v59, %v4931_v61  ;;  %v5637_v53 = vsel %vm4814_vm4, %v13140_v25, 0.0 }
 0x301   :  { %15645 = vst [vmem:[#allocation8_spill] sm:$0xff] %v13148_v36  ;;  %v4940_v60 = vmax.f32 %v4938_v49, %v4939_v41  ;;  %v13157_v17 = vpop.eup %9170  ;;  %v5638_v57 = vsel %vm4814_vm4, %v13145_v40, 0.0  ;;  %v4947_v34 = vmax.f32 %v4945_v47, %v4946_v2  ;;  %v4955_v31 = vrot.slane %v4954_v58, 2 }
 0x302   :  { %v13154_v5 = vpop.f32.mrf.mxu1  ;;  %15646 = vst [vmem:[#allocation21_spill] sm:$0xff] %v13157_v17  ;;  %v5413_v48 = vmul.f32 1.442695, %v5289_v14  ;;  %v5415_v43 = vmul.f32 1.442695, %v5290_v7  ;;  %v5646_v61 = vsel %vm4814_vm4, %v13148_v36, 0.0  ;;  %v13184_v15 = vadd.f32 %v5631_v24, %v5630_v16 }
 0x303   :  { %v5291_v50 = vsub.f32 %v13053_v21, %v4940_v60  ;;  %v5292_v12 = vsub.f32 %v13045_v10, %v4940_v60  ;;  %v4948_v59 = vrot.slane %v4947_v34, 1  ;;  %v4959_v49 = vsel %vm4814_vm4, %v13110_v32, -inf }
 0x304   :  { %v13163_v23 = vpop.f32.mrf.mxu1  ;;  %9180 = vpow2.f32 %v5413_v48  ;;  %v5647_v47 = vsel %vm4814_vm4, %v13157_v17, 0.0  ;;  %v4956_v48 = vmax.f32 %v4954_v58, %v4955_v31  ;;  %v4961_v36 = vmax.f32 %v4959_v49, %v4960_v63 }
 0x305   :  { %v13173_v14 = vpop.eup %9172  ;;  %9182 = vpow2.f32 %v5415_v43  ;;  %v5417_v21 = vmul.f32 1.442695, %v5291_v50  ;;  %v5419_v2 = vmul.f32 1.442695, %v5292_v12  ;;  %v4949_v60 = vmax.f32 %v4947_v34, %v4948_v59 }
 0x306   :  { %v13171_v41 = vpop.f32.mrf.mxu1  ;;  %15647 = vst [vmem:[#allocation112_spill] sm:$0xff] %v13173_v14  ;;  %v13177_v10 = vpop.eup %9174  ;;  %v5570_v17 = vrot.slane %v13069_v9, 2  ;;  %v13187_v43 = vadd.f32 %v5638_v57, %v5637_v53  ;;  %v13189_v50 = vadd.f32 %v5647_v47, %v5646_v61  ;;  %v4957_v31 = vrot.slane %v4956_v48, 1 }
 0x307   :  { %15648 = vst [vmem:[#allocation113_spill] sm:$0xff] %v13177_v10  ;;  %9184 = vpow2.f32 %v5417_v21  ;;  %v5293_v12 = vsub.f32 %v13071_v30, %v4949_v60  ;;  %v5294_v58 = vsub.f32 %v13063_v45, %v4949_v60  ;;  %v4962_v59 = vrot.slane %v4961_v36, 4 }
 0x308   :  { %v13182_v11 = vpop.f32.mrf.mxu1  ;;  %9186 = vpow2.f32 %v5419_v2  ;;  %v5571_v16 = vadd.f32 %v5570_v17, %v13069_v9  ;;  %v5655_v63 = vsel %vm4814_vm4, %v13173_v14, 0.0  ;;  %v5656_v24 = vsel %vm4814_vm4, %v13177_v10, 0.0 }
 0x309   :  { %v5421_v53 = vmul.f32 1.442695, %v5293_v12  ;;  %v4968_v57 = vsel %vm4814_vm4, %v13124_v62, -inf  ;;  %v4958_v30 = vmax.f32 %v4956_v48, %v4957_v31  ;;  %v4963_v49 = vmax.f32 %v4961_v36, %v4962_v59 }
 0x30a   :  { %v13192_v34 = vpop.f32.mrf.mxu1  ;;  %v5572_v47 = vrot.slane %v5571_v16, 1  ;;  %v4969_v45 = vsel %vm4814_vm4, %v13116_v56, -inf  ;;  %v5640_v9 = vrot.slane %v13187_v43, 4  ;;  %v5649_v17 = vrot.slane %v13189_v50, 4 }
 0x30b   :  { %v4970_v21 = vmax.f32 %v4968_v57, %v4969_v45  ;;  %v5579_v2 = vrot.slane %v13073_v51, 2  ;;  %v5657_v7 = vadd.f32 %v5656_v24, %v5655_v63  ;;  %v5423_v10 = vmul.f32 1.442695, %v5294_v58 }
 0x30c   :  { %v13202_v61 = vpop.f32.mrf.mxu1  ;;  %v13211_v12 = vpop.eup %9176  ;;  %v5295_v48 = vsub.f32 %v13092_v20, %v4958_v30  ;;  %v5296_v36 = vsub.f32 %v13079_v46, %v4958_v30  ;;  %9188 = vpow2.f32 %v5421_v53  ;;  %v4964_v59 = vrot.slane %v4963_v49, 2 }
 0x30d   :  { %15649 = vst [vmem:[#allocation114_spill] sm:$0xff] %v13211_v12  ;;  %v13215_v31 = vpop.eup %9178  ;;  %v5573_v14 = vadd.f32 %v5572_v47, %v5571_v16  ;;  %v4971_v40 = vrot.slane %v4970_v21, 4  ;;  %v5664_v57 = vsel %vm4814_vm4, %v13211_v12, 0.0  ;;  %v5580_v63 = vadd.f32 %v5579_v2, %v13073_v51 }
 0x30e   :  { %v13209_v60 = vpop.f32.mrf.mxu1  ;;  %15650 = vst [vmem:[#allocation115_spill] sm:$0xff] %v13215_v31  ;;  %v5665_v45 = vsel %vm4814_vm4, %v13215_v31, 0.0  ;;  %v5425_v25 = vmul.f32 1.442695, %v5295_v48  ;;  %v5427_v58 = vmul.f32 1.442695, %v5296_v36  ;;  %v4965_v24 = vmax.f32 %v4963_v49, %v4964_v59 }
 0x30f   :  { %9190 = vrcp.f32 %v5573_v14  ;;  %v4972_v20 = vmax.f32 %v4970_v21, %v4971_v40  ;;  %v5581_v16 = vrot.slane %v5580_v63, 1  ;;  %v4977_v53 = vsel %vm4814_vm4, %v13138_v44, -inf }
 0x310   :  { %v13222_v46 = vpop.f32.mrf.mxu1  ;;  %9192 = vpow2.f32 %v5423_v10  ;;  %v15652_v47 = vrot.slane %v13067_v55, 2  ;;  %v5666_v51 = vadd.f32 %v5665_v45, %v5664_v57  ;;  %v4966_v49 = vrot.slane %v4965_v24, 1 }
 0x311   :  { %v13224_v30 = vpop.eup %9180  ;;  %9194 = vpow2.f32 %v5425_v25  ;;  %v4978_v40 = vsel %vm4814_vm4, %v13132_v1, -inf  ;;  %v4973_v10 = vrot.slane %v4972_v20, 2  ;;  %v5582_v21 = vadd.f32 %v5581_v16, %v5580_v63 }
 0x312   :  { %15651 = vst [vmem:[#allocation116_spill] sm:$0xff] %v13224_v30  ;;  %v5589_v31 = vadd.f32 %v15652_v47, %v13067_v55  ;;  %v13231_v48 = vpop.eup %9182  ;;  %v5673_v14 = vsel %vm4814_vm4, %v13224_v30, 0.0  ;;  %v4979_v2 = vmax.f32 %v4977_v53, %v4978_v40  ;;  %9196 = vpow2.f32 %v5427_v58  ;;  %v13241_v57 = vpop.f32.mrf.mxu1 }
 0x313   :  { %15653 = vst [vmem:[#allocation117_spill] sm:$0xff] %v13231_v48  ;;  %v5674_v59 = vsel %vm4814_vm4, %v13231_v48, 0.0  ;;  %v4967_v55 = vmax.f32 %v4965_v24, %v4966_v49  ;;  %v13246_v45 = vadd.f32 %v5640_v9, %v13187_v43  ;;  %v4974_v12 = vmax.f32 %v4972_v20, %v4973_v10 }
 0x314   :  { %v13237_v36 = vpop.eup %9184  ;;  %v5590_v47 = vrot.slane %v5589_v31, 1  ;;  %9198 = vrcp.f32 %v5582_v21  ;;  %v4980_v30 = vrot.slane %v4979_v2, 4  ;;  %v13249_v63 = vadd.f32 %v5649_v17, %v13189_v50  ;;  %v13258_v50 = vpop.f32.mrf.mxu1 }
 0x315   :  { %v13243_v25 = vpop.eup %9186  ;;  %v5658_v16 = vrot.slane %v5657_v7, 4  ;;  %v5667_v53 = vrot.slane %v5666_v51, 4  ;;  %v5297_v40 = vsub.f32 %v13110_v32, %v4967_v55  ;;  %v5675_v58 = vadd.f32 %v5674_v59, %v5673_v14 }
 0x316   :  { %v5298_v24 = vsub.f32 %v13098_v4, %v4967_v55  ;;  %v4975_v49 = vrot.slane %v4974_v12, 1  ;;  %v4981_v48 = vmax.f32 %v4979_v2, %v4980_v30  ;;  %v5682_v43 = vsel %vm4814_vm4, %v13237_v36, 0.0 }
 0x317   :  { %v5683_v9 = vsel %vm4814_vm4, %v13243_v25, 0.0  ;;  %v5591_v20 = vadd.f32 %v5590_v47, %v5589_v31  ;;  %v5429_v10 = vmul.f32 1.442695, %v5297_v40  ;;  %v13262_v21 = vadd.f32 %v5658_v16, %v5657_v7  ;;  %v13276_v16 = vpop.f32.mrf.mxu1 }
 0x318   :  { %v4976_v32 = vmax.f32 %v4974_v12, %v4975_v49  ;;  %v4982_v14 = vrot.slane %v4981_v48, 2  ;;  %v5431_v30 = vmul.f32 1.442695, %v5298_v24  ;;  %v4986_v2 = vsel %vm4814_vm4, %v13154_v5, -inf }
 0x319   :  { %v13266_v59 = vpop.eup %9188  ;;  %v13268_v55 = vadd.f32 %v5667_v53, %v5666_v51  ;;  %v5676_v31 = vrot.slane %v5675_v58, 4  ;;  %v13270_v47 = vadd.f32 %v5683_v9, %v5682_v43  ;;  %9200 = vrcp.f32 %v5591_v20 }
 0x31a   :  { %15654 = vst [vmem:[#allocation118_spill] sm:$0xff] %v13266_v59  ;;  %v5299_v17 = vsub.f32 %v13124_v62, %v4976_v32  ;;  %v5300_v12 = vsub.f32 %v13116_v56, %v4976_v32  ;;  %v4983_v40 = vmax.f32 %v4981_v48, %v4982_v14  ;;  %v4987_v7 = vsel %vm4814_vm4, %v13143_v39, -inf }
 0x31b   :  { %9202 = vpow2.f32 %v5429_v10  ;;  %v4988_v4 = vmax.f32 %v4986_v2, %v4987_v7  ;;  %v15655_v51 = vrot.slane %v13094_v3, 2  ;;  %v13288_v32 = vadd.f32 %v5676_v31, %v5675_v58 }
 0x31c   :  { %v9191_v24 = vpop.eup %9190  ;;  %v5433_v49 = vmul.f32 1.442695, %v5299_v17  ;;  %9204 = vpow2.f32 %v5431_v30  ;;  %v5435_v48 = vmul.f32 1.442695, %v5300_v12  ;;  %v4984_v17 = vrot.slane %v4983_v40, 1  ;;  %v13293_v30 = vpop.f32.mrf.mxu1 }
 0x31d   :  { %v5598_v53 = vadd.f32 %v15655_v51, %v13094_v3  ;;  %v13281_v43 = vpop.eup %9192  ;;  %v6065_v56 = vmul.f32 %v9191_v24, %v12977_v26  ;;  %v4989_v10 = vrot.slane %v4988_v4, 4  ;;  %v5685_v14 = vrot.slane %v13270_v47, 4 }
 0x31e   :  { %15656 = vst [vmem:[#allocation119_spill] sm:$0xff] %v13281_v43  ;;  %v13285_v9 = vpop.eup %9194  ;;  %v5691_v3 = vsel %vm4814_vm4, %v13266_v59, 0.0  ;;  %9206 = vpow2.f32 %v5433_v49  ;;  %v5692_v12 = vsel %vm4814_vm4, %v13281_v43, 0.0  ;;  %v4985_v58 = vmax.f32 %v4983_v40, %v4984_v17 }
 0x31f   :  { %6167 = vperm.xlu0 %9130, %v6065_v56   ;;  %v5599_v2 = vrot.slane %v5598_v53, 1  ;;  %v13295_v26 = vpop.eup %9196  ;;  %9208 = vpow2.f32 %v5435_v48  ;;  %v4990_v31 = vmax.f32 %v4988_v4, %v4989_v10  ;;  %v6066_v51 = vmul.f32 %v9191_v24, %v12981_v52 }
 0x320   :  { %15657 = vst [vmem:[#allocation120_spill] sm:$0xff] %v13295_v26  ;;  %v4995_v62 = vsel %vm4814_vm4, %v13171_v41, -inf  ;;  %v15658_v49 = vrot.slane %v13114_v29, 2  ;;  %v5301_v59 = vsub.f32 %v13138_v44, %v4985_v58  ;;  %v5302_v43 = vsub.f32 %v13132_v1, %v4985_v58 }
 0x321   :  { %v9199_v7 = vpop.eup %9198  ;;  %v5600_v20 = vadd.f32 %v5599_v2, %v5598_v53  ;;  %v4996_v4 = vsel %vm4814_vm4, %v13163_v23, -inf  ;;  %v5700_v52 = vsel %vm4814_vm4, %v13285_v9, 0.0  ;;  %v4991_v40 = vrot.slane %v4990_v31, 2  ;;  %v13312_v53 = vpop.f32.mrf.mxu1 }
 0x322   :  { %v5607_v56 = vadd.f32 %v15658_v49, %v13114_v29  ;;  %v6067_v37 = vmul.f32 %v9199_v7, %v12987_v38  ;;  %v4997_v24 = vmax.f32 %v4995_v62, %v4996_v4  ;;  %v5701_v29 = vsel %vm4814_vm4, %v13295_v26, 0.0 }
 0x323   :  { %6172 = vperm.xlu0 %9130, %v6066_v51   ;;  %9210 = vrcp.f32 %v5600_v20  ;;  %v5437_v38 = vmul.f32 1.442695, %v5301_v59  ;;  %v5439_v44 = vmul.f32 1.442695, %v5302_v43  ;;  %v4992_v1 = vmax.f32 %v4990_v31, %v4991_v40  ;;  %v13323_v43 = vpop.f32.mrf.mxu1 }
 0x324   :  { %6177 = vperm.xlu1 %9131, %v6067_v37   ;;  %v5608_v48 = vrot.slane %v5607_v56, 1  ;;  %v4998_v17 = vrot.slane %v4997_v24, 4  ;;  %v5005_v10 = vsel %vm4814_vm4, %v13182_v11, -inf  ;;  %v5004_v2 = vsel %vm4814_vm4, %v13192_v34, -inf }
 0x325   :  { %v13320_v58 = vadd.f32 %v5692_v12, %v5691_v3  ;;  %v6068_v62 = vmul.f32 %v9199_v7, %v12991_v18  ;;  %v5006_v51 = vmax.f32 %v5004_v2, %v5005_v10  ;;  %v5702_v49 = vadd.f32 %v5701_v29, %v5700_v52 }
 0x326   :  { %v5609_v20 = vadd.f32 %v5608_v48, %v5607_v56  ;;  %9212 = vpow2.f32 %v5437_v38  ;;  %v4993_v37 = vrot.slane %v4992_v1, 1  ;;  %v4999_v59 = vmax.f32 %v4997_v24, %v4998_v17  ;;  %v9201_v31 = vpop.eup %9200 }
 0x327   :  { %v5007_v40 = vrot.slane %v5006_v51, 4  ;;  %v15659_v3 = vrot.slane %v13134_v27, 2  ;;  %v13332_v18 = vadd.f32 %v5685_v14, %v13270_v47  ;;  %v6069_v7 = vmul.f32 %v9201_v31, %v13009_v22  ;;  %v13341_v14 = vpop.f32.mrf.mxu1 }
 0x328   :  { %6182 = vperm.xlu1 %9131, %v6068_v62   ;;  %9214 = vrcp.f32 %v5609_v20  ;;  %v13329_v26 = vpop.eup %9202  ;;  %v4994_v56 = vmax.f32 %v4992_v1, %v4993_v37  ;;  %v6070_v24 = vmul.f32 %v9201_v31, %v13013_v42  ;;  %v5000_v29 = vrot.slane %v4999_v59, 2 }
 0x329   :  { %v5616_v12 = vadd.f32 %v15659_v3, %v13134_v27  ;;  %9216 = vpow2.f32 %v5439_v44  ;;  %v13335_v52 = vpop.eup %9204  ;;  %v5008_v38 = vmax.f32 %v5006_v51, %v5007_v40  ;;  %v5694_v17 = vrot.slane %v13320_v58, 4  ;;  %6187 = vperm.xlu0 %9130, %v6069_v7  }
 0x32a   :  { %v5703_v10 = vrot.slane %v5702_v49, 4  ;;  %v5303_v27 = vsub.f32 %v13154_v5, %v4994_v56  ;;  %v5304_v47 = vsub.f32 %v13143_v39, %v4994_v56  ;;  %v5001_v22 = vmax.f32 %v4999_v59, %v5000_v29  ;;  %v13360_v56 = vpop.f32.mrf.mxu1 }
 0x32b   :  { %v5617_v48 = vrot.slane %v5616_v12, 1  ;;  %v13343_v44 = vpop.eup %9206  ;;  %v5009_v1 = vrot.slane %v5008_v38, 2  ;;  %v5013_v42 = vsel %vm4814_vm4, %v13209_v60, -inf  ;;  %v5709_v20 = vsel %vm4814_vm4, %v13329_v26, 0.0 }
 0x32c   :  { %6192 = vperm.xlu1 %9131, %v6070_v24   ;;  %v13347_v62 = vpop.eup %9208  ;;  %v5710_v5 = vsel %vm4814_vm4, %v13335_v52, 0.0  ;;  %v5441_v39 = vmul.f32 1.442695, %v5303_v27  ;;  %v5443_v51 = vmul.f32 1.442695, %v5304_v47  ;;  %v5002_v37 = vrot.slane %v5001_v22, 1 }
 0x32d   :  { %v5618_v2 = vadd.f32 %v5617_v48, %v5616_v12  ;;  %v5010_v31 = vmax.f32 %v5008_v38, %v5009_v1  ;;  %v5014_v59 = vsel %vm4814_vm4, %v13202_v61, -inf  ;;  %v5718_v40 = vsel %vm4814_vm4, %v13343_v44, 0.0 }
 0x32e   :  { %v5015_v3 = vmax.f32 %v5013_v42, %v5014_v59  ;;  %v15660_v12 = vrot.slane %v13151_v6, 2  ;;  %v5719_v29 = vsel %vm4814_vm4, %v13347_v62, 0.0  ;;  %v5003_v38 = vmax.f32 %v5001_v22, %v5002_v37 }
 0x32f   :  { %9218 = vrcp.f32 %v5618_v2  ;;  %v5011_v48 = vrot.slane %v5010_v31, 1  ;;  %v13366_v42 = vadd.f32 %v5710_v5, %v5709_v20  ;;  %v13372_v4 = vadd.f32 %v5694_v17, %v13320_v58 }
 0x330   :  { %9220 = vpow2.f32 %v5441_v39  ;;  %v5625_v7 = vadd.f32 %v15660_v12, %v13151_v6  ;;  %v9211_v24 = vpop.eup %9210  ;;  %v5016_v1 = vrot.slane %v5015_v3, 4  ;;  %v5305_v39 = vsub.f32 %v13171_v41, %v5003_v38 }
 0x331   :  { %9222 = vpow2.f32 %v5443_v51  ;;  %v6071_v27 = vmul.f32 %v9211_v24, %v13027_v13  ;;  %v6072_v47 = vmul.f32 %v9211_v24, %v13033_v8  ;;  %v5306_v6 = vsub.f32 %v13163_v23, %v5003_v38  ;;  %v13376_v8 = vpop.f32.mrf.mxu1 }
 0x332   :  { %v5626_v2 = vrot.slane %v5625_v7, 1  ;;  %v5012_v59 = vmax.f32 %v5010_v31, %v5011_v48  ;;  %v13374_v22 = vadd.f32 %v5703_v10, %v5702_v49  ;;  %v5017_v13 = vmax.f32 %v5015_v3, %v5016_v1 }
 0x333   :  { %6197 = vperm.xlu0 %9130, %v6071_v27   ;;  %6202 = vperm.xlu1 %9131, %v6072_v47   ;;  %v13378_v51 = vpop.eup %9212  ;;  %v13380_v20 = vadd.f32 %v5719_v29, %v5718_v40  ;;  %v5445_v41 = vmul.f32 1.442695, %v5305_v39  ;;  %v5447_v5 = vmul.f32 1.442695, %v5306_v6  ;;  %v5022_v49 = vsel %vm4814_vm4, %v13241_v57, -inf }
 0x334   :  { %v5627_v23 = vadd.f32 %v5626_v2, %v5625_v7  ;;  %v5307_v31 = vsub.f32 %v13192_v34, %v5012_v59  ;;  %v5308_v58 = vsub.f32 %v13182_v11, %v5012_v59  ;;  %v5018_v17 = vrot.slane %v5017_v13, 2  ;;  %v13393_v11 = vpop.f32.mrf.mxu1 }
 0x335   :  { %v9215_v37 = vpop.eup %9214  ;;  %v5712_v3 = vrot.slane %v13366_v42, 4  ;;  %9224 = vpow2.f32 %v5445_v41  ;;  %v5023_v34 = vsel %vm4814_vm4, %v13222_v46, -inf  ;;  %v15661_v27 = vrot.slane %v13184_v15, 2 }
 0x336   :  { %v13386_v10 = vpop.eup %9216  ;;  %v6073_v40 = vmul.f32 %v9215_v37, %v13043_v0  ;;  %v6074_v24 = vmul.f32 %v9215_v37, %v13047_v33  ;;  %9226 = vpow2.f32 %v5447_v5  ;;  %v5449_v7 = vmul.f32 1.442695, %v5307_v31  ;;  %v13410_v31 = vpop.f32.mrf.mxu1 }
 0x337   :  { %v5019_v29 = vmax.f32 %v5017_v13, %v5018_v17  ;;  %v5451_v38 = vmul.f32 1.442695, %v5308_v58  ;;  %9228 = vrcp.f32 %v5627_v23  ;;  %v5024_v48 = vmax.f32 %v5022_v49, %v5023_v34 }
 0x338   :  { %6207 = vperm.xlu0 %9130, %v6073_v40   ;;  %6212 = vperm.xlu1 %9131, %v6074_v24   ;;  %v5634_v47 = vadd.f32 %v15661_v27, %v13184_v15  ;;  %v5721_v0 = vrot.slane %v13380_v20, 4  ;;  %v5727_v33 = vsel %vm4814_vm4, %v13378_v51, 0.0  ;;  %v5031_v2 = vsel %vm4814_vm4, %v13276_v16, -inf }
 0x339   :  { %v5020_v1 = vrot.slane %v5019_v29, 1  ;;  %v5728_v39 = vsel %vm4814_vm4, %v13386_v10, 0.0  ;;  %v5025_v6 = vrot.slane %v5024_v48, 4  ;;  %v5032_v13 = vsel %vm4814_vm4, %v13258_v50, -inf }
 0x33a   :  { %v5635_v59 = vrot.slane %v5634_v47, 1  ;;  %9230 = vpow2.f32 %v5449_v7  ;;  %v5033_v5 = vmax.f32 %v5031_v2, %v5032_v13  ;;  %v15662_v23 = vrot.slane %v13246_v45, 2 }
 0x33b   :  { %v5021_v15 = vmax.f32 %v5019_v29, %v5020_v1  ;;  %9232 = vpow2.f32 %v5451_v38  ;;  %v5026_v40 = vmax.f32 %v5024_v48, %v5025_v6  ;;  %v5729_v13 = vadd.f32 %v5728_v39, %v5727_v33 }
 0x33c   :  { %v9219_v41 = vpop.eup %9218  ;;  %v5643_v37 = vadd.f32 %v15662_v23, %v13246_v45  ;;  %v5636_v34 = vadd.f32 %v5635_v59, %v5634_v47  ;;  %v5041_v45 = vsel %vm4814_vm4, %v13293_v30, -inf  ;;  %v5040_v59 = vsel %vm4814_vm4, %v13312_v53, -inf }
 0x33d   :  { %v13412_v58 = vpop.eup %9220  ;;  %v6075_v17 = vmul.f32 %v9219_v41, %v13059_v54  ;;  %v6076_v49 = vmul.f32 %v9219_v41, %v13065_v35  ;;  %v5309_v7 = vsub.f32 %v13209_v60, %v5021_v15  ;;  %v5310_v29 = vsub.f32 %v13202_v61, %v5021_v15  ;;  %v13426_v60 = vpop.f32.mrf.mxu1 }
 0x33e   :  { %v13416_v24 = vpop.eup %9222  ;;  %v5736_v27 = vsel %vm4814_vm4, %v13412_v58, 0.0  ;;  %v5027_v38 = vrot.slane %v5026_v40, 2  ;;  %v5034_v54 = vrot.slane %v5033_v5, 4  ;;  %v5644_v1 = vrot.slane %v5643_v37, 1 }
 0x33f   :  { %6217 = vperm.xlu0 %9130, %v6075_v17   ;;  %6222 = vperm.xlu1 %9131, %v6076_v49   ;;  %v5737_v35 = vsel %vm4814_vm4, %v13416_v24, 0.0  ;;  %v5453_v48 = vmul.f32 1.442695, %v5309_v7  ;;  %v5455_v2 = vmul.f32 1.442695, %v5310_v29  ;;  %9234 = vrcp.f32 %v5636_v34  ;;  %v13436_v34 = vpop.f32.mrf.mxu1 }
 0x340   :  { %v5028_v61 = vmax.f32 %v5026_v40, %v5027_v38  ;;  %v5035_v47 = vmax.f32 %v5033_v5, %v5034_v54  ;;  %v5645_v6 = vadd.f32 %v5644_v1, %v5643_v37  ;;  %v5042_v41 = vmax.f32 %v5040_v59, %v5041_v45 }
 0x341   :  { %9236 = vpow2.f32 %v5453_v48  ;;  %v15663_v15 = vrot.slane %v13249_v63, 2  ;;  %v5738_v17 = vadd.f32 %v5737_v35, %v5736_v27  ;;  %v13447_v54 = vadd.f32 %v5721_v0, %v13380_v20 }
 0x342   :  { %9238 = vpow2.f32 %v5455_v2  ;;  %v5029_v49 = vrot.slane %v5028_v61, 1  ;;  %v5036_v7 = vrot.slane %v5035_v47, 2  ;;  %v13433_v29 = vpop.eup %9224  ;;  %v5043_v5 = vrot.slane %v5042_v41, 4 }
 0x343   :  { %v5652_v23 = vadd.f32 %v15663_v15, %v13249_v63  ;;  %9240 = vrcp.f32 %v5645_v6  ;;  %v13438_v33 = vpop.eup %9226  ;;  %v13444_v63 = vadd.f32 %v5712_v3, %v13366_v42  ;;  %v5730_v1 = vrot.slane %v5729_v13, 4 }
 0x344   :  { %v5030_v45 = vmax.f32 %v5028_v61, %v5029_v49  ;;  %v5037_v27 = vmax.f32 %v5035_v47, %v5036_v7  ;;  %v9229_v38 = vpop.eup %9228  ;;  %v5044_v35 = vmax.f32 %v5042_v41, %v5043_v5  ;;  %v5739_v2 = vrot.slane %v5738_v17, 4  ;;  %v13455_v49 = vpop.f32.mrf.mxu1 }
 0x345   :  { %v5653_v37 = vrot.slane %v5652_v23, 1  ;;  %v6077_v6 = vmul.f32 %v9229_v38, %v13081_v28  ;;  %v5049_v15 = vsel %vm4814_vm4, %v13341_v14, -inf  ;;  %v6078_v3 = vmul.f32 %v9229_v38, %v13088_v19 }
 0x346   :  { %v5311_v59 = vsub.f32 %v13241_v57, %v5030_v45  ;;  %v5312_v42 = vsub.f32 %v13222_v46, %v5030_v45  ;;  %v5038_v61 = vrot.slane %v5037_v27, 1  ;;  %v5045_v47 = vrot.slane %v5044_v35, 2 }
 0x347   :  { %v5654_v48 = vadd.f32 %v5653_v37, %v5652_v23  ;;  %v13457_v20 = vpop.eup %9230  ;;  %v5745_v28 = vsel %vm4814_vm4, %v13433_v29, 0.0  ;;  %v5746_v57 = vsel %vm4814_vm4, %v13438_v33, 0.0  ;;  %6227 = vperm.xlu0 %9130, %v6077_v6   ;;  %v5050_v46 = vsel %vm4814_vm4, %v13323_v43, -inf  ;;  %6232 = vperm.xlu1 %9131, %v6078_v3   ;;  %v13478_v3 = vpop.f32.mrf.mxu1 }
 0x348   :  { %v13466_v41 = vpop.eup %9232  ;;  %v5457_v19 = vmul.f32 1.442695, %v5311_v59  ;;  %v5039_v23 = vmax.f32 %v5037_v27, %v5038_v61  ;;  %v5046_v7 = vmax.f32 %v5044_v35, %v5045_v47  ;;  %v13469_v37 = vadd.f32 %v5730_v1, %v5729_v13  ;;  %v15665_v1 = vld [vmem:[#allocation6_spill] sm:$0xff] }
 0x349   :  { %9242 = vrcp.f32 %v5654_v48  ;;  %v5051_v45 = vmax.f32 %v5049_v15, %v5050_v46  ;;  %v15664_v38 = vrot.slane %v13262_v21, 2  ;;  %v13474_v6 = vadd.f32 %v5739_v2, %v5738_v17  ;;  %v15666_v17 = vld [vmem:[#allocation19_spill] sm:$0xff] }
 0x34a   :  { %v5459_v39 = vmul.f32 1.442695, %v5312_v42  ;;  %v5313_v40 = vsub.f32 %v13276_v16, %v5039_v23  ;;  %v5314_v59 = vsub.f32 %v13258_v50, %v5039_v23  ;;  %v5747_v35 = vadd.f32 %v5746_v57, %v5745_v28 }
 0x34b   :  { %v5661_v0 = vadd.f32 %v15664_v38, %v13262_v21  ;;  %v5047_v48 = vrot.slane %v5046_v7, 1  ;;  %v5052_v61 = vrot.slane %v5051_v45, 4  ;;  %9244 = vpow2.f32 %v5457_v19 }
 0x34c   :  { %v9235_v27 = vpop.eup %9234  ;;  %v5461_v47 = vmul.f32 1.442695, %v5313_v40  ;;  %v5463_v46 = vmul.f32 1.442695, %v5314_v59  ;;  %v5754_v28 = vsel %vm4814_vm4, %v13457_v20, 0.0  ;;  %v5755_v57 = vsel %vm4814_vm4, %v13466_v41, 0.0  ;;  %v13492_v40 = vpop.f32.mrf.mxu1 }
 0x34d   :  { %v5662_v13 = vrot.slane %v5661_v0, 1  ;;  %v6079_v15 = vmul.f32 %v9235_v27, %v15665_v1  ;;  %v6080_v2 = vmul.f32 %v9235_v27, %v15666_v17  ;;  %v5048_v42 = vmax.f32 %v5046_v7, %v5047_v48  ;;  %v15668_v27 = vld [vmem:[#allocation7_spill] sm:$0xff] }
 0x34e   :  { %v13481_v21 = vpop.eup %9236  ;;  %v5053_v16 = vmax.f32 %v5051_v45, %v5052_v61  ;;  %9246 = vpow2.f32 %v5459_v39  ;;  %v5059_v45 = vsel %vm4814_vm4, %v13360_v56, -inf  ;;  %v15670_v17 = vrot.slane %v13268_v55, 2 }
 0x34f   :  { %v5663_v38 = vadd.f32 %v5662_v13, %v5661_v0  ;;  %v13484_v50 = vpop.eup %9238  ;;  %v5763_v19 = vsel %vm4814_vm4, %v13481_v21, 0.0  ;;  %6237 = vperm.xlu0 %9130, %v6079_v15   ;;  %9248 = vpow2.f32 %v5461_v47  ;;  %6242 = vperm.xlu1 %9131, %v6080_v2   ;;  %v5315_v0 = vsub.f32 %v13312_v53, %v5048_v42  ;;  %v15669_v13 = vld [vmem:[#allocation20_spill] sm:$0xff] }
 0x350   :  { %15667 = vst [vmem:[#allocation6_spill] sm:$0xff] %v13484_v50  ;;  %v9241_v23 = vpop.eup %9240  ;;  %v5316_v7 = vsub.f32 %v13293_v30, %v5048_v42  ;;  %v5764_v59 = vsel %vm4814_vm4, %v13484_v50, 0.0  ;;  %9250 = vpow2.f32 %v5463_v46  ;;  %v5054_v39 = vrot.slane %v5053_v16, 2  ;;  %v13507_v42 = vpop.f32.mrf.mxu1 }
 0x351   :  { %v6081_v48 = vmul.f32 %v9241_v23, %v15668_v27  ;;  %v5465_v61 = vmul.f32 1.442695, %v5315_v0  ;;  %v6082_v1 = vmul.f32 %v9241_v23, %v15669_v13  ;;  %9252 = vrcp.f32 %v5663_v38 }
 0x352   :  { %v5058_v15 = vsel %vm4814_vm4, %v13376_v8, -inf  ;;  %v5467_v53 = vmul.f32 1.442695, %v5316_v7  ;;  %v5055_v30 = vmax.f32 %v5053_v16, %v5054_v39  ;;  %v5670_v2 = vadd.f32 %v15670_v17, %v13268_v55  ;;  %v15673_v17 = vld [vmem:[#allocation21_spill] sm:$0xff]  ;;  %v13518_v12 = vpop.f32.mrf.mxu1 }
 0x353   :  { %6247 = vperm.xlu0 %9130, %v6081_v48   ;;  %v5060_v47 = vmax.f32 %v5058_v15, %v5059_v45  ;;  %v5748_v46 = vrot.slane %v5747_v35, 4  ;;  %v5756_v27 = vadd.f32 %v5755_v57, %v5754_v28  ;;  %6252 = vperm.xlu1 %9131, %v6082_v1   ;;  %v5067_v23 = vsel %vm4814_vm4, %v13410_v31, -inf  ;;  %v15672_v28 = vld [vmem:[#allocation8_spill] sm:$0xff] }
 0x354   :  { %v15671_v38 = vrot.slane %v13288_v32, 2  ;;  %v5765_v48 = vadd.f32 %v5764_v59, %v5763_v19  ;;  %v5056_v7 = vrot.slane %v5055_v30, 1  ;;  %v5068_v45 = vsel %vm4814_vm4, %v13393_v11, -inf }
 0x355   :  { %v5061_v16 = vrot.slane %v5060_v47, 4  ;;  %9254 = vpow2.f32 %v5465_v61  ;;  %v5671_v55 = vrot.slane %v5670_v2, 1  ;;  %v5069_v13 = vmax.f32 %v5067_v23, %v5068_v45 }
 0x356   :  { %v5679_v0 = vadd.f32 %v15671_v38, %v13288_v32  ;;  %v9243_v39 = vpop.eup %9242  ;;  %9256 = vpow2.f32 %v5467_v53  ;;  %v5057_v1 = vmax.f32 %v5055_v30, %v5056_v7  ;;  %v13520_v32 = vadd.f32 %v5748_v46, %v5747_v35 }
 0x357   :  { %v6083_v57 = vmul.f32 %v9243_v39, %v15672_v28  ;;  %v6084_v5 = vmul.f32 %v9243_v39, %v15673_v17  ;;  %v5062_v19 = vmax.f32 %v5060_v47, %v5061_v16  ;;  %v5672_v59 = vadd.f32 %v5671_v55, %v5670_v2 }
 0x358   :  { %v5680_v15 = vrot.slane %v5679_v0, 1  ;;  %v5070_v38 = vrot.slane %v5069_v13, 4  ;;  %v5757_v50 = vrot.slane %v5756_v27, 4  ;;  %v5317_v61 = vsub.f32 %v13341_v14, %v5057_v1  ;;  %v13524_v45 = vpop.eup %9244  ;;  %v13531_v14 = vpop.f32.mrf.mxu1 }
 0x359   :  { %6257 = vperm.xlu0 %9130, %v6083_v57   ;;  %v5318_v23 = vsub.f32 %v13323_v43, %v5057_v1  ;;  %6262 = vperm.xlu1 %9131, %v6084_v5   ;;  %15674 = vst [vmem:[#allocation19_spill] sm:$0xff] %v13524_v45  ;;  %v5766_v30 = vrot.slane %v5765_v48, 4  ;;  %v5063_v7 = vrot.slane %v5062_v19, 2  ;;  %9258 = vrcp.f32 %v5672_v59 }
 0x35a   :  { %v5681_v53 = vadd.f32 %v5680_v15, %v5679_v0  ;;  %v5071_v39 = vmax.f32 %v5069_v13, %v5070_v38  ;;  %v5077_v47 = vsel %vm4814_vm4, %v13426_v60, -inf  ;;  %v5076_v2 = vsel %vm4814_vm4, %v13436_v34, -inf  ;;  %v13552_v15 = vpop.f32.mrf.mxu1 }
 0x35b   :  { %v13533_v43 = vpop.eup %9246  ;;  %v5469_v5 = vmul.f32 1.442695, %v5317_v61  ;;  %v5064_v46 = vmax.f32 %v5062_v19, %v5063_v7  ;;  %v5078_v16 = vmax.f32 %v5076_v2, %v5077_v47  ;;  %v5471_v28 = vmul.f32 1.442695, %v5318_v23 }
 0x35c   :  { %9260 = vrcp.f32 %v5681_v53  ;;  %15675 = vst [vmem:[#allocation7_spill] sm:$0xff] %v13533_v43  ;;  %v5072_v0 = vrot.slane %v5071_v39, 2  ;;  %v13535_v55 = vpop.eup %9248  ;;  %v15677_v57 = vrot.slane %v13332_v18, 2  ;;  %v13544_v59 = vadd.f32 %v5757_v50, %v5756_v27  ;;  %v15680_v27 = vld [vmem:[#allocation113_spill] sm:$0xff] }
 0x35d   :  { %15676 = vst [vmem:[#allocation20_spill] sm:$0xff] %v13535_v55  ;;  %v13542_v17 = vpop.eup %9250  ;;  %v13546_v38 = vadd.f32 %v5766_v30, %v5765_v48  ;;  %v5772_v19 = vsel %vm4814_vm4, %v13524_v45, 0.0  ;;  %v5065_v61 = vrot.slane %v5064_v46, 1  ;;  %v5773_v7 = vsel %vm4814_vm4, %v13533_v43, 0.0 }
 0x35e   :  { %v5688_v1 = vadd.f32 %v15677_v57, %v13332_v18  ;;  %15678 = vst [vmem:[#allocation8_spill] sm:$0xff] %v13542_v17  ;;  %v9253_v53 = vpop.eup %9252  ;;  %v5073_v47 = vmax.f32 %v5071_v39, %v5072_v0  ;;  %v5079_v23 = vrot.slane %v5078_v16, 4  ;;  %9262 = vpow2.f32 %v5469_v5  ;;  %v15679_v18 = vld [vmem:[#allocation112_spill] sm:$0xff] }
 0x35f   :  { %v6085_v57 = vmul.f32 %v9253_v53, %v15679_v18  ;;  %v5066_v50 = vmax.f32 %v5064_v46, %v5065_v61  ;;  %v6086_v48 = vmul.f32 %v9253_v53, %v15680_v27  ;;  %9264 = vpow2.f32 %v5471_v28 }
 0x360   :  { %v5689_v2 = vrot.slane %v5688_v1, 1  ;;  %v5074_v30 = vrot.slane %v5073_v47, 1  ;;  %v5080_v13 = vmax.f32 %v5078_v16, %v5079_v23  ;;  %v5781_v45 = vsel %vm4814_vm4, %v13535_v55, 0.0 }
 0x361   :  { %v5782_v39 = vsel %vm4814_vm4, %v13542_v17, 0.0  ;;  %6267 = vperm.xlu0 %9130, %v6085_v57   ;;  %v5319_v0 = vsub.f32 %v13376_v8, %v5066_v50  ;;  %v5320_v5 = vsub.f32 %v13360_v56, %v5066_v50  ;;  %6272 = vperm.xlu1 %9131, %v6086_v48   ;;  %v5774_v46 = vadd.f32 %v5773_v7, %v5772_v19 }
 0x362   :  { %v5690_v35 = vadd.f32 %v5689_v2, %v5688_v1  ;;  %v13562_v18 = vpop.eup %9254  ;;  %v5075_v61 = vmax.f32 %v5073_v47, %v5074_v30  ;;  %v5081_v28 = vrot.slane %v5080_v13, 2  ;;  %v5085_v16 = vsel %vm4814_vm4, %v13478_v3, -inf  ;;  %v13566_v1 = vpop.f32.mrf.mxu1 }
 0x363   :  { %15681 = vst [vmem:[#allocation21_spill] sm:$0xff] %v13562_v18  ;;  %v13568_v53 = vpop.eup %9256  ;;  %v5473_v23 = vmul.f32 1.442695, %v5319_v0  ;;  %v5475_v2 = vmul.f32 1.442695, %v5320_v5  ;;  %v5086_v8 = vsel %vm4814_vm4, %v13455_v49, -inf  ;;  %v5783_v56 = vadd.f32 %v5782_v39, %v5781_v45 }
 0x364   :  { %15682 = vst [vmem:[#allocation112_spill] sm:$0xff] %v13568_v53  ;;  %9266 = vrcp.f32 %v5690_v35  ;;  %v5321_v57 = vsub.f32 %v13410_v31, %v5075_v61  ;;  %v5322_v19 = vsub.f32 %v13393_v11, %v5075_v61  ;;  %v5082_v7 = vmax.f32 %v5080_v13, %v5081_v28  ;;  %v13581_v31 = vpop.f32.mrf.mxu1  ;;  %v15684_v0 = vld [vmem:[#allocation114_spill] sm:$0xff]  ;;  %v15685_v61 = vld [vmem:[#allocation115_spill] sm:$0xff]  ;;  %v15687_v13 = vld [vmem:[#allocation117_spill] sm:$0xff] }
 0x365   :  { %v5790_v47 = vsel %vm4814_vm4, %v13562_v18, 0.0  ;;  %9268 = vpow2.f32 %v5473_v23  ;;  %v5087_v50 = vmax.f32 %v5085_v16, %v5086_v8  ;;  %v15683_v27 = vrot.slane %v13372_v4, 2 }
 0x366   :  { %v9259_v30 = vpop.eup %9258  ;;  %v5791_v35 = vsel %vm4814_vm4, %v13568_v53, 0.0  ;;  %9270 = vpow2.f32 %v5475_v2  ;;  %v5477_v45 = vmul.f32 1.442695, %v5321_v57  ;;  %v5083_v39 = vrot.slane %v5082_v7, 1  ;;  %v15686_v2 = vld [vmem:[#allocation116_spill] sm:$0xff] }
 0x367   :  { %v5697_v48 = vadd.f32 %v15683_v27, %v13372_v4  ;;  %v6087_v5 = vmul.f32 %v9259_v30, %v15684_v0  ;;  %v6088_v28 = vmul.f32 %v9259_v30, %v15685_v61  ;;  %v5088_v16 = vrot.slane %v5087_v50, 4  ;;  %v13592_v61 = vpop.f32.mrf.mxu1 }
 0x368   :  { %v5775_v23 = vrot.slane %v5774_v46, 4  ;;  %v5784_v8 = vrot.slane %v5783_v56, 4  ;;  %v5479_v4 = vmul.f32 1.442695, %v5322_v19  ;;  %v5084_v27 = vmax.f32 %v5082_v7, %v5083_v39 }
 0x369   :  { %v9261_v11 = vpop.eup %9260  ;;  %v13586_v18 = vadd.f32 %v5791_v35, %v5790_v47  ;;  %6277 = vperm.xlu0 %9130, %v6087_v5   ;;  %6282 = vperm.xlu1 %9131, %v6088_v28   ;;  %v5089_v53 = vmax.f32 %v5087_v50, %v5088_v16  ;;  %v5698_v17 = vrot.slane %v5697_v48, 1  ;;  %9272 = vpow2.f32 %v5477_v45  ;;  %v13614_v16 = vpop.f32.mrf.mxu1 }
 0x36a   :  { %v6089_v57 = vmul.f32 %v9261_v11, %v15686_v2  ;;  %v5323_v0 = vsub.f32 %v13436_v34, %v5084_v27  ;;  %v6090_v30 = vmul.f32 %v9261_v11, %v15687_v13  ;;  %v5095_v7 = vsel %vm4814_vm4, %v13492_v40, -inf }
 0x36b   :  { %v5090_v43 = vrot.slane %v5089_v53, 2  ;;  %v5699_v19 = vadd.f32 %v5698_v17, %v5697_v48  ;;  %v5094_v47 = vsel %vm4814_vm4, %v13507_v42, -inf  ;;  %v13598_v35 = vpop.eup %9262  ;;  %v13600_v50 = vadd.f32 %v5775_v23, %v5774_v46  ;;  %v13628_v55 = vpop.f32.mrf.mxu1 }
 0x36c   :  { %v13602_v39 = vadd.f32 %v5784_v8, %v5783_v56  ;;  %9274 = vpow2.f32 %v5479_v4  ;;  %v5096_v34 = vmax.f32 %v5094_v47, %v5095_v7  ;;  %v13604_v45 = vpop.eup %9264  ;;  %v5793_v11 = vrot.slane %v13586_v18, 4 }
 0x36d   :  { %15688 = vst [vmem:[#allocation113_spill] sm:$0xff] %v13604_v45  ;;  %6287 = vperm.xlu0 %9130, %v6089_v57   ;;  %6292 = vperm.xlu1 %9131, %v6090_v30   ;;  %v5091_v17 = vmax.f32 %v5089_v53, %v5090_v43  ;;  %9276 = vrcp.f32 %v5699_v19  ;;  %v15689_v48 = vrot.slane %v13374_v22, 2  ;;  %v5481_v5 = vmul.f32 1.442695, %v5323_v0 }
 0x36e   :  { %v5097_v28 = vrot.slane %v5096_v34, 4  ;;  %v5104_v46 = vsel %vm4814_vm4, %v13518_v12, -inf  ;;  %v5103_v56 = vsel %vm4814_vm4, %v13531_v14, -inf  ;;  %v5324_v23 = vsub.f32 %v13426_v60, %v5084_v27 }
 0x36f   :  { %v5706_v13 = vadd.f32 %v15689_v48, %v13374_v22  ;;  %v5092_v8 = vrot.slane %v5091_v17, 1  ;;  %v5105_v43 = vmax.f32 %v5103_v56, %v5104_v46  ;;  %v5799_v2 = vsel %vm4814_vm4, %v13598_v35, 0.0 }
 0x370   :  { %v5800_v22 = vsel %vm4814_vm4, %v13604_v45, 0.0  ;;  %v5098_v57 = vmax.f32 %v5096_v34, %v5097_v28  ;;  %v15690_v0 = vrot.slane %v13444_v63, 2  ;;  %9278 = vpow2.f32 %v5481_v5  ;;  %v7222_v34 = vld [vmem:[%s14874_s4 + $0x38] sm:$0xff] }
 0x371   :  { %v5707_v4 = vrot.slane %v5706_v13, 1  ;;  %v9267_v53 = vpop.eup %9266  ;;  %v5093_v7 = vmax.f32 %v5091_v17, %v5092_v8  ;;  %v5106_v46 = vrot.slane %v5105_v43, 4  ;;  %v5113_v8 = vsel %vm4814_vm4, %v13552_v15, -inf  ;;  %9082 = vmatpush3.msra.mxu0 %v7222_v34 }
 0x372   :  { %v5715_v30 = vadd.f32 %v15690_v0, %v13444_v63  ;;  %v6091_v19 = vmul.f32 %v9267_v53, %v13237_v36  ;;  %v6092_v60 = vmul.f32 %v9267_v53, %v13243_v25  ;;  %v13626_v47 = vpop.eup %9268  ;;  %v5099_v48 = vrot.slane %v5098_v57, 2 }
 0x373   :  { %v5708_v27 = vadd.f32 %v5707_v4, %v5706_v13  ;;  %15691 = vst [vmem:[#allocation114_spill] sm:$0xff] %v13626_v47  ;;  %v13633_v28 = vpop.eup %9270  ;;  %v5483_v63 = vmul.f32 1.442695, %v5324_v23  ;;  %v5325_v36 = vsub.f32 %v13478_v3, %v5093_v7  ;;  %v5326_v25 = vsub.f32 %v13455_v49, %v5093_v7 }
 0x374   :  { %v5716_v56 = vrot.slane %v5715_v30, 1  ;;  %15692 = vst [vmem:[#allocation115_spill] sm:$0xff] %v13633_v28  ;;  %6297 = vperm.xlu0 %9130, %v6091_v19   ;;  %6302 = vperm.xlu1 %9131, %v6092_v60   ;;  %v5100_v17 = vmax.f32 %v5098_v57, %v5099_v48  ;;  %v5107_v13 = vmax.f32 %v5105_v43, %v5106_v46  ;;  %v5808_v4 = vsel %vm4814_vm4, %v13626_v47, 0.0 }
 0x375   :  { %9280 = vrcp.f32 %v5708_v27  ;;  %v5809_v23 = vsel %vm4814_vm4, %v13633_v28, 0.0  ;;  %v5485_v53 = vmul.f32 1.442695, %v5325_v36  ;;  %v5112_v3 = vsel %vm4814_vm4, %v13566_v1, -inf }
 0x376   :  { %v5717_v5 = vadd.f32 %v5716_v56, %v5715_v30  ;;  %v15693_v49 = vmov 0.0   ;;  %v5487_v0 = vmul.f32 1.442695, %v5326_v25  ;;  %v5101_v57 = vrot.slane %v5100_v17, 1  ;;  %v13646_v30 = vpop.f32.mrf.mxu1  ;;  %v13648_v19 = vpop.eup %9272 }
 0x377   :  { %9083 = vmatprep.subr.mxu0 %v15693_v49  ;;  %v5108_v43 = vrot.slane %v5107_v13, 2  ;;  %15694 = vst [vmem:[#allocation116_spill] sm:$0xff] %v13648_v19  ;;  %v13652_v60 = vadd.f32 %v5793_v11, %v13586_v18  ;;  %v5114_v27 = vmax.f32 %v5112_v3, %v5113_v8  ;;  %v5801_v48 = vadd.f32 %v5800_v22, %v5799_v2  ;;  %v15698_v8 = vld [vmem:[#allocation119_spill] sm:$0xff] }
 0x378   :  { %9282 = vrcp.f32 %v5717_v5  ;;  %v5102_v46 = vmax.f32 %v5100_v17, %v5101_v57  ;;  %v5810_v25 = vadd.f32 %v5809_v23, %v5808_v4  ;;  %v15696_v28 = vrot.slane %v13447_v54, 2  ;;  %v13662_v22 = vpop.f32.mrf.mxu1  ;;  %v15697_v17 = vld [vmem:[#allocation118_spill] sm:$0xff] }
 0x379   :  { %9284 = vpow2.f32 %v5483_v63  ;;  %v5109_v56 = vmax.f32 %v5107_v13, %v5108_v43  ;;  %v13654_v34 = vpop.eup %9274  ;;  %v5115_v5 = vrot.slane %v5114_v27, 4 }
 0x37a   :  { %9286 = vpow2.f32 %v5485_v53  ;;  %15695 = vst [vmem:[#allocation117_spill] sm:$0xff] %v13654_v34  ;;  %v5724_v47 = vadd.f32 %v15696_v28, %v13447_v54  ;;  %v9277_v7 = vpop.eup %9276  ;;  %v5327_v18 = vsub.f32 %v13507_v42, %v5102_v46  ;;  %v5328_v11 = vsub.f32 %v13492_v40, %v5102_v46  ;;  %v13675_v46 = vpop.f32.mrf.mxu1 }
 0x37b   :  { %9288 = vpow2.f32 %v5487_v0  ;;  %v5110_v2 = vrot.slane %v5109_v56, 1  ;;  %v6093_v13 = vmul.f32 %v9277_v7, %v15697_v17  ;;  %v6094_v4 = vmul.f32 %v9277_v7, %v15698_v8 }
 0x37c   :  { %v5116_v23 = vmax.f32 %v5114_v27, %v5115_v5  ;;  %v5802_v53 = vrot.slane %v5801_v48, 4  ;;  %v5817_v54 = vsel %vm4814_vm4, %v13648_v19, 0.0  ;;  %v5489_v28 = vmul.f32 1.442695, %v5327_v18  ;;  %v15700_v19 = vld [vmem:[#allocation120_spill] sm:$0xff] }
 0x37d   :  { %v5491_v3 = vmul.f32 1.442695, %v5328_v11  ;;  %v5818_v42 = vsel %vm4814_vm4, %v13654_v34, 0.0  ;;  %6307 = vperm.xlu0 %9130, %v6093_v13   ;;  %6312 = vperm.xlu1 %9131, %v6094_v4   ;;  %v5111_v40 = vmax.f32 %v5109_v56, %v5110_v2  ;;  %v5725_v57 = vrot.slane %v5724_v47, 1  ;;  %v13677_v5 = vpop.eup %9278 }
 0x37e   :  { %v5117_v0 = vrot.slane %v5116_v23, 2  ;;  %v5811_v43 = vrot.slane %v5810_v25, 4  ;;  %9290 = vpow2.f32 %v5489_v28  ;;  %v5122_v7 = vsel %vm4814_vm4, %v13581_v31, -inf }
 0x37f   :  { %v5121_v27 = vsel %vm4814_vm4, %v13592_v61, -inf  ;;  %9292 = vpow2.f32 %v5491_v3  ;;  %v5329_v18 = vsub.f32 %v13531_v14, %v5111_v40  ;;  %v5330_v11 = vsub.f32 %v13518_v12, %v5111_v40 }
 0x380   :  { %v5118_v56 = vmax.f32 %v5116_v23, %v5117_v0  ;;  %v13681_v17 = vadd.f32 %v5818_v42, %v5817_v54  ;;  %v5726_v13 = vadd.f32 %v5725_v57, %v5724_v47  ;;  %v5123_v8 = vmax.f32 %v5121_v27, %v5122_v7  ;;  %v13690_v23 = vpop.f32.mrf.mxu1 }
 0x381   :  { %v15699_v4 = vrot.slane %v13469_v37, 2  ;;  %v5493_v36 = vmul.f32 1.442695, %v5329_v18  ;;  %v5495_v34 = vmul.f32 1.442695, %v5330_v11  ;;  %v13688_v45 = vadd.f32 %v5802_v53, %v5801_v48 }
 0x382   :  { %v9281_v2 = vpop.eup %9280  ;;  %v5119_v14 = vrot.slane %v5118_v56, 1  ;;  %9294 = vrcp.f32 %v5726_v13  ;;  %v5124_v12 = vrot.slane %v5123_v8, 4  ;;  %v13692_v47 = vadd.f32 %v5811_v43, %v5810_v25  ;;  %v13709_v27 = vpop.f32.mrf.mxu1 }
 0x383   :  { %v5733_v28 = vadd.f32 %v15699_v4, %v13469_v37  ;;  %v6095_v63 = vmul.f32 %v9281_v2, %v13285_v9  ;;  %v6096_v3 = vmul.f32 %v9281_v2, %v15700_v19  ;;  %9296 = vpow2.f32 %v5493_v36 }
 0x384   :  { %v5130_v9 = vsel %vm4814_vm4, %v13628_v55, -inf  ;;  %v5820_v19 = vrot.slane %v13681_v17, 4  ;;  %9298 = vpow2.f32 %v5495_v34  ;;  %v5120_v53 = vmax.f32 %v5118_v56, %v5119_v14 }
 0x385   :  { %v9283_v54 = vpop.eup %9282  ;;  %6317 = vperm.xlu0 %9130, %v6095_v63   ;;  %6322 = vperm.xlu1 %9131, %v6096_v3   ;;  %v5734_v37 = vrot.slane %v5733_v28, 1  ;;  %v5125_v0 = vmax.f32 %v5123_v8, %v5124_v12  ;;  %v5131_v36 = vsel %vm4814_vm4, %v13614_v16, -inf  ;;  %v5826_v57 = vsel %vm4814_vm4, %v13677_v5, 0.0 }
 0x386   :  { %v13696_v42 = vpop.eup %9284  ;;  %v6097_v48 = vmul.f32 %v9283_v54, %v13329_v26  ;;  %v6098_v25 = vmul.f32 %v9283_v54, %v13335_v52  ;;  %v5331_v43 = vsub.f32 %v13566_v1, %v5120_v53  ;;  %v5332_v7 = vsub.f32 %v13552_v15, %v5120_v53 }
 0x387   :  { %v13700_v40 = vpop.eup %9286  ;;  %v5735_v63 = vadd.f32 %v5734_v37, %v5733_v28  ;;  %v5132_v34 = vmax.f32 %v5130_v9, %v5131_v36  ;;  %v5827_v52 = vsel %vm4814_vm4, %v13696_v42, 0.0  ;;  %v5126_v18 = vrot.slane %v5125_v0, 2  ;;  %v13729_v9 = vpop.f32.mrf.mxu1 }
 0x388   :  { %v13711_v26 = vpop.eup %9288  ;;  %v15701_v11 = vrot.slane %v13474_v6, 2  ;;  %v5835_v1 = vsel %vm4814_vm4, %v13700_v40, 0.0  ;;  %v5497_v15 = vmul.f32 1.442695, %v5331_v43  ;;  %v5499_v2 = vmul.f32 1.442695, %v5332_v7 }
 0x389   :  { %6327 = vperm.xlu0 %9130, %v6097_v48   ;;  %6332 = vperm.xlu1 %9131, %v6098_v25   ;;  %9300 = vrcp.f32 %v5735_v63  ;;  %v5133_v13 = vrot.slane %v5132_v34, 4  ;;  %v5127_v8 = vmax.f32 %v5125_v0, %v5126_v18  ;;  %v5140_v28 = vsel %vm4814_vm4, %v13646_v30, -inf }
 0x38a   :  { %v5742_v56 = vadd.f32 %v15701_v11, %v13474_v6  ;;  %v5139_v3 = vsel %vm4814_vm4, %v13662_v22, -inf  ;;  %v5836_v14 = vsel %vm4814_vm4, %v13711_v26, 0.0  ;;  %v15702_v6 = vrot.slane %v13520_v32, 2 }
 0x38b   :  { %v5134_v12 = vmax.f32 %v5132_v34, %v5133_v13  ;;  %v5141_v54 = vmax.f32 %v5139_v3, %v5140_v28  ;;  %v13731_v48 = vpop.eup %9290  ;;  %v5828_v53 = vadd.f32 %v5827_v52, %v5826_v57  ;;  %9302 = vpow2.f32 %v5497_v15  ;;  %v13739_v15 = vpop.f32.mrf.mxu1 }
 0x38c   :  { %v5743_v4 = vrot.slane %v5742_v56, 1  ;;  %v5751_v37 = vadd.f32 %v15702_v6, %v13520_v32  ;;  %v5128_v25 = vrot.slane %v5127_v8, 1  ;;  %v13733_v63 = vpop.eup %9292  ;;  %9304 = vpow2.f32 %v5499_v2 }
 0x38d   :  { %v5135_v36 = vrot.slane %v5134_v12, 2  ;;  %v5142_v43 = vrot.slane %v5141_v54, 4  ;;  %v5837_v34 = vadd.f32 %v5836_v14, %v5835_v1  ;;  %v5844_v18 = vsel %vm4814_vm4, %v13731_v48, 0.0 }
 0x38e   :  { %v5744_v0 = vadd.f32 %v5743_v4, %v5742_v56  ;;  %v5752_v7 = vrot.slane %v5751_v37, 1  ;;  %v5129_v11 = vmax.f32 %v5127_v8, %v5128_v25  ;;  %v5845_v32 = vsel %vm4814_vm4, %v13733_v63, 0.0 }
 0x38f   :  { %v5136_v13 = vmax.f32 %v5134_v12, %v5135_v36  ;;  %v5143_v57 = vmax.f32 %v5141_v54, %v5142_v43  ;;  %v9295_v56 = vpop.eup %9294  ;;  %v13742_v2 = vadd.f32 %v5820_v19, %v13681_v17  ;;  %v5829_v4 = vrot.slane %v5828_v53, 4 }
 0x390   :  { %9306 = vrcp.f32 %v5744_v0  ;;  %v5753_v52 = vadd.f32 %v5752_v7, %v5751_v37  ;;  %v5333_v1 = vsub.f32 %v13592_v61, %v5129_v11  ;;  %v5334_v28 = vsub.f32 %v13581_v31, %v5129_v11  ;;  %v13746_v3 = vpop.eup %9296  ;;  %v13756_v61 = vpop.f32.mrf.mxu1 }
 0x391   :  { %v6099_v8 = vmul.f32 %v9295_v56, %v13343_v44  ;;  %v6100_v14 = vmul.f32 %v9295_v56, %v13347_v62  ;;  %v5137_v12 = vrot.slane %v5136_v13, 1  ;;  %v5148_v54 = vsel %vm4814_vm4, %v13690_v23, -inf  ;;  %v13752_v6 = vpop.eup %9298 }
 0x392   :  { %v5846_v37 = vadd.f32 %v5845_v32, %v5844_v18  ;;  %v5501_v17 = vmul.f32 1.442695, %v5333_v1  ;;  %v5503_v19 = vmul.f32 1.442695, %v5334_v28  ;;  %v5144_v25 = vrot.slane %v5143_v57, 2 }
 0x393   :  { %v5838_v0 = vrot.slane %v5837_v34, 4  ;;  %6337 = vperm.xlu0 %9130, %v6099_v8   ;;  %6342 = vperm.xlu1 %9131, %v6100_v14   ;;  %v5138_v31 = vmax.f32 %v5136_v13, %v5137_v12  ;;  %9308 = vrcp.f32 %v5753_v52  ;;  %v5149_v44 = vsel %vm4814_vm4, %v13675_v46, -inf }
 0x394   :  { %v5853_v62 = vsel %vm4814_vm4, %v13746_v3, 0.0  ;;  %9310 = vpow2.f32 %v5501_v17  ;;  %v5145_v36 = vmax.f32 %v5143_v57, %v5144_v25  ;;  %v5150_v43 = vmax.f32 %v5148_v54, %v5149_v44  ;;  %v13769_v54 = vpop.f32.mrf.mxu1 }
 0x395   :  { %v5854_v18 = vsel %vm4814_vm4, %v13752_v6, 0.0  ;;  %9312 = vpow2.f32 %v5503_v19  ;;  %v5335_v11 = vsub.f32 %v13628_v55, %v5138_v31  ;;  %v5336_v32 = vsub.f32 %v13614_v16, %v5138_v31 }
 0x396   :  { %v9301_v7 = vpop.eup %9300  ;;  %v5847_v13 = vrot.slane %v5846_v37, 4  ;;  %v5146_v1 = vrot.slane %v5145_v36, 1  ;;  %v5151_v14 = vrot.slane %v5150_v43, 4  ;;  %v15703_v57 = vrot.slane %v13544_v59, 2 }
 0x397   :  { %v6101_v52 = vmul.f32 %v9301_v7, %v13378_v51  ;;  %v6102_v56 = vmul.f32 %v9301_v7, %v13386_v10  ;;  %v5505_v28 = vmul.f32 1.442695, %v5335_v11  ;;  %v5507_v8 = vmul.f32 1.442695, %v5336_v32  ;;  %v13790_v11 = vpop.f32.mrf.mxu1 }
 0x398   :  { %v5760_v12 = vadd.f32 %v15703_v57, %v13544_v59  ;;  %v5804_v17 = vrot.slane %v13688_v45, 2  ;;  %v13772_v55 = vadd.f32 %v5829_v4, %v5828_v53  ;;  %v13774_v16 = vadd.f32 %v5854_v18, %v5853_v62  ;;  %v13776_v10 = vpop.eup %9302 }
 0x399   :  { %6347 = vperm.xlu0 %9130, %v6101_v52   ;;  %6352 = vperm.xlu1 %9131, %v6102_v56   ;;  %v5147_v51 = vmax.f32 %v5145_v36, %v5146_v1  ;;  %9314 = vpow2.f32 %v5505_v28  ;;  %v5152_v19 = vmax.f32 %v5150_v43, %v5151_v14  ;;  %v5157_v31 = vsel %vm4814_vm4, %v13729_v9, -inf  ;;  %v13780_v59 = vpop.eup %9304 }
 0x39a   :  { %v5761_v25 = vrot.slane %v5760_v12, 1  ;;  %v13782_v44 = vadd.f32 %v5838_v0, %v5837_v34  ;;  %v13784_v7 = vadd.f32 %v5847_v13, %v5846_v37  ;;  %9316 = vpow2.f32 %v5507_v8 }
 0x39b   :  { %v5337_v53 = vsub.f32 %v13662_v22, %v5147_v51  ;;  %v5338_v62 = vsub.f32 %v13646_v30, %v5147_v51  ;;  %v5153_v36 = vrot.slane %v5152_v19, 2  ;;  %v5158_v43 = vsel %vm4814_vm4, %v13709_v27, -inf  ;;  %v7221_v30 = vld [vmem:[%s14874_s4 + $0x30] sm:$0xff] }
 0x39c   :  { %v5762_v18 = vadd.f32 %v5761_v25, %v5760_v12  ;;  %v5159_v37 = vmax.f32 %v5157_v31, %v5158_v43  ;;  %v5856_v0 = vrot.slane %v13774_v16, 4  ;;  %v5862_v56 = vsel %vm4814_vm4, %v13776_v10, 0.0  ;;  %v13809_v12 = vpop.f32.mrf.mxu1  ;;  %9084 = vmatpush3.msra.mxu0 %v7221_v30 }
 0x39d   :  { %v9307_v4 = vpop.eup %9306  ;;  %v5509_v52 = vmul.f32 1.442695, %v5337_v53  ;;  %v5511_v13 = vmul.f32 1.442695, %v5338_v62  ;;  %v5154_v22 = vmax.f32 %v5152_v19, %v5153_v36  ;;  %v5863_v1 = vsel %vm4814_vm4, %v13780_v59, 0.0  ;;  %9085 = vmatprep.subr.mxu0 %v15693_v49 }
 0x39e   :  { %v6103_v32 = vmul.f32 %v9307_v4, %v13412_v58  ;;  %v6104_v34 = vmul.f32 %v9307_v4, %v13416_v24  ;;  %9318 = vrcp.f32 %v5762_v18  ;;  %v5160_v58 = vrot.slane %v5159_v37, 4 }
 0x39f   :  { %v15704_v24 = vrot.slane %v13546_v38, 2  ;;  %9320 = vpow2.f32 %v5509_v52  ;;  %v5155_v8 = vrot.slane %v5154_v22, 1  ;;  %v5167_v14 = vsel %vm4814_vm4, %v13739_v15, -inf }
 0x3a0   :  { %6357 = vperm.xlu0 %9130, %v6103_v32   ;;  %6362 = vperm.xlu1 %9131, %v6104_v34   ;;  %v5166_v57 = vsel %vm4814_vm4, %v13756_v61, -inf  ;;  %v9309_v51 = vpop.eup %9308  ;;  %v5161_v19 = vmax.f32 %v5159_v37, %v5160_v58  ;;  %v15705_v53 = vrot.slane %v13600_v50, 2  ;;  %9322 = vpow2.f32 %v5511_v13 }
 0x3a1   :  { %v5769_v28 = vadd.f32 %v15704_v24, %v13546_v38  ;;  %v5168_v31 = vmax.f32 %v5166_v57, %v5167_v14  ;;  %v13815_v38 = vpop.eup %9310  ;;  %v6105_v62 = vmul.f32 %v9309_v51, %v13433_v29  ;;  %v5156_v36 = vmax.f32 %v5154_v22, %v5155_v8  ;;  %v13827_v22 = vpop.f32.mrf.mxu1 }
 0x3a2   :  { %v5778_v4 = vadd.f32 %v15705_v53, %v13600_v50  ;;  %15706 = vst [vmem:[#allocation118_spill] sm:$0xff] %v13815_v38  ;;  %v6106_v18 = vmul.f32 %v9309_v51, %v13438_v33  ;;  %v13819_v43 = vpop.eup %9312  ;;  %v5871_v32 = vsel %vm4814_vm4, %v13815_v38, 0.0  ;;  %v5162_v52 = vrot.slane %v5161_v19, 2 }
 0x3a3   :  { %v5770_v25 = vrot.slane %v5769_v28, 1  ;;  %15707 = vst [vmem:[#allocation119_spill] sm:$0xff] %v13819_v43  ;;  %v5169_v37 = vrot.slane %v5168_v31, 4  ;;  %v5872_v50 = vsel %vm4814_vm4, %v13819_v43, 0.0  ;;  %v5339_v30 = vsub.f32 %v13690_v23, %v5156_v36 }
 0x3a4   :  { %6367 = vperm.xlu0 %9130, %v6105_v62   ;;  %v5340_v13 = vsub.f32 %v13675_v46, %v5156_v36  ;;  %6372 = vperm.xlu1 %9131, %v6106_v18   ;;  %v5779_v29 = vrot.slane %v5778_v4, 1  ;;  %v5864_v33 = vadd.f32 %v5863_v1, %v5862_v56  ;;  %v5163_v58 = vmax.f32 %v5161_v19, %v5162_v52  ;;  %v13845_v36 = vpop.f32.mrf.mxu1 }
 0x3a5   :  { %v5771_v34 = vadd.f32 %v5770_v25, %v5769_v28  ;;  %v5170_v24 = vmax.f32 %v5168_v31, %v5169_v37  ;;  %v5873_v8 = vadd.f32 %v5872_v50, %v5871_v32  ;;  %v5513_v14 = vmul.f32 1.442695, %v5339_v30 }
 0x3a6   :  { %v5515_v28 = vmul.f32 1.442695, %v5340_v13  ;;  %v5780_v57 = vadd.f32 %v5779_v29, %v5778_v4  ;;  %v13829_v51 = vpop.eup %9314  ;;  %v5164_v25 = vrot.slane %v5163_v58, 1  ;;  %v5176_v23 = vsel %vm4814_vm4, %v13769_v54, -inf }
 0x3a7   :  { %9324 = vrcp.f32 %v5771_v34  ;;  %15708 = vst [vmem:[#allocation120_spill] sm:$0xff] %v13829_v51  ;;  %v5171_v53 = vrot.slane %v5170_v24, 2  ;;  %v5175_v46 = vsel %vm4814_vm4, %v13790_v11, -inf  ;;  %v13835_v62 = vpop.eup %9316  ;;  %v13838_v56 = vadd.f32 %v5856_v0, %v13774_v16 }
 0x3a8   :  { %15709 = vst [vmem:[#allocation121_spill] sm:$0xff] %v13835_v62  ;;  %v5880_v1 = vsel %vm4814_vm4, %v13829_v51, 0.0  ;;  %v5177_v19 = vmax.f32 %v5175_v46, %v5176_v23  ;;  %v15710_v31 = vrot.slane %v13602_v39, 2  ;;  %v5865_v18 = vrot.slane %v5864_v33, 4 }
 0x3a9   :  { %v5881_v32 = vsel %vm4814_vm4, %v13835_v62, 0.0  ;;  %9326 = vpow2.f32 %v5513_v14  ;;  %v5165_v52 = vmax.f32 %v5163_v58, %v5164_v25  ;;  %v5874_v34 = vrot.slane %v5873_v8, 4  ;;  %v13855_v14 = vpop.f32.mrf.mxu1 }
 0x3aa   :  { %v5787_v4 = vadd.f32 %v15710_v31, %v13602_v39  ;;  %v5172_v37 = vmax.f32 %v5170_v24, %v5171_v53  ;;  %9328 = vrcp.f32 %v5780_v57  ;;  %v5178_v16 = vrot.slane %v5177_v19, 4 }
 0x3ab   :  { %v9319_v0 = vpop.eup %9318  ;;  %v13849_v50 = vadd.f32 %v5881_v32, %v5880_v1  ;;  %9330 = vpow2.f32 %v5515_v28  ;;  %v5341_v30 = vsub.f32 %v13729_v9, %v5165_v52  ;;  %v5342_v29 = vsub.f32 %v13709_v27, %v5165_v52  ;;  %v7219_v9 = vld [vmem:[%s14874_s4 + $0x20] sm:$0xff] }
 0x3ac   :  { %v5788_v13 = vrot.slane %v5787_v4, 1  ;;  %v6107_v39 = vmul.f32 %v9319_v0, %v13457_v20  ;;  %v6108_v23 = vmul.f32 %v9319_v0, %v13466_v41  ;;  %v5173_v46 = vrot.slane %v5172_v37, 1  ;;  %v13857_v58 = vpop.eup %9320 }
 0x3ad   :  { %15711 = vst [vmem:[#allocation122_spill] sm:$0xff] %v13857_v58  ;;  %v5813_v24 = vrot.slane %v13692_v47, 2  ;;  %v5179_v25 = vmax.f32 %v5177_v19, %v5178_v16  ;;  %v13864_v53 = vpop.eup %9322  ;;  %v13867_v31 = vadd.f32 %v5865_v18, %v5864_v33  ;;  %v13869_v32 = vadd.f32 %v5874_v34, %v5873_v8  ;;  %v7220_v19 = vld [vmem:[%s14874_s4 + $0x28] sm:$0xff]  ;;  %v13882_v18 = vpop.permute.xlu0 %6167 }
 0x3ae   :  { %6377 = vperm.xlu0 %9130, %v6107_v39   ;;  %6382 = vperm.xlu1 %9131, %v6108_v23   ;;  %v5174_v27 = vmax.f32 %v5172_v37, %v5173_v46  ;;  %v5789_v41 = vadd.f32 %v5788_v13, %v5787_v4  ;;  %15712 = vst [vmem:[#allocation123_spill] sm:$0xff] %v13864_v53  ;;  %v5517_v0 = vmul.f32 1.442695, %v5341_v30  ;;  %v5519_v39 = vmul.f32 1.442695, %v5342_v29  ;;  %v13876_v4 = vpop.f32.mrf.mxu1  ;;  %v13884_v34 = vpop.permute.xlu1 %6177 }
 0x3af   :  { %v5180_v52 = vrot.slane %v5179_v25, 2  ;;  %9086 = vmatpush3.msra.mxu0 %v7220_v19  ;;  %v5185_v33 = vsel %vm4814_vm4, %v13809_v12, -inf  ;;  %v5184_v8 = vsel %vm4814_vm4, %v13827_v22, -inf  ;;  %v15713_v46 = vrot.slane %v13652_v60, 2  ;;  %v15714_v19 = vld [vmem:[#allocation6_spill] sm:$0xff] }
 0x3b0   :  { %v5343_v37 = vsub.f32 %v13756_v61, %v5174_v27  ;;  %9332 = vrcp.f32 %v5789_v41  ;;  %9087 = vmatprep.subr.mxu0 %v15693_v49  ;;  %v5889_v61 = vsel %vm4814_vm4, %v13857_v58, 0.0  ;;  %v5344_v29 = vsub.f32 %v13739_v15, %v5174_v27 }
 0x3b1   :  { %v5181_v13 = vmax.f32 %v5179_v25, %v5180_v52  ;;  %v5186_v23 = vmax.f32 %v5184_v8, %v5185_v33  ;;  %v5796_v25 = vadd.f32 %v15713_v46, %v13652_v60  ;;  %v5890_v41 = vsel %vm4814_vm4, %v13864_v53, 0.0  ;;  %v13900_v33 = vpop.f32.mrf.mxu1  ;;  %9088 = vmatpush3.msra.mxu0 %v7219_v9  ;;  %v7218_v60 = vld [vmem:[%s14874_s4 + $0x18] sm:$0xff] }
 0x3b2   :  { %9334 = vpow2.f32 %v5517_v0  ;;  %v5521_v28 = vmul.f32 1.442695, %v5343_v37  ;;  %v5194_v8 = vsel %vm4814_vm4, %v13845_v36, -inf  ;;  %v5193_v0 = vsel %vm4814_vm4, %v13855_v14, -inf  ;;  %9089 = vmatprep.subr.mxu0 %v15693_v49 }
 0x3b3   :  { %v5182_v20 = vrot.slane %v5181_v13, 1  ;;  %v5187_v15 = vrot.slane %v5186_v23, 4  ;;  %v5797_v27 = vrot.slane %v5796_v25, 1  ;;  %9336 = vpow2.f32 %v5519_v39  ;;  %9090 = vmatpush3.msra.mxu0 %v7218_v60  ;;  %v7216_v60 = vld [vmem:[%s14874_s4 + $0x8] sm:$0xff] }
 0x3b4   :  { %v9325_v30 = vpop.eup %9324  ;;  %v5195_v9 = vmax.f32 %v5193_v0, %v5194_v8  ;;  %v13912_v16 = vadd.f32 %v5890_v41, %v5889_v61  ;;  %v5805_v39 = vadd.f32 %v5804_v17, %v13688_v45  ;;  %9338 = vpow2.f32 %v5521_v28  ;;  %v15717_v61 = vld [vmem:[#allocation19_spill] sm:$0xff]  ;;  %9091 = vmatprep.subr.mxu0 %v15693_v49 }
 0x3b5   :  { %v6109_v52 = vmul.f32 %v9325_v30, %v13481_v21  ;;  %v6110_v1 = vmul.f32 %v9325_v30, %v15714_v19  ;;  %v5183_v21 = vmax.f32 %v5181_v13, %v5182_v20  ;;  %v5523_v30 = vmul.f32 1.442695, %v5344_v29  ;;  %v13919_v13 = vpop.permute.xlu0 %6172  ;;  %v7217_v29 = vld [vmem:[%s14874_s4 + $0x10] sm:$0xff] }
 0x3b6   :  { %v13909_v37 = vpop.eup %9326  ;;  %v5188_v46 = vmax.f32 %v5186_v23, %v5187_v15  ;;  %v5798_v19 = vadd.f32 %v5797_v27, %v5796_v25  ;;  %v15718_v25 = vld [vmem:[#allocation7_spill] sm:$0xff]  ;;  %v13930_v15 = vpop.f32.mrf.mxu1  ;;  %v5196_v27 = vrot.slane %v5195_v9, 4  ;;  %9092 = vmatpush3.msra.mxu0 %v7217_v29 }
 0x3b7   :  { %6387 = vperm.xlu0 %9130, %v6109_v52   ;;  %6392 = vperm.xlu1 %9131, %v6110_v1   ;;  %15715 = vst [vmem:[#allocation6_spill] sm:$0xff] %v13909_v37  ;;  %v9329_v57 = vpop.eup %9328  ;;  %v5345_v1 = vsub.f32 %v13790_v11, %v5183_v21  ;;  %v5346_v20 = vsub.f32 %v13769_v54, %v5183_v21  ;;  %v13921_v52 = vpop.permute.xlu1 %6182  ;;  %v5898_v28 = vsel %vm4814_vm4, %v13909_v37, 0.0  ;;  %v5806_v21 = vrot.slane %v5805_v39, 1 }
 0x3b8   :  { %v13926_v23 = vpop.eup %9330  ;;  %v6111_v11 = vmul.f32 %v9329_v57, %v15717_v61  ;;  %v6112_v54 = vmul.f32 %v9329_v57, %v15718_v25  ;;  %v5189_v41 = vrot.slane %v5188_v46, 2  ;;  %9340 = vrcp.f32 %v5798_v19  ;;  %9093 = vmatprep.subr.mxu0 %v15693_v49  ;;  %v13948_v29 = vpop.f32.mrf.mxu1 }
 0x3b9   :  { %15716 = vst [vmem:[#allocation124_spill] sm:$0xff] %v13926_v23  ;;  %v5525_v45 = vmul.f32 1.442695, %v5345_v1  ;;  %v5527_v17 = vmul.f32 1.442695, %v5346_v20  ;;  %9342 = vpow2.f32 %v5523_v30  ;;  %v5899_v8 = vsel %vm4814_vm4, %v13926_v23, 0.0  ;;  %9094 = vmatpush3.msra.mxu0 %v7216_v60  ;;  %v13950_v25 = vpop.permute.xlu0 %6187 }
 0x3ba   :  { %v5190_v57 = vmax.f32 %v5188_v46, %v5189_v41  ;;  %v5197_v0 = vmax.f32 %v5195_v9, %v5196_v27  ;;  %v5202_v19 = vsel %vm4814_vm4, %v13900_v33, -inf  ;;  %v5814_v1 = vadd.f32 %v5813_v24, %v13692_v47  ;;  %9095 = vmatprep.subr.mxu0 %v15693_v49  ;;  %v15720_v60 = vld [vmem:[#allocation20_spill] sm:$0xff]  ;;  %v13968_v58 = vpop.f32.mrf.mxu1 }
 0x3bb   :  { %6397 = vperm.xlu0 %9130, %v6111_v11   ;;  %6402 = vperm.xlu1 %9131, %v6112_v54   ;;  %9344 = vpow2.f32 %v5525_v45  ;;  %v5807_v30 = vadd.f32 %v5806_v21, %v5805_v39  ;;  %v5203_v46 = vsel %vm4814_vm4, %v13876_v4, -inf  ;;  %v13952_v54 = vpop.permute.xlu1 %6192  ;;  %v15719_v24 = vrot.slane %v13849_v50, 4 }
 0x3bc   :  { %v5191_v20 = vrot.slane %v5190_v57, 1  ;;  %9346 = vpow2.f32 %v5527_v17  ;;  %v5198_v9 = vrot.slane %v5197_v0, 2  ;;  %v5204_v61 = vmax.f32 %v5202_v19, %v5203_v46  ;;  %v7215_v17 = vld [vmem:[%s14874_s4] sm:$0xff]  ;;  %v15721_v19 = vld [vmem:[#allocation8_spill] sm:$0xff]  ;;  %s9488_s4 = smov [#allocation3]  }
 0x3bd   :  { %v5815_v11 = vrot.slane %v5814_v1, 1  ;;  %v9333_v47 = vpop.eup %9332  ;;  %v13958_v39 = vadd.f32 %v15719_v24, %v13849_v50  ;;  %v5892_v41 = vrot.slane %v13912_v16, 4  ;;  %9348 = vrcp.f32 %v5807_v30  ;;  %9096 = vmatpush3.msra.mxu0 %v7215_v17  ;;  %v13984_v17 = vpop.permute.xlu0 %6197  ;;  %s7582_s21 = sshll.u32 %s9488_s4, 4  ;;  %s7583_s21 = int_to_ptr.vmem [resolvable:$true] %s7582_s21 }
 0x3be   :  { %v5192_v45 = vmax.f32 %v5190_v57, %v5191_v20  ;;  %v5900_v27 = vadd.f32 %v5899_v8, %v5898_v28  ;;  %v6113_v21 = vmul.f32 %v9333_v47, %v15720_v60  ;;  %v6114_v46 = vmul.f32 %v9333_v47, %v15721_v19  ;;  %s9463_s22 = scalar_lea.vmem %s7583_s21, 16  ;;  %s9467_s23 = scalar_lea.vmem %s7583_s21, 32 }
 0x3bf   :  { %v5199_v23 = vmax.f32 %v5197_v0, %v5198_v9  ;;  %v5205_v24 = vrot.slane %v5204_v61, 4  ;;  %v5816_v53 = vadd.f32 %v5815_v11, %v5814_v1  ;;  %v13970_v57 = vpop.eup %9334  ;;  %v5211_v0 = vsel %vm4814_vm4, %v13948_v29, -inf  ;;  %v13986_v60 = vpop.permute.xlu1 %6202  ;;  %p9464_p0 = scmp.ne.s32.totalorder %s7583_s21, %s9463_s22  ;;  %p9468_p1 = scmp.lt.s32.totalorder %s7583_s21, %s7583_s21 }
 0x3c0   :  { %v5347_v37 = vsub.f32 %v13827_v22, %v5192_v45  ;;  %v5348_v50 = vsub.f32 %v13809_v12, %v5192_v45  ;;  %15722 = vst [vmem:[#allocation19_spill] sm:$0xff] %v13970_v57  ;;  %6407 = vperm.xlu0 %9130, %v6113_v21   ;;  %6412 = vperm.xlu1 %9131, %v6114_v46   ;;  %v13976_v30 = vpop.eup %9336  ;;  %v5212_v45 = vsel %vm4814_vm4, %v13930_v15, -inf  ;;  %v5901_v21 = vrot.slane %v5900_v27, 4  ;;  %v13988_v12 = vpop.f32.mrf.mxu1  ;;  %p9469_p2 = scmp.lt.s32.totalorder %s9467_s23, %s9463_s22 }
 0x3c1   :  { %v5200_v8 = vrot.slane %v5199_v23, 1  ;;  %15723 = vst [vmem:[#allocation7_spill] sm:$0xff] %v13976_v30  ;;  %v5206_v9 = vmax.f32 %v5204_v61, %v5205_v24  ;;  %v13980_v11 = vadd.f32 %v5892_v41, %v13912_v16  ;;  %9350 = vrcp.f32 %v5816_v53 }
 0x3c2   :  { %v5529_v22 = vmul.f32 1.442695, %v5347_v37  ;;  %v5531_v1 = vmul.f32 1.442695, %v5348_v50  ;;  %v5213_v46 = vmax.f32 %v5211_v0, %v5212_v45  ;;  %v13990_v37 = vpop.eup %9338  ;;  %v5907_v16 = vsel %vm4814_vm4, %v13970_v57, 0.0  ;;  %v15727_v45 = vld [vmem:[#allocation21_spill] sm:$0xff]  ;;  %p9470_p3 = por %p9469_p2, %p9468_p1 }
 0x3c3   :  { %v5201_v47 = vmax.f32 %v5199_v23, %v5200_v8  ;;  %v5207_v19 = vrot.slane %v5206_v9, 2  ;;  %15724 = vst [vmem:[#allocation20_spill] sm:$0xff] %v13990_v37  ;;  %v5908_v41 = vsel %vm4814_vm4, %v13976_v30, 0.0  ;;  %v15725_v8 = vrot.slane %v13742_v2, 2  ;;  %v15728_v57 = vld [vmem:[#allocation112_spill] sm:$0xff]  ;;  %v14006_v30 = vpop.f32.mrf.mxu1 }
 0x3c4   :  { %9352 = vpow2.f32 %v5529_v22  ;;  %v5214_v24 = vrot.slane %v5213_v46, 4  ;;  %p9471_p4 = pnand %p9470_p3, %p9464_p0 }
 0x3c5   :  { %9354 = vpow2.f32 %v5531_v1  ;;  %v5349_v53 = vsub.f32 %v13855_v14, %v5201_v47  ;;  %v5350_v23 = vsub.f32 %v13845_v36, %v5201_v47  ;;  %v9341_v61 = vpop.eup %9340  ;;  %v5208_v50 = vmax.f32 %v5206_v9, %v5207_v19  ;;  %v14032_v43 = vpop.f32.mrf.mxu1 }
 0x3c6   :  { %v5823_v0 = vadd.f32 %v15725_v8, %v13742_v2  ;;  %v14001_v22 = vpop.eup %9342  ;;  %v6115_v28 = vmul.f32 %v9341_v61, %v15727_v45  ;;  %v6116_v14 = vmul.f32 %v9341_v61, %v15728_v57  ;;  %v5215_v62 = vmax.f32 %v5213_v46, %v5214_v24  ;;  %v14020_v46 = vpop.permute.xlu1 %6212 }
 0x3c7   :  { %15726 = vst [vmem:[#allocation8_spill] sm:$0xff] %v14001_v22  ;;  %v5533_v20 = vmul.f32 1.442695, %v5349_v53  ;;  %v5535_v1 = vmul.f32 1.442695, %v5350_v23  ;;  %v5209_v47 = vrot.slane %v5208_v50, 1  ;;  %v14010_v19 = vadd.f32 %v5901_v21, %v5900_v27  ;;  %v14018_v53 = vpop.permute.xlu0 %6207 }
 0x3c8   :  { %v5824_v51 = vrot.slane %v5823_v0, 1  ;;  %v14008_v9 = vpop.eup %9344  ;;  %v14012_v2 = vadd.f32 %v5908_v41, %v5907_v16  ;;  %v5916_v8 = vsel %vm4814_vm4, %v13990_v37, 0.0  ;;  %6417 = vperm.xlu0 %9130, %v6115_v28   ;;  %6422 = vperm.xlu1 %9131, %v6116_v14   ;;  %v5220_v57 = vsel %vm4814_vm4, %v13988_v12, -inf  ;;  %v15731_v37 = vld [vmem:[#allocation113_spill] sm:$0xff] }
 0x3c9   :  { %15729 = vst [vmem:[#allocation21_spill] sm:$0xff] %v14008_v9  ;;  %v14022_v23 = vpop.eup %9346  ;;  %v5917_v27 = vsel %vm4814_vm4, %v14001_v22, 0.0  ;;  %9356 = vpow2.f32 %v5533_v20  ;;  %v5210_v21 = vmax.f32 %v5208_v50, %v5209_v47  ;;  %v5221_v16 = vsel %vm4814_vm4, %v13968_v58, -inf }
 0x3ca   :  { %15730 = vst [vmem:[#allocation112_spill] sm:$0xff] %v14022_v23  ;;  %v9349_v61 = vpop.eup %9348  ;;  %9358 = vpow2.f32 %v5535_v1  ;;  %v5216_v28 = vrot.slane %v5215_v62, 2  ;;  %v5825_v41 = vadd.f32 %v5824_v51, %v5823_v0  ;;  %v5222_v24 = vmax.f32 %v5220_v57, %v5221_v16  ;;  %v14047_v16 = vpop.permute.xlu1 %6222 }
 0x3cb   :  { %v6117_v45 = vmul.f32 %v9349_v61, %v13598_v35  ;;  %v5351_v14 = vsub.f32 %v13900_v33, %v5210_v21  ;;  %v5352_v36 = vsub.f32 %v13876_v4, %v5210_v21  ;;  %v6118_v49 = vmul.f32 %v9349_v61, %v15731_v37  ;;  %v14045_v21 = vpop.permute.xlu0 %6217  ;;  %15733 = vst [vmem:[#allocation113_spill] sm:$0xff] %v14047_v16 }
 0x3cc   :  { %v5925_v20 = vsel %vm4814_vm4, %v14008_v9, 0.0  ;;  %v5217_v50 = vmax.f32 %v5215_v62, %v5216_v28  ;;  %9360 = vrcp.f32 %v5825_v41  ;;  %v5223_v47 = vrot.slane %v5222_v24, 4  ;;  %v14052_v41 = vpop.f32.mrf.mxu1 }
 0x3cd   :  { %v5926_v51 = vsel %vm4814_vm4, %v14022_v23, 0.0  ;;  %6427 = vperm.xlu0 %9130, %v6117_v45   ;;  %v5537_v0 = vmul.f32 1.442695, %v5351_v14  ;;  %v5539_v35 = vmul.f32 1.442695, %v5352_v36  ;;  %6432 = vperm.xlu1 %9131, %v6118_v49   ;;  %v15732_v4 = vrot.slane %v13772_v55, 2 }
 0x3ce   :  { %v5218_v37 = vrot.slane %v5217_v50, 1  ;;  %v5224_v1 = vmax.f32 %v5222_v24, %v5223_v47  ;;  %v5230_v57 = vsel %vm4814_vm4, %v14006_v30, -inf  ;;  %v5229_v62 = vsel %vm4814_vm4, %v14032_v43, -inf  ;;  %v9351_v61 = vpop.eup %9350  ;;  %v15736_v47 = vld [vmem:[#allocation114_spill] sm:$0xff] }
 0x3cf   :  { %v5832_v33 = vadd.f32 %v15732_v4, %v13772_v55  ;;  %9362 = vpow2.f32 %v5537_v0  ;;  %v5231_v49 = vmax.f32 %v5229_v62, %v5230_v57  ;;  %v15734_v28 = vrot.slane %v13782_v44, 2  ;;  %v15738_v0 = vld [vmem:[#allocation115_spill] sm:$0xff] }
 0x3d0   :  { %v5910_v45 = vrot.slane %v14012_v2, 4  ;;  %v5918_v14 = vadd.f32 %v5917_v27, %v5916_v8  ;;  %v6119_v4 = vmul.f32 %v9351_v61, %v15736_v47  ;;  %v5219_v23 = vmax.f32 %v5217_v50, %v5218_v37  ;;  %v14065_v37 = vpop.f32.mrf.mxu1 }
 0x3d1   :  { %v5833_v36 = vrot.slane %v5832_v33, 1  ;;  %v5841_v55 = vadd.f32 %v15734_v28, %v13782_v44  ;;  %v14054_v24 = vpop.eup %9352  ;;  %9364 = vpow2.f32 %v5539_v35  ;;  %v6120_v22 = vmul.f32 %v9351_v61, %v15738_v0  ;;  %v14069_v61 = vpop.permute.xlu0 %6227 }
 0x3d2   :  { %15735 = vst [vmem:[#allocation125_spill] sm:$0xff] %v14054_v24  ;;  %v14058_v9 = vpop.eup %9354  ;;  %v5225_v57 = vrot.slane %v5224_v1, 2  ;;  %v5927_v38 = vadd.f32 %v5926_v51, %v5925_v20  ;;  %6437 = vperm.xlu0 %9130, %v6119_v4   ;;  %v5353_v44 = vsub.f32 %v13948_v29, %v5219_v23  ;;  %v5354_v28 = vsub.f32 %v13930_v15, %v5219_v23  ;;  %v14071_v29 = vpop.permute.xlu1 %6232 }
 0x3d3   :  { %15737 = vst [vmem:[#allocation114_spill] sm:$0xff] %v14058_v9  ;;  %v5834_v62 = vadd.f32 %v5833_v36, %v5832_v33  ;;  %v5232_v16 = vrot.slane %v5231_v49, 4  ;;  %v5934_v8 = vsel %vm4814_vm4, %v14054_v24, 0.0  ;;  %6442 = vperm.xlu1 %9131, %v6120_v22   ;;  %v5842_v50 = vrot.slane %v5841_v55, 1 }
 0x3d4   :  { %v5226_v27 = vmax.f32 %v5224_v1, %v5225_v57  ;;  %v5935_v35 = vsel %vm4814_vm4, %v14058_v9, 0.0  ;;  %v5541_v33 = vmul.f32 1.442695, %v5353_v44  ;;  %v5543_v20 = vmul.f32 1.442695, %v5354_v28 }
 0x3d5   :  { %9366 = vrcp.f32 %v5834_v62  ;;  %v5233_v51 = vmax.f32 %v5231_v49, %v5232_v16  ;;  %v14075_v23 = vadd.f32 %v5910_v45, %v14012_v2  ;;  %v5843_v1 = vadd.f32 %v5842_v50, %v5841_v55  ;;  %v15741_v55 = vld [vmem:[#allocation107_spill] sm:$0xff] }
 0x3d6   :  { %v5227_v22 = vrot.slane %v5226_v27, 1  ;;  %v14077_v36 = vpop.eup %9356  ;;  %v5919_v47 = vrot.slane %v5918_v14, 4  ;;  %9368 = vpow2.f32 %v5541_v33  ;;  %v5238_v0 = vsel %vm4814_vm4, %v14065_v37, -inf }
 0x3d7   :  { %15739 = vst [vmem:[#allocation115_spill] sm:$0xff] %v14077_v36  ;;  %v5234_v4 = vrot.slane %v5233_v51, 2  ;;  %v14081_v16 = vpop.eup %9358  ;;  %v5928_v49 = vrot.slane %v5927_v38, 4  ;;  %v14083_v57 = vadd.f32 %v5935_v35, %v5934_v8  ;;  %9370 = vpow2.f32 %v5543_v20  ;;  %v14094_v20 = vpop.f32.mrf.mxu1 }
 0x3d8   :  { %15740 = vst [vmem:[#allocation126_spill] sm:$0xff] %v14081_v16  ;;  %v5228_v62 = vmax.f32 %v5226_v27, %v5227_v22  ;;  %9372 = vrcp.f32 %v5843_v1  ;;  %v5239_v2 = vsel %vm4814_vm4, %v14052_v41, -inf  ;;  %v15742_v45 = vmax.f32 %v15741_v55, 0.0  ;;  %v15744_v1 = vld [vmem:[#allocation117_spill] sm:$0xff] }
 0x3d9   :  { %v5235_v44 = vmax.f32 %v5233_v51, %v5234_v4  ;;  %v9361_v50 = vpop.eup %9360  ;;  %v5943_v33 = vsel %vm4814_vm4, %v14077_v36, 0.0  ;;  %v5240_v35 = vmax.f32 %v5238_v0, %v5239_v2  ;;  %v5944_v27 = vsel %vm4814_vm4, %v14081_v16, 0.0  ;;  %v15743_v51 = vld [vmem:[#allocation116_spill] sm:$0xff] }
 0x3da   :  { %v6665_v28 = vmul.f32 %v13882_v18, %v15742_v45  ;;  %v5355_v15 = vsub.f32 %v13988_v12, %v5228_v62  ;;  %v5356_v8 = vsub.f32 %v13968_v58, %v5228_v62  ;;  %v6121_v22 = vmul.f32 %v9361_v50, %v15743_v51  ;;  %v14100_v18 = vpop.permute.xlu0 %6237  ;;  %v14102_v45 = vpop.permute.xlu1 %6242  ;;  %v15748_v51 = vld [vmem:[#allocation106_spill] sm:$0xff] }
 0x3db   :  { %v6122_v4 = vmul.f32 %v9361_v50, %v15744_v1  ;;  %v5236_v55 = vrot.slane %v5235_v44, 1  ;;  %15745 = vst [vmem:[#allocation107_spill] sm:$0xff] %v14100_v18  ;;  %15746 = vst [vmem:[#allocation116_spill] sm:$0xff] %v14102_v45  ;;  %v5241_v12 = vrot.slane %v5240_v35, 4  ;;  %v15747_v58 = vrot.slane %v13784_v7, 2 }
 0x3dc   :  { %v5545_v36 = vmul.f32 1.442695, %v5355_v15  ;;  %v5547_v9 = vmul.f32 1.442695, %v5356_v8  ;;  %v14107_v62 = vpop.eup %9362  ;;  %v14110_v16 = vadd.f32 %v5919_v47, %v5918_v14  ;;  %6447 = vperm.xlu0 %9130, %v6121_v22   ;;  %v15749_v1 = vmax.f32 %v15748_v51, 0.0 }
 0x3dd   :  { %v5850_v0 = vadd.f32 %v15747_v58, %v13784_v7  ;;  %6452 = vperm.xlu1 %9131, %v6122_v4   ;;  %v5237_v50 = vmax.f32 %v5235_v44, %v5236_v55  ;;  %v14115_v15 = vadd.f32 %v5928_v49, %v5927_v38  ;;  %v5937_v8 = vrot.slane %v14083_v57, 4  ;;  %v14118_v7 = vpop.f32.mrf.mxu1 }
 0x3de   :  { %v6666_v24 = vmul.f32 %v13919_v13, %v15749_v1  ;;  %v5242_v45 = vmax.f32 %v5240_v35, %v5241_v12  ;;  %v14120_v58 = vpop.eup %9364  ;;  %v5945_v2 = vadd.f32 %v5944_v27, %v5943_v33  ;;  %9374 = vpow2.f32 %v5545_v36  ;;  %v14130_v36 = vpop.permute.xlu0 %6247 }
 0x3df   :  { %v5851_v18 = vrot.slane %v5850_v0, 1  ;;  %15750 = vst [vmem:[#allocation117_spill] sm:$0xff] %v14120_v58  ;;  %v5357_v14 = vsub.f32 %v14032_v43, %v5237_v50  ;;  %v6765_v47 = vsel %vm3948_vm3, %v6665_v28, 0.0  ;;  %v5952_v44 = vsel %vm4814_vm4, %v14107_v62, 0.0  ;;  %v14132_v43 = vpop.permute.xlu1 %6252 }
 0x3e0   :  { %9376 = vpow2.f32 %v5547_v9  ;;  %v5358_v38 = vsub.f32 %v14006_v30, %v5237_v50  ;;  %v5243_v13 = vrot.slane %v5242_v45, 2  ;;  %v6766_v4 = vsel %vm3948_vm3, %v6666_v24, 0.0 }
 0x3e1   :  { %v5549_v35 = vmul.f32 1.442695, %v5357_v14  ;;  %v5852_v22 = vadd.f32 %v5851_v18, %v5850_v0  ;;  %v5247_v33 = vsel %vm4814_vm4, %v14118_v7, -inf  ;;  %v5953_v28 = vsel %vm4814_vm4, %v14120_v58, 0.0 }
 0x3e2   :  { %v9367_v49 = vpop.eup %9366  ;;  %v5551_v27 = vmul.f32 1.442695, %v5358_v38  ;;  %v5244_v55 = vmax.f32 %v5242_v45, %v5243_v13  ;;  %v5248_v24 = vsel %vm4814_vm4, %v14094_v20, -inf  ;;  %v6767_v18 = vadd.f32 %v6766_v4, %v6765_v47 }
 0x3e3   :  { %v6123_v9 = vmul.f32 %v9367_v49, %v13677_v5  ;;  %v6124_v30 = vmul.f32 %v9367_v49, %v13696_v42  ;;  %9378 = vpow2.f32 %v5549_v35  ;;  %v14140_v12 = vpop.eup %9368  ;;  %v5946_v0 = vrot.slane %v5945_v2, 4 }
 0x3e4   :  { %15751 = vst [vmem:[#allocation106_spill] sm:$0xff] %v14140_v12  ;;  %9380 = vpow2.f32 %v5551_v27  ;;  %v5249_v50 = vmax.f32 %v5247_v33, %v5248_v24  ;;  %v15752_v51 = vrot.slane %v13838_v56, 2  ;;  %v14145_v1 = vpop.eup %9370  ;;  %v5954_v42 = vadd.f32 %v5953_v28, %v5952_v44  ;;  %v14156_v28 = vpop.permute.xlu0 %6257 }
 0x3e5   :  { %6457 = vperm.xlu0 %9130, %v6123_v9   ;;  %6462 = vperm.xlu1 %9131, %v6124_v30   ;;  %15753 = vst [vmem:[#allocation127_spill] sm:$0xff] %v14145_v1  ;;  %v5245_v14 = vrot.slane %v5244_v55, 1  ;;  %9382 = vrcp.f32 %v5852_v22  ;;  %v6768_v45 = vrot.slane %v6767_v18, 4  ;;  %v9373_v38 = vpop.eup %9372  ;;  %v14148_v47 = vadd.f32 %v5937_v8, %v14083_v57  ;;  %v14158_v22 = vpop.permute.xlu1 %6262  ;;  %v15754_v57 = vld [vmem:[#allocation109_spill] sm:$0xff] }
 0x3e6   :  { %v5859_v5 = vadd.f32 %v15752_v51, %v13838_v56  ;;  %v5961_v13 = vsel %vm4814_vm4, %v14140_v12, 0.0  ;;  %v5250_v49 = vrot.slane %v5249_v50, 4  ;;  %v5962_v4 = vsel %vm4814_vm4, %v14145_v1, 0.0  ;;  %v14165_v51 = vpop.f32.mrf.mxu1 }
 0x3e7   :  { %v6125_v56 = vmul.f32 %v9373_v38, %v13700_v40  ;;  %v5246_v33 = vmax.f32 %v5244_v55, %v5245_v14  ;;  %v6126_v44 = vmul.f32 %v9373_v38, %v13711_v26  ;;  %v14160_v9 = vadd.f32 %v5946_v0, %v5945_v2  ;;  %v15756_v2 = vld [vmem:[#allocation108_spill] sm:$0xff] }
 0x3e8   :  { %v5860_v35 = vrot.slane %v5859_v5, 1  ;;  %v15755_v8 = vmax.f32 %v15754_v57, 0.0  ;;  %v5251_v30 = vmax.f32 %v5249_v50, %v5250_v49  ;;  %v5955_v1 = vrot.slane %v5954_v42, 4 }
 0x3e9   :  { %6467 = vperm.xlu0 %9130, %v6125_v56   ;;  %v5359_v40 = vsub.f32 %v14065_v37, %v5246_v33  ;;  %v5360_v26 = vsub.f32 %v14052_v41, %v5246_v33  ;;  %6472 = vperm.xlu1 %9131, %v6126_v44   ;;  %v6769_v55 = vadd.f32 %v6768_v45, %v6767_v18  ;;  %v15757_v0 = vmax.f32 %v15756_v2, 0.0  ;;  %v14185_v44 = vpop.permute.xlu0 %6267  ;;  %v15761_v37 = vld [vmem:[#allocation111_spill] sm:$0xff] }
 0x3ea   :  { %v6667_v27 = vmul.f32 %v13884_v34, %v15755_v8  ;;  %v5861_v24 = vadd.f32 %v5860_v35, %v5859_v5  ;;  %v5963_v14 = vadd.f32 %v5962_v4, %v5961_v13  ;;  %v5252_v38 = vrot.slane %v5251_v30, 2  ;;  %v14179_v13 = vpop.f32.mrf.mxu1  ;;  %v14187_v8 = vpop.permute.xlu1 %6272 }
 0x3eb   :  { %v6668_v57 = vmul.f32 %v13921_v52, %v15757_v0  ;;  %v5553_v5 = vmul.f32 1.442695, %v5359_v40  ;;  %v5555_v49 = vmul.f32 1.442695, %v5360_v26  ;;  %v14174_v35 = vpop.eup %9374  ;;  %v14183_v52 = vadd.f32 %v5955_v1, %v5954_v42 }
 0x3ec   :  { %9384 = vrcp.f32 %v5861_v24  ;;  %15758 = vst [vmem:[#allocation109_spill] sm:$0xff] %v14174_v35  ;;  %v6774_v41 = vsel %vm3948_vm3, %v6667_v27, 0.0  ;;  %v5253_v18 = vmax.f32 %v5251_v30, %v5252_v38  ;;  %v6770_v56 = vrot.slane %v6769_v55, 2 }
 0x3ed   :  { %v6775_v45 = vsel %vm3948_vm3, %v6668_v57, 0.0  ;;  %v14181_v4 = vpop.eup %9376  ;;  %9386 = vpow2.f32 %v5553_v5  ;;  %v5964_v40 = vrot.slane %v5963_v14, 4  ;;  %v5257_v30 = vsel %vm4814_vm4, %v14165_v51, -inf }
 0x3ee   :  { %15759 = vst [vmem:[#allocation108_spill] sm:$0xff] %v14181_v4  ;;  %v6776_v33 = vadd.f32 %v6775_v45, %v6774_v41  ;;  %9388 = vpow2.f32 %v5555_v49  ;;  %v5254_v27 = vrot.slane %v5253_v18, 1  ;;  %v5256_v1 = vsel %vm4814_vm4, %v14179_v13, -inf }
 0x3ef   :  { %v15760_v42 = vrot.slane %v13867_v31, 2  ;;  %v5970_v0 = vsel %vm4814_vm4, %v14174_v35, 0.0  ;;  %v5971_v57 = vsel %vm4814_vm4, %v14181_v4, 0.0  ;;  %v5258_v49 = vmax.f32 %v5256_v1, %v5257_v30 }
 0x3f0   :  { %v6777_v26 = vrot.slane %v6776_v33, 4  ;;  %v14197_v2 = vpop.eup %9378  ;;  %v5255_v5 = vmax.f32 %v5253_v18, %v5254_v27  ;;  %v6771_v24 = vadd.f32 %v6770_v56, %v6769_v55  ;;  %v15762_v50 = vmax.f32 %v15761_v37, 0.0  ;;  %v14217_v37 = vpop.permute.xlu0 %6277 }
 0x3f1   :  { %v5868_v38 = vadd.f32 %v15760_v42, %v13867_v31  ;;  %v14203_v41 = vpop.eup %9380  ;;  %v14209_v12 = vadd.f32 %v5964_v40, %v5963_v14  ;;  %v5972_v18 = vadd.f32 %v5971_v57, %v5970_v0  ;;  %v5979_v27 = vsel %vm4814_vm4, %v14197_v2, 0.0 }
 0x3f2   :  { %v6669_v34 = vmul.f32 %v13950_v25, %v15762_v50  ;;  %v9383_v42 = vpop.eup %9382  ;;  %v5361_v35 = vsub.f32 %v14118_v7, %v5255_v5  ;;  %v5362_v58 = vsub.f32 %v14094_v20, %v5255_v5  ;;  %v6778_v4 = vadd.f32 %v6777_v26, %v6776_v33  ;;  %v14219_v25 = vpop.permute.xlu1 %6282  ;;  %v15763_v26 = vld [vmem:[#allocation110_spill] sm:$0xff] }
 0x3f3   :  { %v5869_v31 = vrot.slane %v5868_v38, 1  ;;  %v6127_v30 = vmul.f32 %v9383_v42, %v13731_v48  ;;  %v6128_v55 = vmul.f32 %v9383_v42, %v13733_v63  ;;  %v5980_v14 = vsel %vm4814_vm4, %v14203_v41, 0.0 }
 0x3f4   :  { %v5557_v50 = vmul.f32 1.442695, %v5361_v35  ;;  %v5559_v7 = vmul.f32 1.442695, %v5362_v58  ;;  %v5259_v56 = vrot.slane %v5258_v49, 4  ;;  %v6772_v20 = vrot.slane %v6771_v24, 1 }
 0x3f5   :  { %6477 = vperm.xlu0 %9130, %v6127_v30   ;;  %6482 = vperm.xlu1 %9131, %v6128_v55   ;;  %v6783_v33 = vsel %vm3948_vm3, %v6669_v34, 0.0  ;;  %v5870_v40 = vadd.f32 %v5869_v31, %v5868_v38  ;;  %v15764_v48 = vmax.f32 %v15763_v26, 0.0  ;;  %v6779_v1 = vrot.slane %v6778_v4, 2  ;;  %v15766_v30 = vld [vmem:[#allocation9_spill] sm:$0xff] }
 0x3f6   :  { %9390 = vpow2.f32 %v5557_v50  ;;  %v5260_v0 = vmax.f32 %v5258_v49, %v5259_v56  ;;  %v15765_v57 = vrot.slane %v13869_v32, 2  ;;  %v5981_v58 = vadd.f32 %v5980_v14, %v5979_v27  ;;  %v14239_v27 = vpop.permute.xlu0 %6287  ;;  %v14241_v14 = vpop.permute.xlu1 %6292 }
 0x3f7   :  { %v6670_v63 = vmul.f32 %v13952_v54, %v15764_v48  ;;  %9392 = vpow2.f32 %v5559_v7  ;;  %v15767_v55 = vmax.f32 %v15766_v30, 0.0  ;;  %v5973_v50 = vrot.slane %v5972_v18, 4  ;;  %v15768_v48 = vld [vmem:[#allocation58_spill] sm:$0xff] }
 0x3f8   :  { %v5877_v5 = vadd.f32 %v15765_v57, %v13869_v32  ;;  %v5261_v31 = vrot.slane %v5260_v0, 2  ;;  %9394 = vrcp.f32 %v5870_v40  ;;  %v14237_v56 = vadd.f32 %v6772_v20, %v6771_v24 }
 0x3f9   :  { %v9385_v35 = vpop.eup %9384  ;;  %v6784_v42 = vsel %vm3948_vm3, %v6670_v63, 0.0  ;;  %v6671_v34 = vmul.f32 %v13984_v17, %v15767_v55  ;;  %v6780_v17 = vadd.f32 %v6779_v1, %v6778_v4  ;;  %v5982_v24 = vrot.slane %v5981_v58, 4  ;;  %v15771_v55 = vld [vmem:[#allocation22_spill] sm:$0xff] }
 0x3fa   :  { %v6129_v38 = vmul.f32 %v9385_v35, %v13746_v3  ;;  %v6130_v54 = vmul.f32 %v9385_v35, %v13752_v6  ;;  %v6785_v32 = vadd.f32 %v6784_v42, %v6783_v33  ;;  %v14243_v7 = vpop.eup %9386  ;;  %v5262_v26 = vmax.f32 %v5260_v0, %v5261_v31 }
 0x3fb   :  { %v5878_v3 = vrot.slane %v5877_v5, 1  ;;  %v15769_v6 = vmax.f32 %v15768_v48, 0.0  ;;  %v14248_v63 = vpop.eup %9388  ;;  %v5988_v20 = vsel %vm4814_vm4, %v14243_v7, 0.0  ;;  %v6792_v57 = vsel %vm3948_vm3, %v6671_v34, 0.0 }
 0x3fc   :  { %6487 = vperm.xlu0 %9130, %v6129_v38   ;;  %6492 = vperm.xlu1 %9131, %v6130_v54   ;;  %15770 = vst [vmem:[#allocation111_spill] sm:$0xff] %v14248_v63  ;;  %v6786_v33 = vrot.slane %v6785_v32, 4  ;;  %v5989_v35 = vsel %vm4814_vm4, %v14248_v63, 0.0  ;;  %v5263_v4 = vrot.slane %v5262_v26, 1  ;;  %v14256_v42 = vadd.f32 %v5973_v50, %v5972_v18  ;;  %v15774_v18 = vld [vmem:[#allocation10_spill] sm:$0xff] }
 0x3fd   :  { %v6672_v40 = vmul.f32 %v13986_v60, %v15769_v6  ;;  %v5879_v1 = vadd.f32 %v5878_v3, %v5877_v5  ;;  %v15772_v38 = vmax.f32 %v15771_v55, 0.0  ;;  %v6781_v54 = vrot.slane %v6780_v17, 1 }
 0x3fe   :  { %v6787_v60 = vadd.f32 %v6786_v33, %v6785_v32  ;;  %v5264_v48 = vmax.f32 %v5262_v26, %v5263_v4  ;;  %v15773_v34 = vrot.slane %v13958_v39, 2  ;;  %v5990_v49 = vadd.f32 %v5989_v35, %v5988_v20  ;;  %v14269_v33 = vpop.permute.xlu1 %6302 }
 0x3ff   :  { %v6793_v0 = vsel %vm3948_vm3, %v6672_v40, 0.0  ;;  %v6673_v31 = vmul.f32 %v14018_v53, %v15772_v38  ;;  %9396 = vrcp.f32 %v5879_v1  ;;  %v15775_v50 = vmax.f32 %v15774_v18, 0.0  ;;  %v14267_v40 = vpop.permute.xlu0 %6297 }
 0x400   :  { %v6794_v30 = vadd.f32 %v6793_v0, %v6792_v57  ;;  %v5886_v6 = vadd.f32 %v15773_v34, %v13958_v39  ;;  %v6788_v5 = vrot.slane %v6787_v60, 2  ;;  %v14271_v53 = vadd.f32 %v5982_v24, %v5981_v58 }
 0x401   :  { %v6674_v32 = vmul.f32 %v14020_v46, %v15775_v50  ;;  %v5363_v26 = vsub.f32 %v14179_v13, %v5264_v48  ;;  %v5364_v57 = vsub.f32 %v14165_v51, %v5264_v48  ;;  %v6801_v35 = vsel %vm3948_vm3, %v6673_v31, 0.0 }
 0x402   :  { %v6795_v3 = vrot.slane %v6794_v30, 4  ;;  %v5887_v4 = vrot.slane %v5886_v6, 1  ;;  %v6789_v39 = vadd.f32 %v6788_v5, %v6787_v60  ;;  %v5991_v18 = vrot.slane %v5990_v49, 4 }
 0x403   :  { %v6802_v1 = vsel %vm3948_vm3, %v6674_v32, 0.0  ;;  %v5561_v0 = vmul.f32 1.442695, %v5363_v26  ;;  %v5563_v55 = vmul.f32 1.442695, %v5364_v57  ;;  %v14277_v34 = vpop.eup %9390  ;;  %v6782_v58 = vadd.f32 %v6781_v54, %v6780_v17  ;;  %v15779_v17 = vld [vmem:[#allocation54_spill] sm:$0xff]  ;;  %v14292_v32 = vpop.permute.xlu0 %6307 }
 0x404   :  { %v6796_v20 = vadd.f32 %v6795_v3, %v6794_v30  ;;  %v5888_v46 = vadd.f32 %v5887_v4, %v5886_v6  ;;  %v6803_v38 = vadd.f32 %v6802_v1, %v6801_v35  ;;  %15776 = vst [vmem:[#allocation110_spill] sm:$0xff] %v14277_v34  ;;  %v6790_v24 = vrot.slane %v6789_v39, 1  ;;  %v14279_v13 = vpop.eup %9392  ;;  %v14294_v26 = vpop.permute.xlu1 %6312 }
 0x405   :  { %15777 = vst [vmem:[#allocation9_spill] sm:$0xff] %v14279_v13  ;;  %v5997_v51 = vsel %vm4814_vm4, %v14277_v34, 0.0  ;;  %9398 = vpow2.f32 %v5561_v0  ;;  %v15778_v30 = vrot.slane %v13980_v11, 2  ;;  %v9395_v48 = vpop.eup %9394  ;;  %v5998_v5 = vsel %vm4814_vm4, %v14279_v13, 0.0  ;;  %v15804_v13 = vld [vmem:[#allocation121_spill] sm:$0xff] }
 0x406   :  { %v6797_v50 = vrot.slane %v6796_v20, 2  ;;  %v6804_v60 = vrot.slane %v6803_v38, 4  ;;  %9400 = vpow2.f32 %v5563_v55  ;;  %v15780_v54 = vmax.f32 %v15779_v17, 0.0  ;;  %v15781_v17 = vld [vmem:[#allocation60_spill] sm:$0xff] }
 0x407   :  { %v5895_v31 = vadd.f32 %v15778_v30, %v13980_v11  ;;  %v6131_v57 = vmul.f32 %v9395_v48, %v13776_v10  ;;  %v6791_v4 = vadd.f32 %v6790_v24, %v6789_v39  ;;  %v6132_v11 = vmul.f32 %v9395_v48, %v13780_v59  ;;  %v15783_v10 = vld [vmem:[#allocation113_spill] sm:$0xff]  ;;  %v15803_v55 = vld [vmem:[#allocation120_spill] sm:$0xff] }
 0x408   :  { %v6675_v3 = vmul.f32 %v14045_v21, %v15780_v54  ;;  %9402 = vrcp.f32 %v5888_v46  ;;  %v5999_v35 = vadd.f32 %v5998_v5, %v5997_v51  ;;  %v6798_v1 = vadd.f32 %v6797_v50, %v6796_v20  ;;  %v15784_v46 = vld [vmem:[#allocation55_spill] sm:$0xff] }
 0x409   :  { %v6805_v0 = vadd.f32 %v6804_v60, %v6803_v38  ;;  %v5896_v30 = vrot.slane %v5895_v31, 1  ;;  %v14299_v6 = vadd.f32 %v5991_v18, %v5990_v49  ;;  %v7274_v21 = vsel %vm7273_vm5, %v6782_v58, %v14237_v56  ;;  %6497 = vperm.xlu0 %9130, %v6131_v57   ;;  %6502 = vperm.xlu1 %9131, %v6132_v11   ;;  %v15787_v50 = vld [vmem:[#allocation11_spill] sm:$0xff]  ;;  %v14320_v11 = vpop.permute.xlu0 %6317 }
 0x40a   :  { %v15782_v54 = vmax.f32 %v15781_v17, 0.0  ;;  %v15785_v51 = vmax.f32 %v15784_v46, 0.0  ;;  %v15786_v38 = vrot.slane %v14010_v19, 2  ;;  %v14313_v18 = vsel %vm7275_vm6, %v6791_v4, %v7274_v21  ;;  %v15790_v21 = vld [vmem:[#allocation119_spill] sm:$0xff]  ;;  %v15791_v46 = vld [vmem:[#allocation56_spill] sm:$0xff] }
 0x40b   :  { %v6806_v24 = vrot.slane %v6805_v0, 2  ;;  %v5897_v59 = vadd.f32 %v5896_v30, %v5895_v31  ;;  %v6810_v56 = vsel %vm3948_vm3, %v6675_v3, 0.0  ;;  %v15788_v60 = vmax.f32 %v15787_v50, 0.0  ;;  %v14322_v30 = vpop.permute.xlu1 %6322 }
 0x40c   :  { %v6676_v39 = vmul.f32 %v15783_v10, %v15782_v54  ;;  %v6677_v20 = vmul.f32 %v14069_v61, %v15785_v51  ;;  %v5904_v49 = vadd.f32 %v15786_v38, %v14010_v19  ;;  %v9397_v31 = vpop.eup %9396  ;;  %v6000_v5 = vrot.slane %v5999_v35, 4  ;;  %v15789_v19 = vld [vmem:[#allocation118_spill] sm:$0xff] }
 0x40d   :  { %v6678_v48 = vmul.f32 %v14071_v29, %v15788_v60  ;;  %v6799_v57 = vrot.slane %v6798_v1, 1  ;;  %9404 = vrcp.f32 %v5897_v59  ;;  %v6133_v4 = vmul.f32 %v9397_v31, %v15789_v19  ;;  %v15793_v59 = vld [vmem:[#allocation107_spill] sm:$0xff] }
 0x40e   :  { %v6811_v58 = vsel %vm3948_vm3, %v6676_v39, 0.0  ;;  %v6134_v3 = vmul.f32 %v9397_v31, %v15790_v21  ;;  %v6807_v17 = vadd.f32 %v6806_v24, %v6805_v0  ;;  %v5905_v54 = vrot.slane %v5904_v49, 1 }
 0x40f   :  { %v6812_v61 = vadd.f32 %v6811_v58, %v6810_v56  ;;  %v6819_v39 = vsel %vm3948_vm3, %v6677_v20, 0.0  ;;  %v6820_v29 = vsel %vm3948_vm3, %v6678_v48, 0.0  ;;  %v15792_v51 = vmax.f32 %v15791_v46, 0.0  ;;  %6507 = vperm.xlu0 %9130, %v6133_v4   ;;  %v15795_v20 = vld [vmem:[#allocation62_spill] sm:$0xff]  ;;  %v15797_v48 = vld [vmem:[#allocation116_spill] sm:$0xff] }
 0x410   :  { %6512 = vperm.xlu1 %9131, %v6134_v3   ;;  %v5906_v56 = vadd.f32 %v5905_v54, %v5904_v49  ;;  %v6821_v58 = vadd.f32 %v6820_v29, %v6819_v39  ;;  %v15794_v50 = vrot.slane %v14075_v23, 2  ;;  %v14334_v31 = vadd.f32 %v6000_v5, %v5999_v35 }
 0x411   :  { %v6813_v10 = vrot.slane %v6812_v61, 4  ;;  %v6679_v38 = vmul.f32 %v15793_v59, %v15792_v51  ;;  %v6800_v0 = vadd.f32 %v6799_v57, %v6798_v1  ;;  %v15796_v19 = vmax.f32 %v15795_v20, 0.0 }
 0x412   :  { %v5913_v60 = vadd.f32 %v15794_v50, %v14075_v23  ;;  %v15798_v46 = vmov 0.0   ;;  %v6808_v4 = vrot.slane %v6807_v17, 1  ;;  %9406 = vrcp.f32 %v5906_v56  ;;  %v14341_v54 = vpop.eup %9398 }
 0x413   :  { %v6814_v24 = vadd.f32 %v6813_v10, %v6812_v61  ;;  %v6680_v21 = vmul.f32 %v15797_v48, %v15796_v19  ;;  %9097 = vmatprep.mubr.msk.f32.mxu0 %vm9487_vm9, %v15798_v46  ;;  %v6822_v49 = vrot.slane %v6821_v58, 4  ;;  %15799 = vst [vmem:[#allocation58_spill] sm:$0xff] %v14341_v54  ;;  %v6828_v35 = vsel %vm3948_vm3, %v6679_v38, 0.0  ;;  %v14348_v61 = vpop.permute.xlu0 %6327  ;;  %v14350_v10 = vpop.permute.xlu1 %6332  ;;  %v15801_v19 = vld [vmem:[#allocation57_spill] sm:$0xff] }
 0x414   :  { %v5914_v3 = vrot.slane %v5913_v60, 1  ;;  %v15800_v5 = vrot.slane %v14110_v16, 2  ;;  %v14352_v39 = vpop.eup %9400  ;;  %v6006_v29 = vsel %vm4814_vm4, %v14341_v54, 0.0 }
 0x415   :  { %v6815_v23 = vrot.slane %v6814_v24, 2  ;;  %v6829_v1 = vsel %vm3948_vm3, %v6680_v21, 0.0  ;;  %v6823_v51 = vadd.f32 %v6822_v49, %v6821_v58  ;;  %v9403_v38 = vpop.eup %9402  ;;  %v6007_v50 = vsel %vm4814_vm4, %v14352_v39, 0.0 }
 0x416   :  { %v5922_v57 = vadd.f32 %v15800_v5, %v14110_v16  ;;  %v5915_v59 = vadd.f32 %v5914_v3, %v5913_v60  ;;  %v6830_v56 = vadd.f32 %v6829_v1, %v6828_v35  ;;  %v15802_v16 = vmax.f32 %v15801_v19, 0.0 }
 0x417   :  { %v6816_v20 = vadd.f32 %v6815_v23, %v6814_v24  ;;  %v6008_v5 = vadd.f32 %v6007_v50, %v6006_v29  ;;  %v6135_v45 = vmul.f32 %v9403_v38, %v15803_v55  ;;  %v6136_v34 = vmul.f32 %v9403_v38, %v15804_v13  ;;  %v15805_v23 = vld [vmem:[#allocation12_spill] sm:$0xff] }
 0x418   :  { %v6681_v48 = vmul.f32 %v14130_v36, %v15802_v16  ;;  %v5923_v21 = vrot.slane %v5922_v57, 1  ;;  %v6824_v54 = vrot.slane %v6823_v51, 2  ;;  %9408 = vrcp.f32 %v5915_v59  ;;  %v14371_v59 = vpop.permute.xlu0 %6337 }
 0x419   :  { %v6817_v63 = vrot.slane %v6816_v20, 1  ;;  %v6831_v58 = vrot.slane %v6830_v56, 4  ;;  %v6009_v49 = vrot.slane %v6008_v5, 4  ;;  %6517 = vperm.xlu0 %9130, %v6135_v45   ;;  %v6809_v3 = vadd.f32 %v6808_v4, %v6807_v17  ;;  %6522 = vperm.xlu1 %9131, %v6136_v34  }
 0x41a   :  { %v5924_v60 = vadd.f32 %v5923_v21, %v5922_v57  ;;  %v6825_v24 = vadd.f32 %v6824_v54, %v6823_v51  ;;  %v15806_v35 = vmax.f32 %v15805_v23, 0.0  ;;  %v7278_v1 = vsel %vm7277_vm7, %v6800_v0, %v14313_v18  ;;  %v14373_v57 = vpop.permute.xlu1 %6342  ;;  %v9405_v45 = vpop.eup %9404  ;;  %v15810_v0 = vld [vmem:[#allocation122_spill] sm:$0xff]  ;;  %v15814_v23 = vld [vmem:[#allocation59_spill] sm:$0xff] }
 0x41b   :  { %v6832_v55 = vadd.f32 %v6831_v58, %v6830_v56  ;;  %v15807_v13 = vrot.slane %v14115_v15, 2  ;;  %v6818_v34 = vadd.f32 %v6817_v63, %v6816_v20  ;;  %v6837_v17 = vsel %vm3948_vm3, %v6681_v48, 0.0  ;;  %v15811_v56 = vld [vmem:[#allocation123_spill] sm:$0xff]  ;;  %v15812_v58 = vld [vmem:[#allocation26_spill] sm:$0xff] }
 0x41c   :  { %v6682_v36 = vmul.f32 %v14132_v43, %v15806_v35  ;;  %9410 = vrcp.f32 %v5924_v60  ;;  %v15808_v43 = vld [vmem:[#allocation23_spill] sm:$0xff]  ;;  %v6137_v51 = vmul.f32 %v9405_v45, %v15810_v0  ;;  %v6138_v38 = vmul.f32 %v9405_v45, %v15811_v56  ;;  %v14401_v0 = vpop.permute.xlu0 %6347 }
 0x41d   :  { %v5931_v29 = vadd.f32 %v15807_v13, %v14115_v15  ;;  %v15809_v54 = vmax.f32 %v15808_v43, 0.0  ;;  %v6826_v50 = vrot.slane %v6825_v24, 1  ;;  %v6833_v15 = vrot.slane %v6832_v55, 2  ;;  %v15817_v43 = vld [vmem:[#allocation27_spill] sm:$0xff] }
 0x41e   :  { %v6838_v4 = vsel %vm3948_vm3, %v6682_v36, 0.0  ;;  %v14382_v19 = vadd.f32 %v6009_v49, %v6008_v5  ;;  %v7280_v16 = vsel %vm7279_vm8, %v6809_v3, %v7278_v1  ;;  %v5993_v20 = vrot.slane %v14299_v6, 2  ;;  %6527 = vperm.xlu0 %9130, %v6137_v51   ;;  %6532 = vperm.xlu1 %9131, %v6138_v38   ;;  %v15820_v51 = vld [vmem:[#allocation124_spill] sm:$0xff] }
 0x41f   :  { %v6683_v18 = vmul.f32 %v14156_v28, %v15809_v54  ;;  %v6839_v21 = vadd.f32 %v6838_v4, %v6837_v17  ;;  %v5932_v63 = vrot.slane %v5931_v29, 1  ;;  %v6834_v48 = vadd.f32 %v6833_v15, %v6832_v55  ;;  %v9407_v45 = vpop.eup %9406 }
 0x420   :  { %v15813_v60 = vmax.f32 %v15812_v58, 0.0  ;;  %v15815_v35 = vmax.f32 %v15814_v23, 0.0  ;;  %v15816_v3 = vrot.slane %v14148_v47, 2  ;;  %v7282_v17 = vsel %vm7281_vm10, %v6818_v34, %v7280_v16  ;;  %v15821_v16 = vld [vmem:[#allocation24_spill] sm:$0xff] }
 0x421   :  { %v6840_v13 = vrot.slane %v6839_v21, 4  ;;  %v6846_v5 = vsel %vm3948_vm3, %v6683_v18, 0.0  ;;  %v5933_v49 = vadd.f32 %v5932_v63, %v5931_v29  ;;  %v6827_v55 = vadd.f32 %v6826_v50, %v6825_v24  ;;  %v15819_v18 = vld [vmem:[#allocation6_spill] sm:$0xff] }
 0x422   :  { %v6684_v28 = vmul.f32 %v14158_v22, %v15813_v60  ;;  %v6685_v36 = vmul.f32 %v14185_v44, %v15815_v35  ;;  %v5940_v1 = vadd.f32 %v15816_v3, %v14148_v47  ;;  %v15818_v22 = vmax.f32 %v15817_v43, 0.0  ;;  %v14403_v44 = vpop.permute.xlu1 %6352 }
 0x423   :  { %v6139_v29 = vmul.f32 %v9407_v45, %v15819_v18  ;;  %v6140_v56 = vmul.f32 %v9407_v45, %v15820_v51  ;;  %v6835_v38 = vrot.slane %v6834_v48, 1  ;;  %v6841_v47 = vadd.f32 %v6840_v13, %v6839_v21  ;;  %v15824_v13 = vld [vmem:[#allocation15_spill] sm:$0xff] }
 0x424   :  { %v6847_v4 = vsel %vm3948_vm3, %v6684_v28, 0.0  ;;  %v6686_v54 = vmul.f32 %v14187_v8, %v15818_v22  ;;  %9412 = vrcp.f32 %v5933_v49  ;;  %v6855_v24 = vsel %vm3948_vm3, %v6685_v36, 0.0  ;;  %v15829_v18 = vld [vmem:[#allocation7_spill] sm:$0xff] }
 0x425   :  { %v6848_v15 = vadd.f32 %v6847_v4, %v6846_v5  ;;  %v5941_v34 = vrot.slane %v5940_v1, 1  ;;  %6537 = vperm.xlu0 %9130, %v6139_v29   ;;  %6542 = vperm.xlu1 %9131, %v6140_v56   ;;  %v6842_v50 = vrot.slane %v6841_v47, 2  ;;  %v15822_v63 = vmax.f32 %v15821_v16, 0.0  ;;  %v9409_v49 = vpop.eup %9408  ;;  %v15826_v4 = vld [vmem:[#allocation61_spill] sm:$0xff] }
 0x426   :  { %v6856_v8 = vsel %vm3948_vm3, %v6686_v54, 0.0  ;;  %v15823_v60 = vrot.slane %v14160_v9, 2  ;;  %v15825_v5 = vmax.f32 %v15824_v13, 0.0  ;;  %v15827_v43 = vmax.f32 %v15826_v4, 0.0  ;;  %v14425_v51 = vpop.permute.xlu1 %6362 }
 0x427   :  { %v6687_v58 = vmul.f32 %v14217_v37, %v15822_v63  ;;  %v6849_v23 = vrot.slane %v6848_v15, 4  ;;  %v5942_v21 = vadd.f32 %v5941_v34, %v5940_v1  ;;  %v6857_v35 = vadd.f32 %v6856_v8, %v6855_v24  ;;  %v15828_v37 = vld [vmem:[#allocation19_spill] sm:$0xff]  ;;  %v14423_v1 = vpop.permute.xlu0 %6357 }
 0x428   :  { %v5949_v28 = vadd.f32 %v15823_v60, %v14160_v9  ;;  %v6688_v36 = vmul.f32 %v14219_v25, %v15825_v5  ;;  %v6843_v3 = vadd.f32 %v6842_v50, %v6841_v47  ;;  %v6689_v22 = vmul.f32 %v14239_v27, %v15827_v43  ;;  %v15830_v50 = vld [vmem:[#allocation20_spill] sm:$0xff] }
 0x429   :  { %v6141_v54 = vmul.f32 %v9409_v49, %v15828_v37  ;;  %v6142_v29 = vmul.f32 %v9409_v49, %v15829_v18  ;;  %v6850_v9 = vadd.f32 %v6849_v23, %v6848_v15  ;;  %9414 = vrcp.f32 %v5942_v21  ;;  %v9411_v56 = vpop.eup %9410  ;;  %v15831_v60 = vld [vmem:[#allocation8_spill] sm:$0xff] }
 0x42a   :  { %v5950_v45 = vrot.slane %v5949_v28, 1  ;;  %v6858_v25 = vrot.slane %v6857_v35, 4  ;;  %v6864_v47 = vsel %vm3948_vm3, %v6687_v58, 0.0  ;;  %v6865_v34 = vsel %vm3948_vm3, %v6688_v36, 0.0 }
 0x42b   :  { %6547 = vperm.xlu0 %9130, %v6141_v54   ;;  %v6836_v27 = vadd.f32 %v6835_v38, %v6834_v48  ;;  %6552 = vperm.xlu1 %9131, %v6142_v29   ;;  %v6143_v8 = vmul.f32 %v9411_v56, %v15830_v50  ;;  %v6851_v16 = vrot.slane %v6850_v9, 2  ;;  %v6866_v63 = vadd.f32 %v6865_v34, %v6864_v47  ;;  %v15833_v38 = vld [vmem:[#allocation30_spill] sm:$0xff]  ;;  %v14447_v29 = vpop.permute.xlu1 %6372 }
 0x42c   :  { %v5951_v24 = vadd.f32 %v5950_v45, %v5949_v28  ;;  %v6844_v15 = vrot.slane %v6843_v3, 1  ;;  %v6144_v23 = vmul.f32 %v9411_v56, %v15831_v60  ;;  %v6859_v21 = vadd.f32 %v6858_v25, %v6857_v35 }
 0x42d   :  { %v6852_v13 = vadd.f32 %v6851_v16, %v6850_v9  ;;  %v6867_v5 = vrot.slane %v6866_v63, 4  ;;  %v6873_v49 = vsel %vm3948_vm3, %v6689_v22, 0.0  ;;  %v15832_v58 = vrot.slane %v14183_v52, 2  ;;  %v15835_v22 = vld [vmem:[#allocation25_spill] sm:$0xff]  ;;  %v15838_v16 = vld [vmem:[#allocation32_spill] sm:$0xff] }
 0x42e   :  { %9416 = vrcp.f32 %v5951_v24  ;;  %v6860_v36 = vrot.slane %v6859_v21, 2  ;;  %v7284_v48 = vsel %vm7283_vm11, %v6827_v55, %v7282_v17  ;;  %v15834_v45 = vmax.f32 %v15833_v38, 0.0 }
 0x42f   :  { %v5958_v28 = vadd.f32 %v15832_v58, %v14183_v52  ;;  %6557 = vperm.xlu0 %9130, %v6143_v8   ;;  %6562 = vperm.xlu1 %9131, %v6144_v23   ;;  %v6868_v35 = vadd.f32 %v6867_v5, %v6866_v63  ;;  %v14440_v37 = vsel %vm7285_vm12, %v6836_v27, %v7284_v48  ;;  %v15836_v54 = vmax.f32 %v15835_v22, 0.0  ;;  %v14445_v52 = vpop.permute.xlu0 %6367  ;;  %v15841_v5 = vld [vmem:[#allocation112_spill] sm:$0xff] }
 0x430   :  { %v6690_v4 = vmul.f32 %v14241_v14, %v15834_v45  ;;  %v6853_v17 = vrot.slane %v6852_v13, 1  ;;  %v6861_v55 = vadd.f32 %v6860_v36, %v6859_v21  ;;  %9098 = vmatmul.mubr.msk.f32.vlgmr.msra.gmra.mxu0 %vm3948_vm3, %v14440_v37  ;;  %v15837_v9 = vrot.slane %v14209_v12, 2  ;;  %v15840_v21 = vld [vmem:[#allocation21_spill] sm:$0xff] }
 0x431   :  { %v5959_v43 = vrot.slane %v5958_v28, 1  ;;  %v6691_v18 = vmul.f32 %v14267_v40, %v15836_v54  ;;  %v6002_v25 = vrot.slane %v14334_v31, 2  ;;  %v6869_v47 = vrot.slane %v6868_v35, 2  ;;  %9100 = vmatprep.mubr.msk.f32.mxu0 %vm9487_vm9, %v15798_v46  ;;  %v9413_v34 = vpop.eup %9412  ;;  %v14474_v54 = vpop.permute.xlu1 %6382 }
 0x432   :  { %v6874_v14 = vsel %vm3948_vm3, %v6690_v4, 0.0  ;;  %v5967_v56 = vadd.f32 %v15837_v9, %v14209_v12  ;;  %v6011_v27 = vrot.slane %v14382_v19, 2  ;;  %v6862_v50 = vrot.slane %v6861_v55, 1  ;;  %v15842_v4 = vld [vmem:[#allocation13_spill] sm:$0xff] }
 0x433   :  { %v5960_v24 = vadd.f32 %v5959_v43, %v5958_v28  ;;  %v6875_v40 = vadd.f32 %v6874_v14, %v6873_v49  ;;  %v15839_v63 = vmax.f32 %v15838_v16, 0.0  ;;  %v6845_v23 = vadd.f32 %v6844_v15, %v6843_v3  ;;  %v14472_v22 = vpop.permute.xlu0 %6377  ;;  %v15845_v9 = vld [vmem:[#allocation125_spill] sm:$0xff]  ;;  %v15847_v16 = vld [vmem:[#allocation63_spill] sm:$0xff] }
 0x434   :  { %v5968_v8 = vrot.slane %v5967_v56, 1  ;;  %v6145_v12 = vmul.f32 %v9413_v34, %v15840_v21  ;;  %v6146_v58 = vmul.f32 %v9413_v34, %v15841_v5  ;;  %v6882_v28 = vsel %vm3948_vm3, %v6691_v18, 0.0 }
 0x435   :  { %v6692_v60 = vmul.f32 %v14269_v33, %v15839_v63  ;;  %v6854_v49 = vadd.f32 %v6853_v17, %v6852_v13  ;;  %9418 = vrcp.f32 %v5960_v24  ;;  %v6876_v36 = vrot.slane %v6875_v40, 4 }
 0x436   :  { %v5969_v48 = vadd.f32 %v5968_v8, %v5967_v56  ;;  %6567 = vperm.xlu0 %9130, %v6145_v12   ;;  %6572 = vperm.xlu1 %9131, %v6146_v58   ;;  %v6870_v38 = vadd.f32 %v6869_v47, %v6868_v35  ;;  %v15843_v43 = vmax.f32 %v15842_v4, 0.0  ;;  %v15844_v3 = vrot.slane %v14256_v42, 2  ;;  %v9415_v13 = vpop.eup %9414  ;;  %v15846_v47 = vld [vmem:[#allocation114_spill] sm:$0xff] }
 0x437   :  { %v6883_v45 = vsel %vm3948_vm3, %v6692_v60, 0.0  ;;  %v6863_v18 = vadd.f32 %v6862_v50, %v6861_v55  ;;  %v6877_v17 = vadd.f32 %v6876_v36, %v6875_v40  ;;  %v14477_v35 = vadd.f32 %v6011_v27, %v14382_v19  ;;  %v15853_v36 = vld [vmem:[#allocation126_spill] sm:$0xff] }
 0x438   :  { %v6693_v33 = vmul.f32 %v14292_v32, %v15843_v43  ;;  %v5976_v15 = vadd.f32 %v15844_v3, %v14256_v42  ;;  %9420 = vrcp.f32 %v5969_v48  ;;  %v6884_v14 = vadd.f32 %v6883_v45, %v6882_v28  ;;  %v15851_v28 = vld [vmem:[#allocation14_spill] sm:$0xff]  ;;  %v14498_v43 = vpop.permute.xlu0 %6387 }
 0x439   :  { %v6147_v56 = vmul.f32 %v9415_v13, %v15845_v9  ;;  %v6148_v32 = vmul.f32 %v9415_v13, %v15846_v47  ;;  %v7287_v34 = vsel %vm7273_vm5, %v6854_v49, %v6845_v23  ;;  %v6878_v42 = vrot.slane %v6877_v17, 2  ;;  %v15850_v23 = vld [vmem:[#allocation115_spill] sm:$0xff]  ;;  %v15854_v13 = vld [vmem:[#allocation64_spill] sm:$0xff] }
 0x43a   :  { %v5977_v24 = vrot.slane %v5976_v15, 1  ;;  %v6885_v8 = vrot.slane %v6884_v14, 4  ;;  %v15848_v63 = vmax.f32 %v15847_v16, 0.0  ;;  %v6871_v40 = vrot.slane %v6870_v38, 1 }
 0x43b   :  { %v9417_v55 = vpop.eup %9416  ;;  %6577 = vperm.xlu0 %9130, %v6147_v56   ;;  %6582 = vperm.xlu1 %9131, %v6148_v32   ;;  %v6891_v19 = vsel %vm3948_vm3, %v6693_v33, 0.0  ;;  %v15849_v50 = vrot.slane %v14271_v53, 2  ;;  %v14490_v12 = vsel %vm7275_vm6, %v6863_v18, %v7287_v34  ;;  %v15852_v49 = vmax.f32 %v15851_v28, 0.0  ;;  %v14500_v33 = vpop.permute.xlu1 %6392  ;;  %v15856_v34 = vld [vmem:[#allocation66_spill] sm:$0xff] }
 0x43c   :  { %v6694_v60 = vmul.f32 %v14294_v26, %v15848_v63  ;;  %v5978_v27 = vadd.f32 %v5977_v24, %v5976_v15  ;;  %v6149_v5 = vmul.f32 %v9417_v55, %v15850_v23  ;;  %v6886_v58 = vadd.f32 %v6885_v8, %v6884_v14 }
 0x43d   :  { %v5985_v21 = vadd.f32 %v15849_v50, %v14271_v53  ;;  %v6695_v26 = vmul.f32 %v14320_v11, %v15852_v49  ;;  %v6150_v48 = vmul.f32 %v9417_v55, %v15853_v36  ;;  %v6879_v53 = vadd.f32 %v6878_v42, %v6877_v17  ;;  %v15858_v55 = vld [vmem:[#allocation65_spill] sm:$0xff]  ;;  %v14528_v49 = vpop.permute.xlu0 %6397 }
 0x43e   :  { %9422 = vrcp.f32 %v5978_v27  ;;  %v6892_v45 = vsel %vm3948_vm3, %v6694_v60, 0.0  ;;  %v6887_v3 = vrot.slane %v6886_v58, 2  ;;  %v15855_v18 = vmax.f32 %v15854_v13, 0.0  ;;  %v15864_v36 = vld [vmem:[#allocation117_spill] sm:$0xff] }
 0x43f   :  { %v5986_v4 = vrot.slane %v5985_v21, 1  ;;  %v6893_v15 = vadd.f32 %v6892_v45, %v6891_v19  ;;  %v6013_v9 = vrot.slane %v14477_v35, 1  ;;  %6587 = vperm.xlu0 %9130, %v6149_v5   ;;  %v14506_v11 = vadd.f32 %v6871_v40, %v6870_v38  ;;  %6592 = vperm.xlu1 %9131, %v6150_v48   ;;  %v15862_v5 = vld [vmem:[#allocation67_spill] sm:$0xff] }
 0x440   :  { %v6696_v14 = vmul.f32 %v14322_v30, %v15855_v18  ;;  %v5994_v47 = vadd.f32 %v5993_v20, %v14299_v6  ;;  %v6900_v17 = vsel %vm3948_vm3, %v6695_v26, 0.0  ;;  %v15857_v42 = vmax.f32 %v15856_v34, 0.0  ;;  %v15860_v6 = vld [vmem:[#allocation16_spill] sm:$0xff]  ;;  %v14530_v26 = vpop.permute.xlu1 %6402  ;;  %v15868_v34 = vld [vmem:[#allocation127_spill] sm:$0xff] }
 0x441   :  { %v5987_v56 = vadd.f32 %v5986_v4, %v5985_v21  ;;  %v6894_v32 = vrot.slane %v6893_v15, 4  ;;  %v6888_v8 = vadd.f32 %v6887_v3, %v6886_v58  ;;  %v6880_v63 = vrot.slane %v6879_v53, 1 }
 0x442   :  { %v6901_v24 = vsel %vm3948_vm3, %v6696_v14, 0.0  ;;  %v6697_v30 = vmul.f32 %v14348_v61, %v15857_v42  ;;  %v5995_v38 = vrot.slane %v5994_v47, 1  ;;  %v15859_v40 = vmax.f32 %v15858_v55, 0.0  ;;  %v9419_v50 = vpop.eup %9418 }
 0x443   :  { %9424 = vrcp.f32 %v5987_v56  ;;  %v6902_v16 = vadd.f32 %v6901_v24, %v6900_v17  ;;  %v6895_v60 = vadd.f32 %v6894_v32, %v6893_v15  ;;  %v15861_v20 = vmax.f32 %v15860_v6, 0.0  ;;  %v15866_v32 = vld [vmem:[#allocation17_spill] sm:$0xff] }
 0x444   :  { %v6698_v19 = vmul.f32 %v14350_v10, %v15859_v40  ;;  %v5996_v23 = vadd.f32 %v5995_v38, %v5994_v47  ;;  %v6003_v61 = vadd.f32 %v6002_v25, %v14334_v31  ;;  %v15863_v58 = vmax.f32 %v15862_v5, 0.0 }
 0x445   :  { %v6699_v27 = vmul.f32 %v14371_v59, %v15861_v20  ;;  %v6903_v21 = vrot.slane %v6902_v16, 4  ;;  %v6151_v10 = vmul.f32 %v9419_v50, %v14107_v62  ;;  %v6152_v48 = vmul.f32 %v9419_v50, %v15864_v36  ;;  %v9421_v4 = vpop.eup %9420  ;;  %v14549_v50 = vpop.permute.xlu1 %6412  ;;  %v15874_v36 = vld [vmem:[#allocation108_spill] sm:$0xff] }
 0x446   :  { %v6700_v28 = vmul.f32 %v14373_v57, %v15863_v58  ;;  %v6896_v59 = vrot.slane %v6895_v60, 2  ;;  %v6909_v45 = vsel %vm3948_vm3, %v6697_v30, 0.0  ;;  %v6889_v3 = vrot.slane %v6888_v8, 1  ;;  %v15865_v57 = vld [vmem:[#allocation106_spill] sm:$0xff]  ;;  %v15873_v58 = vld [vmem:[#allocation109_spill] sm:$0xff] }
 0x447   :  { %v6904_v15 = vadd.f32 %v6903_v21, %v6902_v16  ;;  %9426 = vrcp.f32 %v5996_v23  ;;  %v6910_v31 = vsel %vm3948_vm3, %v6698_v19, 0.0  ;;  %6597 = vperm.xlu0 %9130, %v6151_v10   ;;  %6602 = vperm.xlu1 %9131, %v6152_v48   ;;  %v6153_v25 = vmul.f32 %v9421_v4, %v15865_v57  ;;  %v15869_v19 = vld [vmem:[#allocation68_spill] sm:$0xff] }
 0x448   :  { %v6897_v13 = vadd.f32 %v6896_v59, %v6895_v60  ;;  %v6918_v18 = vsel %vm3948_vm3, %v6699_v27, 0.0  ;;  %v6004_v14 = vrot.slane %v6003_v61, 1  ;;  %v6911_v56 = vadd.f32 %v6910_v31, %v6909_v45  ;;  %v14547_v27 = vpop.permute.xlu0 %6407 }
 0x449   :  { %v6905_v62 = vrot.slane %v6904_v15, 2  ;;  %v6919_v47 = vsel %vm3948_vm3, %v6700_v28, 0.0  ;;  %v15867_v17 = vmax.f32 %v15866_v32, 0.0  ;;  %v6154_v42 = vmul.f32 %v9421_v4, %v15868_v34 }
 0x44a   :  { %v6005_v30 = vadd.f32 %v6004_v14, %v6003_v61  ;;  %v6920_v16 = vadd.f32 %v6919_v47, %v6918_v18  ;;  %v6014_v38 = vadd.f32 %v6013_v9, %v14477_v35  ;;  %v6898_v55 = vrot.slane %v6897_v13, 1  ;;  %v15871_v61 = vld [vmem:[#allocation33_spill] sm:$0xff]  ;;  %v15877_v18 = vld [vmem:[#allocation34_spill] sm:$0xff] }
 0x44b   :  { %v6701_v24 = vmul.f32 %v14401_v0, %v15867_v17  ;;  %v6906_v40 = vadd.f32 %v6905_v62, %v6904_v15  ;;  %v6912_v60 = vrot.slane %v6911_v56, 4  ;;  %v15870_v6 = vmax.f32 %v15869_v19, 0.0  ;;  %v9423_v21 = vpop.eup %9422  ;;  %6607 = vperm.xlu0 %9130, %v6153_v25   ;;  %6612 = vperm.xlu1 %9131, %v6154_v42   ;;  %v15875_v15 = vld [vmem:[#allocation69_spill] sm:$0xff]  ;;  %v15879_v47 = vld [vmem:[#allocation18_spill] sm:$0xff] }
 0x44c   :  { %v6881_v23 = vadd.f32 %v6880_v63, %v6879_v53  ;;  %9428 = vrcp.f32 %v6005_v30  ;;  %v6921_v0 = vrot.slane %v6920_v16, 4  ;;  %v15872_v5 = vmax.f32 %v15871_v61, 0.0 }
 0x44d   :  { %v6702_v20 = vmul.f32 %v14403_v44, %v15870_v6  ;;  %v6890_v9 = vadd.f32 %v6889_v3, %v6888_v8  ;;  %v6155_v28 = vmul.f32 %v9423_v21, %v15873_v58  ;;  %v6907_v10 = vrot.slane %v6906_v40, 1  ;;  %v15884_v58 = vld [vmem:[#allocation35_spill] sm:$0xff] }
 0x44e   :  { %v6703_v35 = vmul.f32 %v14423_v1, %v15872_v5  ;;  %v6927_v44 = vsel %vm3948_vm3, %v6701_v24, 0.0  ;;  %v6156_v48 = vmul.f32 %v9423_v21, %v15874_v36  ;;  %v6913_v59 = vadd.f32 %v6912_v60, %v6911_v56  ;;  %v14573_v24 = vpop.permute.xlu0 %6417  ;;  %v15881_v60 = vld [vmem:[#allocation70_spill] sm:$0xff]  ;;  %v15888_v36 = vld [vmem:[#allocation36_spill] sm:$0xff] }
 0x44f   :  { %9430 = vrcp.f32 %v6014_v38  ;;  %v6928_v53 = vsel %vm3948_vm3, %v6702_v20, 0.0  ;;  %v6899_v63 = vadd.f32 %v6898_v55, %v6897_v13  ;;  %v6922_v45 = vadd.f32 %v6921_v0, %v6920_v16  ;;  %6617 = vperm.xlu0 %9130, %v6155_v28   ;;  %v15883_v0 = vld [vmem:[#allocation111_spill] sm:$0xff] }
 0x450   :  { %v6929_v4 = vadd.f32 %v6928_v53, %v6927_v44  ;;  %v15876_v31 = vmax.f32 %v15875_v15, 0.0  ;;  %v9425_v1 = vpop.eup %9424  ;;  %v7289_v8 = vsel %vm7277_vm7, %v14506_v11, %v14490_v12  ;;  %6622 = vperm.xlu1 %9131, %v6156_v48   ;;  %v6908_v3 = vadd.f32 %v6907_v10, %v6906_v40  ;;  %v14575_v12 = vpop.permute.xlu1 %6422 }
 0x451   :  { %v6936_v25 = vsel %vm3948_vm3, %v6703_v35, 0.0  ;;  %v15878_v14 = vmax.f32 %v15877_v18, 0.0  ;;  %v6157_v62 = vmul.f32 %v9425_v1, %v14197_v2  ;;  %v15880_v32 = vmax.f32 %v15879_v47, 0.0 }
 0x452   :  { %v6704_v57 = vmul.f32 %v14425_v51, %v15876_v31  ;;  %v6930_v56 = vrot.slane %v6929_v4, 4  ;;  %v7290_v17 = vsel %vm7279_vm8, %v6881_v23, %v7289_v8  ;;  %v6158_v11 = vmul.f32 %v9425_v1, %v14203_v41  ;;  %v14604_v53 = vpop.permute.xlu0 %6427  ;;  %v15890_v8 = vld [vmem:[#allocation72_spill] sm:$0xff] }
 0x453   :  { %v6706_v13 = vmul.f32 %v14447_v29, %v15878_v14  ;;  %v6705_v51 = vmul.f32 %v14445_v52, %v15880_v32  ;;  %v6914_v34 = vrot.slane %v6913_v59, 2  ;;  %v7291_v29 = vsel %vm7281_vm10, %v6890_v9, %v7290_v17  ;;  %6627 = vperm.xlu0 %9130, %v6157_v62   ;;  %v15893_v14 = vld [vmem:[#allocation9_spill] sm:$0xff] }
 0x454   :  { %v6937_v42 = vsel %vm3948_vm3, %v6704_v57, 0.0  ;;  %v6923_v30 = vrot.slane %v6922_v45, 2  ;;  %v6931_v2 = vadd.f32 %v6930_v56, %v6929_v4  ;;  %v7292_v38 = vsel %vm7283_vm11, %v6899_v63, %v7291_v29  ;;  %v9427_v55 = vpop.eup %9426  ;;  %6632 = vperm.xlu1 %9131, %v6158_v11   ;;  %v6433_v63 = vpop.permute.xlu1 %6432  ;;  %v15894_v11 = vld [vmem:[#allocation58_spill] sm:$0xff] }
 0x455   :  { %v6938_v16 = vadd.f32 %v6937_v42, %v6936_v25  ;;  %v14582_v52 = vsel %vm7285_vm12, %v6908_v3, %v7292_v38  ;;  %v6946_v40 = vsel %vm3948_vm3, %v6706_v13, 0.0  ;;  %v15882_v41 = vmax.f32 %v15881_v60, 0.0  ;;  %v15892_v25 = vld [vmem:[#allocation110_spill] sm:$0xff] }
 0x456   :  { %v6159_v6 = vmul.f32 %v9427_v55, %v14243_v7  ;;  %v6932_v20 = vrot.slane %v6931_v2, 2  ;;  %v6945_v21 = vsel %vm3948_vm3, %v6705_v51, 0.0  ;;  %9101 = vmatmul.mubr.msk.f32.gmra.mxu0 %vm3948_vm3, %v14582_v52  ;;  %v6915_v23 = vadd.f32 %v6914_v34, %v6913_v59  ;;  %v15886_v7 = vld [vmem:[#allocation71_spill] sm:$0xff] }
 0x457   :  { %v6707_v19 = vmul.f32 %v14472_v22, %v15882_v41  ;;  %v6160_v61 = vmul.f32 %v9427_v55, %v15883_v0  ;;  %v6939_v5 = vrot.slane %v6938_v16, 4  ;;  %v6947_v35 = vadd.f32 %v6946_v40, %v6945_v21  ;;  %9103 = vmatprep.mubr.msk.f32.mxu0 %vm9487_vm9, %v15798_v46  ;;  %v6438_v40 = vpop.permute.xlu0 %6437 }
 0x458   :  { %v6924_v9 = vadd.f32 %v6923_v30, %v6922_v45  ;;  %v15885_v28 = vmax.f32 %v15884_v58, 0.0  ;;  %v15887_v10 = vmax.f32 %v15886_v7, 0.0  ;;  %v15889_v48 = vmax.f32 %v15888_v36, 0.0  ;;  %6637 = vperm.xlu0 %9130, %v6159_v6   ;;  %v6443_v60 = vpop.permute.xlu1 %6442 }
 0x459   :  { %6642 = vperm.xlu1 %9131, %v6160_v61   ;;  %v6933_v4 = vadd.f32 %v6932_v20, %v6931_v2  ;;  %v6940_v15 = vadd.f32 %v6939_v5, %v6938_v16  ;;  %v6948_v45 = vrot.slane %v6947_v35, 4  ;;  %v6954_v31 = vsel %vm3948_vm3, %v6707_v19, 0.0  ;;  %v9429_v57 = vpop.eup %9428 }
 0x45a   :  { %v6708_v22 = vmul.f32 %v14474_v54, %v15885_v28  ;;  %v6709_v44 = vmul.f32 %v14498_v43, %v15887_v10  ;;  %v6710_v59 = vmul.f32 %v14500_v33, %v15889_v48  ;;  %v15891_v3 = vmax.f32 %v15890_v8, 0.0  ;;  %v15899_v48 = vld [vmem:[#allocation74_spill] sm:$0xff] }
 0x45b   :  { %v6161_v18 = vmul.f32 %v9429_v57, %v15892_v25  ;;  %v6162_v13 = vmul.f32 %v9429_v57, %v15893_v14  ;;  %v6941_v62 = vrot.slane %v6940_v15, 2  ;;  %v6949_v56 = vadd.f32 %v6948_v45, %v6947_v35  ;;  %v15901_v57 = vld [vmem:[#allocation42_spill] sm:$0xff] }
 0x45c   :  { %v6955_v54 = vsel %vm3948_vm3, %v6708_v22, 0.0  ;;  %v6963_v1 = vsel %vm3948_vm3, %v6709_v44, 0.0  ;;  %v6964_v43 = vsel %vm3948_vm3, %v6710_v59, 0.0  ;;  %v6711_v33 = vmul.f32 %v14528_v49, %v15891_v3  ;;  %v9431_v47 = vpop.eup %9430  ;;  %v15895_v49 = vld [vmem:[#allocation38_spill] sm:$0xff]  ;;  %v15897_v44 = vld [vmem:[#allocation40_spill] sm:$0xff] }
 0x45d   :  { %v6956_v32 = vadd.f32 %v6955_v54, %v6954_v31  ;;  %v6965_v51 = vadd.f32 %v6964_v43, %v6963_v1  ;;  %6647 = vperm.xlu0 %9130, %v6161_v18   ;;  %v6925_v17 = vrot.slane %v6924_v9, 1  ;;  %6652 = vperm.xlu1 %9131, %v6162_v13   ;;  %v6163_v34 = vmul.f32 %v9431_v47, %v15894_v11  ;;  %v6448_v1 = vpop.permute.xlu0 %6447  ;;  %v6453_v43 = vpop.permute.xlu1 %6452  ;;  %v15903_v3 = vld [vmem:[#allocation44_spill] sm:$0xff] }
 0x45e   :  { %v6934_v42 = vrot.slane %v6933_v4, 1  ;;  %v6950_v29 = vrot.slane %v6949_v56, 2  ;;  %v6942_v30 = vadd.f32 %v6941_v62, %v6940_v15  ;;  %v15896_v38 = vmax.f32 %v15895_v49, 0.0  ;;  %v15905_v62 = vld [vmem:[#allocation73_spill] sm:$0xff] }
 0x45f   :  { %v6957_v2 = vrot.slane %v6956_v32, 4  ;;  %v6966_v16 = vrot.slane %v6965_v51, 4  ;;  %v6916_v41 = vrot.slane %v6915_v23, 1  ;;  %v6164_v19 = vmul.f32 %v9431_v47, %v14352_v39 }
 0x460   :  { %v6712_v55 = vmul.f32 %v14530_v26, %v15896_v38  ;;  %v6972_v6 = vsel %vm3948_vm3, %v6711_v33, 0.0  ;;  %v6951_v20 = vadd.f32 %v6950_v29, %v6949_v56  ;;  %v6926_v5 = vadd.f32 %v6925_v17, %v6924_v9  ;;  %v15911_v38 = vld [vmem:[#allocation46_spill] sm:$0xff] }
 0x461   :  { %v6958_v21 = vadd.f32 %v6957_v2, %v6956_v32  ;;  %v6967_v0 = vadd.f32 %v6966_v16, %v6965_v51  ;;  %6657 = vperm.xlu0 %9130, %v6163_v34   ;;  %6662 = vperm.xlu1 %9131, %v6164_v19   ;;  %v6935_v58 = vadd.f32 %v6934_v42, %v6933_v4  ;;  %v6943_v28 = vrot.slane %v6942_v30, 1  ;;  %v15907_v32 = vld [vmem:[#allocation75_spill] sm:$0xff]  ;;  %v15909_v42 = vld [vmem:[#allocation76_spill] sm:$0xff] }
 0x462   :  { %v6973_v61 = vsel %vm3948_vm3, %v6712_v55, 0.0  ;;  %v6917_v7 = vadd.f32 %v6916_v41, %v6915_v23  ;;  %v15898_v36 = vmax.f32 %v15897_v44, 0.0  ;;  %v15900_v59 = vmax.f32 %v15899_v48, 0.0 }
 0x463   :  { %v6974_v35 = vadd.f32 %v6973_v61, %v6972_v6  ;;  %v6959_v22 = vrot.slane %v6958_v21, 2  ;;  %v6968_v26 = vrot.slane %v6967_v0, 2  ;;  %v6952_v45 = vrot.slane %v6951_v20, 1  ;;  %v15913_v6 = vld [vmem:[#allocation77_spill] sm:$0xff] }
 0x464   :  { %v6714_v39 = vmul.f32 %v14549_v50, %v15898_v36  ;;  %v6715_v15 = vmul.f32 %v14573_v24, %v15900_v59  ;;  %v15902_v54 = vmax.f32 %v15901_v57, 0.0  ;;  %v7294_v23 = vsel %vm7273_vm5, %v6926_v5, %v6917_v7  ;;  %v6458_v5 = vpop.permute.xlu0 %6457 }
 0x465   :  { %v6975_v10 = vrot.slane %v6974_v35, 4  ;;  %v6960_v31 = vadd.f32 %v6959_v22, %v6958_v21  ;;  %v6969_v9 = vadd.f32 %v6968_v26, %v6967_v0  ;;  %v15904_v33 = vmax.f32 %v15903_v3, 0.0  ;;  %v15915_v21 = vld [vmem:[#allocation48_spill] sm:$0xff]  ;;  %v15919_v3 = vld [vmem:[#allocation78_spill] sm:$0xff] }
 0x466   :  { %v6716_v4 = vmul.f32 %v14575_v12, %v15902_v54  ;;  %v7295_v50 = vsel %vm7275_vm6, %v6935_v58, %v7294_v23  ;;  %v6944_v18 = vadd.f32 %v6943_v28, %v6942_v30  ;;  %v15906_v56 = vmax.f32 %v15905_v62, 0.0  ;;  %v15923_v62 = vld [vmem:[#allocation80_spill] sm:$0xff] }
 0x467   :  { %v6976_v8 = vadd.f32 %v6975_v10, %v6974_v35  ;;  %v6718_v25 = vmul.f32 %v6433_v63, %v15904_v33  ;;  %v6961_v14 = vrot.slane %v6960_v31, 1  ;;  %v6970_v24 = vrot.slane %v6969_v9, 1  ;;  %v6463_v35 = vpop.permute.xlu1 %6462 }
 0x468   :  { %v6713_v47 = vmul.f32 %v14547_v27, %v15906_v56  ;;  %v6982_v12 = vsel %vm3948_vm3, %v6714_v39, 0.0  ;;  %v15908_v51 = vmax.f32 %v15907_v32, 0.0  ;;  %v6953_v11 = vadd.f32 %v6952_v45, %v6951_v20 }
 0x469   :  { %v6977_v13 = vrot.slane %v6976_v8, 2  ;;  %v6990_v34 = vsel %vm3948_vm3, %v6715_v15, 0.0  ;;  %v6991_v63 = vsel %vm3948_vm3, %v6716_v4, 0.0  ;;  %v15910_v29 = vmax.f32 %v15909_v42, 0.0 }
 0x46a   :  { %v6717_v17 = vmul.f32 %v14604_v53, %v15908_v51  ;;  %v6962_v2 = vadd.f32 %v6961_v14, %v6960_v31  ;;  %v7000_v49 = vsel %vm3948_vm3, %v6718_v25, 0.0  ;;  %v15912_v27 = vmax.f32 %v15911_v38, 0.0  ;;  %v15917_v31 = vld [vmem:[#allocation79_spill] sm:$0xff]  ;;  %v15921_v14 = vld [vmem:[#allocation81_spill] sm:$0xff] }
 0x46b   :  { %v6719_v30 = vmul.f32 %v6438_v40, %v15910_v29  ;;  %v6978_v16 = vadd.f32 %v6977_v13, %v6976_v8  ;;  %v7296_v41 = vsel %vm7277_vm7, %v6944_v18, %v7295_v50  ;;  %v6971_v19 = vadd.f32 %v6970_v24, %v6969_v9  ;;  %v6473_v23 = vpop.permute.xlu1 %6472 }
 0x46c   :  { %v6720_v55 = vmul.f32 %v6443_v60, %v15912_v27  ;;  %v15914_v53 = vmax.f32 %v15913_v6, 0.0  ;;  %v15916_v0 = vmax.f32 %v15915_v21, 0.0  ;;  %v6992_v40 = vadd.f32 %v6991_v63, %v6990_v34 }
 0x46d   :  { %v6979_v58 = vrot.slane %v6978_v16, 1  ;;  %v6999_v28 = vsel %vm3948_vm3, %v6717_v17, 0.0  ;;  %v6981_v26 = vsel %vm3948_vm3, %v6713_v47, 0.0  ;;  %v7008_v7 = vsel %vm3948_vm3, %v6719_v30, 0.0 }
 0x46e   :  { %v6721_v20 = vmul.f32 %v6448_v1, %v15914_v53  ;;  %v6722_v61 = vmul.f32 %v6453_v43, %v15916_v0  ;;  %v7009_v22 = vsel %vm3948_vm3, %v6720_v55, 0.0  ;;  %v7001_v60 = vadd.f32 %v7000_v49, %v6999_v28  ;;  %v6468_v43 = vpop.permute.xlu0 %6467 }
 0x46f   :  { %v7297_v10 = vsel %vm7279_vm8, %v6953_v11, %v7296_v41  ;;  %v6980_v44 = vadd.f32 %v6979_v58, %v6978_v16  ;;  %v6983_v36 = vadd.f32 %v6982_v12, %v6981_v26  ;;  %v7010_v39 = vadd.f32 %v7009_v22, %v7008_v7  ;;  %v15927_v26 = vld [vmem:[#allocation82_spill] sm:$0xff] }
 0x470   :  { %v7298_v48 = vsel %vm7281_vm10, %v6962_v2, %v7297_v10  ;;  %v7017_v59 = vsel %vm3948_vm3, %v6721_v20, 0.0  ;;  %v7018_v45 = vsel %vm3948_vm3, %v6722_v61, 0.0  ;;  %v15918_v9 = vmax.f32 %v15917_v31, 0.0 }
 0x471   :  { %v7299_v15 = vsel %vm7283_vm11, %v6971_v19, %v7298_v48  ;;  %v6993_v54 = vrot.slane %v6992_v40, 4  ;;  %v7019_v1 = vadd.f32 %v7018_v45, %v7017_v59  ;;  %v7002_v8 = vrot.slane %v7001_v60, 4 }
 0x472   :  { %v6723_v57 = vmul.f32 %v6458_v5, %v15918_v9  ;;  %v14666_v4 = vsel %vm7285_vm12, %v6980_v44, %v7299_v15  ;;  %v15920_v33 = vmax.f32 %v15919_v3, 0.0  ;;  %v6984_v50 = vrot.slane %v6983_v36, 4  ;;  %v6478_v61 = vpop.permute.xlu0 %6477  ;;  %v6483_v5 = vpop.permute.xlu1 %6482 }
 0x473   :  { %9104 = vmatmul.mubr.msk.f32.gmra.mxu0 %vm3948_vm3, %v14666_v4  ;;  %v7011_v18 = vrot.slane %v7010_v39, 4  ;;  %v15922_v24 = vmax.f32 %v15921_v14, 0.0  ;;  %v15924_v56 = vmax.f32 %v15923_v62, 0.0  ;;  %v7020_v12 = vrot.slane %v7019_v1, 4 }
 0x474   :  { %v6724_v25 = vmul.f32 %v6463_v35, %v15920_v33  ;;  %9106 = vmatprep.mubr.msk.f32.mxu0 %vm9487_vm9, %v15798_v46  ;;  %v7026_v32 = vsel %vm3948_vm3, %v6723_v57, 0.0  ;;  %v6994_v17 = vadd.f32 %v6993_v54, %v6992_v40  ;;  %v7003_v34 = vadd.f32 %v7002_v8, %v7001_v60  ;;  %v15925_v40 = vld [vmem:[#allocation83_spill] sm:$0xff] }
 0x475   :  { %v6725_v13 = vmul.f32 %v6468_v43, %v15922_v24  ;;  %v6726_v47 = vmul.f32 %v6473_v23, %v15924_v56  ;;  %v6985_v29 = vadd.f32 %v6984_v50, %v6983_v36  ;;  %v7012_v30 = vadd.f32 %v7011_v18, %v7010_v39 }
 0x476   :  { %v7027_v51 = vsel %vm3948_vm3, %v6724_v25, 0.0  ;;  %v7021_v49 = vadd.f32 %v7020_v12, %v7019_v1  ;;  %v6995_v38 = vrot.slane %v6994_v17, 2  ;;  %v7004_v41 = vrot.slane %v7003_v34, 2 }
 0x477   :  { %v7028_v11 = vadd.f32 %v7027_v51, %v7026_v32  ;;  %v7035_v63 = vsel %vm3948_vm3, %v6725_v13, 0.0  ;;  %v7036_v42 = vsel %vm3948_vm3, %v6726_v47, 0.0  ;;  %v6986_v19 = vrot.slane %v6985_v29, 2 }
 0x478   :  { %v7037_v16 = vadd.f32 %v7036_v42, %v7035_v63  ;;  %v7013_v6 = vrot.slane %v7012_v30, 2  ;;  %v7022_v20 = vrot.slane %v7021_v49, 2  ;;  %v6996_v21 = vadd.f32 %v6995_v38, %v6994_v17  ;;  %v6488_v17 = vpop.permute.xlu0 %6487 }
 0x479   :  { %v7029_v2 = vrot.slane %v7028_v11, 4  ;;  %v7005_v35 = vadd.f32 %v7004_v41, %v7003_v34  ;;  %v15926_v28 = vmax.f32 %v15925_v40, 0.0  ;;  %v15928_v60 = vmax.f32 %v15927_v26, 0.0 }
 0x47a   :  { %v7038_v55 = vrot.slane %v7037_v16, 4  ;;  %v6987_v10 = vadd.f32 %v6986_v19, %v6985_v29  ;;  %v7014_v44 = vadd.f32 %v7013_v6, %v7012_v30  ;;  %v7023_v36 = vadd.f32 %v7022_v20, %v7021_v49  ;;  %v15931_v19 = vld [vmem:[#allocation28_spill] sm:$0xff] }
 0x47b   :  { %v7030_v27 = vadd.f32 %v7029_v2, %v7028_v11  ;;  %v6727_v22 = vmul.f32 %v6478_v61, %v15926_v28  ;;  %v6728_v7 = vmul.f32 %v6483_v5, %v15928_v60  ;;  %v6997_v59 = vrot.slane %v6996_v21, 1  ;;  %v6493_v11 = vpop.permute.xlu1 %6492  ;;  %v15933_v20 = vld [vmem:[#allocation84_spill] sm:$0xff]  ;;  %v15935_v61 = vld [vmem:[#allocation87_spill] sm:$0xff] }
 0x47c   :  { %v7039_v53 = vadd.f32 %v7038_v55, %v7037_v16  ;;  %v7006_v31 = vrot.slane %v7005_v35, 1  ;;  %v6988_v57 = vrot.slane %v6987_v10, 1  ;;  %v7015_v54 = vrot.slane %v7014_v44, 1 }
 0x47d   :  { %v7031_v0 = vrot.slane %v7030_v27, 2  ;;  %v7044_v39 = vsel %vm3948_vm3, %v6727_v22, 0.0  ;;  %v7045_v48 = vsel %vm3948_vm3, %v6728_v7, 0.0  ;;  %v7024_v43 = vrot.slane %v7023_v36, 1  ;;  %v15939_v22 = vld [vmem:[#allocation85_spill] sm:$0xff] }
 0x47e   :  { %v7040_v58 = vrot.slane %v7039_v53, 2  ;;  %v7046_v45 = vadd.f32 %v7045_v48, %v7044_v39  ;;  %v6998_v23 = vadd.f32 %v6997_v59, %v6996_v21  ;;  %v7007_v33 = vadd.f32 %v7006_v31, %v7005_v35  ;;  %v15941_v39 = vld [vmem:[#allocation89_spill] sm:$0xff] }
 0x47f   :  { %v7032_v15 = vadd.f32 %v7031_v0, %v7030_v27  ;;  %v6989_v50 = vadd.f32 %v6988_v57, %v6987_v10  ;;  %v7016_v18 = vadd.f32 %v7015_v54, %v7014_v44  ;;  %v7025_v24 = vadd.f32 %v7024_v43, %v7023_v36  ;;  %v15929_v27 = vld [vmem:[#allocation86_spill] sm:$0xff] }
 0x480   :  { %v7041_v9 = vadd.f32 %v7040_v58, %v7039_v53  ;;  %v7047_v1 = vrot.slane %v7046_v45, 4  ;;  %v15930_v55 = vmax.f32 %v15929_v27, 0.0  ;;  %v15932_v6 = vmax.f32 %v15931_v19, 0.0  ;;  %v15937_v58 = vld [vmem:[#allocation88_spill] sm:$0xff] }
 0x481   :  { %v7033_v8 = vrot.slane %v7032_v15, 1  ;;  %v7301_v13 = vsel %vm7273_vm5, %v6998_v23, %v6989_v50  ;;  %v15934_v21 = vmax.f32 %v15933_v20, 0.0  ;;  %v15936_v5 = vmax.f32 %v15935_v61, 0.0 }
 0x482   :  { %v7048_v3 = vadd.f32 %v7047_v1, %v7046_v45  ;;  %v7042_v25 = vrot.slane %v7041_v9, 1  ;;  %v7302_v47 = vsel %vm7275_vm6, %v7007_v33, %v7301_v13  ;;  %v15938_v40 = vmax.f32 %v15937_v58, 0.0 }
 0x483   :  { %v7034_v62 = vadd.f32 %v7033_v8, %v7032_v15  ;;  %v7303_v32 = vsel %vm7277_vm7, %v7016_v18, %v7302_v47  ;;  %v6730_v0 = vmul.f32 %v6493_v11, %v15934_v21  ;;  %v15940_v26 = vmax.f32 %v15939_v22, 0.0  ;;  %v15943_v15 = vld [vmem:[#allocation29_spill] sm:$0xff] }
 0x484   :  { %v7049_v14 = vrot.slane %v7048_v3, 2  ;;  %v7043_v12 = vadd.f32 %v7042_v25, %v7041_v9  ;;  %v7304_v34 = vsel %vm7279_vm8, %v7025_v24, %v7303_v32  ;;  %v6498_v2 = vpop.permute.xlu0 %6497  ;;  %v6503_v16 = vpop.permute.xlu1 %6502  ;;  %v15942_v48 = vmax.f32 %v15941_v39, 0.0 }
 0x485   :  { %v7305_v42 = vsel %vm7281_vm10, %v7034_v62, %v7304_v34  ;;  %v6732_v41 = vmul.f32 %v6503_v16, %v15930_v55  ;;  %v6731_v35 = vmul.f32 %v6498_v2, %v15936_v5  ;;  %v6729_v60 = vmul.f32 %v6488_v17, %v15940_v26  ;;  %v15947_v62 = vld [vmem:[#allocation31_spill] sm:$0xff]  ;;  %v15953_v26 = vld [vmem:[#allocation94_spill] sm:$0xff] }
 0x486   :  { %v7050_v56 = vadd.f32 %v7049_v14, %v7048_v3  ;;  %v7306_v29 = vsel %vm7283_vm11, %v7043_v12, %v7305_v42  ;;  %v15944_v45 = vmax.f32 %v15943_v15, 0.0  ;;  %v7054_v9 = vsel %vm3948_vm3, %v6730_v0, 0.0  ;;  %v15945_v14 = vld [vmem:[#allocation90_spill] sm:$0xff]  ;;  %v15951_v55 = vld [vmem:[#allocation91_spill] sm:$0xff] }
 0x487   :  { %v7063_v7 = vsel %vm3948_vm3, %v6732_v41, 0.0  ;;  %v7062_v57 = vsel %vm3948_vm3, %v6731_v35, 0.0  ;;  %v7053_v23 = vsel %vm3948_vm3, %v6729_v60, 0.0  ;;  %v15946_v24 = vmax.f32 %v15945_v14, 0.0 }
 0x488   :  { %v7051_v51 = vrot.slane %v7050_v56, 1  ;;  %v7064_v54 = vadd.f32 %v7063_v7, %v7062_v57  ;;  %v7055_v33 = vadd.f32 %v7054_v9, %v7053_v23  ;;  %v15952_v41 = vmax.f32 %v15951_v55, 0.0 }
 0x489   :  { %v15954_v60 = vmax.f32 %v15953_v26, 0.0 }
 0x48a   :  { %v7052_v63 = vadd.f32 %v7051_v51, %v7050_v56  ;;  %v6508_v49 = vpop.permute.xlu0 %6507  ;;  %v15948_v56 = vmax.f32 %v15947_v62, 0.0  ;;  %v7065_v12 = vrot.slane %v7064_v54, 4  ;;  %v7056_v11 = vrot.slane %v7055_v33, 4 }
 0x48b   :  { %v6513_v38 = vpop.permute.xlu1 %6512  ;;  %v6733_v28 = vmul.f32 %v6508_v49, %v15938_v40  ;;  %v15949_v49 = vld [vmem:[#allocation92_spill] sm:$0xff] }
 0x48c   :  { %v14695_v30 = vsel %vm7285_vm12, %v7052_v63, %v7306_v29  ;;  %v6734_v53 = vmul.f32 %v6513_v38, %v15932_v6  ;;  %v7066_v2 = vadd.f32 %v7065_v12, %v7064_v54  ;;  %v15950_v38 = vmax.f32 %v15949_v49, 0.0 }
 0x48d   :  { %9107 = vmatmul.mubr.msk.f32.gmra.mxu0 %vm3948_vm3, %v14695_v30  ;;  %v7071_v1 = vsel %vm3948_vm3, %v6733_v28, 0.0 }
 0x48e   :  { %9109 = vmatprep.mubr.msk.f32.mxu0 %vm9487_vm9, %v15798_v46  ;;  %v7072_v36 = vsel %vm3948_vm3, %v6734_v53, 0.0  ;;  %v7057_v53 = vadd.f32 %v7056_v11, %v7055_v33  ;;  %v7067_v35 = vrot.slane %v7066_v2, 2 }
 0x48f   :  { %v7073_v8 = vadd.f32 %v7072_v36, %v7071_v1 }
 0x490   :  { %v7058_v39 = vrot.slane %v7057_v53, 2  ;;  %v7068_v9 = vadd.f32 %v7067_v35, %v7066_v2 }
 0x491   :  { %v7074_v32 = vrot.slane %v7073_v8, 4 }
 0x492   :  { %v7059_v14 = vadd.f32 %v7058_v39, %v7057_v53  ;;  %v7069_v12 = vrot.slane %v7068_v9, 1  ;;  %v15963_v39 = vld [vmem:[#allocation37_spill] sm:$0xff] }
 0x493   :  { %v7075_v6 = vadd.f32 %v7074_v32, %v7073_v8  ;;  %v15957_v8 = vld [vmem:[#allocation96_spill] sm:$0xff] }
 0x494   :  { %v6518_v10 = vpop.permute.xlu0 %6517  ;;  %v6523_v44 = vpop.permute.xlu1 %6522 }
 0x495   :  { %v6735_v59 = vmul.f32 %v6518_v10, %v15942_v48  ;;  %v6736_v31 = vmul.f32 %v6523_v44, %v15944_v45  ;;  %v7076_v28 = vrot.slane %v7075_v6, 2  ;;  %v15955_v10 = vld [vmem:[#allocation93_spill] sm:$0xff] }
 0x496   :  { %v15956_v44 = vmax.f32 %v15955_v10, 0.0 }
 0x497   :  { %v7081_v43 = vsel %vm3948_vm3, %v6736_v31, 0.0  ;;  %v7080_v3 = vsel %vm3948_vm3, %v6735_v59, 0.0 }
 0x498   :  { %v7082_v25 = vadd.f32 %v7081_v43, %v7080_v3  ;;  %v7077_v43 = vadd.f32 %v7076_v28, %v7075_v6  ;;  %v15958_v3 = vmax.f32 %v15957_v8, 0.0 }
 0x499   :  { %v6528_v50 = vpop.permute.xlu0 %6527  ;;  %v6533_v18 = vpop.permute.xlu1 %6532 }
 0x49a   :  { %v6737_v13 = vmul.f32 %v6528_v50, %v15946_v24  ;;  %v6738_v47 = vmul.f32 %v6533_v18, %v15948_v56  ;;  %v7083_v34 = vrot.slane %v7082_v25, 4  ;;  %v7078_v11 = vrot.slane %v7077_v43, 1 }
 0x49c   :  { %v7089_v51 = vsel %vm3948_vm3, %v6737_v13, 0.0  ;;  %v7090_v17 = vsel %vm3948_vm3, %v6738_v47, 0.0  ;;  %v7084_v20 = vadd.f32 %v7083_v34, %v7082_v25  ;;  %v15959_v25 = vld [vmem:[#allocation95_spill] sm:$0xff]  ;;  %v7060_v34 = vrot.slane %v7059_v14, 1 }
 0x49d   :  { %v7091_v63 = vadd.f32 %v7090_v17, %v7089_v51  ;;  %v15960_v50 = vmax.f32 %v15959_v25, 0.0 }
 0x49e   :  { %v7085_v48 = vrot.slane %v7084_v20, 2  ;;  %v7061_v6 = vadd.f32 %v7060_v34, %v7059_v14  ;;  %v15971_v14 = vld [vmem:[#allocation99_spill] sm:$0xff] }
 0x49f   :  { %v7092_v16 = vrot.slane %v7091_v63, 4 }
 0x4a0   :  { %v6538_v42 = vpop.permute.xlu0 %6537  ;;  %v6543_v29 = vpop.permute.xlu1 %6542  ;;  %v7086_v24 = vadd.f32 %v7085_v48, %v7084_v20  ;;  %v15964_v48 = vmax.f32 %v15963_v39, 0.0  ;;  %v15981_v39 = vld [vmem:[#allocation102_spill] sm:$0xff] }
 0x4a1   :  { %v6739_v27 = vmul.f32 %v6538_v42, %v15950_v38  ;;  %v6740_v19 = vmul.f32 %v6543_v29, %v15952_v41  ;;  %v7093_v61 = vadd.f32 %v7092_v16, %v7091_v63  ;;  %v7070_v38 = vadd.f32 %v7069_v12, %v7068_v9  ;;  %v15965_v9 = vld [vmem:[#allocation98_spill] sm:$0xff] }
 0x4a2   :  { %v7087_v63 = vrot.slane %v7086_v24, 1 }
 0x4a3   :  { %v7098_v21 = vsel %vm3948_vm3, %v6739_v27, 0.0  ;;  %v7099_v0 = vsel %vm3948_vm3, %v6740_v19, 0.0  ;;  %v7094_v59 = vrot.slane %v7093_v61, 2  ;;  %v7079_v19 = vadd.f32 %v7078_v11, %v7077_v43 }
 0x4a4   :  { %v7100_v5 = vadd.f32 %v7099_v0, %v7098_v21  ;;  %v7088_v53 = vadd.f32 %v7087_v63, %v7086_v24  ;;  %v7308_v35 = vsel %vm7273_vm5, %v7070_v38, %v7061_v6  ;;  %v15972_v24 = vmax.f32 %v15971_v14, 0.0  ;;  %v15973_v63 = vld [vmem:[#allocation100_spill] sm:$0xff] }
 0x4a5   :  { %v7095_v62 = vadd.f32 %v7094_v59, %v7093_v61  ;;  %v7309_v28 = vsel %vm7275_vm6, %v7079_v19, %v7308_v35 }
 0x4a6   :  { %v6548_v58 = vpop.permute.xlu0 %6547  ;;  %v6553_v40 = vpop.permute.xlu1 %6552  ;;  %v7101_v22 = vrot.slane %v7100_v5, 4  ;;  %v7310_v26 = vsel %vm7277_vm7, %v7088_v53, %v7309_v28 }
 0x4a7   :  { %v6741_v7 = vmul.f32 %v6548_v58, %v15954_v60  ;;  %v6742_v36 = vmul.f32 %v6553_v40, %v15956_v44  ;;  %v7096_v49 = vrot.slane %v7095_v62, 1 }
 0x4a8   :  { %v7102_v15 = vadd.f32 %v7101_v22, %v7100_v5 }
 0x4a9   :  { %v7107_v45 = vsel %vm3948_vm3, %v6741_v7, 0.0  ;;  %v7108_v31 = vsel %vm3948_vm3, %v6742_v36, 0.0  ;;  %v7097_v5 = vadd.f32 %v7096_v49, %v7095_v62  ;;  %v15961_v7 = vld [vmem:[#allocation39_spill] sm:$0xff] }
 0x4aa   :  { %v7109_v57 = vadd.f32 %v7108_v31, %v7107_v45  ;;  %v6558_v54 = vpop.permute.xlu0 %6557  ;;  %v6563_v1 = vpop.permute.xlu1 %6562  ;;  %v7103_v23 = vrot.slane %v7102_v15, 2  ;;  %v15962_v10 = vmax.f32 %v15961_v7, 0.0  ;;  %v15975_v49 = vld [vmem:[#allocation43_spill] sm:$0xff] }
 0x4ab   :  { %v6743_v33 = vmul.f32 %v6558_v54, %v15958_v3  ;;  %v6744_v18 = vmul.f32 %v6563_v1, %v15960_v50  ;;  %v7311_v45 = vsel %vm7279_vm8, %v7097_v5, %v7310_v26  ;;  %v15967_v1 = vld [vmem:[#allocation41_spill] sm:$0xff]  ;;  %v15976_v38 = vmax.f32 %v15975_v49, 0.0 }
 0x4ac   :  { %v7110_v13 = vrot.slane %v7109_v57, 4  ;;  %v7104_v32 = vadd.f32 %v7103_v23, %v7102_v15  ;;  %v15968_v43 = vmax.f32 %v15967_v1, 0.0 }
 0x4ad   :  { %v7116_v56 = vsel %vm3948_vm3, %v6743_v33, 0.0  ;;  %v7117_v47 = vsel %vm3948_vm3, %v6744_v18, 0.0  ;;  %v15969_v33 = vld [vmem:[#allocation97_spill] sm:$0xff] }
 0x4ae   :  { %v7111_v51 = vadd.f32 %v7110_v13, %v7109_v57  ;;  %v7118_v17 = vadd.f32 %v7117_v47, %v7116_v56  ;;  %v7105_v27 = vrot.slane %v7104_v32, 1  ;;  %v15966_v57 = vmax.f32 %v15965_v9, 0.0 }
 0x4af   :  { %v15970_v25 = vmax.f32 %v15969_v33, 0.0 }
 0x4b0   :  { %v7112_v42 = vrot.slane %v7111_v51, 2  ;;  %v7119_v29 = vrot.slane %v7118_v17, 4  ;;  %v7106_v58 = vadd.f32 %v7105_v27, %v7104_v32 }
 0x4b1   :  { %v6568_v2 = vpop.permute.xlu0 %6567  ;;  %v6573_v16 = vpop.permute.xlu1 %6572 }
 0x4b2   :  { %v7113_v55 = vadd.f32 %v7112_v42, %v7111_v51  ;;  %v7120_v41 = vadd.f32 %v7119_v29, %v7118_v17  ;;  %v6746_v59 = vmul.f32 %v6573_v16, %v15964_v48  ;;  %v7312_v8 = vsel %vm7281_vm10, %v7106_v58, %v7311_v45  ;;  %v15979_v58 = vld [vmem:[#allocation45_spill] sm:$0xff] }
 0x4b3   :  { %v6745_v50 = vmul.f32 %v6568_v2, %v15970_v25  ;;  %v15974_v42 = vmax.f32 %v15973_v63, 0.0  ;;  %v15982_v48 = vmax.f32 %v15981_v39, 0.0 }
 0x4b4   :  { %v7114_v20 = vrot.slane %v7113_v55, 1  ;;  %v7121_v21 = vrot.slane %v7120_v41, 2  ;;  %v7126_v56 = vsel %vm3948_vm3, %v6746_v59, 0.0 }
 0x4b5   :  { %v7125_v11 = vsel %vm3948_vm3, %v6745_v50, 0.0 }
 0x4b6   :  { %v6578_v0 = vpop.permute.xlu0 %6577  ;;  %v6583_v61 = vpop.permute.xlu1 %6582  ;;  %v7122_v40 = vadd.f32 %v7121_v21, %v7120_v41  ;;  %v7115_v22 = vadd.f32 %v7114_v20, %v7113_v55  ;;  %v7127_v2 = vadd.f32 %v7126_v56, %v7125_v11  ;;  %v15977_v21 = vld [vmem:[#allocation101_spill] sm:$0xff] }
 0x4b7   :  { %v6748_v44 = vmul.f32 %v6583_v61, %v15962_v10  ;;  %v6747_v54 = vmul.f32 %v6578_v0, %v15966_v57  ;;  %v15978_v0 = vmax.f32 %v15977_v21, 0.0 }
 0x4b8   :  { %v7123_v60 = vrot.slane %v7122_v40, 1  ;;  %v7313_v3 = vsel %vm7283_vm11, %v7115_v22, %v7312_v8  ;;  %v7128_v5 = vrot.slane %v7127_v2, 4 }
 0x4b9   :  { %v7135_v18 = vsel %vm3948_vm3, %v6748_v44, 0.0  ;;  %v7134_v47 = vsel %vm3948_vm3, %v6747_v54, 0.0 }
 0x4ba   :  { %v6593_v36 = vpop.permute.xlu1 %6592  ;;  %v6588_v15 = vpop.permute.xlu0 %6587  ;;  %v7124_v31 = vadd.f32 %v7123_v60, %v7122_v40  ;;  %v7136_v32 = vadd.f32 %v7135_v18, %v7134_v47  ;;  %v15980_v40 = vmax.f32 %v15979_v58, 0.0  ;;  %v15985_v18 = vld [vmem:[#allocation103_spill] sm:$0xff]  ;;  %v15987_v47 = vld [vmem:[#allocation49_spill] sm:$0xff] }
 0x4bb   :  { %v6750_v23 = vmul.f32 %v6593_v36, %v15968_v43  ;;  %v6749_v13 = vmul.f32 %v6588_v15, %v15972_v24  ;;  %v7129_v15 = vadd.f32 %v7128_v5, %v7127_v2  ;;  %v15986_v14 = vmax.f32 %v15985_v18, 0.0 }
 0x4bc   :  { %v14769_v62 = vsel %vm7285_vm12, %v7124_v31, %v7313_v3  ;;  %v7137_v55 = vrot.slane %v7136_v32, 4  ;;  %v15983_v31 = vld [vmem:[#allocation47_spill] sm:$0xff] }
 0x4bd   :  { %9110 = vmatmul.mubr.msk.f32.gmra.mxu0 %vm3948_vm3, %v14769_v62  ;;  %v7144_v12 = vsel %vm3948_vm3, %v6750_v23, 0.0  ;;  %v7143_v34 = vsel %vm3948_vm3, %v6749_v13, 0.0  ;;  %v15984_v9 = vmax.f32 %v15983_v31, 0.0  ;;  %v7130_v13 = vrot.slane %v7129_v15, 2 }
 0x4be   :  { %9112 = vmatprep.mubr.msk.f32.mxu0 %vm9487_vm9, %v15798_v46  ;;  %v7145_v16 = vadd.f32 %v7144_v12, %v7143_v34  ;;  %v7138_v26 = vadd.f32 %v7137_v55, %v7136_v32  ;;  %v15988_v12 = vmax.f32 %v15987_v47, 0.0  ;;  %v15989_v55 = vld [vmem:[#allocation51_spill] sm:$0xff] }
 0x4c0   :  { %v7146_v35 = vrot.slane %v7145_v16, 4  ;;  %v7139_v43 = vrot.slane %v7138_v26, 2 }
 0x4c2   :  { %v6598_v51 = vpop.permute.xlu0 %6597  ;;  %v6603_v17 = vpop.permute.xlu1 %6602  ;;  %v7147_v45 = vadd.f32 %v7146_v35, %v7145_v16  ;;  %v7140_v11 = vadd.f32 %v7139_v43, %v7138_v26 }
 0x4c3   :  { %v6751_v29 = vmul.f32 %v6598_v51, %v15974_v42  ;;  %v6752_v27 = vmul.f32 %v6603_v17, %v15976_v38  ;;  %v7131_v38 = vadd.f32 %v7130_v13, %v7129_v15  ;;  %v15997_v13 = vld [vmem:[#allocation105_spill] sm:$0xff] }
 0x4c4   :  { %v7148_v56 = vrot.slane %v7147_v45, 2  ;;  %v7141_v5 = vrot.slane %v7140_v11, 1 }
 0x4c5   :  { %v7152_v41 = vsel %vm3948_vm3, %v6751_v29, 0.0  ;;  %v7153_v19 = vsel %vm3948_vm3, %v6752_v27, 0.0 }
 0x4c6   :  { %v6608_v6 = vpop.permute.xlu0 %6607  ;;  %v6613_v53 = vpop.permute.xlu1 %6612  ;;  %v7154_v20 = vadd.f32 %v7153_v19, %v7152_v41  ;;  %v7149_v27 = vadd.f32 %v7148_v56, %v7147_v45  ;;  %v15990_v41 = vmax.f32 %v15989_v55, 0.0  ;;  %v15998_v56 = vmax.f32 %v15997_v13, 0.0 }
 0x4c7   :  { %v6753_v61 = vmul.f32 %v6608_v6, %v15978_v0  ;;  %v6754_v28 = vmul.f32 %v6613_v53, %v15980_v40  ;;  %v15991_v6 = vld [vmem:[#allocation50_spill] sm:$0xff] }
 0x4c8   :  { %v7155_v22 = vrot.slane %v7154_v20, 4  ;;  %v15992_v53 = vmax.f32 %v15991_v6, 0.0 }
 0x4c9   :  { %v7161_v60 = vsel %vm3948_vm3, %v6753_v61, 0.0  ;;  %v7162_v7 = vsel %vm3948_vm3, %v6754_v28, 0.0 }
 0x4ca   :  { %v6618_v10 = vpop.permute.xlu0 %6617  ;;  %v7163_v36 = vadd.f32 %v7162_v7, %v7161_v60  ;;  %v7156_v54 = vadd.f32 %v7155_v22, %v7154_v20 }
 0x4cb   :  { %v6623_v44 = vpop.permute.xlu1 %6622  ;;  %v6755_v59 = vmul.f32 %v6618_v10, %v15982_v48  ;;  %v7132_v10 = vrot.slane %v7131_v38, 1 }
 0x4cc   :  { %v6756_v57 = vmul.f32 %v6623_v44, %v15984_v9  ;;  %v7164_v1 = vrot.slane %v7163_v36, 4  ;;  %v7157_v51 = vrot.slane %v7156_v54, 2  ;;  %v7150_v44 = vrot.slane %v7149_v27, 1 }
 0x4cd   :  { %v7170_v23 = vsel %vm3948_vm3, %v6755_v59, 0.0  ;;  %v15995_v59 = vld [vmem:[#allocation52_spill] sm:$0xff] }
 0x4ce   :  { %v7171_v8 = vsel %vm3948_vm3, %v6756_v57, 0.0  ;;  %v6628_v3 = vpop.permute.xlu0 %6627  ;;  %v7165_v25 = vadd.f32 %v7164_v1, %v7163_v36  ;;  %v7158_v21 = vadd.f32 %v7157_v51, %v7156_v54  ;;  %v15993_v36 = vld [vmem:[#allocation53_spill] sm:$0xff]  ;;  %v15996_v15 = vmax.f32 %v15995_v59, 0.0 }
 0x4cf   :  { %v6633_v33 = vpop.permute.xlu1 %6632  ;;  %v7172_v50 = vadd.f32 %v7171_v8, %v7170_v23  ;;  %v6757_v24 = vmul.f32 %v6628_v3, %v15986_v14  ;;  %v15994_v39 = vmax.f32 %v15993_v36, 0.0  ;;  %v7142_v54 = vadd.f32 %v7141_v5, %v7140_v11 }
 0x4d0   :  { %v6758_v32 = vmul.f32 %v6633_v33, %v15988_v12  ;;  %v7166_v34 = vrot.slane %v7165_v25, 2  ;;  %v7159_v31 = vrot.slane %v7158_v21, 1  ;;  %v7133_v14 = vadd.f32 %v7132_v10, %v7131_v38  ;;  %v15999_v12 = vld [vmem:[#allocation104_spill] sm:$0xff] }
 0x4d1   :  { %v7173_v17 = vrot.slane %v7172_v50, 4  ;;  %v7179_v63 = vsel %vm3948_vm3, %v6757_v24, 0.0  ;;  %v7151_v24 = vadd.f32 %v7150_v44, %v7149_v27 }
 0x4d2   :  { %v7180_v42 = vsel %vm3948_vm3, %v6758_v32, 0.0  ;;  %v7167_v35 = vadd.f32 %v7166_v34, %v7165_v25  ;;  %v16000_v32 = vmax.f32 %v15999_v12, 0.0 }
 0x4d3   :  { %v6638_v29 = vpop.permute.xlu0 %6637  ;;  %v7174_v16 = vadd.f32 %v7173_v17, %v7172_v50  ;;  %v7181_v49 = vadd.f32 %v7180_v42, %v7179_v63  ;;  %v7160_v17 = vadd.f32 %v7159_v31, %v7158_v21  ;;  %v7315_v42 = vsel %vm7273_vm5, %v7142_v54, %v7133_v14 }
 0x4d4   :  { %v6643_v2 = vpop.permute.xlu1 %6642  ;;  %v6759_v19 = vmul.f32 %v6638_v29, %v15990_v41  ;;  %v7168_v1 = vrot.slane %v7167_v35, 1  ;;  %v7316_v41 = vsel %vm7275_vm6, %v7151_v24, %v7315_v42 }
 0x4d5   :  { %v6760_v20 = vmul.f32 %v6643_v2, %v15992_v53  ;;  %v7175_v0 = vrot.slane %v7174_v16, 2  ;;  %v7182_v61 = vrot.slane %v7181_v49, 4  ;;  %v7317_v6 = vsel %vm7277_vm7, %v7160_v17, %v7316_v41 }
 0x4d6   :  { %v7188_v58 = vsel %vm3948_vm3, %v6759_v19, 0.0  ;;  %v7169_v29 = vadd.f32 %v7168_v1, %v7167_v35 }
 0x4d7   :  { %v7189_v40 = vsel %vm3948_vm3, %v6760_v20, 0.0  ;;  %v7176_v26 = vadd.f32 %v7175_v0, %v7174_v16  ;;  %v7183_v60 = vadd.f32 %v7182_v61, %v7181_v49 }
 0x4d8   :  { %v6648_v28 = vpop.permute.xlu0 %6647  ;;  %v6653_v22 = vpop.permute.xlu1 %6652  ;;  %v7190_v7 = vadd.f32 %v7189_v40, %v7188_v58  ;;  %v7318_v0 = vsel %vm7279_vm8, %v7169_v29, %v7317_v6 }
 0x4d9   :  { %v6761_v48 = vmul.f32 %v6648_v28, %v15994_v39  ;;  %v6762_v45 = vmul.f32 %v6653_v22, %v15996_v15  ;;  %v7184_v9 = vrot.slane %v7183_v60, 2  ;;  %v7177_v33 = vrot.slane %v7176_v26, 1 }
 0x4da   :  { %v7191_v57 = vrot.slane %v7190_v7, 4 }
 0x4db   :  { %v7197_v43 = vsel %vm3948_vm3, %v6761_v48, 0.0  ;;  %v7198_v23 = vsel %vm3948_vm3, %v6762_v45, 0.0  ;;  %v7185_v25 = vadd.f32 %v7184_v9, %v7183_v60  ;;  %v7178_v49 = vadd.f32 %v7177_v33, %v7176_v26 }
 0x4dc   :  { %v6658_v8 = vpop.permute.xlu0 %6657  ;;  %v6663_v3 = vpop.permute.xlu1 %6662  ;;  %v7192_v50 = vadd.f32 %v7191_v57, %v7190_v7  ;;  %v7199_v18 = vadd.f32 %v7198_v23, %v7197_v43 }
 0x4dd   :  { %v6763_v47 = vmul.f32 %v6658_v8, %v15998_v56  ;;  %v6764_v51 = vmul.f32 %v6663_v3, %v16000_v32  ;;  %v7186_v11 = vrot.slane %v7185_v25, 1  ;;  %v7319_v58 = vsel %vm7281_vm10, %v7178_v49, %v7318_v0 }
 0x4de   :  { %v7193_v34 = vrot.slane %v7192_v50, 2  ;;  %v7200_v63 = vrot.slane %v7199_v18, 4 }
 0x4df   :  { %v7206_v2 = vsel %vm3948_vm3, %v6763_v47, 0.0  ;;  %v7207_v16 = vsel %vm3948_vm3, %v6764_v51, 0.0  ;;  %v7187_v19 = vadd.f32 %v7186_v11, %v7185_v25 }
 0x4e0   :  { %v7194_v38 = vadd.f32 %v7193_v34, %v7192_v50  ;;  %v7201_v27 = vadd.f32 %v7200_v63, %v7199_v18  ;;  %v7208_v55 = vadd.f32 %v7207_v16, %v7206_v2 }
 0x4e1   :  { %v7320_v40 = vsel %vm7283_vm11, %v7187_v19, %v7319_v58 }
 0x4e2   :  { %v7195_v53 = vrot.slane %v7194_v38, 1  ;;  %v7202_v20 = vrot.slane %v7201_v27, 2  ;;  %v7209_v21 = vrot.slane %v7208_v55, 4 }
 0x4e4   :  { %v7196_v61 = vadd.f32 %v7195_v53, %v7194_v38  ;;  %v7203_v5 = vadd.f32 %v7202_v20, %v7201_v27  ;;  %v7210_v35 = vadd.f32 %v7209_v21, %v7208_v55 }
 0x4e6   :  { %v7211_v28 = vrot.slane %v7210_v35, 2  ;;  %v14829_v22 = vsel %vm7285_vm12, %v7196_v61, %v7320_v40  ;;  %v7204_v26 = vrot.slane %v7203_v5, 1 }
 0x4e7   :  { %9113 = vmatmul.mubr.msk.f32.gmra.mxu0 %vm3948_vm3, %v14829_v22 }
 0x4e8   :  { %v7212_v60 = vadd.f32 %v7211_v28, %v7210_v35  ;;  %9115 = vmatprep.mubr.msk.f32.mxu0 %vm9487_vm9, %v15798_v46  ;;  %v7205_v10 = vadd.f32 %v7204_v26, %v7203_v5 }
 0x4ea   :  { %v7213_v7 = vrot.slane %v7212_v60, 1 }
 0x4ec   :  { %v7214_v44 = vadd.f32 %v7213_v7, %v7212_v60 }
 0x4ee   :  { %v14836_v36 = vsel %vm7273_vm5, %v7214_v44, %v7205_v10 }
 0x4ef   :  { %9116 = vmatmul.mubr.msk.f32.gmra.mxu0 %vm3948_vm3, %v14836_v36 }
 0x4f0   :  { %v7403_v39 = vpop.f32.mrf.mxu0 }
 0x4f1   :  { %v7437_v50 = vsel %vm4814_vm4, %v7403_v39, -inf }
 0x4f2   :  { %v9099_v48 = vpop.f32.mrf.mxu0 }
 0x516   :  { %v7408_v59 = vpop.f32.mrf.mxu0 }
 0x517   :  { %v7438_v8 = vsel %vm4814_vm4, %v7408_v59, -inf }
 0x518   :  { %v9102_v15 = vpop.f32.mrf.mxu0 }
 0x533   :  { %v7413_v45 = vpop.f32.mrf.mxu0 }
 0x534   :  { %v7439_v18 = vsel %vm4814_vm4, %v7413_v45, -inf }
 0x535   :  { %v9105_v31 = vpop.f32.mrf.mxu0 }
 0x54d   :  { %v7418_v9 = vpop.f32.mrf.mxu0 }
 0x54e   :  { %v7440_v47 = vsel %vm4814_vm4, %v7418_v9, -inf }
 0x54f   :  { %v9108_v57 = vpop.f32.mrf.mxu0 }
 0x57d   :  { %v7423_v54 = vpop.f32.mrf.mxu0 }
 0x57e   :  { %v7441_v3 = vsel %vm4814_vm4, %v7423_v54, -inf }
 0x57f   :  { %v9111_v1 = vpop.f32.mrf.mxu0  ;;  %v7442_v24 = vmax.f32 %v7437_v50, %v7441_v3 }
 0x5a7   :  { %v7428_v46 = vpop.f32.mrf.mxu0 }
 0x5a8   :  { %v7443_v23 = vsel %vm4814_vm4, %v7428_v46, -inf }
 0x5a9   :  { %v9114_v43 = vpop.f32.mrf.mxu0  ;;  %v7444_v33 = vmax.f32 %v7438_v8, %v7443_v23 }
 0x5ab   :  { %v7448_v12 = vmax.f32 %v7442_v24, %v7444_v33 }
 0x5af   :  { %v7433_v25 = vpop.f32.mrf.mxu0 }
 0x5b0   :  { %v7446_v14 = vsel %vm7445_vm13, %v7433_v25, -inf }
 0x5b1   :  { %v7447_v13 = vmax.f32 %v7439_v18, %v7446_v14  ;;  %v9117_v56 = vpop.f32.mrf.mxu0 }
 0x5b3   :  { %v7449_v32 = vmax.f32 %v7447_v13, %v7440_v47 }
 0x5b5   :  { %v7450_v51 = vmax.f32 %v7448_v12, %v7449_v32 }
 0x5b7   :  { %v7451_v17 = vrot.slane %v7450_v51, 4 }
 0x5b9   :  { %v7452_v11 = vmax.f32 %v7450_v51, %v7451_v17 }
 0x5bb   :  { %v7453_v34 = vrot.slane %v7452_v11, 2 }
 0x5bd   :  { %v7454_v63 = vmax.f32 %v7452_v11, %v7453_v34 }
 0x5bf   :  { %v7455_v42 = vrot.slane %v7454_v63, 1 }
 0x5c1   :  { %v7456_v29 = vmax.f32 %v7454_v63, %v7455_v42 }
 0x5c3   :  { %v7457_v2 = vsub.f32 %v7403_v39, %v7456_v29  ;;  %v7458_v16 = vsub.f32 %v7408_v59, %v7456_v29  ;;  %v7459_v49 = vsub.f32 %v7413_v45, %v7456_v29  ;;  %v7460_v38 = vsub.f32 %v7418_v9, %v7456_v29 }
 0x5c4   :  { %v7461_v27 = vsub.f32 %v7423_v54, %v7456_v29  ;;  %v7462_v6 = vsub.f32 %v7428_v46, %v7456_v29  ;;  %v7463_v20 = vsub.f32 %v7433_v25, %v7456_v29 }
 0x5c5   :  { %v7464_v55 = vmul.f32 1.442695, %v7457_v2  ;;  %v7466_v41 = vmul.f32 1.442695, %v7458_v16  ;;  %v7468_v19 = vmul.f32 1.442695, %v7459_v49 }
 0x5c6   :  { %v7470_v53 = vmul.f32 1.442695, %v7460_v38  ;;  %v7472_v21 = vmul.f32 1.442695, %v7461_v27  ;;  %v7474_v0 = vmul.f32 1.442695, %v7462_v6 }
 0x5c7   :  { %9432 = vpow2.f32 %v7464_v55  ;;  %v7476_v61 = vmul.f32 1.442695, %v7463_v20 }
 0x5c8   :  { %9434 = vpow2.f32 %v7466_v41 }
 0x5c9   :  { %9436 = vpow2.f32 %v7468_v19 }
 0x5ca   :  { %9438 = vpow2.f32 %v7470_v53 }
 0x5cb   :  { %9440 = vpow2.f32 %v7472_v21 }
 0x5cc   :  { %9442 = vpow2.f32 %v7474_v0 }
 0x5cd   :  { %9444 = vpow2.f32 %v7476_v61 }
 0x5d4   :  { %v9433_v5 = vpop.eup %9432 }
 0x5d5   :  { %v9435_v35 = vpop.eup %9434  ;;  %v7478_v58 = vsel %vm4814_vm4, %v9433_v5, 0.0 }
 0x5d6   :  { %v9437_v40 = vpop.eup %9436  ;;  %v7479_v28 = vsel %vm4814_vm4, %v9435_v35, 0.0 }
 0x5d7   :  { %v9439_v26 = vpop.eup %9438  ;;  %v7480_v60 = vadd.f32 %v7479_v28, %v7478_v58  ;;  %v7481_v7 = vsel %vm4814_vm4, %v9437_v40, 0.0 }
 0x5d8   :  { %v9441_v10 = vpop.eup %9440  ;;  %v7483_v39 = vsel %vm4814_vm4, %v9439_v26, 0.0 }
 0x5d9   :  { %v7482_v44 = vadd.f32 %v7481_v7, %v7480_v60  ;;  %v9443_v48 = vpop.eup %9442  ;;  %v7485_v15 = vsel %vm4814_vm4, %v9441_v10, 0.0 }
 0x5da   :  { %v9445_v45 = vpop.eup %9444  ;;  %v7487_v9 = vsel %vm4814_vm4, %v9443_v48, 0.0 }
 0x5db   :  { %v7484_v59 = vadd.f32 %v7483_v39, %v7482_v44  ;;  %v7489_v54 = vsel %vm7445_vm13, %v9445_v45, 0.0 }
 0x5dd   :  { %v7486_v31 = vadd.f32 %v7485_v15, %v7484_v59 }
 0x5df   :  { %v7488_v57 = vadd.f32 %v7487_v9, %v7486_v31 }
 0x5e1   :  { %v7490_v1 = vadd.f32 %v7489_v54, %v7488_v57 }
 0x5e3   :  { %v7491_v46 = vrot.slane %v7490_v1, 4 }
 0x5e5   :  { %v7492_v43 = vadd.f32 %v7491_v46, %v7490_v1 }
 0x5e7   :  { %v7493_v23 = vrot.slane %v7492_v43, 2 }
 0x5e9   :  { %v7494_v8 = vadd.f32 %v7493_v23, %v7492_v43 }
 0x5eb   :  { %v7495_v3 = vrot.slane %v7494_v8, 1 }
 0x5ed   :  { %v7496_v33 = vadd.f32 %v7495_v3, %v7494_v8 }
 0x5ef   :  { %9446 = vrcp.f32 %v7496_v33 }
 0x5fc   :  { %v9447_v25 = vpop.eup %9446 }
 0x5fd   :  { %v7499_v50 = vmul.f32 %v9447_v25, %v9435_v35  ;;  %v7498_v18 = vmul.f32 %v9447_v25, %v9433_v5  ;;  %v7501_v14 = vmul.f32 %v9447_v25, %v9439_v26  ;;  %v7500_v24 = vmul.f32 %v9447_v25, %v9437_v40 }
 0x5fe   :  { %v7503_v13 = vmul.f32 %v9447_v25, %v9443_v48  ;;  %v7502_v56 = vmul.f32 %v9447_v25, %v9441_v10  ;;  %v7504_v47 = vmul.f32 %v9447_v25, %v9445_v45 }
 0x5ff   :  { %7512 = vperm.xlu1 %9131, %v7499_v50   ;;  %7507 = vperm.xlu0 %9130, %v7498_v18  }
 0x603   :  { %7522 = vperm.xlu1 %9131, %v7501_v14   ;;  %7517 = vperm.xlu0 %9130, %v7500_v24  }
 0x607   :  { %7532 = vperm.xlu1 %9131, %v7503_v13   ;;  %7527 = vperm.xlu0 %9130, %v7502_v56  }
 0x60b   :  { %7537 = vperm.xlu0 %9130, %v7504_v47  }
 0x67a   :  { %v7513_v12 = vpop.permute.xlu1 %7512  ;;  %v7508_v32 = vpop.permute.xlu0 %7507 }
 0x67b   :  { %v7548_v51 = vmul.f32 %v7513_v12, %v14582_v52  ;;  %v7547_v17 = vmul.f32 %v7508_v32, %v14440_v37 }
 0x67d   :  { %v7555_v11 = vsel %vm3948_vm3, %v7548_v51, 0.0  ;;  %v7554_v34 = vsel %vm3948_vm3, %v7547_v17, 0.0 }
 0x67e   :  { %v7523_v63 = vpop.permute.xlu1 %7522  ;;  %v7518_v42 = vpop.permute.xlu0 %7517  ;;  %v7556_v16 = vadd.f32 %v7555_v11, %v7554_v34 }
 0x67f   :  { %v7550_v29 = vmul.f32 %v7523_v63, %v14695_v30  ;;  %v7549_v2 = vmul.f32 %v7518_v42, %v14666_v4 }
 0x681   :  { %v7557_v49 = vsel %vm3948_vm3, %v7549_v2, 0.0  ;;  %v7559_v52 = vsel %vm3948_vm3, %v7550_v29, 0.0 }
 0x682   :  { %v7558_v38 = vadd.f32 %v7557_v49, %v7556_v16  ;;  %v7533_v27 = vpop.permute.xlu1 %7532  ;;  %v7528_v55 = vpop.permute.xlu0 %7527 }
 0x683   :  { %v7552_v37 = vmul.f32 %v7533_v27, %v14829_v22  ;;  %v7551_v41 = vmul.f32 %v7528_v55, %v14769_v62 }
 0x684   :  { %v7560_v19 = vadd.f32 %v7559_v52, %v7558_v38 }
 0x685   :  { %v7561_v6 = vsel %vm3948_vm3, %v7551_v41, 0.0  ;;  %v7563_v4 = vsel %vm3948_vm3, %v7552_v37, 0.0 }
 0x686   :  { %v7562_v53 = vadd.f32 %v7561_v6, %v7560_v19  ;;  %v7538_v30 = vpop.permute.xlu0 %7537 }
 0x687   :  { %v7553_v20 = vmul.f32 %v7538_v30, %v14836_v36 }
 0x688   :  { %v7564_v21 = vadd.f32 %v7563_v4, %v7562_v53 }
 0x689   :  { %v7566_v0 = vsel %vm7565_vm14, %v7553_v20, 0.0 }
 0x68a   :  { %v7567_v61 = vadd.f32 %v7566_v0, %v7564_v21 }
 0x68c   :  { %v7568_v5 = vrot.slane %v7567_v61, 4 }
 0x68e   :  { %v7569_v35 = vadd.f32 %v7568_v5, %v7567_v61 }
 0x690   :  { %v7570_v58 = vrot.slane %v7569_v35, 2 }
 0x692   :  { %v7571_v40 = vadd.f32 %v7570_v58, %v7569_v35 }
 0x694   :  { %v7572_v62 = vrot.slane %v7571_v40, 1 }
 0x696   :  { %v7573_v22 = vadd.f32 %v7572_v62, %v7571_v40 }
 0x698   :  { %7575 = vst.msk [vmem:[#allocation3] sm:$0x1] %vm7574_vm15, %v7573_v22 }
 0x699   :  { %9474 = shalt.err (!%p9471_p4)
}
 0x69a   :  { %7585 = dma.vmem_to_hbm [thread:$0]  %s7583_s21, 16, %s14875_s5, [#allocation4]  }
 0x69b   :  { %9483 = dma.done.wait [#allocation4], 16  }
 0x69c   :  { %9484 = vsyncadd [#allocation4], 4294967280 }
 0x69d   :  { %7589 = vsyncpa [#allocation4], 1 }

</bundles_post_ra>
